<compile_context>
chip_gen: v6e
topology: v6e:2x2x1
jax: 0.10.0
libtpu: 0.0.40
codegen_flags: <defaults>
</compile_context>

<pallas_src>
from functools import partial

import jax
import jax.numpy as jnp
from jax.experimental import pallas as pl
from jax.experimental.pallas import tpu as pltpu


def _mxu_layer(w_ref, b_ref, h_bf16):
    """relu(W @ h + b): bf16 MXU inputs, f32 accumulation, f32 output."""
    y = jnp.dot(w_ref[...], h_bf16, preferred_element_type=jnp.float32) + b_ref[...]
    return jnp.maximum(y, 0.0)


# ---------------------------------------------------------------------------
# Fused kernel: 5-layer per-point MLP + global max-pool + classification head.
# grid = (B, N // tile_n); the running per-batch max lives in a lane-dense
# (emb, 128) VMEM scratch; the head runs once per batch in the last-tile
# epilogue and writes the (out_pad, 1) logits column.
# ---------------------------------------------------------------------------
def pointnet_fused_kernel(x_ref,
                          w1, w2, w3, w4, w5,
                          b1, b2, b3, b4, b5,
                          w6, b6, w7, b7,
                          o_ref, acc_ref):
    t = pl.program_id(1)

    @pl.when(t == 0)
    def _():
        acc_ref[...] = jnp.full(acc_ref.shape, -jnp.inf, acc_ref.dtype)

    # ---- per-point MLP on this (3, tile_n) tile ---------------------------
    x = x_ref[0]                                        # (3, TN) f32
    # Layer 1 (3 -> 64) on the VPU: three broadcast-mul + adds (f32, exact).
    h = (w1[:, 0:1] * x[0:1, :]
         + w1[:, 1:2] * x[1:2, :]
         + w1[:, 2:3] * x[2:3, :]
         + b1[...])
    h = jnp.maximum(h, 0.0).astype(jnp.bfloat16)        # (64,  TN)
    h = _mxu_layer(w2, b2, h).astype(jnp.bfloat16)      # (64,  TN)
    h = _mxu_layer(w3, b3, h).astype(jnp.bfloat16)      # (64,  TN)
    h = _mxu_layer(w4, b4, h).astype(jnp.bfloat16)      # (128, TN)
    h = _mxu_layer(w5, b5, h)                           # (emb, TN) f32

    # ---- global max-pool: fold 128-lane chunks into the lane-dense scratch
    # (elementwise max on VPU; no per-step XLU reduce, no narrow output store).
    m = acc_ref[...]
    for c in range(h.shape[1] // 128):
        m = jnp.maximum(m, h[:, c * 128:(c + 1) * 128])
    acc_ref[...] = m

    # ---- epilogue on the last point tile: cross-lane max + fused head -----
    @pl.when(t == pl.num_programs(1) - 1)
    def _():
        pooled = jnp.max(acc_ref[...], axis=1, keepdims=True)          # (emb, 1)
        h6 = jnp.dot(w6[...], pooled.astype(jnp.bfloat16),
                     preferred_element_type=jnp.float32) + b6[...]     # (512, 1)
        h6 = jnp.maximum(h6, 0.0).astype(jnp.bfloat16)
        # dropout (dp1) is identity in eval mode.
        logits = jnp.dot(w7[...], h6,
                         preferred_element_type=jnp.float32) + b7[...] # (out_pad, 1)
        o_ref[0] = logits


def _const_spec(arr):
    nd = arr.ndim
    return pl.BlockSpec(arr.shape, lambda b, t, _n=nd: (0,) * _n)


# ---------------------------------------------------------------------------
# Wrapper
# ---------------------------------------------------------------------------
@partial(jax.jit, static_argnames=("tile_n",))
def pointnet_forward(x, params, *, tile_n=1024):
    """x: (B, 3, N) float32 (PyTorch NCW).  Returns (B, output_channels)."""
    (w1, b1, w2, b2, w3, b3, w4, b4, w5, b5, w6, b6, w7, bias7) = params
    B, cin, N = x.shape
    emb = w5.shape[1]
    hid = w6.shape[1]
    out_ch = w7.shape[1]

    tile_n = min(tile_n, N)
    assert N % tile_n == 0, "N must be a multiple of tile_n"
    assert tile_n % 128 == 0, "tile_n must be a multiple of 128"

    # conv1 stays f32 (VPU path); conv2-5 are bf16 (cout, cin) MXU weights.
    w1t = jnp.transpose(w1).astype(jnp.float32)                       # (64, 3)
    wT = [jnp.transpose(w).astype(jnp.bfloat16) for w in (w2, w3, w4, w5)]
    bc = [jnp.reshape(b, (-1, 1)).astype(jnp.float32)
          for b in (b1, b2, b3, b4, b5)]

    # Head: column-oriented (out, in) bf16 weights; output channels padded to a
    # multiple of 128 so the final matmul / store are tile-clean.
    out_pad = ((out_ch + 127) // 128) * 128
    if out_pad != out_ch:
        w7p = jnp.pad(w7, ((0, 0), (0, out_pad - out_ch)))
        b7p = jnp.pad(bias7, ((0, 0), (0, out_pad - out_ch)))
    else:
        w7p, b7p = w7, bias7
    w6t = jnp.transpose(w6).astype(jnp.bfloat16)                      # (512, emb)
    b6c = jnp.reshape(b6, (-1, 1)).astype(jnp.float32)                # (512, 1)
    w7t = jnp.transpose(w7p).astype(jnp.bfloat16)                     # (out_pad, 512)
    b7c = jnp.reshape(b7p, (-1, 1)).astype(jnp.float32)               # (out_pad, 1)

    consts = [w1t, *wT, *bc, w6t, b6c, w7t, b7c]

    flops = (2 * B * N * (cin * 64 + 64 * 64 + 64 * 64 + 64 * 128 + 128 * emb)
             + 2 * B * (emb * hid + hid * out_pad))
    bytes_accessed = (int(x.size) * 4
                      + sum(int(c.size) * c.dtype.itemsize for c in consts)
                      + B * out_pad * 4)

    out = pl.pallas_call(
        pointnet_fused_kernel,
        out_shape=jax.ShapeDtypeStruct((B, out_pad, 1), jnp.float32),
        grid_spec=pltpu.PrefetchScalarGridSpec(
            num_scalar_prefetch=0,
            grid=(B, N // tile_n),
            in_specs=[pl.BlockSpec((1, cin, tile_n), lambda b, t: (b, 0, t))]
                     + [_const_spec(c) for c in consts],
            out_specs=pl.BlockSpec((1, out_pad, 1), lambda b, t: (b, 0, 0)),
            scratch_shapes=[pltpu.VMEM((emb, 128), jnp.float32)],
        ),
        compiler_params=pltpu.CompilerParams(
            # Batch axis parallel (shards across v7x TensorCores); the
            # point-tile axis carries the max accumulation -> "arbitrary".
            dimension_semantics=("parallel", "arbitrary")),
        cost_estimate=pl.CostEstimate(flops=flops, transcendentals=0,
                                      bytes_accessed=bytes_accessed),
    )(x, *consts)

    return out[:, :out_ch, 0]


# ---------------------------------------------------------------------------
# Deterministic parameter construction (synthetic, mirrors the module shapes)
# ---------------------------------------------------------------------------
def make_params(key, emb_dims=256, output_channels=40):
    dims = [(3, 64), (64, 64), (64, 64), (64, 128), (128, emb_dims)]
    eps = 1e-5
    keys = jax.random.split(key, 32)
    ki = iter(range(32))

    params = []
    # five bias-free 1x1 convs, each followed by a BatchNorm1d (folded in)
    for (cin, cout) in dims:
        w = jax.random.normal(keys[next(ki)], (cin, cout), jnp.float32) * 0.1
        gamma = 1.0 + 0.1 * jax.random.normal(keys[next(ki)], (cout,), jnp.float32)
        beta = 0.1 * jax.random.normal(keys[next(ki)], (cout,), jnp.float32)
        mean = 0.1 * jax.random.normal(keys[next(ki)], (cout,), jnp.float32)
        var = jax.random.uniform(keys[next(ki)], (cout,), jnp.float32, 0.5, 1.5)
        scale = gamma / jnp.sqrt(var + eps)
        w_f = w * scale[None, :]
        b_f = (beta - mean * scale)[None, :]            # (1, cout)
        params += [w_f, b_f]

    # linear1 (bias-free) + bn6 folded
    w6 = jax.random.normal(keys[next(ki)], (emb_dims, 512), jnp.float32) * 0.05
    gamma6 = 1.0 + 0.1 * jax.random.normal(keys[next(ki)], (512,), jnp.float32)
    beta6 = 0.1 * jax.random.normal(keys[next(ki)], (512,), jnp.float32)
    mean6 = 0.1 * jax.random.normal(keys[next(ki)], (512,), jnp.float32)
    var6 = jax.random.uniform(keys[next(ki)], (512,), jnp.float32, 0.5, 1.5)
    scale6 = gamma6 / jnp.sqrt(var6 + eps)
    params += [w6 * scale6[None, :], (beta6 - mean6 * scale6)[None, :]]

    # linear2 (with bias)
    w7 = jax.random.normal(keys[next(ki)], (512, output_channels), jnp.float32) * 0.05
    bias7 = 0.1 * jax.random.normal(keys[next(ki)], (output_channels,), jnp.float32)
    params += [w7, bias7[None, :]]
    return tuple(params)


def reference_forward(x, params):
    (w1, b1, w2, b2, w3, b3, w4, b4, w5, b5, w6, b6, w7, bias7) = params
    h = jnp.transpose(x, (0, 2, 1))                      # (B, N, 3)
    for w, b in ((w1, b1), (w2, b2), (w3, b3), (w4, b4), (w5, b5)):
        h = jnp.maximum(jnp.einsum("bnc,cd->bnd", h, w) + b[None], 0.0)
    h = jnp.max(h, axis=1)                               # (B, emb)
    h = jnp.maximum(h @ w6 + b6, 0.0)
    return h @ w7 + bias7


if __name__ == "__main__":
    key = jax.random.PRNGKey(0)
    kx, kp = jax.random.split(key)

    B, N = 2, 2048
    emb_dims, output_channels = 256, 40

    x = jax.random.normal(kx, (B, 3, N), jnp.float32)    # PyTorch NCW layout
    params = make_params(kp, emb_dims=emb_dims, output_channels=output_channels)

    out = pointnet_forward(x, params, tile_n=1024)
    out = jax.block_until_ready(out)

    ref = reference_forward(x, params)
    assert out.shape == (B, output_channels)
    assert jnp.allclose(out, ref, rtol=2e-2, atol=2e-2), "mismatch vs JAX reference"

    print("KERNEL_OK")
</pallas_src>

<mosaic_0001>
module attributes {stable_mosaic.version = 11 : i64} {
  func.func @pointnet_fused_kernel(%arg0: i32, %arg1: i32, %arg2: memref<1x3x1024xf32, #tpu.memory_space<vmem>>, %arg3: memref<64x3xf32, #tpu.memory_space<vmem>>, %arg4: memref<64x64xbf16, #tpu.memory_space<vmem>>, %arg5: memref<64x64xbf16, #tpu.memory_space<vmem>>, %arg6: memref<128x64xbf16, #tpu.memory_space<vmem>>, %arg7: memref<256x128xbf16, #tpu.memory_space<vmem>>, %arg8: memref<64x1xf32, #tpu.memory_space<vmem>>, %arg9: memref<64x1xf32, #tpu.memory_space<vmem>>, %arg10: memref<64x1xf32, #tpu.memory_space<vmem>>, %arg11: memref<128x1xf32, #tpu.memory_space<vmem>>, %arg12: memref<256x1xf32, #tpu.memory_space<vmem>>, %arg13: memref<512x256xbf16, #tpu.memory_space<vmem>>, %arg14: memref<512x1xf32, #tpu.memory_space<vmem>>, %arg15: memref<128x512xbf16, #tpu.memory_space<vmem>>, %arg16: memref<128x1xf32, #tpu.memory_space<vmem>>, %arg17: memref<1x128x1xf32, #tpu.memory_space<vmem>>, %arg18: memref<256x128xf32, #tpu.memory_space<vmem>>) attributes {dimension_semantics = [#tpu.dimension_semantics<parallel>, #tpu.dimension_semantics<arbitrary>], iteration_bounds = array<i64: 2, 2>, scalar_prefetch = 0 : i64, scratch_operands = 1 : i64, tpu.core_type = #tpu.core_type<tc>, window_params = [{transform_indices = @transform_0, window_bounds = array<i64: 1, 3, 1024>}, {pipeline_mode = #tpu.pipeline_mode<synchronous>, transform_indices = @transform_1, window_bounds = array<i64: 64, 3>}, {pipeline_mode = #tpu.pipeline_mode<synchronous>, transform_indices = @transform_2, window_bounds = array<i64: 64, 64>}, {pipeline_mode = #tpu.pipeline_mode<synchronous>, transform_indices = @transform_3, window_bounds = array<i64: 64, 64>}, {pipeline_mode = #tpu.pipeline_mode<synchronous>, transform_indices = @transform_4, window_bounds = array<i64: 128, 64>}, {pipeline_mode = #tpu.pipeline_mode<synchronous>, transform_indices = @transform_5, window_bounds = array<i64: 256, 128>}, {pipeline_mode = #tpu.pipeline_mode<synchronous>, transform_indices = @transform_6, window_bounds = array<i64: 64, 1>}, {pipeline_mode = #tpu.pipeline_mode<synchronous>, transform_indices = @transform_7, window_bounds = array<i64: 64, 1>}, {pipeline_mode = #tpu.pipeline_mode<synchronous>, transform_indices = @transform_8, window_bounds = array<i64: 64, 1>}, {pipeline_mode = #tpu.pipeline_mode<synchronous>, transform_indices = @transform_9, window_bounds = array<i64: 128, 1>}, {pipeline_mode = #tpu.pipeline_mode<synchronous>, transform_indices = @transform_10, window_bounds = array<i64: 256, 1>}, {pipeline_mode = #tpu.pipeline_mode<synchronous>, transform_indices = @transform_11, window_bounds = array<i64: 512, 256>}, {pipeline_mode = #tpu.pipeline_mode<synchronous>, transform_indices = @transform_12, window_bounds = array<i64: 512, 1>}, {pipeline_mode = #tpu.pipeline_mode<synchronous>, transform_indices = @transform_13, window_bounds = array<i64: 128, 512>}, {pipeline_mode = #tpu.pipeline_mode<synchronous>, transform_indices = @transform_14, window_bounds = array<i64: 128, 1>}, {transform_indices = @transform_15, window_bounds = array<i64: 1, 128, 1>}]} {
    %c0_i32 = arith.constant 0 : i32
    %0 = arith.cmpi eq, %arg1, %c0_i32 : i32
    %1 = arith.extui %0 : i1 to i32
    %c0_i32_0 = arith.constant 0 : i32
    %2 = arith.cmpi ne, %1, %c0_i32_0 : i32
    scf.if %2 {
      %cst_38 = arith.constant 0xFF800000 : f32
      %80 = vector.broadcast %cst_38 : f32 to vector<256x128xf32>
      %c0_39 = arith.constant 0 : index
      %c0_40 = arith.constant 0 : index
      %81 = vector.load %arg18[%c0_39, %c0_40] : memref<256x128xf32, #tpu.memory_space<vmem>>, vector<256x128xf32>
      tpu.vector_store %arg18[%c0_39, %c0_40], %80 {strides = array<i32>} : memref<256x128xf32, #tpu.memory_space<vmem>>, vector<256x128xf32>,
    } else {
    }
    %c0 = arith.constant 0 : index
    %c0_1 = arith.constant 0 : index
    %c0_2 = arith.constant 0 : index
    %3 = vector.load %arg2[%c0, %c0_1, %c0_2] : memref<1x3x1024xf32, #tpu.memory_space<vmem>>, vector<1x3x1024xf32>
    %4 = vector.shape_cast %3 : vector<1x3x1024xf32> to vector<3x1024xf32>
    %c0_3 = arith.constant 0 : index
    %c0_4 = arith.constant 0 : index
    %5 = vector.load %arg3[%c0_3, %c0_4] : memref<64x3xf32, #tpu.memory_space<vmem>>, vector<64x1xf32>
    %6 = vector.extract_strided_slice %4 {offsets = [0, 0], sizes = [1, 1024], strides = [1, 1]} : vector<3x1024xf32> to vector<1x1024xf32>
    %7 = vector.broadcast %5 : vector<64x1xf32> to vector<64x1024xf32>
    %8 = vector.broadcast %6 : vector<1x1024xf32> to vector<64x1024xf32>
    %9 = arith.mulf %7, %8 : vector<64x1024xf32>
    %c0_5 = arith.constant 0 : index
    %c1 = arith.constant 1 : index
    %10 = vector.load %arg3[%c0_5, %c1] : memref<64x3xf32, #tpu.memory_space<vmem>>, vector<64x1xf32>
    %11 = vector.extract_strided_slice %4 {offsets = [1, 0], sizes = [1, 1024], strides = [1, 1]} : vector<3x1024xf32> to vector<1x1024xf32>
    %12 = vector.broadcast %10 : vector<64x1xf32> to vector<64x1024xf32>
    %13 = vector.broadcast %11 : vector<1x1024xf32> to vector<64x1024xf32>
    %14 = arith.mulf %12, %13 : vector<64x1024xf32>
    %15 = arith.addf %9, %14 : vector<64x1024xf32>
    %c0_6 = arith.constant 0 : index
    %c2 = arith.constant 2 : index
    %16 = vector.load %arg3[%c0_6, %c2] : memref<64x3xf32, #tpu.memory_space<vmem>>, vector<64x1xf32>
    %17 = vector.extract_strided_slice %4 {offsets = [2, 0], sizes = [1, 1024], strides = [1, 1]} : vector<3x1024xf32> to vector<1x1024xf32>
    %18 = vector.broadcast %16 : vector<64x1xf32> to vector<64x1024xf32>
    %19 = vector.broadcast %17 : vector<1x1024xf32> to vector<64x1024xf32>
    %20 = arith.mulf %18, %19 : vector<64x1024xf32>
    %21 = arith.addf %15, %20 : vector<64x1024xf32>
    %c0_7 = arith.constant 0 : index
    %c0_8 = arith.constant 0 : index
    %22 = vector.load %arg8[%c0_7, %c0_8] : memref<64x1xf32, #tpu.memory_space<vmem>>, vector<64x1xf32>
    %23 = vector.broadcast %22 : vector<64x1xf32> to vector<64x1024xf32>
    %24 = arith.addf %21, %23 : vector<64x1024xf32>
    %cst = arith.constant 0.000000e+00 : f32
    %25 = vector.broadcast %cst : f32 to vector<64x1024xf32>
    %26 = arith.maximumf %24, %25 : vector<64x1024xf32>
    %27 = arith.truncf %26 : vector<64x1024xf32> to vector<64x1024xbf16>
    %c0_9 = arith.constant 0 : index
    %c0_10 = arith.constant 0 : index
    %28 = vector.load %arg4[%c0_9, %c0_10] : memref<64x64xbf16, #tpu.memory_space<vmem>>, vector<64x64xbf16>
    %cst_11 = arith.constant dense<0.000000e+00> : vector<64x1024xf32>
    %29 = tpu.matmul %28, %27, %cst_11 {dimension_numbers = #tpu.dot_dimension_numbers<[1], [0], [0], [1], [0, 0, 1, 1], [], []>} : vector<64x64xbf16>, vector<64x1024xbf16>, vector<64x1024xf32> -> vector<64x1024xf32>
    %c0_12 = arith.constant 0 : index
    %c0_13 = arith.constant 0 : index
    %30 = vector.load %arg9[%c0_12, %c0_13] : memref<64x1xf32, #tpu.memory_space<vmem>>, vector<64x1xf32>
    %31 = vector.broadcast %30 : vector<64x1xf32> to vector<64x1024xf32>
    %32 = arith.addf %29, %31 : vector<64x1024xf32>
    %cst_14 = arith.constant 0.000000e+00 : f32
    %33 = vector.broadcast %cst_14 : f32 to vector<64x1024xf32>
    %34 = arith.maximumf %32, %33 : vector<64x1024xf32>
    %35 = arith.truncf %34 : vector<64x1024xf32> to vector<64x1024xbf16>
    %c0_15 = arith.constant 0 : index
    %c0_16 = arith.constant 0 : index
    %36 = vector.load %arg5[%c0_15, %c0_16] : memref<64x64xbf16, #tpu.memory_space<vmem>>, vector<64x64xbf16>
    %cst_17 = arith.constant dense<0.000000e+00> : vector<64x1024xf32>
    %37 = tpu.matmul %36, %35, %cst_17 {dimension_numbers = #tpu.dot_dimension_numbers<[1], [0], [0], [1], [0, 0, 1, 1], [], []>} : vector<64x64xbf16>, vector<64x1024xbf16>, vector<64x1024xf32> -> vector<64x1024xf32>
    %c0_18 = arith.constant 0 : index
    %c0_19 = arith.constant 0 : index
    %38 = vector.load %arg10[%c0_18, %c0_19] : memref<64x1xf32, #tpu.memory_space<vmem>>, vector<64x1xf32>
    %39 = vector.broadcast %38 : vector<64x1xf32> to vector<64x1024xf32>
    %40 = arith.addf %37, %39 : vector<64x1024xf32>
    %cst_20 = arith.constant 0.000000e+00 : f32
    %41 = vector.broadcast %cst_20 : f32 to vector<64x1024xf32>
    %42 = arith.maximumf %40, %41 : vector<64x1024xf32>
    %43 = arith.truncf %42 : vector<64x1024xf32> to vector<64x1024xbf16>
    %c0_21 = arith.constant 0 : index
    %c0_22 = arith.constant 0 : index
    %44 = vector.load %arg6[%c0_21, %c0_22] : memref<128x64xbf16, #tpu.memory_space<vmem>>, vector<128x64xbf16>
    %cst_23 = arith.constant dense<0.000000e+00> : vector<128x1024xf32>
    %45 = tpu.matmul %44, %43, %cst_23 {dimension_numbers = #tpu.dot_dimension_numbers<[1], [0], [0], [1], [0, 0, 1, 1], [], []>} : vector<128x64xbf16>, vector<64x1024xbf16>, vector<128x1024xf32> -> vector<128x1024xf32>
    %c0_24 = arith.constant 0 : index
    %c0_25 = arith.constant 0 : index
    %46 = vector.load %arg11[%c0_24, %c0_25] : memref<128x1xf32, #tpu.memory_space<vmem>>, vector<128x1xf32>
    %47 = vector.broadcast %46 : vector<128x1xf32> to vector<128x1024xf32>
    %48 = arith.addf %45, %47 : vector<128x1024xf32>
    %cst_26 = arith.constant 0.000000e+00 : f32
    %49 = vector.broadcast %cst_26 : f32 to vector<128x1024xf32>
    %50 = arith.maximumf %48, %49 : vector<128x1024xf32>
    %51 = arith.truncf %50 : vector<128x1024xf32> to vector<128x1024xbf16>
    %c0_27 = arith.constant 0 : index
    %c0_28 = arith.constant 0 : index
    %52 = vector.load %arg7[%c0_27, %c0_28] : memref<256x128xbf16, #tpu.memory_space<vmem>>, vector<256x128xbf16>
    %cst_29 = arith.constant dense<0.000000e+00> : vector<256x1024xf32>
    %53 = tpu.matmul %52, %51, %cst_29 {dimension_numbers = #tpu.dot_dimension_numbers<[1], [0], [0], [1], [0, 0, 1, 1], [], []>} : vector<256x128xbf16>, vector<128x1024xbf16>, vector<256x1024xf32> -> vector<256x1024xf32>
    %c0_30 = arith.constant 0 : index
    %c0_31 = arith.constant 0 : index
    %54 = vector.load %arg12[%c0_30, %c0_31] : memref<256x1xf32, #tpu.memory_space<vmem>>, vector<256x1xf32>
    %55 = vector.broadcast %54 : vector<256x1xf32> to vector<256x1024xf32>
    %56 = arith.addf %53, %55 : vector<256x1024xf32>
    %cst_32 = arith.constant 0.000000e+00 : f32
    %57 = vector.broadcast %cst_32 : f32 to vector<256x1024xf32>
    %58 = arith.maximumf %56, %57 : vector<256x1024xf32>
    %c0_33 = arith.constant 0 : index
    %c0_34 = arith.constant 0 : index
    %59 = vector.load %arg18[%c0_33, %c0_34] : memref<256x128xf32, #tpu.memory_space<vmem>>, vector<256x128xf32>
    %60 = vector.extract_strided_slice %58 {offsets = [0, 0], sizes = [256, 128], strides = [1, 1]} : vector<256x1024xf32> to vector<256x128xf32>
    %61 = arith.maximumf %59, %60 : vector<256x128xf32>
    %62 = vector.extract_strided_slice %58 {offsets = [0, 128], sizes = [256, 128], strides = [1, 1]} : vector<256x1024xf32> to vector<256x128xf32>
    %63 = arith.maximumf %61, %62 : vector<256x128xf32>
    %64 = vector.extract_strided_slice %58 {offsets = [0, 256], sizes = [256, 128], strides = [1, 1]} : vector<256x1024xf32> to vector<256x128xf32>
    %65 = arith.maximumf %63, %64 : vector<256x128xf32>
    %66 = vector.extract_strided_slice %58 {offsets = [0, 384], sizes = [256, 128], strides = [1, 1]} : vector<256x1024xf32> to vector<256x128xf32>
    %67 = arith.maximumf %65, %66 : vector<256x128xf32>
    %68 = vector.extract_strided_slice %58 {offsets = [0, 512], sizes = [256, 128], strides = [1, 1]} : vector<256x1024xf32> to vector<256x128xf32>
    %69 = arith.maximumf %67, %68 : vector<256x128xf32>
    %70 = vector.extract_strided_slice %58 {offsets = [0, 640], sizes = [256, 128], strides = [1, 1]} : vector<256x1024xf32> to vector<256x128xf32>
    %71 = arith.maximumf %69, %70 : vector<256x128xf32>
    %72 = vector.extract_strided_slice %58 {offsets = [0, 768], sizes = [256, 128], strides = [1, 1]} : vector<256x1024xf32> to vector<256x128xf32>
    %73 = arith.maximumf %71, %72 : vector<256x128xf32>
    %74 = vector.extract_strided_slice %58 {offsets = [0, 896], sizes = [256, 128], strides = [1, 1]} : vector<256x1024xf32> to vector<256x128xf32>
    %75 = arith.maximumf %73, %74 : vector<256x128xf32>
    %c0_35 = arith.constant 0 : index
    %c0_36 = arith.constant 0 : index
    %76 = vector.load %arg18[%c0_35, %c0_36] : memref<256x128xf32, #tpu.memory_space<vmem>>, vector<256x128xf32>
    tpu.vector_store %arg18[%c0_35, %c0_36], %75 {strides = array<i32>} : memref<256x128xf32, #tpu.memory_space<vmem>>, vector<256x128xf32>,
    %c1_i32 = arith.constant 1 : i32
    %77 = arith.cmpi eq, %arg1, %c1_i32 : i32
    %78 = arith.extui %77 : i1 to i32
    %c0_i32_37 = arith.constant 0 : i32
    %79 = arith.cmpi ne, %78, %c0_i32_37 : i32
    scf.if %79 {
      %c0_38 = arith.constant 0 : index
      %c0_39 = arith.constant 0 : index
      %80 = vector.load %arg18[%c0_38, %c0_39] : memref<256x128xf32, #tpu.memory_space<vmem>>, vector<256x128xf32>
      %cst_40 = arith.constant dense<0xFF800000> : vector<256xf32>
      %81 = vector.multi_reduction <maximumf>, %80, %cst_40 [1] : vector<256x128xf32> to vector<256xf32>
      %82 = vector.shape_cast %81 : vector<256xf32> to vector<256x1xf32>
      %c0_41 = arith.constant 0 : index
      %c0_42 = arith.constant 0 : index
      %83 = vector.load %arg13[%c0_41, %c0_42] : memref<512x256xbf16, #tpu.memory_space<vmem>>, vector<512x256xbf16>
      %84 = arith.truncf %82 : vector<256x1xf32> to vector<256x1xbf16>
      %cst_43 = arith.constant dense<0.000000e+00> : vector<512x1xf32>
      %85 = tpu.matmul %83, %84, %cst_43 {dimension_numbers = #tpu.dot_dimension_numbers<[1], [0], [0], [1], [0, 0, 1, 1], [], []>} : vector<512x256xbf16>, vector<256x1xbf16>, vector<512x1xf32> -> vector<512x1xf32>
      %c0_44 = arith.constant 0 : index
      %c0_45 = arith.constant 0 : index
      %86 = vector.load %arg14[%c0_44, %c0_45] : memref<512x1xf32, #tpu.memory_space<vmem>>, vector<512x1xf32>
      %87 = arith.addf %85, %86 : vector<512x1xf32>
      %cst_46 = arith.constant 0.000000e+00 : f32
      %88 = vector.broadcast %cst_46 : f32 to vector<512x1xf32>
      %89 = arith.maximumf %87, %88 : vector<512x1xf32>
      %90 = arith.truncf %89 : vector<512x1xf32> to vector<512x1xbf16>
      %c0_47 = arith.constant 0 : index
      %c0_48 = arith.constant 0 : index
      %91 = vector.load %arg15[%c0_47, %c0_48] : memref<128x512xbf16, #tpu.memory_space<vmem>>, vector<128x512xbf16>
      %cst_49 = arith.constant dense<0.000000e+00> : vector<128x1xf32>
      %92 = tpu.matmul %91, %90, %cst_49 {dimension_numbers = #tpu.dot_dimension_numbers<[1], [0], [0], [1], [0, 0, 1, 1], [], []>} : vector<128x512xbf16>, vector<512x1xbf16>, vector<128x1xf32> -> vector<128x1xf32>
      %c0_50 = arith.constant 0 : index
      %c0_51 = arith.constant 0 : index
      %93 = vector.load %arg16[%c0_50, %c0_51] : memref<128x1xf32, #tpu.memory_space<vmem>>, vector<128x1xf32>
      %94 = arith.addf %92, %93 : vector<128x1xf32>
      %c0_52 = arith.constant 0 : index
      %c0_53 = arith.constant 0 : index
      %c0_54 = arith.constant 0 : index
      %95 = vector.load %arg17[%c0_52, %c0_53, %c0_54] : memref<1x128x1xf32, #tpu.memory_space<vmem>>, vector<1x128x1xf32>
      %96 = vector.shape_cast %95 : vector<1x128x1xf32> to vector<128x1xf32>
      %97 = vector.shape_cast %94 : vector<128x1xf32> to vector<1x128x1xf32>
      tpu.vector_store %arg17[%c0_52, %c0_53, %c0_54], %97 {strides = array<i32>} : memref<1x128x1xf32, #tpu.memory_space<vmem>>, vector<1x128x1xf32>,
    } else {
    }
    return
  }
  func.func @transform_0(%arg0: i32, %arg1: i32) -> (i32, i32, i32) {
    %c0_i32 = arith.constant 0 : i32
    %c0_i32_0 = arith.constant 0 : i32
    return %arg0, %c0_i32, %arg1 : i32, i32, i32
  }
  func.func @transform_1(%arg0: i32, %arg1: i32) -> (i32, i32) {
    %c0_i32 = arith.constant 0 : i32
    %c0_i32_0 = arith.constant 0 : i32
    %c0_i32_1 = arith.constant 0 : i32
    return %c0_i32, %c0_i32_0 : i32, i32
  }
  func.func @transform_2(%arg0: i32, %arg1: i32) -> (i32, i32) {
    %c0_i32 = arith.constant 0 : i32
    %c0_i32_0 = arith.constant 0 : i32
    %c0_i32_1 = arith.constant 0 : i32
    return %c0_i32, %c0_i32_0 : i32, i32
  }
  func.func @transform_3(%arg0: i32, %arg1: i32) -> (i32, i32) {
    %c0_i32 = arith.constant 0 : i32
    %c0_i32_0 = arith.constant 0 : i32
    %c0_i32_1 = arith.constant 0 : i32
    return %c0_i32, %c0_i32_0 : i32, i32
  }
  func.func @transform_4(%arg0: i32, %arg1: i32) -> (i32, i32) {
    %c0_i32 = arith.constant 0 : i32
    %c0_i32_0 = arith.constant 0 : i32
    %c0_i32_1 = arith.constant 0 : i32
    return %c0_i32, %c0_i32_0 : i32, i32
  }
  func.func @transform_5(%arg0: i32, %arg1: i32) -> (i32, i32) {
    %c0_i32 = arith.constant 0 : i32
    %c0_i32_0 = arith.constant 0 : i32
    %c0_i32_1 = arith.constant 0 : i32
    return %c0_i32, %c0_i32_0 : i32, i32
  }
  func.func @transform_6(%arg0: i32, %arg1: i32) -> (i32, i32) {
    %c0_i32 = arith.constant 0 : i32
    %c0_i32_0 = arith.constant 0 : i32
    %c0_i32_1 = arith.constant 0 : i32
    return %c0_i32, %c0_i32_0 : i32, i32
  }
  func.func @transform_7(%arg0: i32, %arg1: i32) -> (i32, i32) {
    %c0_i32 = arith.constant 0 : i32
    %c0_i32_0 = arith.constant 0 : i32
    %c0_i32_1 = arith.constant 0 : i32
    return %c0_i32, %c0_i32_0 : i32, i32
  }
  func.func @transform_8(%arg0: i32, %arg1: i32) -> (i32, i32) {
    %c0_i32 = arith.constant 0 : i32
    %c0_i32_0 = arith.constant 0 : i32
    %c0_i32_1 = arith.constant 0 : i32
    return %c0_i32, %c0_i32_0 : i32, i32
  }
  func.func @transform_9(%arg0: i32, %arg1: i32) -> (i32, i32) {
    %c0_i32 = arith.constant 0 : i32
    %c0_i32_0 = arith.constant 0 : i32
    %c0_i32_1 = arith.constant 0 : i32
    return %c0_i32, %c0_i32_0 : i32, i32
  }
  func.func @transform_10(%arg0: i32, %arg1: i32) -> (i32, i32) {
    %c0_i32 = arith.constant 0 : i32
    %c0_i32_0 = arith.constant 0 : i32
    %c0_i32_1 = arith.constant 0 : i32
    return %c0_i32, %c0_i32_0 : i32, i32
  }
  func.func @transform_11(%arg0: i32, %arg1: i32) -> (i32, i32) {
    %c0_i32 = arith.constant 0 : i32
    %c0_i32_0 = arith.constant 0 : i32
    %c0_i32_1 = arith.constant 0 : i32
    return %c0_i32, %c0_i32_0 : i32, i32
  }
  func.func @transform_12(%arg0: i32, %arg1: i32) -> (i32, i32) {
    %c0_i32 = arith.constant 0 : i32
    %c0_i32_0 = arith.constant 0 : i32
    %c0_i32_1 = arith.constant 0 : i32
    return %c0_i32, %c0_i32_0 : i32, i32
  }
  func.func @transform_13(%arg0: i32, %arg1: i32) -> (i32, i32) {
    %c0_i32 = arith.constant 0 : i32
    %c0_i32_0 = arith.constant 0 : i32
    %c0_i32_1 = arith.constant 0 : i32
    return %c0_i32, %c0_i32_0 : i32, i32
  }
  func.func @transform_14(%arg0: i32, %arg1: i32) -> (i32, i32) {
    %c0_i32 = arith.constant 0 : i32
    %c0_i32_0 = arith.constant 0 : i32
    %c0_i32_1 = arith.constant 0 : i32
    return %c0_i32, %c0_i32_0 : i32, i32
  }
  func.func @transform_15(%arg0: i32, %arg1: i32) -> (i32, i32, i32) {
    %c0_i32 = arith.constant 0 : i32
    %c0_i32_0 = arith.constant 0 : i32
    %c0_i32_1 = arith.constant 0 : i32
    return %arg0, %c0_i32, %c0_i32_0 : i32, i32, i32
  }
}

</mosaic_0001>

<bundles_post_ra>
// kernel: pointnet_forward.1
= control target key start
LH: loop header
LB: loop body
LE: loop exit
PB: predicated region body
PF: predicated region fallthrough
CT: control target
= control target key end

     0   :  { %s7033_s18 = smov 0   ;;  %s7035_s19 = smov 0   ;;  %s10612_s0 = inlined_call_operand.vmem [shape: f32[2,3,2048], index: 0, kind: input, shape index: {}]   ;;  %s10613_s1 = inlined_call_operand.vmem [shape: f32[64,3], index: 1, kind: input, shape index: {}]   ;;  %s10614_s2 = inlined_call_operand.vmem [shape: bf16[64,64], index: 2, kind: input, shape index: {}]   ;;  %s10615_s3 = inlined_call_operand.vmem [shape: bf16[64,64], index: 3, kind: input, shape index: {}]   ;;  %s10616_s4 = inlined_call_operand.vmem [shape: bf16[128,64], index: 4, kind: input, shape index: {}]   ;;  %s10617_s5 = inlined_call_operand.vmem [shape: bf16[256,128], index: 5, kind: input, shape index: {}]   ;;  %s10618_s6 = inlined_call_operand.vmem [shape: f32[64,1], index: 6, kind: input, shape index: {}]   ;;  %s10619_s7 = inlined_call_operand.vmem [shape: f32[64,1], index: 7, kind: input, shape index: {}]   ;;  %s10620_s8 = inlined_call_operand.vmem [shape: f32[64,1], index: 8, kind: input, shape index: {}]   ;;  %s10621_s9 = inlined_call_operand.vmem [shape: f32[128,1], index: 9, kind: input, shape index: {}]   ;;  %s10622_s10 = inlined_call_operand.vmem [shape: f32[256,1], index: 10, kind: input, shape index: {}]   ;;  %s10623_s11 = inlined_call_operand.vmem [shape: bf16[512,256], index: 11, kind: input, shape index: {}]   ;;  %s10624_s12 = inlined_call_operand.vmem [shape: f32[512,1], index: 12, kind: input, shape index: {}]   ;;  %s10625_s13 = inlined_call_operand.vmem [shape: bf16[128,512], index: 13, kind: input, shape index: {}]   ;;  %s10626_s14 = inlined_call_operand.vmem [shape: f32[128,1], index: 14, kind: input, shape index: {}]   ;;  %s10627_s15 = inlined_call_operand.vmem [shape: f32[2,128,1], index: 15, kind: output, shape index: {}]  }
   0x1   :  { %s7037_s20 = smov 0   ;;  %s7039_s21 = smov 0  }
   0x2   :  { %s7041_s22 = smov 0  }
   0x3 LB: > { %10729 = sst [smem:[#allocation3_spill]] %s6942_s21  ;;  %s34_s23 = sadd.s32 1, %s6938_s20  ;;  %s6946_s22 = sphi %s7041_s22, %s25_s22   ;;  %s6942_s21 = sphi %s7039_s21, %s11037_s21   ;;  %s6938_s20 = sphi %s7037_s20, %s11039_s20   ;;  %s6934_s19 = sphi %s7035_s19, %s11035_s19   ;;  %s6930_s18 = sphi %s7033_s18, %s11038_s18  }
   0x4   : > { %s37_s24 = sadd.s32 1, %s6942_s21  ;;  %p35_p0 = scmp.ge.s32.totalorder %s34_s23, 2 }
   0x5   : > { %p6309_p1 = scmp.ge.s32.totalorder %s6946_s22, 1  ;;  %p456_p2 = scmp.lt.s32.totalorder %s6946_s22, 5 }
   0x6   : > { %s11041_s23 = smov (%p35_p0, %s34_s23), 0  ;;  %s11043_s24 = smov (!%p35_p0, %s37_s24), %s6942_s21 }
   0x7   : > { %10730 = sst [smem:[#allocation4_spill]] %s11041_s23  ;;  %p457_p3 = pnand %p6309_p1, %p456_p2 }
   0x8   : > { %p39_p4 = scmp.ge.s32.totalorder %s11043_s24, 2 }
   0x9   : > { %460 = sbr.rel (%p457_p3) target bundleno = 2399 (0x95f), region = 80 }
   0xa   : > { %s11045_s24 = smov (%p39_p4, %s11043_s24), 0 }
   0xb   : > { %10731 = sst [smem:[#allocation5_spill]] %s11045_s24 }
   0xe   : > { %s6310_s25 = sshll.u32 %s6930_s18, 3  ;;  %p509_p5 = scmp.lt.s32.totalorder %s6934_s19, 1 }
   0xf   : > { %p511_p6 = scmp.lt.s32.totalorder %s6310_s25, 15  ;;  %p6315_p7 = scmp.ne.s32.totalorder %s6930_s18, 0 }
  0x10   : > { %s11047_s19 = smov (!%p509_p5, %s6934_s19), 1 }
  0x11   : > { %s11049_s25 = smov (!%p511_p6, %s6310_s25), 15  ;;  %s6311_s26 = sshll.u32 %s11047_s19, 4 }
  0x12   : > { %s6511_s27 = sshll.u32 %s11047_s19, 7  ;;  %s514_s28 = sadd.s32 %s6311_s26, %s11049_s25 }
  0x13   : > { %s7069_s16 = scalar_lea.vmem %s10627_s15, %s6511_s27  ;;  %s6312_s17 = sshll.u32 %s514_s28, 2 }
  0x14   : > { %s7074_s24 = scalar_lea.vmem %s10612_s0, %s6312_s17  ;;  %527 = sbr.rel (%p6315_p7) target bundleno = 42 (0x2a), region = 84 }
  0x19   : > { %v6948_v0 = vmov -inf  }
  0x1a   : > { %528 = vst [vmem:[#allocation2 + $0xb0] sm:$0xff] %v6948_v0  ;;  %529 = vst [vmem:[#allocation2] sm:$0xff] %v6948_v0 }
  0x1b   : > { %530 = vst [vmem:[#allocation2 + $0xd8] sm:$0xff] %v6948_v0  ;;  %531 = vst [vmem:[#allocation2 + $0x18] sm:$0xff] %v6948_v0 }
  0x1c   : > { %532 = vst [vmem:[#allocation2 + $0x50] sm:$0xff] %v6948_v0  ;;  %533 = vst [vmem:[#allocation2 + $0x68] sm:$0xff] %v6948_v0 }
  0x1d   : > { %534 = vst [vmem:[#allocation2 + $0x30] sm:$0xff] %v6948_v0  ;;  %535 = vst [vmem:[#allocation2 + $0x48] sm:$0xff] %v6948_v0 }
  0x1e   : > { %536 = vst [vmem:[#allocation2 + $0x80] sm:$0xff] %v6948_v0  ;;  %537 = vst [vmem:[#allocation2 + $0x88] sm:$0xff] %v6948_v0 }
  0x1f   : > { %538 = vst [vmem:[#allocation2 + $0xe8] sm:$0xff] %v6948_v0  ;;  %539 = vst [vmem:[#allocation2 + $0xb8] sm:$0xff] %v6948_v0 }
  0x20   : > { %540 = vst [vmem:[#allocation2 + $0x60] sm:$0xff] %v6948_v0  ;;  %541 = vst [vmem:[#allocation2 + $0xf0] sm:$0xff] %v6948_v0 }
  0x21   : > { %542 = vst [vmem:[#allocation2 + $0x8] sm:$0xff] %v6948_v0  ;;  %543 = vst [vmem:[#allocation2 + $0x78] sm:$0xff] %v6948_v0 }
  0x22   : > { %544 = vst [vmem:[#allocation2 + $0x38] sm:$0xff] %v6948_v0  ;;  %545 = vst [vmem:[#allocation2 + $0x58] sm:$0xff] %v6948_v0 }
  0x23   : > { %546 = vst [vmem:[#allocation2 + $0x40] sm:$0xff] %v6948_v0  ;;  %547 = vst [vmem:[#allocation2 + $0xc8] sm:$0xff] %v6948_v0 }
  0x24   : > { %548 = vst [vmem:[#allocation2 + $0xe0] sm:$0xff] %v6948_v0  ;;  %549 = vst [vmem:[#allocation2 + $0x90] sm:$0xff] %v6948_v0 }
  0x25   : > { %550 = vst [vmem:[#allocation2 + $0x70] sm:$0xff] %v6948_v0  ;;  %551 = vst [vmem:[#allocation2 + $0xc0] sm:$0xff] %v6948_v0 }
  0x26   : > { %552 = vst [vmem:[#allocation2 + $0xa8] sm:$0xff] %v6948_v0  ;;  %553 = vst [vmem:[#allocation2 + $0xd0] sm:$0xff] %v6948_v0 }
  0x27   : > { %554 = vst [vmem:[#allocation2 + $0x10] sm:$0xff] %v6948_v0  ;;  %555 = vst [vmem:[#allocation2 + $0x28] sm:$0xff] %v6948_v0 }
  0x28   : > { %556 = vst [vmem:[#allocation2 + $0xa0] sm:$0xff] %v6948_v0  ;;  %557 = vst [vmem:[#allocation2 + $0xf8] sm:$0xff] %v6948_v0 }
  0x29   : > { %558 = vst [vmem:[#allocation2 + $0x20] sm:$0xff] %v6948_v0  ;;  %559 = vst [vmem:[#allocation2 + $0x98] sm:$0xff] %v6948_v0 }
  0x2a PF: > { %v570_v1 = vld [vmem:[%s10613_s1 + $0x30] sm:$0xff]  ;;  %v6949_v2 = vmov 2   ;;  %v6950_v3 = vmov 1   ;;  %v571_v4 = vld [vmem:[%s10613_s1 + $0x38] sm:$0xff]  ;;  %v568_v5 = vld [vmem:[%s10613_s1 + $0x20] sm:$0xff]  ;;  %v10629_v6 = vmov 0   ;;  %v616_v37 = vlaneseq }
  0x2b   : > { %6718 = vset.pattern.permute.xlu0 %v6949_v2  ;;  %6717 = vset.pattern.permute.xlu1 %v6950_v3  ;;  %v567_v7 = vld [vmem:[%s10613_s1 + $0x18] sm:$0xff]  ;;  %v566_v8 = vld [vmem:[%s10613_s1 + $0x10] sm:$0xff]  ;;  %v565_v9 = vld [vmem:[%s10613_s1 + $0x8] sm:$0xff]  ;;  %vm1500_vm0 = vcmask 523264   ;;  %p6412_p8 = scmp.ne.s32.totalorder %s6930_s18, 1 }
  0x2c   : > { %1009 = vperm.xlu0 %6718, %v570_v1   ;;  %777 = vperm.xlu1 %6717, %v570_v1   ;;  %v569_v10 = vld [vmem:[%s10613_s1 + $0x28] sm:$0xff]  ;;  %v1222_v11 = vld [vmem:[%s10618_s6 + $0x30] sm:$0xff]  ;;  %v1223_v12 = vld [vmem:[%s10618_s6 + $0x38] sm:$0xff]  ;;  %v617_v40 = vshrl.u32 %v616_v37, 7 }
  0x2d   : > { %1545 = vmatprep.mubr.bf16.mxu0 %v10629_v6  ;;  %1618 = vmatprep.mubr.bf16.mxu1 %v10629_v6  ;;  %v564_v13 = vld [vmem:[%s10613_s1] sm:$0xff]  ;;  %v1218_v14 = vld [vmem:[%s10618_s6 + $0x10] sm:$0xff]  ;;  %v1217_v15 = vld [vmem:[%s10618_s6 + $0x8] sm:$0xff] }
  0x2e   : > { %v1439_v16 = vld [vmem:[%s10619_s7 + $0x38] sm:$0xff]  ;;  %v1437_v17 = vld [vmem:[%s10619_s7 + $0x28] sm:$0xff]  ;;  %v1220_v18 = vld [vmem:[%s10618_s6 + $0x20] sm:$0xff]  ;;  %v7205_v43 = vsub.s32 4, %v617_v40  ;;  %v7207_v44 = vsub.s32 5, %v617_v40  ;;  %v7209_v45 = vsub.s32 6, %v617_v40 }
  0x2f   : > { %v1435_v19 = vld [vmem:[%s10619_s7 + $0x18] sm:$0xff]  ;;  %v1221_v20 = vld [vmem:[%s10618_s6 + $0x28] sm:$0xff]  ;;  %v1216_v29 = vld [vmem:[%s10618_s6] sm:$0xff]  ;;  %v7215_v48 = vsub.s32 0, %v617_v40  ;;  %v7217_v49 = vsub.s32 1, %v617_v40  ;;  %v1018_v60 = vsub.s32 2, %v617_v40 }
  0x30   : > { %781 = vperm.xlu1 %6717, %v571_v4   ;;  %1001 = vperm.xlu0 %6718, %v568_v5   ;;  %v1433_v21 = vld [vmem:[%s10619_s7 + $0x8] sm:$0xff]  ;;  %v1916_v22 = vld [vmem:[%s10620_s8 + $0x38] sm:$0xff]  ;;  %v1438_v31 = vld [vmem:[%s10619_s7 + $0x30] sm:$0xff] }
  0x31   : > { %v1914_v23 = vld [vmem:[%s10620_s8 + $0x28] sm:$0xff]  ;;  %v1912_v24 = vld [vmem:[%s10620_s8 + $0x18] sm:$0xff]  ;;  %v1436_v33 = vld [vmem:[%s10619_s7 + $0x20] sm:$0xff] }
  0x32   : > { %v1910_v25 = vld [vmem:[%s10620_s8 + $0x8] sm:$0xff]  ;;  %v2408_v26 = vld [vmem:[%s10621_s9 + $0x78] sm:$0xff]  ;;  %v1434_v35 = vld [vmem:[%s10619_s7 + $0x10] sm:$0xff] }
  0x33   : > { %v1219_v27 = vld [vmem:[%s10618_s6 + $0x18] sm:$0xff]  ;;  %v2406_v28 = vld [vmem:[%s10621_s9 + $0x68] sm:$0xff]  ;;  %v1432_v38 = vld [vmem:[%s10619_s7] sm:$0xff] }
  0x34   : > { %6719 = vset.pattern.permute.xlu1 %v6949_v2  ;;  %997 = vperm.xlu0 %6718, %v567_v7   ;;  %v2404_v30 = vld [vmem:[%s10621_s9 + $0x58] sm:$0xff]  ;;  %v2402_v32 = vld [vmem:[%s10621_s9 + $0x48] sm:$0xff]  ;;  %v1915_v41 = vld [vmem:[%s10620_s8 + $0x30] sm:$0xff] }
  0x35   : > { %1013 = vperm.xlu1 %6719, %v571_v4   ;;  %v2400_v34 = vld [vmem:[%s10621_s9 + $0x38] sm:$0xff]  ;;  %v2398_v36 = vld [vmem:[%s10621_s9 + $0x28] sm:$0xff]  ;;  %v1913_v46 = vld [vmem:[%s10620_s8 + $0x20] sm:$0xff] }
  0x36   : > { %v2396_v39 = vld [vmem:[%s10621_s9 + $0x18] sm:$0xff]  ;;  %v2394_v42 = vld [vmem:[%s10621_s9 + $0x8] sm:$0xff]  ;;  %v560_v47 = vld [vmem:[%s7074_s24] sm:$0x77] }
  0x37   : > { %v561_v50 = vld [vmem:[%s7074_s24 + $0x8] sm:$0x77]  ;;  %v623_v52 = vrot.slane %v560_v47, %v7205_v43  ;;  %v791_v53 = vrot.slane %v560_v47, %v7207_v44  ;;  %v1023_v54 = vrot.slane %v560_v47, %v7209_v45  ;;  %v1911_v55 = vld [vmem:[%s10620_s8 + $0x10] sm:$0xff]  ;;  %v619_v59 = vrot.slane %v560_v47, %v7215_v48  ;;  %v3232_v62 = vld [vmem:[%s10622_s10 + $0x18] sm:$0xff] }
  0x38   : > { %6726 = vset.pattern.permute.xlu0 %v6950_v3  ;;  %v3230_v51 = vld [vmem:[%s10622_s10 + $0x8] sm:$0xff]  ;;  %v631_v56 = vrot.slane %v561_v50, %v7205_v43  ;;  %v799_v57 = vrot.slane %v561_v50, %v7207_v44  ;;  %v1031_v58 = vrot.slane %v561_v50, %v7209_v45  ;;  %v787_v61 = vrot.slane %v560_v47, %v7217_v49 }
  0x39   : > { %6720 = vset.pattern.permute.xlu1 %v10629_v6  ;;  %761 = vperm.xlu0 %6726, %v566_v8   ;;  %v7238_v63 = vrot.slane %v623_v52, %v7215_v48  ;;  %v7241_v0 = vrot.slane %v791_v53, %v7217_v49 }
  0x3a   : > { %594 = vperm.xlu1 %6720, %v568_v5  }
  0x3d   : > { %757 = vperm.xlu0 %6726, %v565_v9  }
  0x3e   : > { %6721 = vset.pattern.permute.xlu1 %v6950_v3 }
  0x3f   : > { %769 = vperm.xlu1 %6721, %v568_v5   ;;  %v7253_v5 = vrot.slane %v799_v57, %v7217_v49 }
  0x41   : > { %6729 = vset.pattern.permute.xlu0 %v10629_v6 }
  0x42   : > { %604 = vperm.xlu0 %6729, %v570_v1   ;;  %v7243_v1 = vrot.slane %v1023_v54, %v1018_v60 }
  0x43   : > { %773 = vperm.xlu1 %6721, %v569_v10  }
  0x46   : > { %609 = vperm.xlu0 %6729, %v571_v4   ;;  %v7250_v4 = vrot.slane %v631_v56, %v7215_v48 }
  0x47   : > { %6722 = vset.pattern.permute.xlu1 %v6949_v2 }
  0x48   : > { %1005 = vperm.xlu1 %6722, %v569_v10  }
  0x4a   : > { %599 = vperm.xlu0 %6729, %v569_v10   ;;  %v7262_v10 = vrot.slane %v787_v61, %v7217_v49 }
  0x4c   : > { %6723 = vset.pattern.permute.xlu1 %v10629_v6 }
  0x4d   : > { %1256 = vperm.xlu1 %6723, %v1222_v11   ;;  %v1019_v11 = vrot.slane %v560_v47, %v1018_v60 }
  0x4e   : > { %1261 = vperm.xlu0 %6729, %v1223_v12   ;;  %v627_v12 = vrot.slane %v561_v50, %v7215_v48 }
  0x51   : > { %584 = vperm.xlu1 %6723, %v566_v8  }
  0x52   : > { %574 = vperm.xlu0 %6729, %v564_v13  }
  0x55   : > { %589 = vperm.xlu1 %6723, %v567_v7  }
  0x56   : > { %1236 = vperm.xlu0 %6729, %v1218_v14   ;;  %v1027_v14 = vrot.slane %v561_v50, %v1018_v60 }
  0x59   : > { %6724 = vset.pattern.permute.xlu1 %v6950_v3 }
  0x5a   : > { %765 = vperm.xlu1 %6724, %v567_v7   ;;  %1231 = vperm.xlu0 %6729, %v1217_v15   ;;  %v7255_v7 = vrot.slane %v1031_v58, %v1018_v60 }
  0x5e   : > { %6725 = vset.pattern.permute.xlu1 %v6949_v2  ;;  %1477 = vperm.xlu0 %6729, %v1439_v16  }
  0x5f   : > { %993 = vperm.xlu1 %6725, %v566_v8   ;;  %v7258_v8 = vrot.slane %v619_v59, %v7215_v48 }
  0x62   : > { %1467 = vperm.xlu0 %6729, %v1437_v17  }
  0x63   : > { %6727 = vset.pattern.permute.xlu1 %v10629_v6 }
  0x64   : > { %1246 = vperm.xlu1 %6727, %v1220_v18   ;;  %v3234_v18 = vld [vmem:[%s10622_s10 + $0x28] sm:$0xff] }
  0x66   : > { %1457 = vperm.xlu0 %6729, %v1435_v19  }
  0x68   : > { %1251 = vperm.xlu1 %6727, %v1221_v20  }
  0x6a   : > { %1447 = vperm.xlu0 %6729, %v1433_v21  }
  0x6c   : > { %579 = vperm.xlu1 %6727, %v565_v9  }
  0x6e   : > { %1954 = vperm.xlu0 %6729, %v1916_v22  }
  0x70   : > { %6728 = vset.pattern.permute.xlu1 %v6950_v3  ;;  %v1909_v3 = vld [vmem:[%s10620_s8] sm:$0xff] }
  0x71   : > { %753 = vperm.xlu1 %6728, %v564_v13  }
  0x72   : > { %1944 = vperm.xlu0 %6729, %v1914_v23   ;;  %v2407_v23 = vld [vmem:[%s10621_s9 + $0x70] sm:$0xff] }
  0x75   : > { %6730 = vset.pattern.permute.xlu1 %v6949_v2  ;;  %v562_v2 = vld [vmem:[%s7074_s24 + $0x10] sm:$0x77] }
  0x76   : > { %1934 = vperm.xlu0 %6729, %v1912_v24   ;;  %985 = vperm.xlu1 %6730, %v564_v13   ;;  %v795_v13 = vrot.slane %v561_v50, %v7217_v49  ;;  %v639_v15 = vrot.slane %v562_v2, %v7205_v43  ;;  %v807_v16 = vrot.slane %v562_v2, %v7207_v44 }
  0x77   : > { %v1039_v17 = vrot.slane %v562_v2, %v7209_v45  ;;  %v803_v21 = vrot.slane %v562_v2, %v7217_v49 }
  0x7a   : > { %1924 = vperm.xlu0 %6729, %v1910_v25   ;;  %989 = vperm.xlu1 %6730, %v565_v9   ;;  %v563_v9 = vld [vmem:[%s7074_s24 + $0x18] sm:$0x77]  ;;  %v635_v25 = vrot.slane %v562_v2, %v7215_v48 }
  0x7b   : > { %v815_v19 = vrot.slane %v563_v9, %v7207_v44  ;;  %v1047_v20 = vrot.slane %v563_v9, %v7209_v45  ;;  %v811_v22 = vrot.slane %v563_v9, %v7217_v49  ;;  %v647_v24 = vrot.slane %v563_v9, %v7205_v43  ;;  %v2405_v43 = vld [vmem:[%s10621_s9 + $0x60] sm:$0xff] }
  0x7c   : > { %v7321_v45 = vrot.slane %v635_v25, %v7215_v48 }
  0x7d   : > { %v7306_v40 = vrot.slane %v1047_v20, %v1018_v60  ;;  %v7318_v44 = vrot.slane %v647_v24, %v7215_v48 }
  0x7e   : > { %2486 = vperm.xlu0 %6729, %v2408_v26   ;;  %6731 = vset.pattern.permute.xlu1 %v10629_v6  ;;  %v1035_v26 = vrot.slane %v562_v2, %v1018_v60  ;;  %10738 = vst [vmem:[#allocation12_spill] sm:$0xff] %v7321_v45  ;;  %v2403_v2 = vld [vmem:[%s10621_s9 + $0x50] sm:$0xff] }
  0x7f   : > { %1241 = vperm.xlu1 %6731, %v1219_v27   ;;  %v1043_v27 = vrot.slane %v563_v9, %v1018_v60  ;;  %10734 = vst [vmem:[#allocation8_spill] sm:$0xff] %v7306_v40  ;;  %10737 = vst [vmem:[#allocation11_spill] sm:$0xff] %v7318_v44 }
  0x81   : > { %v7325_v47 = vrot.slane %v1043_v27, %v1018_v60 }
  0x82   : > { %2476 = vperm.xlu0 %6729, %v2406_v28   ;;  %v7281_v28 = vrot.slane %v1019_v11, %v1018_v60 }
  0x83   : > { %1226 = vperm.xlu1 %6731, %v1216_v29   ;;  %v7284_v29 = vrot.slane %v627_v12, %v7215_v48  ;;  %10740 = vst [vmem:[#allocation14_spill] sm:$0xff] %v7325_v47 }
  0x86   : > { %2466 = vperm.xlu0 %6729, %v2404_v30   ;;  %v7287_v30 = vrot.slane %v795_v13, %v7217_v49 }
  0x87   : > { %1472 = vperm.xlu1 %6731, %v1438_v31   ;;  %v643_v31 = vrot.slane %v563_v9, %v7215_v48 }
  0x89   : > { %v7337_v52 = vrot.slane %v643_v31, %v7215_v48  ;;  %v2401_v31 = vld [vmem:[%s10621_s9 + $0x40] sm:$0xff] }
  0x8a   : > { %2456 = vperm.xlu0 %6729, %v2402_v32   ;;  %v7290_v32 = vrot.slane %v1027_v14, %v1018_v60 }
  0x8b   : > { %1462 = vperm.xlu1 %6731, %v1436_v33   ;;  %v7293_v33 = vrot.slane %v639_v15, %v7215_v48  ;;  %10741 = vst [vmem:[#allocation15_spill] sm:$0xff] %v7337_v52  ;;  %v3238_v48 = vld [vmem:[%s10622_s10 + $0x48] sm:$0xff] }
  0x8e   : > { %2446 = vperm.xlu0 %6729, %v2400_v34   ;;  %v7296_v34 = vrot.slane %v807_v16, %v7217_v49 }
  0x8f   : > { %1452 = vperm.xlu1 %6731, %v1434_v35   ;;  %v7298_v35 = vrot.slane %v1039_v17, %v1018_v60 }
  0x91   : > { %10732 = vst [vmem:[#allocation6_spill] sm:$0xff] %v7298_v35 }
  0x92   : > { %2436 = vperm.xlu0 %6729, %v2398_v36  }
  0x93   : > { %1442 = vperm.xlu1 %6731, %v1432_v38   ;;  %v3236_v38 = vld [vmem:[%s10622_s10 + $0x38] sm:$0xff] }
  0x96   : > { %2426 = vperm.xlu0 %6729, %v2396_v39   ;;  %v7304_v39 = vrot.slane %v815_v19, %v7217_v49 }
  0x97   : > { %1949 = vperm.xlu1 %6731, %v1915_v41   ;;  %v7309_v41 = vrot.slane %v803_v21, %v7217_v49 }
  0x98   : > { %10733 = vst [vmem:[#allocation7_spill] sm:$0xff] %v7304_v39 }
  0x99   : > { %10735 = vst [vmem:[#allocation9_spill] sm:$0xff] %v7309_v41 }
  0x9a   : > { %2416 = vperm.xlu0 %6729, %v2394_v42   ;;  %v7312_v42 = vrot.slane %v811_v22, %v7217_v49  ;;  %v3240_v22 = vld [vmem:[%s10622_s10 + $0x58] sm:$0xff] }
  0x9b   : > { %1939 = vperm.xlu1 %6731, %v1913_v46   ;;  %v7323_v46 = vrot.slane %v1035_v26, %v1018_v60 }
  0x9c   : > { %10736 = vst [vmem:[#allocation10_spill] sm:$0xff] %v7312_v42 }
  0x9d   : > { %10739 = vst [vmem:[#allocation13_spill] sm:$0xff] %v7323_v46 }
  0x9e   : > { %3268 = vperm.xlu0 %6729, %v3230_v51  }
  0x9f   : > { %1929 = vperm.xlu1 %6731, %v1911_v55  }
  0xa2   : > { %3278 = vperm.xlu0 %6729, %v3232_v62  }
  0xa3   : > { %1919 = vperm.xlu1 %6731, %v1909_v3  }
  0xa6   : > { %3288 = vperm.xlu0 %6729, %v3234_v18  }
  0xa7   : > { %v778_v36 = vpop.permute.xlu1 %777  ;;  %2481 = vperm.xlu1 %6731, %v2407_v23   ;;  %v1010_v37 = vpop.permute.xlu0 %1009 }
  0xa8   : > { %v7328_v50 = vmul.f32 %v7241_v0, %v778_v36  ;;  %v7331_v49 = vmul.f32 %v7243_v1, %v1010_v37  ;;  %v7334_v51 = vmul.f32 %v7253_v5, %v778_v36  ;;  %v7340_v53 = vmul.f32 %v7255_v7, %v1010_v37 }
  0xa9   : > { %v7343_v54 = vmul.f32 %v7262_v10, %v778_v36  ;;  %v7346_v55 = vmul.f32 %v7281_v28, %v1010_v37  ;;  %v7349_v56 = vmul.f32 %v7287_v30, %v778_v36  ;;  %v7355_v59 = vmul.f32 %v7290_v32, %v1010_v37 }
  0xaa   : > { %3298 = vperm.xlu0 %6729, %v3236_v38   ;;  %v7358_v60 = vmul.f32 %v7296_v34, %v778_v36  ;;  %v7361_v61 = vmul.f32 %v7298_v35, %v1010_v37  ;;  %v7364_v62 = vmul.f32 %v7304_v39, %v778_v36  ;;  %v7370_v3 = vmul.f32 %v7306_v40, %v1010_v37 }
  0xab   : > { %v782_v57 = vpop.permute.xlu1 %781  ;;  %2471 = vperm.xlu1 %6731, %v2405_v43   ;;  %v1002_v58 = vpop.permute.xlu0 %1001  ;;  %v7373_v9 = vmul.f32 %v7309_v41, %v778_v36  ;;  %v7376_v11 = vmul.f32 %v7323_v46, %v1010_v37  ;;  %v7379_v12 = vmul.f32 %v7312_v42, %v778_v36  ;;  %v7391_v16 = vmul.f32 %v7325_v47, %v1010_v37 }
  0xac   : > { %10742 = vst [vmem:[#allocation16_spill] sm:$0xff] %v7361_v61  ;;  %10743 = vst [vmem:[#allocation17_spill] sm:$0xff] %v7364_v62  ;;  %v7382_v13 = vmul.f32 %v7241_v0, %v782_v57  ;;  %v7385_v14 = vmul.f32 %v7253_v5, %v782_v57  ;;  %v7388_v15 = vmul.f32 %v7262_v10, %v782_v57 }
  0xad   : > { %10744 = vst [vmem:[#allocation18_spill] sm:$0xff] %v7370_v3  ;;  %10745 = vst [vmem:[#allocation19_spill] sm:$0xff] %v7373_v9  ;;  %v7394_v17 = vmul.f32 %v7287_v30, %v782_v57  ;;  %v7397_v18 = vmul.f32 %v7243_v1, %v1002_v58  ;;  %v7400_v19 = vmul.f32 %v7255_v7, %v1002_v58 }
  0xae   : > { %10746 = vst [vmem:[#allocation20_spill] sm:$0xff] %v7376_v11  ;;  %10747 = vst [vmem:[#allocation21_spill] sm:$0xff] %v7379_v12  ;;  %3308 = vperm.xlu0 %6729, %v3238_v48   ;;  %v7403_v20 = vmul.f32 %v7281_v28, %v1002_v58  ;;  %v7409_v23 = vmul.f32 %v7290_v32, %v1002_v58  ;;  %v7412_v24 = vmul.f32 %v7296_v34, %v782_v57 }
  0xaf   : > { %10748 = vst [vmem:[#allocation22_spill] sm:$0xff] %v7391_v16  ;;  %2461 = vperm.xlu1 %6731, %v2403_v2   ;;  %v998_v21 = vpop.permute.xlu0 %997  ;;  %v7415_v25 = vmul.f32 %v7304_v39, %v782_v57  ;;  %v7418_v26 = vmul.f32 %v7309_v41, %v782_v57  ;;  %v7424_v36 = vmul.f32 %v7312_v42, %v782_v57 }
  0xb0   : > { %10749 = vst [vmem:[#allocation23_spill] sm:$0xff] %v7412_v24  ;;  %v1014_v27 = vpop.permute.xlu1 %1013  ;;  %v7427_v37 = vmul.f32 %v7298_v35, %v1002_v58  ;;  %v7430_v38 = vmul.f32 %v7306_v40, %v1002_v58  ;;  %v7433_v43 = vmul.f32 %v7323_v46, %v1002_v58  ;;  %v7436_v48 = vmul.f32 %v7243_v1, %v998_v21 }
  0xb1   : > { %10750 = vst [vmem:[#allocation24_spill] sm:$0xff] %v7415_v25  ;;  %10751 = vst [vmem:[#allocation25_spill] sm:$0xff] %v7418_v26  ;;  %v7439_v2 = vmul.f32 %v7255_v7, %v998_v21  ;;  %v7442_v6 = vmul.f32 %v7281_v28, %v998_v21  ;;  %v7445_v57 = vmul.f32 %v7325_v47, %v1002_v58 }
  0xb2   : > { %10752 = vst [vmem:[#allocation26_spill] sm:$0xff] %v7424_v36  ;;  %10753 = vst [vmem:[#allocation27_spill] sm:$0xff] %v7427_v37  ;;  %3318 = vperm.xlu0 %6729, %v3240_v22   ;;  %v7448_v37 = vmul.f32 %v7243_v1, %v1014_v27  ;;  %v7457_v16 = vmul.f32 %v7290_v32, %v998_v21  ;;  %v3242_v36 = vld [vmem:[%s10622_s10 + $0x68] sm:$0xff]  ;;  %v7463_v58 = vmul.f32 %v7290_v32, %v1014_v27 }
  0xb3   : > { %10754 = vst [vmem:[#allocation28_spill] sm:$0xff] %v7430_v38  ;;  %10755 = vst [vmem:[#allocation29_spill] sm:$0xff] %v7433_v43  ;;  %v7451_v38 = vmul.f32 %v7255_v7, %v1014_v27  ;;  %v7454_v43 = vmul.f32 %v7281_v28, %v1014_v27  ;;  %2451 = vperm.xlu1 %6731, %v2401_v31   ;;  %v7466_v22 = vmul.f32 %v7298_v35, %v1014_v27  ;;  %v2399_v31 = vld [vmem:[%s10621_s9 + $0x30] sm:$0xff] }
  0xb4   : > { %10756 = vst [vmem:[#allocation30_spill] sm:$0xff] %v7436_v48  ;;  %10757 = vst [vmem:[#allocation31_spill] sm:$0xff] %v7439_v2  ;;  %v7472_v12 = vmul.f32 %v7323_v46, %v1014_v27  ;;  %v762_v11 = vpop.permute.xlu0 %761  ;;  %v7478_v26 = vmul.f32 %v7325_v47, %v1014_v27  ;;  %v7481_v9 = vmul.f32 %v7298_v35, %v998_v21 }
  0xb5   : > { %10758 = vst [vmem:[#allocation32_spill] sm:$0xff] %v7442_v6  ;;  %10759 = vst [vmem:[#allocation33_spill] sm:$0xff] %v7445_v57  ;;  %v7469_v57 = vmul.f32 %v7306_v40, %v1014_v27  ;;  %v7487_v6 = vmul.f32 %v7323_v46, %v998_v21  ;;  %v7493_v2 = vmul.f32 %v7253_v5, %v762_v11 }
  0xb6   : > { %10760 = vst [vmem:[#allocation34_spill] sm:$0xff] %v7457_v16  ;;  %10761 = vst [vmem:[#allocation35_spill] sm:$0xff] %v7466_v22  ;;  %v7484_v16 = vmul.f32 %v7306_v40, %v998_v21  ;;  %v7496_v48 = vmul.f32 %v7262_v10, %v762_v11  ;;  %v7499_v27 = vmul.f32 %v7325_v47, %v998_v21  ;;  %3328 = vperm.xlu0 %6729, %v3242_v36   ;;  %v3244_v40 = vld [vmem:[%s10622_s10 + $0x78] sm:$0xff] }
  0xb7   : > { %10762 = vst [vmem:[#allocation36_spill] sm:$0xff] %v7469_v57  ;;  %10763 = vst [vmem:[#allocation37_spill] sm:$0xff] %v7472_v12  ;;  %v595_v57 = vpop.permute.xlu1 %594  ;;  %v7490_v12 = vmul.f32 %v7241_v0, %v762_v11  ;;  %v7505_v46 = vmul.f32 %v7287_v30, %v762_v11  ;;  %2441 = vperm.xlu1 %6731, %v2399_v31   ;;  %v2397_v31 = vld [vmem:[%s10621_s9 + $0x20] sm:$0xff]  ;;  %v7527_v3 = vmul.f32 %v7296_v34, %v762_v11 }
  0xb8   : > { %10764 = vst [vmem:[#allocation38_spill] sm:$0xff] %v7478_v26  ;;  %10765 = vst [vmem:[#allocation39_spill] sm:$0xff] %v7481_v9  ;;  %v721_v9 = vmul.f32 %v7238_v63, %v595_v57  ;;  %v722_v35 = vmul.f32 %v7284_v29, %v595_v57  ;;  %v7512_v21 = vmul.f32 %v7293_v33, %v595_v57  ;;  %v758_v47 = vpop.permute.xlu0 %757 }
  0xb9   : > { %10766 = vst [vmem:[#allocation40_spill] sm:$0xff] %v7484_v16  ;;  %10767 = vst [vmem:[#allocation41_spill] sm:$0xff] %v7487_v6  ;;  %v723_v16 = vmul.f32 %v7250_v4, %v595_v57  ;;  %v720_v6 = vmul.f32 %v7258_v8, %v595_v57  ;;  %v7515_v36 = vmul.f32 %v7318_v44, %v595_v57 }
  0xba   : > { %10768 = vst [vmem:[#allocation42_spill] sm:$0xff] %v7499_v27  ;;  %10769 = vst [vmem:[#allocation43_spill] sm:$0xff] %v7512_v21  ;;  %v7518_v27 = vmul.f32 %v7321_v45, %v595_v57  ;;  %v7524_v26 = vmul.f32 %v7337_v52, %v595_v57  ;;  %v7530_v25 = vmul.f32 %v7304_v39, %v762_v11  ;;  %3338 = vperm.xlu0 %6729, %v3244_v40  }
  0xbb   : > { %10770 = vst [vmem:[#allocation44_spill] sm:$0xff] %v7515_v36  ;;  %10773 = vst [vmem:[#allocation47_spill] sm:$0xff] %v7527_v3  ;;  %v7533_v21 = vmul.f32 %v7309_v41, %v762_v11  ;;  %v7536_v36 = vmul.f32 %v7241_v0, %v758_v47  ;;  %v7542_v62 = vmul.f32 %v7262_v10, %v758_v47  ;;  %2431 = vperm.xlu1 %6731, %v2397_v31  }
  0xbc   : > { %10771 = vst [vmem:[#allocation45_spill] sm:$0xff] %v7518_v27  ;;  %10772 = vst [vmem:[#allocation46_spill] sm:$0xff] %v7524_v26  ;;  %v7539_v27 = vmul.f32 %v7253_v5, %v758_v47  ;;  %v7545_v57 = vmul.f32 %v7312_v42, %v762_v11  ;;  %v770_v26 = vpop.permute.xlu1 %769  ;;  %v7548_v3 = vmul.f32 %v7287_v30, %v758_v47  ;;  %v3246_v11 = vld [vmem:[%s10622_s10 + $0x88] sm:$0xff] }
  0xbd   : > { %10774 = vst [vmem:[#allocation48_spill] sm:$0xff] %v7530_v25  ;;  %10775 = vst [vmem:[#allocation49_spill] sm:$0xff] %v7533_v21  ;;  %v7551_v25 = vmul.f32 %v7296_v34, %v758_v47  ;;  %v7554_v21 = vmul.f32 %v7304_v39, %v758_v47  ;;  %v891_v40 = vmul.f32 %v7253_v5, %v770_v26  ;;  %v7581_v22 = vpop.permute.xlu0 %604 }
  0xbe   : > { %10776 = vst [vmem:[#allocation50_spill] sm:$0xff] %v7536_v36  ;;  %10777 = vst [vmem:[#allocation51_spill] sm:$0xff] %v7539_v27  ;;  %v7557_v36 = vmul.f32 %v7309_v41, %v758_v47  ;;  %v7573_v31 = vmul.f32 %v7304_v39, %v770_v26  ;;  %v7579_v27 = vmul.f32 %v7312_v42, %v758_v47  ;;  %3348 = vperm.xlu0 %6729, %v3246_v11  }
  0xbf   : > { %10778 = vst [vmem:[#allocation52_spill] sm:$0xff] %v7542_v62  ;;  %10779 = vst [vmem:[#allocation53_spill] sm:$0xff] %v7545_v57  ;;  %v889_v57 = vmul.f32 %v7241_v0, %v770_v26  ;;  %v890_v62 = vmul.f32 %v7287_v30, %v770_v26  ;;  %v955_v52 = vadd.f32 %v891_v40, %v723_v16  ;;  %v2393_v16 = vld [vmem:[%s10621_s9] sm:$0xff] }
  0xc0   : > { %10780 = vst [vmem:[#allocation54_spill] sm:$0xff] %v7548_v3  ;;  %10781 = vst [vmem:[#allocation55_spill] sm:$0xff] %v7551_v25  ;;  %v888_v3 = vmul.f32 %v7262_v10, %v770_v26  ;;  %v7570_v25 = vmul.f32 %v7296_v34, %v770_v26  ;;  %v7583_v24 = vpop.permute.xlu1 %773  ;;  %v738_v47 = vmul.f32 %v7284_v29, %v7581_v22 }
  0xc1   : > { %10782 = vst [vmem:[#allocation56_spill] sm:$0xff] %v7554_v21  ;;  %10783 = vst [vmem:[#allocation57_spill] sm:$0xff] %v7557_v36  ;;  %v2395_v21 = vld [vmem:[%s10621_s9 + $0x10] sm:$0xff]  ;;  %v7576_v36 = vmul.f32 %v7309_v41, %v770_v26  ;;  %v953_v61 = vadd.f32 %v889_v57, %v721_v9  ;;  %v954_v44 = vadd.f32 %v890_v62, %v722_v35 }
  0xc2   : > { %10784 = vst [vmem:[#allocation58_spill] sm:$0xff] %v7570_v25  ;;  %10785 = vst [vmem:[#allocation59_spill] sm:$0xff] %v7573_v31  ;;  %v952_v45 = vadd.f32 %v888_v3, %v720_v6  ;;  %v737_v25 = vmul.f32 %v7238_v63, %v7581_v22  ;;  %v739_v31 = vmul.f32 %v7250_v4, %v7581_v22  ;;  %2421 = vperm.xlu1 %6731, %v2395_v21   ;;  %v3248_v6 = vld [vmem:[%s10622_s10 + $0x98] sm:$0xff] }
  0xc3   : > { %10786 = vst [vmem:[#allocation60_spill] sm:$0xff] %v7576_v36  ;;  %10787 = vst [vmem:[#allocation61_spill] sm:$0xff] %v7579_v27  ;;  %v736_v36 = vmul.f32 %v7258_v8, %v7581_v22  ;;  %v897_v35 = vmul.f32 %v7241_v0, %v7583_v24  ;;  %v7599_v62 = vadd.f32 %v7397_v18, %v953_v61  ;;  %v7613_v61 = vpop.permute.xlu0 %609  ;;  %3358 = vperm.xlu0 %6729, %v3248_v6  }
  0xc4   : > { %v899_v3 = vmul.f32 %v7253_v5, %v7583_v24  ;;  %v7604_v9 = vmul.f32 %v7312_v42, %v770_v26  ;;  %v969_v21 = vadd.f32 %v7328_v50, %v737_v25  ;;  %v971_v57 = vadd.f32 %v7334_v51, %v739_v31 }
  0xc5   : > { %v968_v11 = vadd.f32 %v7343_v54, %v736_v36  ;;  %v970_v40 = vadd.f32 %v7349_v56, %v738_v47  ;;  %v7616_v18 = vadd.f32 %v7400_v19, %v955_v52  ;;  %v7620_v26 = vmul.f32 %v7262_v10, %v7583_v24  ;;  %v7637_v19 = vpop.permute.xlu1 %1005 }
  0xc6   : > { %10788 = vst [vmem:[#allocation62_spill] sm:$0xff] %v7604_v9  ;;  %v7623_v27 = vadd.f32 %v7403_v20, %v952_v45  ;;  %v7627_v50 = vmul.f32 %v7287_v30, %v7583_v24  ;;  %v745_v51 = vmul.f32 %v7238_v63, %v7613_v61  ;;  %v1201_v54 = vadd.f32 %v7331_v49, %v969_v21  ;;  %v3250_v45 = vld [vmem:[%s10622_s10 + $0xa8] sm:$0xff] }
  0xc7   : > { %v747_v52 = vmul.f32 %v7250_v4, %v7613_v61  ;;  %v7635_v56 = vadd.f32 %v7409_v23, %v954_v44  ;;  %2411 = vperm.xlu1 %6731, %v2393_v16   ;;  %v1203_v20 = vadd.f32 %v7340_v53, %v971_v57  ;;  %v744_v25 = vmul.f32 %v7258_v8, %v7613_v61  ;;  %v3229_v44 = vld [vmem:[%s10622_s10] sm:$0xff]  ;;  %v7656_v6 = vpop.permute.xlu0 %599 }
  0xc8   : > { %v1200_v49 = vadd.f32 %v7346_v55, %v968_v11  ;;  %v746_v36 = vmul.f32 %v7284_v29, %v7613_v61  ;;  %v977_v23 = vadd.f32 %v7382_v13, %v745_v51  ;;  %v1202_v47 = vadd.f32 %v7355_v59, %v970_v40  ;;  %3368 = vperm.xlu0 %6729, %v3250_v45   ;;  %v3231_v45 = vld [vmem:[%s10622_s10 + $0x10] sm:$0xff] }
  0xc9   : > { %v979_v31 = vadd.f32 %v7385_v14, %v747_v52  ;;  %v1129_v53 = vmul.f32 %v7243_v1, %v7637_v19  ;;  %v976_v55 = vadd.f32 %v7388_v15, %v744_v25  ;;  %v1131_v21 = vmul.f32 %v7255_v7, %v7637_v19  ;;  %v7679_v52 = vpop.permute.xlu1 %1256 }
  0xca   : > { %v978_v16 = vadd.f32 %v7394_v17, %v746_v36  ;;  %v1128_v57 = vmul.f32 %v7281_v28, %v7637_v19  ;;  %v1209_v13 = vadd.f32 %v7448_v37, %v977_v23  ;;  %v729_v59 = vmul.f32 %v7238_v63, %v7656_v6  ;;  %v3252_v17 = vld [vmem:[%s10622_s10 + $0xb8] sm:$0xff] }
  0xcb   : > { %v731_v14 = vmul.f32 %v7250_v4, %v7656_v6  ;;  %v1130_v15 = vmul.f32 %v7290_v32, %v7637_v19  ;;  %3263 = vperm.xlu1 %6731, %v3229_v44   ;;  %v1211_v11 = vadd.f32 %v7451_v38, %v979_v31  ;;  %v1208_v40 = vadd.f32 %v7454_v43, %v976_v55  ;;  %v7690_v43 = vpop.permute.xlu0 %1261 }
  0xcc   : > { %v1210_v37 = vadd.f32 %v7463_v58, %v978_v16  ;;  %v728_v51 = vmul.f32 %v7258_v8, %v7656_v6  ;;  %v961_v25 = vadd.f32 %v897_v35, %v729_v59  ;;  %v730_v44 = vmul.f32 %v7284_v29, %v7656_v6  ;;  %3378 = vperm.xlu0 %6729, %v3252_v17  }
  0xcd   : > { %v963_v36 = vadd.f32 %v899_v3, %v731_v14  ;;  %v7688_v38 = vmul.f32 %v7293_v33, %v7581_v22  ;;  %v1313_v58 = vadd.f32 %v7679_v52, %v1201_v54  ;;  %v1315_v23 = vadd.f32 %v7679_v52, %v1203_v20  ;;  %v3254_v54 = vld [vmem:[%s10622_s10 + $0xc8] sm:$0xff]  ;;  %v7703_v42 = vpop.permute.xlu1 %584 }
  0xce   : > { %v1312_v31 = vadd.f32 %v7679_v52, %v1200_v49  ;;  %v1314_v55 = vadd.f32 %v7679_v52, %v1202_v47  ;;  %v1321_v35 = vadd.f32 %v7690_v43, %v1209_v13  ;;  %v1323_v3 = vadd.f32 %v7690_v43, %v1211_v11  ;;  %10789 = vst [vmem:[#allocation63_spill] sm:$0xff] %v7703_v42  ;;  %v3233_v47 = vld [vmem:[%s10622_s10 + $0x20] sm:$0xff] }
  0xcf   : > { %v1320_v16 = vadd.f32 %v7690_v43, %v1208_v40  ;;  %v1322_v59 = vadd.f32 %v7690_v43, %v1210_v37  ;;  %3273 = vperm.xlu1 %6731, %v3231_v45   ;;  %v1377_v14 = vmax.f32 %v1313_v58, 0.0  ;;  %v1379_v20 = vmax.f32 %v1315_v23, 0.0 }
  0xd0   : > { %v1376_v9 = vmax.f32 %v1312_v31, 0.0  ;;  %v1378_v49 = vmax.f32 %v1314_v55, 0.0  ;;  %v1385_v13 = vmax.f32 %v1321_v35, 0.0  ;;  %v1387_v17 = vmax.f32 %v1323_v3, 0.0  ;;  %3388 = vperm.xlu0 %6729, %v3254_v54   ;;  %v3256_v35 = vld [vmem:[%s10622_s10 + $0xd8] sm:$0xff] }
  0xd1   : > { %v1384_v11 = vmax.f32 %v1320_v16, 0.0  ;;  %v1386_v40 = vmax.f32 %v1322_v59, 0.0  ;;  %v7708_v37 = vadd.f32 %v1129_v53, %v961_v25  ;;  %v960_v45 = vadd.f32 %v7620_v26, %v728_v51  ;;  %v7725_v51 = vpop.permute.xlu0 %574  ;;  %v7727_v25 = vpop.permute.xlu1 %589 }
  0xd2   : > { %v962_v41 = vadd.f32 %v7627_v50, %v730_v44  ;;  %v749_v58 = vmul.f32 %v7293_v33, %v7613_v61  ;;  %v1417_v23 = vpack.c.bf16 %v1385_v13, %v1377_v14  ;;  %v1419_v31 = vpack.c.bf16 %v1387_v17, %v1379_v20  ;;  %10790 = vst [vmem:[#allocation64_spill] sm:$0xff] %v7725_v51  ;;  %v10795_v13 = vld [vmem:[#allocation23_spill] sm:$0xff] }
  0xd3   : > { %v1416_v55 = vpack.c.bf16 %v1384_v11, %v1376_v9  ;;  %v1418_v39 = vpack.c.bf16 %v1386_v40, %v1378_v49  ;;  %3283 = vperm.xlu1 %6731, %v3233_v47   ;;  %v7717_v3 = vadd.f32 %v1131_v21, %v963_v36  ;;  %v7719_v53 = vadd.f32 %v1128_v57, %v960_v45  ;;  %v3235_v9 = vld [vmem:[%s10622_s10 + $0x30] sm:$0xff]  ;;  %v10796_v11 = vld [vmem:[#allocation11_spill] sm:$0xff] }
  0xd4   : > { %v705_v26 = vmul.f32 %v7238_v63, %v7703_v42  ;;  %v707_v50 = vmul.f32 %v7250_v4, %v7703_v42  ;;  %10791 = vst [vmem:[#allocation65_spill] sm:$0xff] %v7727_v25  ;;  %1521 = vmatprep.subr.bf16.mxu0 %v1417_v23  ;;  %1594 = vmatprep.subr.bf16.mxu1 %v1419_v31  ;;  %v10799_v31 = vld [vmem:[#allocation12_spill] sm:$0xff] }
  0xd5   : > { %v7732_v21 = vadd.f32 %v1130_v15, %v962_v41  ;;  %v704_v57 = vmul.f32 %v7258_v8, %v7703_v42  ;;  %v706_v36 = vmul.f32 %v7284_v29, %v7703_v42  ;;  %1522 = vmatpush1.bf16.msra.mxu0 %v1416_v55  ;;  %1595 = vmatpush1.bf16.msra.mxu1 %v1418_v39  ;;  %v7775_v45 = vpop.permute.xlu1 %765  ;;  %v10804_v42 = vld [vmem:[#allocation24_spill] sm:$0xff] }
  0xd6   : > { %v713_v44 = vmul.f32 %v7238_v63, %v7727_v25  ;;  %v937_v16 = vadd.f32 %v7490_v12, %v705_v26  ;;  %v7743_v59 = vmul.f32 %v7238_v63, %v7725_v51  ;;  %3398 = vperm.xlu0 %6729, %v3256_v35   ;;  %v715_v41 = vmul.f32 %v7250_v4, %v7727_v25  ;;  %v3258_v12 = vld [vmem:[%s10622_s10 + $0xe8] sm:$0xff] }
  0xd7   : > { %v939_v15 = vadd.f32 %v7493_v2, %v707_v50  ;;  %v712_v54 = vmul.f32 %v7258_v8, %v7727_v25  ;;  %v936_v39 = vadd.f32 %v7496_v48, %v704_v57  ;;  %3293 = vperm.xlu1 %6731, %v3235_v9   ;;  %v714_v14 = vmul.f32 %v7284_v29, %v7727_v25  ;;  %v3237_v48 = vld [vmem:[%s10622_s10 + $0x40] sm:$0xff]  ;;  %v3260_v57 = vld [vmem:[%s10622_s10 + $0xf8] sm:$0xff] }
  0xd8   : > { %10792 = vst [vmem:[#allocation66_spill] sm:$0xff] %v7743_v59  ;;  %v938_v20 = vadd.f32 %v7505_v46, %v706_v36  ;;  %v7759_v49 = vmul.f32 %v7250_v4, %v7725_v51  ;;  %v7763_v2 = vmul.f32 %v7258_v8, %v7725_v51  ;;  %v973_v47 = vadd.f32 %v7358_v60, %v7688_v38  ;;  %v10800_v38 = vld [vmem:[#allocation15_spill] sm:$0xff] }
  0xd9   : > { %v981_v17 = vadd.f32 %v10795_v13, %v749_v58  ;;  %v743_v46 = vmul.f32 %v10796_v11, %v7581_v22  ;;  %v751_v40 = vmul.f32 %v10796_v11, %v7613_v61  ;;  %10797 = vst [vmem:[#allocation23_spill] sm:$0xff] %v7775_v45  ;;  %v7779_v23 = vmul.f32 %v7284_v29, %v7725_v51  ;;  %v10803_v51 = vld [vmem:[#allocation17_spill] sm:$0xff]  ;;  %v3239_v11 = vld [vmem:[%s10622_s10 + $0x50] sm:$0xff] }
  0xda   : > { %10793 = vst [vmem:[#allocation67_spill] sm:$0xff] %v7759_v49  ;;  %10794 = vst [vmem:[#allocation68_spill] sm:$0xff] %v7763_v2  ;;  %v740_v55 = vmul.f32 %v10799_v31, %v7581_v22  ;;  %v7785_v60 = vmul.f32 %v10799_v31, %v7613_v61  ;;  %v7789_v58 = vmul.f32 %v10800_v38, %v7581_v22  ;;  %3408 = vperm.xlu0 %6729, %v3258_v12   ;;  %v10801_v22 = vld [vmem:[#allocation16_spill] sm:$0xff]  ;;  %v10802_v12 = vld [vmem:[#allocation35_spill] sm:$0xff] }
  0xdb   : > { %10798 = vst [vmem:[#allocation69_spill] sm:$0xff] %v7779_v23  ;;  %v881_v35 = vmul.f32 %v7241_v0, %v7775_v45  ;;  %v883_v26 = vmul.f32 %v7253_v5, %v7775_v45  ;;  %v880_v50 = vmul.f32 %v7262_v10, %v7775_v45  ;;  %v882_v9 = vmul.f32 %v7287_v30, %v7775_v45 }
  0xdc   : > { %3303 = vperm.xlu1 %6731, %v3237_v48   ;;  %v1205_v36 = vadd.f32 %v10801_v22, %v973_v47  ;;  %v1213_v13 = vadd.f32 %v10802_v12, %v981_v17  ;;  %v975_v25 = vadd.f32 %v10803_v51, %v743_v46  ;;  %v983_v31 = vadd.f32 %v10804_v42, %v751_v40  ;;  %v10805_v17 = vld [vmem:[#allocation18_spill] sm:$0xff]  ;;  %v7814_v51 = vpop.permute.xlu1 %993  ;;  %v10808_v40 = vld [vmem:[#allocation31_spill] sm:$0xff] }
  0xdd   : > { %v945_v23 = vadd.f32 %v881_v35, %v713_v44  ;;  %v947_v2 = vadd.f32 %v883_v26, %v715_v41  ;;  %v944_v45 = vadd.f32 %v880_v50, %v712_v54  ;;  %v750_v48 = vmul.f32 %v10800_v38, %v7613_v61  ;;  %10806 = vst [vmem:[#allocation15_spill] sm:$0xff] %v7814_v51  ;;  %v10807_v42 = vld [vmem:[#allocation30_spill] sm:$0xff]  ;;  %v10809_v41 = vld [vmem:[#allocation32_spill] sm:$0xff] }
  0xde   : > { %v946_v49 = vadd.f32 %v882_v9, %v714_v14  ;;  %v1317_v59 = vadd.f32 %v7679_v52, %v1205_v36  ;;  %v1325_v47 = vadd.f32 %v7690_v43, %v1213_v13  ;;  %v1207_v22 = vadd.f32 %v10805_v17, %v975_v25  ;;  %3418 = vperm.xlu0 %6729, %v3260_v57   ;;  %v10810_v61 = vld [vmem:[#allocation36_spill] sm:$0xff]  ;;  %v7839_v13 = vpop.permute.xlu0 %1236  ;;  %v10811_v17 = vld [vmem:[#allocation34_spill] sm:$0xff] }
  0xdf   : > { %v7817_v46 = vadd.f32 %v10807_v42, %v945_v23  ;;  %v7820_v44 = vadd.f32 %v10808_v40, %v947_v2  ;;  %v7823_v54 = vadd.f32 %v10809_v41, %v944_v45  ;;  %v1215_v14 = vadd.f32 %v10810_v61, %v983_v31  ;;  %v3241_v2 = vld [vmem:[%s10622_s10 + $0x60] sm:$0xff] }
  0xe0   : > { %3313 = vperm.xlu1 %6731, %v3239_v11   ;;  %v1105_v35 = vmul.f32 %v7243_v1, %v7814_v51  ;;  %v1107_v25 = vmul.f32 %v7255_v7, %v7814_v51  ;;  %v1104_v26 = vmul.f32 %v7281_v28, %v7814_v51  ;;  %v1106_v23 = vmul.f32 %v7290_v32, %v7814_v51  ;;  %v7846_v51 = vpop.permute.xlu1 %1246 }
  0xe1   : > { %v1381_v45 = vmax.f32 %v1317_v59, 0.0  ;;  %v1389_v50 = vmax.f32 %v1325_v47, 0.0  ;;  %v1319_v11 = vadd.f32 %v7679_v52, %v1207_v22  ;;  %v1327_v31 = vadd.f32 %v7690_v43, %v1215_v14 }
  0xe2   : > { %v1169_v9 = vadd.f32 %v1105_v35, %v937_v16  ;;  %v1171_v57 = vadd.f32 %v1107_v25, %v939_v15  ;;  %v1168_v36 = vadd.f32 %v1104_v26, %v936_v39  ;;  %v1170_v12 = vadd.f32 %v1106_v23, %v938_v20  ;;  %v10812_v39 = vld [vmem:[#allocation19_spill] sm:$0xff]  ;;  %v10820_v26 = vld [vmem:[#allocation38_spill] sm:$0xff] }
  0xe3   : > { %v7842_v42 = vadd.f32 %v10811_v17, %v946_v49  ;;  %v7844_v40 = vpack.c.bf16 %v1389_v50, %v1381_v45  ;;  %v1383_v41 = vmax.f32 %v1319_v11, 0.0  ;;  %v1391_v61 = vmax.f32 %v1327_v31, 0.0  ;;  %v3243_v49 = vld [vmem:[%s10622_s10 + $0x70] sm:$0xff] }
  0xe4   : > { %3323 = vperm.xlu1 %6731, %v3241_v2   ;;  %v7849_v59 = vadd.f32 %v7839_v13, %v1169_v9  ;;  %v7852_v16 = vadd.f32 %v7839_v13, %v1171_v57  ;;  %v7855_v15 = vadd.f32 %v7839_v13, %v1168_v36  ;;  %v972_v20 = vadd.f32 %v10812_v39, %v740_v55  ;;  %v10814_v31 = vld [vmem:[#allocation20_spill] sm:$0xff]  ;;  %v10815_v57 = vld [vmem:[#allocation21_spill] sm:$0xff] }
  0xe5   : > { %v1297_v47 = vadd.f32 %v7846_v51, %v7599_v62  ;;  %v1299_v22 = vadd.f32 %v7846_v51, %v7616_v18  ;;  %v1296_v14 = vadd.f32 %v7846_v51, %v7623_v27  ;;  %v1298_v35 = vadd.f32 %v7846_v51, %v7635_v56  ;;  %v7875_v18 = vpop.permute.xlu1 %1251  ;;  %v10813_v56 = vld [vmem:[#allocation25_spill] sm:$0xff] }
  0xe6   : > { %v7873_v23 = vadd.f32 %v7839_v13, %v1170_v12  ;;  %v7877_v27 = vpack.c.bf16 %v1391_v61, %v1383_v41  ;;  %v980_v11 = vadd.f32 %v10813_v56, %v7785_v60  ;;  %v1204_v9 = vadd.f32 %v10814_v31, %v972_v20  ;;  %v3245_v12 = vld [vmem:[%s10622_s10 + $0x80] sm:$0xff]  ;;  %v10816_v61 = vld [vmem:[#allocation37_spill] sm:$0xff] }
  0xe7   : > { %v1361_v2 = vmax.f32 %v1297_v47, 0.0  ;;  %v1363_v62 = vmax.f32 %v1299_v22, 0.0  ;;  %v1360_v45 = vmax.f32 %v1296_v14, 0.0  ;;  %v1362_v50 = vmax.f32 %v1298_v35, 0.0  ;;  %v10818_v22 = vld [vmem:[#allocation22_spill] sm:$0xff] }
  0xe8   : > { %3333 = vperm.xlu1 %6731, %v3243_v49   ;;  %v974_v36 = vadd.f32 %v10815_v57, %v7789_v58  ;;  %v1305_v17 = vadd.f32 %v7875_v18, %v7708_v37  ;;  %v1307_v39 = vadd.f32 %v7875_v18, %v7717_v3  ;;  %v1304_v41 = vadd.f32 %v7875_v18, %v7719_v53  ;;  %v10817_v49 = vld [vmem:[#allocation26_spill] sm:$0xff] }
  0xe9   : > { %v1306_v60 = vadd.f32 %v7875_v18, %v7732_v21  ;;  %v1212_v20 = vadd.f32 %v10816_v61, %v980_v11  ;;  %v1316_v58 = vadd.f32 %v7679_v52, %v1204_v9  ;;  %v982_v47 = vadd.f32 %v10817_v49, %v750_v48  ;;  %v7899_v57 = vpop.permute.xlu1 %579  ;;  %v3247_v48 = vld [vmem:[%s10622_s10 + $0x90] sm:$0xff]  ;;  %v10825_v49 = vld [vmem:[#allocation54_spill] sm:$0xff] }
  0xea   : > { %v1206_v14 = vadd.f32 %v10818_v22, %v974_v36  ;;  %v1369_v35 = vmax.f32 %v1305_v17, 0.0  ;;  %v1371_v56 = vmax.f32 %v1307_v39, 0.0  ;;  %v1368_v37 = vmax.f32 %v1304_v41, 0.0  ;;  %10819 = vst [vmem:[#allocation16_spill] sm:$0xff] %v7899_v57 }
  0xeb   : > { %v1370_v31 = vmax.f32 %v1306_v60, 0.0  ;;  %v1324_v3 = vadd.f32 %v7690_v43, %v1212_v20  ;;  %v1380_v53 = vmax.f32 %v1316_v58, 0.0  ;;  %v1214_v21 = vadd.f32 %v10820_v26, %v982_v47  ;;  %v10822_v60 = vld [vmem:[#allocation51_spill] sm:$0xff]  ;;  %v10823_v20 = vld [vmem:[#allocation52_spill] sm:$0xff] }
  0xec   : > { %3343 = vperm.xlu1 %6731, %v3245_v12   ;;  %v1318_v11 = vadd.f32 %v7679_v52, %v1206_v14  ;;  %v1409_v61 = vpack.c.bf16 %v1369_v35, %v1361_v2  ;;  %v1411_v9 = vpack.c.bf16 %v1371_v56, %v1363_v62  ;;  %v1408_v36 = vpack.c.bf16 %v1368_v37, %v1360_v45 }
  0xed   : > { %v1410_v17 = vpack.c.bf16 %v1370_v31, %v1362_v50  ;;  %v697_v39 = vmul.f32 %v7238_v63, %v7899_v57  ;;  %v699_v12 = vmul.f32 %v7250_v4, %v7899_v57  ;;  %v696_v41 = vmul.f32 %v7258_v8, %v7899_v57  ;;  %v10821_v4 = vld [vmem:[#allocation50_spill] sm:$0xff] }
  0xee   : > { %v698_v52 = vmul.f32 %v7284_v29, %v7899_v57  ;;  %1523 = vmatprep.subr.bf16.mxu0 %v1409_v61  ;;  %1596 = vmatprep.subr.bf16.mxu1 %v1411_v9  ;;  %v1388_v26 = vmax.f32 %v1324_v3, 0.0  ;;  %v1326_v2 = vadd.f32 %v7690_v43, %v1214_v21  ;;  %v1382_v62 = vmax.f32 %v1318_v11, 0.0  ;;  %v7922_v29 = vpop.permute.xlu1 %753  ;;  %v3249_v43 = vld [vmem:[%s10622_s10 + $0xa0] sm:$0xff] }
  0xef   : > { %v733_v45 = vmul.f32 %v7293_v33, %v7656_v6  ;;  %1524 = vmatpush1.bf16.msra.mxu0 %v1408_v36  ;;  %v929_v50 = vadd.f32 %v10821_v4, %v697_v39  ;;  %v931_v8 = vadd.f32 %v10822_v60, %v699_v12  ;;  %v928_v58 = vadd.f32 %v10823_v20, %v696_v41  ;;  %v10827_v11 = vld [vmem:[#allocation58_spill] sm:$0xff]  ;;  %v10830_v39 = vld [vmem:[#allocation67_spill] sm:$0xff]  ;;  %v10831_v12 = vld [vmem:[#allocation68_spill] sm:$0xff] }
  0xf0   : > { %3353 = vperm.xlu1 %6731, %v3247_v48   ;;  %1597 = vmatpush1.bf16.msra.mxu1 %v1410_v17  ;;  %10824 = vst [vmem:[#allocation35_spill] sm:$0xff] %v7922_v29  ;;  %v930_v47 = vadd.f32 %v10825_v49, %v698_v52  ;;  %v7928_v22 = vpack.c.bf16 %v1388_v26, %v1380_v53  ;;  %v1390_v14 = vmax.f32 %v1326_v2, 0.0  ;;  %v10826_v53 = vld [vmem:[#allocation43_spill] sm:$0xff]  ;;  %v10828_v48 = vld [vmem:[#allocation6_spill] sm:$0xff]  ;;  %v10837_v49 = vld [vmem:[#allocation44_spill] sm:$0xff] }
  0xf1   : > { %v901_v35 = vmul.f32 %v7296_v34, %v7583_v24  ;;  %v857_v56 = vmul.f32 %v7241_v0, %v7922_v29  ;;  %v859_v37 = vmul.f32 %v7253_v5, %v7922_v29  ;;  %v856_v31 = vmul.f32 %v7262_v10, %v7922_v29  ;;  %v10829_v0 = vld [vmem:[#allocation66_spill] sm:$0xff]  ;;  %v10832_v10 = vld [vmem:[#allocation69_spill] sm:$0xff]  ;;  %v10833_v26 = vld [vmem:[#allocation27_spill] sm:$0xff] }
  0xf2   : > { %v858_v3 = vmul.f32 %v7287_v30, %v7922_v29  ;;  %v7940_v21 = vpack.c.bf16 %v1390_v14, %v1382_v62  ;;  %v957_v61 = vadd.f32 %v10827_v11, %v10826_v53  ;;  %v1133_v36 = vmul.f32 %v10828_v48, %v7637_v19  ;;  %v3251_v30 = vld [vmem:[%s10622_s10 + $0xb0] sm:$0xff]  ;;  %v10835_v60 = vld [vmem:[#allocation7_spill] sm:$0xff]  ;;  %v10841_v53 = vld [vmem:[#allocation9_spill] sm:$0xff] }
  0xf3   : > { %v965_v9 = vadd.f32 %v901_v35, %v733_v45  ;;  %v921_v17 = vadd.f32 %v857_v56, %v10829_v0  ;;  %v923_v5 = vadd.f32 %v859_v37, %v10830_v39  ;;  %v920_v41 = vadd.f32 %v856_v31, %v10831_v12  ;;  %v10834_v45 = vld [vmem:[#allocation11_spill] sm:$0xff]  ;;  %v10839_v56 = vld [vmem:[#allocation8_spill] sm:$0xff] }
  0xf4   : > { %3363 = vperm.xlu1 %6731, %v3249_v43   ;;  %v922_v52 = vadd.f32 %v858_v3, %v10832_v10  ;;  %v1189_v2 = vadd.f32 %v10833_v26, %v957_v61  ;;  %v735_v4 = vmul.f32 %v10834_v45, %v7656_v6  ;;  %v903_v20 = vmul.f32 %v10835_v60, %v7583_v24  ;;  %v7958_v43 = vpop.permute.xlu1 %985  ;;  %v10838_v14 = vld [vmem:[#allocation59_spill] sm:$0xff]  ;;  %v10840_v31 = vld [vmem:[#allocation12_spill] sm:$0xff] }
  0xf5   : > { %v1197_v62 = vadd.f32 %v1133_v36, %v965_v9  ;;  %10836 = vst [vmem:[#allocation17_spill] sm:$0xff] %v7958_v43  ;;  %v959_v35 = vadd.f32 %v10838_v14, %v10837_v49  ;;  %v1135_v37 = vmul.f32 %v10839_v56, %v7637_v19  ;;  %v732_v3 = vmul.f32 %v10840_v31, %v7656_v6  ;;  %v10842_v26 = vld [vmem:[#allocation28_spill] sm:$0xff]  ;;  %v3253_v14 = vld [vmem:[%s10622_s10 + $0xc0] sm:$0xff] }
  0xf6   : > { %v900_v11 = vmul.f32 %v10841_v53, %v7583_v24  ;;  %v1089_v61 = vmul.f32 %v7243_v1, %v7958_v43  ;;  %v1091_v9 = vmul.f32 %v7255_v7, %v7958_v43  ;;  %v1088_v36 = vmul.f32 %v7281_v28, %v7958_v43 }
  0xf7   : > { %v1090_v0 = vmul.f32 %v7290_v32, %v7958_v43  ;;  %v1301_v39 = vadd.f32 %v7846_v51, %v1189_v2  ;;  %v1309_v12 = vadd.f32 %v7875_v18, %v1197_v62  ;;  %v967_v10 = vadd.f32 %v903_v20, %v735_v4 }
  0xf8   : > { %3373 = vperm.xlu1 %6731, %v3251_v30   ;;  %v1191_v49 = vadd.f32 %v10842_v26, %v959_v35  ;;  %v1153_v63 = vadd.f32 %v1089_v61, %v921_v17  ;;  %v1155_v55 = vadd.f32 %v1091_v9, %v923_v5  ;;  %v1152_v25 = vadd.f32 %v1088_v36, %v920_v41  ;;  %v7982_v57 = vpop.permute.xlu1 %989  ;;  %v10843_v35 = vld [vmem:[#allocation45_spill] sm:$0xff] }
  0xf9   : > { %v1154_v29 = vadd.f32 %v1090_v0, %v922_v52  ;;  %v1365_v53 = vmax.f32 %v1301_v39, 0.0  ;;  %v1373_v43 = vmax.f32 %v1309_v12, 0.0  ;;  %v1199_v30 = vadd.f32 %v1135_v37, %v967_v10  ;;  %v10844_v37 = vld [vmem:[#allocation60_spill] sm:$0xff]  ;;  %v8001_v0 = vpop.permute.xlu0 %1231  ;;  %v10846_v12 = vld [vmem:[#allocation29_spill] sm:$0xff] }
  0xfa   : > { %v1303_v2 = vadd.f32 %v7846_v51, %v1191_v49  ;;  %v1097_v62 = vmul.f32 %v7243_v1, %v7982_v57  ;;  %v1099_v4 = vmul.f32 %v7255_v7, %v7982_v57  ;;  %v1096_v20 = vmul.f32 %v7281_v28, %v7982_v57  ;;  %v3255_v1 = vld [vmem:[%s10622_s10 + $0xd0] sm:$0xff] }
  0xfb   : > { %v1098_v17 = vmul.f32 %v7290_v32, %v7982_v57  ;;  %v7993_v5 = vpack.c.bf16 %v1373_v43, %v1365_v53  ;;  %v1311_v41 = vadd.f32 %v7875_v18, %v1199_v30  ;;  %v956_v61 = vadd.f32 %v10844_v37, %v10843_v35  ;;  %v10845_v43 = vld [vmem:[#allocation13_spill] sm:$0xff]  ;;  %v3257_v30 = vld [vmem:[%s10622_s10 + $0xe0] sm:$0xff] }
  0xfc   : > { %3383 = vperm.xlu1 %6731, %v3253_v14   ;;  %v1367_v52 = vmax.f32 %v1303_v2, 0.0  ;;  %v1161_v7 = vadd.f32 %v1097_v62, %v929_v50  ;;  %v1163_v9 = vadd.f32 %v1099_v4, %v931_v8  ;;  %v1160_v36 = vadd.f32 %v1096_v20, %v928_v58  ;;  %v8006_v26 = vpop.permute.xlu1 %1241 }
  0xfd   : > { %v1162_v28 = vadd.f32 %v1098_v17, %v930_v47  ;;  %v1375_v32 = vmax.f32 %v1311_v41, 0.0  ;;  %v964_v39 = vadd.f32 %v900_v11, %v732_v3  ;;  %v1132_v53 = vmul.f32 %v10845_v43, %v7637_v19 }
  0xfe   : > { %v1188_v10 = vadd.f32 %v10846_v12, %v956_v61  ;;  %v1273_v49 = vadd.f32 %v8001_v0, %v1161_v7  ;;  %v1275_v14 = vadd.f32 %v8001_v0, %v1163_v9  ;;  %v1272_v50 = vadd.f32 %v8001_v0, %v1160_v36 }
  0xff   : > { %v1274_v8 = vadd.f32 %v8001_v0, %v1162_v28  ;;  %v1289_v58 = vadd.f32 %v8006_v26, %v7817_v46  ;;  %v1291_v47 = vadd.f32 %v8006_v26, %v7820_v44  ;;  %v1288_v3 = vadd.f32 %v8006_v26, %v7823_v54 }
 0x100   : > { %3393 = vperm.xlu1 %6731, %v3255_v1   ;;  %v1290_v11 = vadd.f32 %v8006_v26, %v7842_v42  ;;  %v1337_v2 = vmax.f32 %v1273_v49, 0.0  ;;  %v1339_v62 = vmax.f32 %v1275_v14, 0.0  ;;  %v1336_v4 = vmax.f32 %v1272_v50, 0.0  ;;  %v8023_v37 = vpop.permute.xlu1 %1226  ;;  %v10852_v14 = vld [vmem:[#allocation46_spill] sm:$0xff] }
 0x101   : > { %v1338_v20 = vmax.f32 %v1274_v8, 0.0  ;;  %v1353_v17 = vmax.f32 %v1289_v58, 0.0  ;;  %v1355_v41 = vmax.f32 %v1291_v47, 0.0  ;;  %v1352_v46 = vmax.f32 %v1288_v3, 0.0  ;;  %v10853_v50 = vld [vmem:[#allocation62_spill] sm:$0xff] }
 0x102   : > { %v1354_v35 = vmax.f32 %v1290_v11, 0.0  ;;  %v8025_v44 = vpack.c.bf16 %v1375_v32, %v1367_v52  ;;  %v1196_v54 = vadd.f32 %v1132_v53, %v964_v39  ;;  %v1300_v61 = vadd.f32 %v7846_v51, %v1188_v10  ;;  %v3259_v32 = vld [vmem:[%s10622_s10 + $0xf0] sm:$0xff]  ;;  %v10854_v3 = vld [vmem:[#allocation14_spill] sm:$0xff] }
 0x103   : > { %v734_v42 = vmul.f32 %v10800_v38, %v7656_v6  ;;  %v10847_v1 = vmax.f32 %v7849_v59, 0.0  ;;  %v10848_v9 = vmax.f32 %v7852_v16, 0.0  ;;  %v10849_v28 = vmax.f32 %v7855_v15, 0.0 }
 0x104   : > { %3403 = vperm.xlu1 %6731, %v3257_v30   ;;  %v10850_v49 = vmax.f32 %v7873_v23, 0.0  ;;  %v1265_v39 = vadd.f32 %v8023_v37, %v1153_v63  ;;  %v1267_v6 = vadd.f32 %v8023_v37, %v1155_v55  ;;  %v1264_v59 = vadd.f32 %v8023_v37, %v1152_v25  ;;  %v10851_v23 = vld [vmem:[#allocation10_spill] sm:$0xff]  ;;  %v10855_v30 = vld [vmem:[#allocation33_spill] sm:$0xff] }
 0x105   : > { %v1401_v7 = vpack.c.bf16 %v1353_v17, %v10847_v1  ;;  %v1403_v36 = vpack.c.bf16 %v1355_v41, %v10848_v9  ;;  %v1400_v12 = vpack.c.bf16 %v1352_v46, %v10849_v28  ;;  %v1266_v53 = vadd.f32 %v8023_v37, %v1154_v29  ;;  %v10860_v28 = vld [vmem:[#allocation47_spill] sm:$0xff] }
 0x106   : > { %v1402_v52 = vpack.c.bf16 %v1354_v35, %v10850_v49  ;;  %v1308_v16 = vadd.f32 %v7875_v18, %v1196_v54  ;;  %v1364_v15 = vmax.f32 %v1300_v61, 0.0  ;;  %v902_v10 = vmul.f32 %v10851_v23, %v7583_v24 }
 0x107   : > { %1525 = vmatprep.subr.bf16.mxu0 %v1401_v7  ;;  %1598 = vmatprep.subr.bf16.mxu1 %v1403_v36  ;;  %v958_v8 = vadd.f32 %v10853_v50, %v10852_v14  ;;  %v1329_v63 = vmax.f32 %v1265_v39, 0.0  ;;  %v1331_v58 = vmax.f32 %v1267_v6, 0.0  ;;  %v1328_v55 = vmax.f32 %v1264_v59, 0.0  ;;  %v10856_v7 = vld [vmem:[#allocation63_spill] sm:$0xff] }
 0x108   : > { %1526 = vmatpush1.bf16.msra.mxu0 %v1400_v12  ;;  %1599 = vmatpush1.bf16.msra.mxu1 %v1402_v52  ;;  %v1330_v47 = vmax.f32 %v1266_v53, 0.0  ;;  %v1372_v25 = vmax.f32 %v1308_v16, 0.0  ;;  %v966_v29 = vadd.f32 %v902_v10, %v734_v42  ;;  %v1134_v11 = vmul.f32 %v10854_v3, %v7637_v19  ;;  %v8059_v42 = vld [vmem:[%s10614_s2] sm:$0xff]   ;;  %v10857_v19 = vld [vmem:[#allocation65_spill] sm:$0xff] }
 0x109   : > { %3413 = vperm.xlu1 %6731, %v3259_v32   ;;  %v1190_v17 = vadd.f32 %v10855_v30, %v958_v8  ;;  %v1393_v41 = vpack.c.bf16 %v1337_v2, %v1329_v63  ;;  %v1395_v46 = vpack.c.bf16 %v1339_v62, %v1331_v58  ;;  %v1392_v24 = vpack.c.bf16 %v1336_v4, %v1328_v55  ;;  %v10858_v62 = vld [vmem:[#allocation23_spill] sm:$0xff]  ;;  %v10863_v55 = vld [vmem:[#allocation40_spill] sm:$0xff] }
 0x10a   : > { %v1394_v35 = vpack.c.bf16 %v1338_v20, %v1330_v47  ;;  %v1412_v54 = vpack.c.bf16 %v1372_v25, %v1364_v15  ;;  %v1198_v61 = vadd.f32 %v1134_v11, %v966_v29  ;;  %v709_v9 = vmul.f32 %v7293_v33, %v10856_v7  ;;  %v10859_v20 = vld [vmem:[#allocation15_spill] sm:$0xff] }
 0x10b   : > { %v1302_v1 = vadd.f32 %v7846_v51, %v1190_v17  ;;  %1527 = vmatprep.subr.bf16.mxu0 %v1393_v41  ;;  %1600 = vmatprep.subr.bf16.mxu1 %v1395_v46  ;;  %v717_v2 = vmul.f32 %v7293_v33, %v10857_v19  ;;  %v885_v4 = vmul.f32 %v7296_v34, %v10858_v62  ;;  %v10864_v11 = vmov 0   ;;  %v8106_v46 = vld [vmem:[%s10614_s2 + $0x8] sm:$0xff]  }
 0x10c   : > { %v1109_v36 = vmul.f32 %v10828_v48, %v10859_v20  ;;  %1528 = vmatpush1.bf16.msra.mxu0 %v1392_v24  ;;  %1601 = vmatpush1.bf16.msra.mxu1 %v1394_v35  ;;  %v1310_v51 = vadd.f32 %v7875_v18, %v1198_v61  ;;  %v941_v12 = vadd.f32 %v10860_v28, %v709_v9  ;;  %v10861_v18 = vld [vmem:[#allocation48_spill] sm:$0xff]  ;;  %v10867_v28 = vld [vmem:[#allocation53_spill] sm:$0xff] }
 0x10d   : > { %v711_v49 = vmul.f32 %v10834_v45, %v10856_v7  ;;  %1667 = vmatprep.subr.bf16.mxu0 %v7844_v40  ;;  %1740 = vmatprep.subr.bf16.mxu1 %v7877_v27  ;;  %v1366_v52 = vmax.f32 %v1302_v1, 0.0  ;;  %v949_v32 = vadd.f32 %v885_v4, %v717_v2  ;;  %v719_v39 = vmul.f32 %v10834_v45, %v10857_v19  ;;  %v10862_v40 = vld [vmem:[#allocation39_spill] sm:$0xff] }
 0x10e   : > { %v887_v6 = vmul.f32 %v10835_v60, %v10858_v62  ;;  %v1374_v59 = vmax.f32 %v1310_v51, 0.0  ;;  %v1173_v53 = vadd.f32 %v1109_v36, %v941_v12  ;;  %v1111_v15 = vmul.f32 %v10839_v56, %v10859_v20 }
 0x10f   : > { %v943_v16 = vadd.f32 %v10861_v18, %v711_v49  ;;  %6320 = vmatmul.mubr.msk.bf16.vlgmr.msra.gmra.mxu0 %vm1500_vm0, %v8059_v42  ;;  %6324 = vmatmul.mubr.msk.bf16.vlgmr.msra.gmra.mxu1 %vm1500_vm0, %v8059_v42  ;;  %v1181_v27 = vadd.f32 %v10862_v40, %v949_v32  ;;  %v708_v14 = vmul.f32 %v10840_v31, %v10856_v7  ;;  %v10868_v49 = vld [vmem:[#allocation41_spill] sm:$0xff] }
 0x110   : > { %v951_v10 = vadd.f32 %v887_v6, %v719_v39  ;;  %1668 = vmatpush1.bf16.msra.mxu0 %v7928_v22  ;;  %1741 = vmatpush1.bf16.msra.mxu1 %v7940_v21  ;;  %v1414_v50 = vpack.c.bf16 %v1374_v59, %v1366_v52  ;;  %v1285_v8 = vadd.f32 %v7839_v13, %v1173_v53  ;;  %v10865_v21 = vld [vmem:[#allocation9_spill] sm:$0xff] }
 0x111   : > { %v1175_v63 = vadd.f32 %v1111_v15, %v943_v16  ;;  %1669 = vmatprep.subr.bf16.mxu0 %v7993_v5  ;;  %1742 = vmatprep.subr.bf16.mxu1 %v8025_v44  ;;  %v1293_v58 = vadd.f32 %v8006_v26, %v1181_v27  ;;  %v716_v25 = vmul.f32 %v10840_v31, %v10857_v19  ;;  %v10866_v5 = vld [vmem:[#allocation49_spill] sm:$0xff]  ;;  %v10872_v15 = vld [vmem:[#allocation35_spill] sm:$0xff] }
 0x112   : > { %v1183_v47 = vadd.f32 %v10863_v55, %v951_v10  ;;  %v1349_v29 = vmax.f32 %v1285_v8, 0.0  ;;  %1555 = vmatprep.mubr.bf16.mxu0 %v10864_v11  ;;  %1628 = vmatprep.mubr.bf16.mxu1 %v10864_v11  ;;  %v884_v30 = vmul.f32 %v10865_v21, %v10858_v62  ;;  %v940_v17 = vadd.f32 %v10866_v5, %v708_v14  ;;  %v10873_v10 = vld [vmem:[#allocation55_spill] sm:$0xff] }
 0x113   : > { %v1287_v22 = vadd.f32 %v7839_v13, %v1175_v63  ;;  %v1357_v44 = vmax.f32 %v1293_v58, 0.0  ;;  %v1108_v24 = vmul.f32 %v10845_v43, %v10859_v20  ;;  %v710_v35 = vmul.f32 %v10800_v38, %v10856_v7  ;;  %v10869_v7 = vld [vmem:[#allocation64_spill] sm:$0xff] }
 0x114   : > { %v1295_v41 = vadd.f32 %v8006_v26, %v1183_v47  ;;  %1670 = vmatpush1.bf16.msra.mxu0 %v1412_v54  ;;  %1743 = vmatpush1.bf16.msra.mxu1 %v1414_v50  ;;  %v948_v1 = vadd.f32 %v884_v30, %v716_v25  ;;  %v718_v9 = vmul.f32 %v10800_v38, %v10857_v19  ;;  %v10874_v50 = vld [vmem:[#allocation17_spill] sm:$0xff] }
 0x115   : > { %v1351_v61 = vmax.f32 %v1287_v22, 0.0  ;;  %v886_v2 = vmul.f32 %v10851_v23, %v10858_v62  ;;  %v1405_v4 = vpack.c.bf16 %v1357_v44, %v1349_v29  ;;  %v1172_v51 = vadd.f32 %v1108_v24, %v940_v17  ;;  %v10870_v62 = vld [vmem:[#allocation16_spill] sm:$0xff] }
 0x116   : > { %v1359_v36 = vmax.f32 %v1295_v41, 0.0  ;;  %v942_v12 = vadd.f32 %v10867_v28, %v710_v35  ;;  %v1180_v52 = vadd.f32 %v10868_v49, %v948_v1  ;;  %v1110_v54 = vmul.f32 %v10854_v3, %v10859_v20  ;;  %v10871_v20 = vld [vmem:[#allocation42_spill] sm:$0xff]  ;;  %v8151_v22 = vld [vmem:[%s10614_s2 + $0x10] sm:$0xff]  }
 0x117   : > { %v950_v32 = vadd.f32 %v886_v2, %v718_v9  ;;  %v693_v39 = vmul.f32 %v7293_v33, %v10869_v7  ;;  %1671 = vmatprep.subr.bf16.mxu0 %v1405_v4  ;;  %6321 = vmatmul.mubr.msk.bf16.gmra.mxu0 %vm1500_vm0, %v8106_v46  ;;  %v1284_v19 = vadd.f32 %v7839_v13, %v1172_v51  ;;  %v10875_v41 = vld [vmem:[#allocation56_spill] sm:$0xff] }
 0x118   : > { %v1407_v6 = vpack.c.bf16 %v1359_v36, %v1351_v61  ;;  %v701_v59 = vmul.f32 %v7293_v33, %v10870_v62  ;;  %6325 = vmatmul.mubr.msk.bf16.gmra.mxu1 %vm1500_vm0, %v8106_v46  ;;  %v1292_v53 = vadd.f32 %v8006_v26, %v1180_v52  ;;  %v1174_v18 = vadd.f32 %v1110_v54, %v942_v12  ;;  %v10876_v52 = vld [vmem:[#allocation57_spill] sm:$0xff] }
 0x119   : > { %v1182_v16 = vadd.f32 %v10871_v20, %v950_v32  ;;  %v861_v40 = vmul.f32 %v7296_v34, %v10872_v15  ;;  %v1348_v27 = vmax.f32 %v1284_v19, 0.0  ;;  %v1093_v8 = vmul.f32 %v10828_v48, %v10874_v50  ;;  %1565 = vmatprep.mubr.bf16.mxu0 %v10864_v11  ;;  %1638 = vmatprep.mubr.bf16.mxu1 %v10864_v11 }
 0x11a   : > { %1744 = vmatprep.subr.bf16.mxu1 %v1407_v6  ;;  %v933_v14 = vadd.f32 %v10873_v10, %v701_v59  ;;  %v1101_v33 = vmul.f32 %v10828_v48, %v7982_v57  ;;  %v1356_v63 = vmax.f32 %v1292_v53, 0.0  ;;  %v1286_v58 = vadd.f32 %v7839_v13, %v1174_v18  ;;  %v6735_v18 = vld [vmem:[%s10614_s2 + $0x18] sm:$0xff]  }
 0x11b   : > { %v1294_v55 = vadd.f32 %v8006_v26, %v1182_v16  ;;  %v925_v47 = vadd.f32 %v861_v40, %v693_v39  ;;  %v695_v25 = vmul.f32 %v10834_v45, %v10869_v7  ;;  %v703_v29 = vmul.f32 %v10834_v45, %v10870_v62  ;;  %v10877_v40 = vld [vmem:[#allocation61_spill] sm:$0xff] }
 0x11c   : > { %v1165_v34 = vadd.f32 %v1101_v33, %v933_v14  ;;  %v863_v48 = vmul.f32 %v10835_v60, %v10872_v15  ;;  %v1404_v13 = vpack.c.bf16 %v1356_v63, %v1348_v27  ;;  %v1350_v26 = vmax.f32 %v1286_v58, 0.0 }
 0x11d   : > { %v1358_v30 = vmax.f32 %v1294_v55, 0.0  ;;  %v1157_v5 = vadd.f32 %v1093_v8, %v925_v47  ;;  %v935_v24 = vadd.f32 %v10875_v41, %v703_v29  ;;  %v1095_v45 = vmul.f32 %v10839_v56, %v10874_v50 }
 0x11e   : > { %v1277_v17 = vadd.f32 %v8001_v0, %v1165_v34  ;;  %v927_v44 = vadd.f32 %v863_v48, %v695_v25  ;;  %1672 = vmatpush1.bf16.msra.mxu0 %v1404_v13  ;;  %v1103_v61 = vmul.f32 %v10839_v56, %v7982_v57  ;;  %v692_v1 = vmul.f32 %v10840_v31, %v10869_v7  ;;  %v8231_v48 = vpop.permute.xlu0 %1477  ;;  %v8233_v13 = vpop.permute.xlu1 %1472 }
 0x11f   : > { %v1406_v35 = vpack.c.bf16 %v1358_v30, %v1350_v26  ;;  %v1269_v60 = vadd.f32 %v8023_v37, %v1157_v5  ;;  %v700_v4 = vmul.f32 %v10840_v31, %v10870_v62  ;;  %v860_v36 = vmul.f32 %v10865_v21, %v10872_v15  ;;  %6322 = vmatmul.mubr.msk.bf16.gmra.mxu0 %vm1500_vm0, %v8151_v22 }
 0x120   : > { %v1341_v9 = vmax.f32 %v1277_v17, 0.0  ;;  %v1159_v2 = vadd.f32 %v1095_v45, %v927_v44  ;;  %v1167_v28 = vadd.f32 %v1103_v61, %v935_v24  ;;  %v1092_v56 = vmul.f32 %v10845_v43, %v10874_v50  ;;  %1575 = vmatprep.mubr.bf16.mxu0 %v10864_v11  ;;  %6326 = vmatmul.mubr.msk.bf16.gmra.mxu1 %vm1500_vm0, %v8151_v22 }
 0x121   : > { %1745 = vmatpush1.bf16.msra.mxu1 %v1406_v35  ;;  %v1333_v51 = vmax.f32 %v1269_v60, 0.0  ;;  %v1100_v12 = vmul.f32 %v10845_v43, %v7982_v57  ;;  %v924_v31 = vadd.f32 %v860_v36, %v692_v1  ;;  %v932_v32 = vadd.f32 %v10876_v52, %v700_v4  ;;  %1648 = vmatprep.mubr.bf16.mxu1 %v10864_v11 }
 0x122   : > { %v1271_v49 = vadd.f32 %v8023_v37, %v1159_v2  ;;  %v694_v21 = vmul.f32 %v10800_v38, %v10869_v7  ;;  %v1279_v39 = vadd.f32 %v8001_v0, %v1167_v28  ;;  %v702_v6 = vmul.f32 %v10800_v38, %v10870_v62  ;;  %v8239_v41 = vpop.permute.xlu0 %1467  ;;  %v8241_v45 = vpop.permute.xlu1 %1462 }
 0x123   : > { %v1397_v54 = vpack.c.bf16 %v1341_v9, %v1333_v51  ;;  %v862_v43 = vmul.f32 %v10851_v23, %v10872_v15  ;;  %v1156_v59 = vadd.f32 %v1092_v56, %v924_v31  ;;  %v1164_v53 = vadd.f32 %v1100_v12, %v932_v32 }
 0x124   : > { %v1335_v19 = vmax.f32 %v1271_v49, 0.0  ;;  %v1094_v7 = vmul.f32 %v10854_v3, %v10874_v50  ;;  %v1343_v20 = vmax.f32 %v1279_v39, 0.0  ;;  %v934_v38 = vadd.f32 %v10877_v40, %v702_v6 }
 0x125   : > { %1673 = vmatprep.subr.bf16.mxu0 %v1397_v54  ;;  %v926_v16 = vadd.f32 %v862_v43, %v694_v21  ;;  %v1102_v23 = vmul.f32 %v10854_v3, %v7982_v57  ;;  %v1268_v62 = vadd.f32 %v8023_v37, %v1156_v59  ;;  %v1276_v15 = vadd.f32 %v8001_v0, %v1164_v53 }
 0x126   : > { %v1399_v27 = vpack.c.bf16 %v1343_v20, %v1335_v19  ;;  %v8243_v4 = vpop.permute.xlu0 %1457  ;;  %v8245_v36 = vpop.permute.xlu1 %1452 }
 0x127   : > { %v1158_v10 = vadd.f32 %v1094_v7, %v926_v16  ;;  %v1166_v14 = vadd.f32 %v1102_v23, %v934_v38  ;;  %v1332_v50 = vmax.f32 %v1268_v62, 0.0  ;;  %v1340_v8 = vmax.f32 %v1276_v15, 0.0  ;;  %6323 = vmatmul.mubr.msk.bf16.gmra.mxu0 %vm1500_vm0, %v6735_v18 }
 0x128   : > { %1746 = vmatprep.subr.bf16.mxu1 %v1399_v27  ;;  %1691 = vmatprep.mubr.bf16.mxu0 %v10864_v11 }
 0x129   : > { %v1270_v33 = vadd.f32 %v8023_v37, %v1158_v10  ;;  %v1278_v63 = vadd.f32 %v8001_v0, %v1166_v14  ;;  %v1396_v58 = vpack.c.bf16 %v1340_v8, %v1332_v50  ;;  %6327 = vmatmul.mubr.msk.bf16.gmra.mxu1 %vm1500_vm0, %v6735_v18 }
 0x12a   : > { %1764 = vmatprep.mubr.bf16.mxu1 %v10864_v11  ;;  %v8247_v52 = vpop.permute.xlu0 %1447  ;;  %v8249_v32 = vpop.permute.xlu1 %1442 }
 0x12b   : > { %v1334_v57 = vmax.f32 %v1270_v33, 0.0  ;;  %v1342_v3 = vmax.f32 %v1278_v63, 0.0  ;;  %1674 = vmatpush1.bf16.msra.mxu0 %v1396_v58 }
 0x12d   : > { %v1398_v55 = vpack.c.bf16 %v1342_v3, %v1334_v57 }
 0x12f   : > { %1747 = vmatpush1.bf16.msra.mxu1 %v1398_v55  ;;  %6328 = vmatmul.mubr.msk.bf16.vlgmr.msra.gmra.mxu0 %vm1500_vm0, %v8059_v42 }
 0x130   : > { %1701 = vmatprep.mubr.bf16.mxu0 %v10864_v11 }
 0x132   : > { %6332 = vmatmul.mubr.msk.bf16.vlgmr.msra.gmra.mxu1 %vm1500_vm0, %v8059_v42 }
 0x133   : > { %1774 = vmatprep.mubr.bf16.mxu1 %v10864_v11 }
 0x137   : > { %6329 = vmatmul.mubr.msk.bf16.gmra.mxu0 %vm1500_vm0, %v8106_v46 }
 0x138   : > { %1711 = vmatprep.mubr.bf16.mxu0 %v10864_v11 }
 0x13a   : > { %6333 = vmatmul.mubr.msk.bf16.gmra.mxu1 %vm1500_vm0, %v8106_v46 }
 0x13b   : > { %1784 = vmatprep.mubr.bf16.mxu1 %v10864_v11 }
 0x13f   : > { %6330 = vmatmul.mubr.msk.bf16.gmra.mxu0 %vm1500_vm0, %v8151_v22 }
 0x140   : > { %1721 = vmatprep.mubr.bf16.mxu0 %v10864_v11 }
 0x142   : > { %6334 = vmatmul.mubr.msk.bf16.gmra.mxu1 %vm1500_vm0, %v8151_v22 }
 0x143   : > { %1794 = vmatprep.mubr.bf16.mxu1 %v10864_v11 }
 0x147   : > { %6331 = vmatmul.mubr.msk.bf16.gmra.mxu0 %vm1500_vm0, %v6735_v18 }
 0x148   : > { %2021 = vmatprep.mubr.bf16.mxu0 %v10864_v11 }
 0x14a   : > { %6335 = vmatmul.mubr.msk.bf16.gmra.mxu1 %vm1500_vm0, %v6735_v18 }
 0x14b   : > { %2094 = vmatprep.mubr.bf16.mxu1 %v10864_v11 }
 0x1cf   : > { %v1547_v0 = vpop.f32.mrf.mxu0  ;;  %v8223_v37 = vpop.f32.mrf.mxu1 }
 0x1d0   : > { %v8252_v21 = vadd.f32 %v1547_v0, %v8249_v32 }
 0x1d1   : > { %v1549_v42 = vpop.f32.mrf.mxu0  ;;  %v8225_v46 = vpop.f32.mrf.mxu1 }
 0x1d2   : > { %v8255_v54 = vadd.f32 %v1549_v42, %v8249_v32 }
 0x1d3   : > { %v1551_v47 = vpop.f32.mrf.mxu0  ;;  %v8227_v34 = vpop.f32.mrf.mxu1 }
 0x1d4   : > { %v8258_v39 = vadd.f32 %v1551_v47, %v8247_v52 }
 0x1d5   : > { %v1553_v25 = vpop.f32.mrf.mxu0  ;;  %v8229_v29 = vpop.f32.mrf.mxu1 }
 0x1d6   : > { %v8261_v6 = vadd.f32 %v1553_v25, %v8247_v52 }
 0x1d7   : > { %v1557_v22 = vpop.f32.mrf.mxu0 }
 0x1d8   : > { %v8235_v26 = vpop.f32.mrf.mxu1  ;;  %v8264_v59 = vadd.f32 %v1557_v22, %v8245_v36 }
 0x1d9   : > { %v1559_v30 = vpop.f32.mrf.mxu0 }
 0x1da   : > { %v1632_v5 = vpop.f32.mrf.mxu1  ;;  %v8267_v53 = vadd.f32 %v1559_v30, %v8245_v36 }
 0x1db   : > { %v1561_v17 = vpop.f32.mrf.mxu0  ;;  %v8270_v7 = vadd.f32 %v1632_v5, %v8245_v36 }
 0x1dc   : > { %v8237_v44 = vpop.f32.mrf.mxu1  ;;  %v8274_v20 = vadd.f32 %v1561_v17, %v8243_v4 }
 0x1dd   : > { %v1563_v24 = vpop.f32.mrf.mxu0 }
 0x1de   : > { %v1636_v35 = vpop.f32.mrf.mxu1  ;;  %v8277_v16 = vadd.f32 %v1563_v24, %v8243_v4 }
 0x1df   : > { %v1567_v60 = vpop.f32.mrf.mxu0  ;;  %v8282_v15 = vadd.f32 %v1636_v35, %v8243_v4 }
 0x1e0   : > { %v1640_v61 = vpop.f32.mrf.mxu1  ;;  %v1568_v47 = vadd.f32 %v1567_v60, %v8241_v45 }
 0x1e1   : > { %v1569_v1 = vpop.f32.mrf.mxu0 }
 0x1e2   : > { %v1642_v9 = vpop.f32.mrf.mxu1  ;;  %v1570_v50 = vadd.f32 %v1569_v1, %v8241_v45 }
 0x1e3   : > { %v1571_v2 = vpop.f32.mrf.mxu0  ;;  %v1643_v25 = vadd.f32 %v1642_v9, %v8241_v45  ;;  %v1641_v9 = vadd.f32 %v1640_v61, %v8241_v45  ;;  %v1627_v61 = vadd.f32 %v8229_v29, %v8247_v52  ;;  %v1623_v29 = vadd.f32 %v8225_v46, %v8249_v32 }
 0x1e4   : > { %v1644_v51 = vpop.f32.mrf.mxu1  ;;  %v1572_v8 = vadd.f32 %v1571_v2, %v8239_v41 }
 0x1e5   : > { %v1573_v28 = vpop.f32.mrf.mxu0  ;;  %v1645_v24 = vadd.f32 %v1644_v51, %v8239_v41  ;;  %v1816_v46 = vmax.f32 %v1627_v61, 0.0 }
 0x1e6   : > { %v1646_v56 = vpop.f32.mrf.mxu1  ;;  %v1574_v40 = vadd.f32 %v1573_v28, %v8239_v41  ;;  %v1838_v28 = vmax.f32 %v1570_v50, 0.0 }
 0x1e7   : > { %v1577_v12 = vpop.f32.mrf.mxu0  ;;  %v1647_v33 = vadd.f32 %v1646_v56, %v8239_v41  ;;  %v1847_v50 = vmax.f32 %v1645_v24, 0.0 }
 0x1e8   : > { %v1578_v27 = vadd.f32 %v1577_v12, %v8233_v13  ;;  %v1846_v22 = vmax.f32 %v1574_v40, 0.0  ;;  %v1830_v40 = vmax.f32 %v8277_v16, 0.0  ;;  %v1822_v16 = vmax.f32 %v8267_v53, 0.0 }
 0x1e9   : > { %v1650_v49 = vpop.f32.mrf.mxu1  ;;  %v1579_v31 = vpop.f32.mrf.mxu0  ;;  %v1848_v56 = vmax.f32 %v1647_v33, 0.0  ;;  %v1814_v53 = vmax.f32 %v8261_v6, 0.0 }
 0x1ea   : > { %v1580_v38 = vadd.f32 %v1579_v31, %v8233_v13  ;;  %v1651_v3 = vadd.f32 %v1650_v49, %v8233_v13  ;;  %v1853_v35 = vmax.f32 %v1578_v27, 0.0  ;;  %v1886_v27 = vpack.c.bf16 %v1846_v22, %v1838_v28 }
 0x1eb   : > { %v1652_v43 = vpop.f32.mrf.mxu1  ;;  %v1581_v19 = vpop.f32.mrf.mxu0  ;;  %v1878_v22 = vpack.c.bf16 %v1830_v40, %v1822_v16  ;;  %v1813_v28 = vmax.f32 %v8258_v39, 0.0 }
 0x1ec   : > { %v1582_v18 = vadd.f32 %v1581_v19, %v8231_v48  ;;  %v1653_v63 = vadd.f32 %v1652_v43, %v8233_v13  ;;  %v1854_v30 = vmax.f32 %v1580_v38, 0.0  ;;  %v1845_v43 = vmax.f32 %v1572_v8, 0.0 }
 0x1ed   : > { %v1654_v23 = vpop.f32.mrf.mxu1  ;;  %v1583_v62 = vpop.f32.mrf.mxu0  ;;  %v1855_v19 = vmax.f32 %v1651_v3, 0.0  ;;  %v1840_v38 = vmax.f32 %v1643_v25, 0.0  ;;  %v1832_v8 = vmax.f32 %v8282_v15, 0.0  ;;  %v1824_v15 = vmax.f32 %v8270_v7, 0.0 }
 0x1ee   : > { %v1655_v10 = vadd.f32 %v1654_v23, %v8231_v48  ;;  %v1584_v14 = vadd.f32 %v1583_v62, %v8231_v48  ;;  %v1861_v55 = vmax.f32 %v1582_v18, 0.0  ;;  %v1856_v12 = vmax.f32 %v1653_v63, 0.0 }
 0x1ef   : > { %v1656_v58 = vpop.f32.mrf.mxu1  ;;  %v8291_v57 = vpop.f32.mrf.mxu0  ;;  %v1880_v6 = vpack.c.bf16 %v1832_v8, %v1824_v15 }
 0x1f0   : > { %v1862_v0 = vmax.f32 %v1584_v14, 0.0  ;;  %v1657_v42 = vadd.f32 %v1656_v58, %v8231_v48  ;;  %v1863_v1 = vmax.f32 %v1655_v10, 0.0  ;;  %v1893_v18 = vpack.c.bf16 %v1861_v55, %v1853_v35 }
 0x1f1   : > { %v8299_v17 = vpop.f32.mrf.mxu0  ;;  %v1635_v10 = vadd.f32 %v8237_v44, %v8243_v4  ;;  %v1837_v14 = vmax.f32 %v1568_v47, 0.0  ;;  %v1888_v58 = vpack.c.bf16 %v1848_v56, %v1840_v38  ;;  %v1631_v44 = vadd.f32 %v8235_v26, %v8245_v36 }
 0x1f2   : > { %v8297_v5 = vpop.f32.mrf.mxu1  ;;  %v1864_v2 = vmax.f32 %v1657_v42, 0.0  ;;  %v1894_v60 = vpack.c.bf16 %v1862_v0, %v1854_v30  ;;  %v1895_v33 = vpack.c.bf16 %v1863_v1, %v1855_v19  ;;  %v1829_v55 = vmax.f32 %v8274_v20, 0.0 }
 0x1f3   : > { %v8304_v31 = vpop.f32.mrf.mxu0  ;;  %v1839_v0 = vmax.f32 %v1641_v9, 0.0  ;;  %v1885_v42 = vpack.c.bf16 %v1845_v43, %v1837_v14  ;;  %v1625_v26 = vadd.f32 %v8227_v34, %v8247_v52  ;;  %v1821_v20 = vmax.f32 %v8264_v59, 0.0 }
 0x1f4   : > { %v8302_v49 = vpop.f32.mrf.mxu1  ;;  %1997 = vmatprep.subr.bf16.mxu0 %v1894_v60  ;;  %v1896_v23 = vpack.c.bf16 %v1864_v2, %v1856_v12  ;;  %v1831_v30 = vmax.f32 %v1635_v10, 0.0  ;;  %v1806_v35 = vmax.f32 %v8255_v54, 0.0  ;;  %v1621_v2 = vadd.f32 %v8223_v37, %v8249_v32  ;;  %v8348_v10 = vld [vmem:[%s10615_s3] sm:$0xff]  }
 0x1f5   : > { %v8310_v62 = vpop.f32.mrf.mxu0  ;;  %1998 = vmatpush1.bf16.msra.mxu0 %v1893_v18  ;;  %v1887_v24 = vpack.c.bf16 %v1847_v50, %v1839_v0  ;;  %v1823_v56 = vmax.f32 %v1631_v44, 0.0  ;;  %v1877_v34 = vpack.c.bf16 %v1829_v55, %v1821_v20  ;;  %v1808_v59 = vmax.f32 %v1623_v29, 0.0  ;;  %v8359_v55 = vld [vmem:[%s10615_s3 + $0x8] sm:$0xff]  }
 0x1f6   : > { %v8308_v51 = vpop.f32.mrf.mxu1  ;;  %2070 = vmatprep.subr.bf16.mxu1 %v1896_v23  ;;  %1999 = vmatprep.subr.bf16.mxu0 %v1886_v27  ;;  %v1870_v54 = vpack.c.bf16 %v1814_v53, %v1806_v35  ;;  %v1805_v9 = vmax.f32 %v8252_v21, 0.0  ;;  %v1815_v43 = vmax.f32 %v1625_v26, 0.0  ;;  %v1807_v39 = vmax.f32 %v1621_v2, 0.0 }
 0x1f7   : > { %v8320_v3 = vpop.f32.mrf.mxu0  ;;  %2071 = vmatpush1.bf16.msra.mxu1 %v1895_v33  ;;  %v1879_v19 = vpack.c.bf16 %v1831_v30, %v1823_v56  ;;  %v1872_v37 = vpack.c.bf16 %v1816_v46, %v1808_v59  ;;  %v8363_v0 = vadd.f32 %v8291_v57, %v8249_v32  ;;  %v8371_v29 = vadd.f32 %v8304_v31, %v8247_v52 }
 0x1f8   : > { %v8318_v63 = vpop.f32.mrf.mxu1  ;;  %2072 = vmatprep.subr.bf16.mxu1 %v1888_v58  ;;  %v1869_v38 = vpack.c.bf16 %v1813_v28, %v1805_v9  ;;  %v1871_v21 = vpack.c.bf16 %v1815_v43, %v1807_v39  ;;  %v8375_v53 = vadd.f32 %v8310_v62, %v8247_v52  ;;  %v8379_v26 = vadd.f32 %v8320_v3, %v8245_v36 }
 0x1f9   : > { %v1705_v25 = vpop.f32.mrf.mxu0  ;;  %2000 = vmatpush1.bf16.msra.mxu0 %v1885_v42  ;;  %v8367_v42 = vadd.f32 %v8299_v17, %v8249_v32 }
 0x1fa   : > { %v8329_v47 = vpop.f32.mrf.mxu1  ;;  %2001 = vmatprep.subr.bf16.mxu0 %v1878_v22  ;;  %v8382_v57 = vadd.f32 %v1705_v25, %v8245_v36 }
 0x1fb   : > { %v1707_v7 = vpop.f32.mrf.mxu0  ;;  %2073 = vmatpush1.bf16.msra.mxu1 %v1887_v24 }
 0x1fc   : > { %v8335_v1 = vpop.f32.mrf.mxu1  ;;  %2074 = vmatprep.subr.bf16.mxu1 %v1880_v6  ;;  %v8387_v31 = vadd.f32 %v1707_v7, %v8243_v4 }
 0x1fd   : > { %v1709_v60 = vpop.f32.mrf.mxu0  ;;  %2002 = vmatpush1.bf16.msra.mxu0 %v1877_v34 }
 0x1fe   : > { %v8340_v12 = vpop.f32.mrf.mxu1  ;;  %2003 = vmatprep.subr.bf16.mxu0 %v1870_v54  ;;  %v8390_v30 = vadd.f32 %v1709_v60, %v8243_v4 }
 0x1ff   : > { %v1713_v40 = vpop.f32.mrf.mxu0  ;;  %2075 = vmatpush1.bf16.msra.mxu1 %v1879_v19 }
 0x200   : > { %v8343_v18 = vpop.f32.mrf.mxu1  ;;  %2076 = vmatprep.subr.bf16.mxu1 %v1872_v37  ;;  %v1714_v25 = vadd.f32 %v1713_v40, %v8241_v45 }
 0x201   : > { %v1715_v27 = vpop.f32.mrf.mxu0  ;;  %2004 = vmatpush1.bf16.msra.mxu0 %v1869_v38 }
 0x202   : > { %v1786_v23 = vpop.f32.mrf.mxu1  ;;  %v1716_v2 = vadd.f32 %v1715_v27, %v8241_v45 }
 0x203   : > { %v1717_v50 = vpop.f32.mrf.mxu0  ;;  %2077 = vmatpush1.bf16.msra.mxu1 %v1871_v21 }
 0x204   : > { %v1788_v14 = vpop.f32.mrf.mxu1  ;;  %6340 = vmatmul.mubr.msk.bf16.vlgmr.msra.gmra.mxu0 %vm1500_vm0, %v8348_v10  ;;  %v1718_v28 = vadd.f32 %v1717_v50, %v8239_v41 }
 0x205   : > { %v1719_v61 = vpop.f32.mrf.mxu0  ;;  %2031 = vmatprep.mubr.bf16.mxu0 %v10864_v11  ;;  %v1789_v19 = vadd.f32 %v1788_v14, %v8241_v45 }
 0x206   : > { %v1790_v33 = vpop.f32.mrf.mxu1  ;;  %6344 = vmatmul.mubr.msk.bf16.vlgmr.msra.gmra.mxu1 %vm1500_vm0, %v8348_v10  ;;  %v1720_v62 = vadd.f32 %v1719_v61, %v8239_v41  ;;  %v1787_v61 = vadd.f32 %v1786_v23, %v8241_v45  ;;  %v1781_v45 = vadd.f32 %v8340_v12, %v8243_v4 }
 0x207   : > { %v1723_v8 = vpop.f32.mrf.mxu0  ;;  %2104 = vmatprep.mubr.bf16.mxu1 %v10864_v11  ;;  %v1791_v37 = vadd.f32 %v1790_v33, %v8239_v41 }
 0x208   : > { %v1792_v16 = vpop.f32.mrf.mxu1  ;;  %v1724_v24 = vadd.f32 %v1723_v8, %v8233_v13  ;;  %v1850_v40 = vmax.f32 %v1720_v62, 0.0  ;;  %v1849_v8 = vmax.f32 %v1718_v28, 0.0  ;;  %v1773_v62 = vadd.f32 %v8318_v63, %v8247_v52 }
 0x209   : > { %v1725_v44 = vpop.f32.mrf.mxu0  ;;  %v1793_v56 = vadd.f32 %v1792_v16, %v8239_v41  ;;  %v1842_v16 = vmax.f32 %v1716_v2, 0.0  ;;  %v1851_v23 = vmax.f32 %v1791_v37, 0.0  ;;  %v1843_v12 = vmax.f32 %v1787_v61, 0.0 }
 0x20a   : > { %v1796_v58 = vpop.f32.mrf.mxu1  ;;  %v1726_v17 = vadd.f32 %v1725_v44, %v8233_v13  ;;  %v1857_v39 = vmax.f32 %v1724_v24, 0.0  ;;  %v1779_v44 = vadd.f32 %v8335_v1, %v8245_v36  ;;  %v1826_v1 = vmax.f32 %v8382_v57, 0.0 }
 0x20b   : > { %v1727_v22 = vpop.f32.mrf.mxu0  ;;  %v1797_v34 = vadd.f32 %v1796_v58, %v8233_v13  ;;  %v1852_v14 = vmax.f32 %v1793_v56, 0.0  ;;  %v1769_v63 = vadd.f32 %v8302_v49, %v8249_v32  ;;  %v1818_v57 = vmax.f32 %v8375_v53, 0.0 }
 0x20c   : > { %v1798_v15 = vpop.f32.mrf.mxu1  ;;  %v1728_v20 = vadd.f32 %v1727_v22, %v8231_v48  ;;  %6341 = vmatmul.mubr.msk.bf16.gmra.mxu0 %vm1500_vm0, %v8359_v55  ;;  %v1858_v60 = vmax.f32 %v1726_v17, 0.0  ;;  %v1844_v22 = vmax.f32 %v1789_v19, 0.0  ;;  %v1890_v17 = vpack.c.bf16 %v1850_v40, %v1842_v16 }
 0x20d   : > { %v1729_v3 = vpop.f32.mrf.mxu0  ;;  %v1799_v46 = vadd.f32 %v1798_v15, %v8233_v13  ;;  %2041 = vmatprep.mubr.bf16.mxu0 %v10864_v11  ;;  %v8414_v13 = vld [vmem:[%s10615_s3 + $0x10] sm:$0xff]   ;;  %v1859_v41 = vmax.f32 %v1797_v34, 0.0  ;;  %v1834_v15 = vmax.f32 %v8390_v30, 0.0  ;;  %v1810_v49 = vmax.f32 %v8367_v42, 0.0 }
 0x20e   : > { %v1800_v35 = vpop.f32.mrf.mxu1  ;;  %v1730_v7 = vadd.f32 %v1729_v3, %v8231_v48  ;;  %6345 = vmatmul.mubr.msk.bf16.gmra.mxu1 %vm1500_vm0, %v8359_v55  ;;  %v1865_v54 = vmax.f32 %v1728_v20, 0.0  ;;  %v1892_v30 = vpack.c.bf16 %v1852_v14, %v1844_v22  ;;  %v1820_v53 = vmax.f32 %v1773_v62, 0.0 }
 0x20f   : > { %v1801_v6 = vadd.f32 %v1800_v35, %v8231_v48  ;;  %2114 = vmatprep.mubr.bf16.mxu1 %v10864_v11  ;;  %v1860_v38 = vmax.f32 %v1799_v46, 0.0  ;;  %v1777_v35 = vadd.f32 %v8329_v47, %v8245_v36  ;;  %v1882_v46 = vpack.c.bf16 %v1834_v15, %v1826_v1  ;;  %v6739_v36 = vld [vmem:[%s10615_s3 + $0x18] sm:$0xff]  }
 0x210   : > { %v1802_v59 = vpop.f32.mrf.mxu1  ;;  %v1866_v9 = vmax.f32 %v1730_v7, 0.0  ;;  %v1897_v33 = vpack.c.bf16 %v1865_v54, %v1857_v39  ;;  %v1771_v47 = vadd.f32 %v8308_v51, %v8247_v52  ;;  %v1891_v7 = vpack.c.bf16 %v1851_v23, %v1843_v12 }
 0x211   : > { %v1803_v43 = vadd.f32 %v1802_v59, %v8231_v48  ;;  %v1867_v27 = vmax.f32 %v1801_v6, 0.0  ;;  %v1783_v48 = vadd.f32 %v8343_v18, %v8243_v4  ;;  %v1841_v18 = vmax.f32 %v1714_v25, 0.0 }
 0x212   : > { %v1898_v50 = vpack.c.bf16 %v1866_v9, %v1858_v60  ;;  %v1833_v4 = vmax.f32 %v8387_v31, 0.0  ;;  %v1828_v25 = vmax.f32 %v1779_v44, 0.0  ;;  %v1825_v31 = vmax.f32 %v8379_v26, 0.0 }
 0x213   : > { %v1868_v21 = vmax.f32 %v1803_v43, 0.0  ;;  %v1899_v20 = vpack.c.bf16 %v1867_v27, %v1859_v41  ;;  %v1836_v24 = vmax.f32 %v1783_v48, 0.0  ;;  %v1889_v3 = vpack.c.bf16 %v1849_v8, %v1841_v18 }
 0x214   : > { %2143 = vmatprep.subr.bf16.mxu0 %v1898_v50  ;;  %6342 = vmatmul.mubr.msk.bf16.gmra.mxu0 %vm1500_vm0, %v8414_v13  ;;  %v1835_v6 = vmax.f32 %v1781_v45, 0.0  ;;  %v1767_v28 = vadd.f32 %v8297_v5, %v8249_v32  ;;  %v1817_v56 = vmax.f32 %v8371_v29, 0.0  ;;  %v1827_v34 = vmax.f32 %v1777_v35, 0.0 }
 0x215   : > { %v1900_v58 = vpack.c.bf16 %v1868_v21, %v1860_v38  ;;  %2144 = vmatpush1.bf16.msra.mxu0 %v1897_v33  ;;  %2051 = vmatprep.mubr.bf16.mxu0 %v10864_v11  ;;  %v1884_v2 = vpack.c.bf16 %v1836_v24, %v1828_v25  ;;  %v1881_v59 = vpack.c.bf16 %v1833_v4, %v1825_v31  ;;  %v1812_v60 = vmax.f32 %v1769_v63, 0.0  ;;  %v8486_v38 = vpop.permute.xlu1 %1949 }
 0x216   : > { %6346 = vmatmul.mubr.msk.bf16.gmra.mxu1 %vm1500_vm0, %v8414_v13  ;;  %2145 = vmatprep.subr.bf16.mxu0 %v1890_v17  ;;  %v1874_v52 = vpack.c.bf16 %v1818_v57, %v1810_v49  ;;  %v1809_v51 = vmax.f32 %v8363_v0, 0.0  ;;  %v1819_v26 = vmax.f32 %v1771_v47, 0.0  ;;  %v1883_v42 = vpack.c.bf16 %v1835_v6, %v1827_v34 }
 0x217   : > { %2216 = vmatprep.subr.bf16.mxu1 %v1900_v58  ;;  %2124 = vmatprep.mubr.bf16.mxu1 %v10864_v11  ;;  %v1876_v32 = vpack.c.bf16 %v1820_v53, %v1812_v60  ;;  %v1811_v5 = vmax.f32 %v1767_v28, 0.0 }
 0x218   : > { %2217 = vmatpush1.bf16.msra.mxu1 %v1899_v20  ;;  %v1873_v29 = vpack.c.bf16 %v1817_v56, %v1809_v51 }
 0x219   : > { %2218 = vmatprep.subr.bf16.mxu1 %v1892_v30  ;;  %2146 = vmatpush1.bf16.msra.mxu0 %v1889_v3  ;;  %v1875_v54 = vpack.c.bf16 %v1819_v26, %v1811_v5  ;;  %v8494_v8 = vpop.permute.xlu1 %1939 }
 0x21a   : > { %2147 = vmatprep.subr.bf16.mxu0 %v1882_v46 }
 0x21c   : > { %2219 = vmatpush1.bf16.msra.mxu1 %v1891_v7  ;;  %6343 = vmatmul.mubr.msk.bf16.gmra.mxu0 %vm1500_vm0, %v6739_v36 }
 0x21d   : > { %2220 = vmatprep.subr.bf16.mxu1 %v1884_v2  ;;  %2148 = vmatpush1.bf16.msra.mxu0 %v1881_v59  ;;  %v8498_v45 = vpop.permute.xlu1 %1929 }
 0x21e   : > { %2167 = vmatprep.mubr.bf16.mxu0 %v10864_v11  ;;  %6347 = vmatmul.mubr.msk.bf16.gmra.mxu1 %vm1500_vm0, %v6739_v36 }
 0x21f   : > { %2149 = vmatprep.subr.bf16.mxu0 %v1874_v52  ;;  %2240 = vmatprep.mubr.bf16.mxu1 %v10864_v11 }
 0x220   : > { %2221 = vmatpush1.bf16.msra.mxu1 %v1883_v42 }
 0x221   : > { %2222 = vmatprep.subr.bf16.mxu1 %v1876_v32  ;;  %2150 = vmatpush1.bf16.msra.mxu0 %v1873_v29  ;;  %v8502_v35 = vpop.permute.xlu1 %1919 }
 0x224   : > { %2223 = vmatpush1.bf16.msra.mxu1 %v1875_v54  ;;  %6348 = vmatmul.mubr.msk.bf16.vlgmr.msra.gmra.mxu0 %vm1500_vm0, %v8348_v10 }
 0x225   : > { %2177 = vmatprep.mubr.bf16.mxu0 %v10864_v11 }
 0x227   : > { %6352 = vmatmul.mubr.msk.bf16.vlgmr.msra.gmra.mxu1 %vm1500_vm0, %v8348_v10 }
 0x228   : > { %2250 = vmatprep.mubr.bf16.mxu1 %v10864_v11 }
 0x22c   : > { %6349 = vmatmul.mubr.msk.bf16.gmra.mxu0 %vm1500_vm0, %v8359_v55 }
 0x22d   : > { %2187 = vmatprep.mubr.bf16.mxu0 %v10864_v11 }
 0x22f   : > { %6353 = vmatmul.mubr.msk.bf16.gmra.mxu1 %vm1500_vm0, %v8359_v55 }
 0x230   : > { %2260 = vmatprep.mubr.bf16.mxu1 %v10864_v11 }
 0x234   : > { %6350 = vmatmul.mubr.msk.bf16.gmra.mxu0 %vm1500_vm0, %v8414_v13 }
 0x235   : > { %2197 = vmatprep.mubr.bf16.mxu0 %v10864_v11 }
 0x237   : > { %6354 = vmatmul.mubr.msk.bf16.gmra.mxu1 %vm1500_vm0, %v8414_v13  ;;  %v8484_v13 = vpop.permute.xlu0 %1954 }
 0x238   : > { %2270 = vmatprep.mubr.bf16.mxu1 %v10864_v11 }
 0x23b   : > { %v8492_v14 = vpop.permute.xlu0 %1944 }
 0x23c   : > { %6351 = vmatmul.mubr.msk.bf16.gmra.mxu0 %vm1500_vm0, %v6739_v36 }
 0x23d   : > { %2585 = vmatprep.mubr.bf16.mxu0 %v10864_v11 }
 0x23f   : > { %6355 = vmatmul.mubr.msk.bf16.gmra.mxu1 %vm1500_vm0, %v6739_v36  ;;  %v8496_v17 = vpop.permute.xlu0 %1934 }
 0x240   : > { %2698 = vmatprep.mubr.bf16.mxu1 %v10864_v11 }
 0x243   : > { %v8500_v30 = vpop.permute.xlu0 %1924 }
 0x2c4   : > { %v2023_v10 = vpop.f32.mrf.mxu0 }
 0x2c5   : > { %v8505_v4 = vadd.f32 %v2023_v10, %v8502_v35 }
 0x2c6   : > { %v8476_v55 = vpop.f32.mrf.mxu1  ;;  %v2025_v0 = vpop.f32.mrf.mxu0 }
 0x2c7   : > { %v8508_v12 = vadd.f32 %v2025_v0, %v8502_v35 }
 0x2c8   : > { %v8478_v9 = vpop.f32.mrf.mxu1  ;;  %v2027_v43 = vpop.f32.mrf.mxu0 }
 0x2c9   : > { %v8511_v3 = vadd.f32 %v2027_v43, %v8500_v30 }
 0x2ca   : > { %v8480_v19 = vpop.f32.mrf.mxu1  ;;  %v2029_v37 = vpop.f32.mrf.mxu0 }
 0x2cb   : > { %v8514_v63 = vadd.f32 %v2029_v37, %v8500_v30 }
 0x2cc   : > { %v8482_v40 = vpop.f32.mrf.mxu1  ;;  %v2033_v39 = vpop.f32.mrf.mxu0 }
 0x2cd   : > { %v8517_v46 = vadd.f32 %v2033_v39, %v8498_v45 }
 0x2ce   : > { %v8488_v27 = vpop.f32.mrf.mxu1  ;;  %v2035_v21 = vpop.f32.mrf.mxu0 }
 0x2cf   : > { %v8520_v36 = vadd.f32 %v2035_v21, %v8498_v45 }
 0x2d0   : > { %v2108_v50 = vpop.f32.mrf.mxu1  ;;  %v2037_v48 = vpop.f32.mrf.mxu0 }
 0x2d1   : > { %v8523_v47 = vadd.f32 %v2108_v50, %v8498_v45  ;;  %v8527_v6 = vadd.f32 %v2037_v48, %v8496_v17 }
 0x2d2   : > { %v8490_v61 = vpop.f32.mrf.mxu1  ;;  %v2039_v16 = vpop.f32.mrf.mxu0 }
 0x2d3   : > { %v8530_v7 = vadd.f32 %v2039_v16, %v8496_v17 }
 0x2d4   : > { %v2112_v41 = vpop.f32.mrf.mxu1  ;;  %v2043_v33 = vpop.f32.mrf.mxu0 }
 0x2d5   : > { %v8535_v56 = vadd.f32 %v2112_v41, %v8496_v17  ;;  %v2044_v43 = vadd.f32 %v2043_v33, %v8494_v8 }
 0x2d6   : > { %v2116_v58 = vpop.f32.mrf.mxu1  ;;  %v2045_v44 = vpop.f32.mrf.mxu0 }
 0x2d7   : > { %v2046_v52 = vadd.f32 %v2045_v44, %v8494_v8 }
 0x2d8   : > { %v2118_v15 = vpop.f32.mrf.mxu1  ;;  %v2047_v22 = vpop.f32.mrf.mxu0 }
 0x2d9   : > { %v2048_v51 = vadd.f32 %v2047_v22, %v8492_v14  ;;  %v2119_v37 = vadd.f32 %v2118_v15, %v8494_v8  ;;  %v2117_v15 = vadd.f32 %v2116_v58, %v8494_v8  ;;  %v2103_v58 = vadd.f32 %v8482_v40, %v8500_v30 }
 0x2da   : > { %v2120_v18 = vpop.f32.mrf.mxu1  ;;  %v2049_v23 = vpop.f32.mrf.mxu0  ;;  %v2099_v40 = vadd.f32 %v8478_v9, %v8502_v35 }
 0x2db   : > { %v2050_v49 = vadd.f32 %v2049_v23, %v8492_v14  ;;  %v2121_v16 = vadd.f32 %v2120_v18, %v8492_v14  ;;  %v2314_v23 = vmax.f32 %v2046_v52, 0.0  ;;  %v2292_v9 = vmax.f32 %v2103_v58, 0.0 }
 0x2dc   : > { %v2122_v20 = vpop.f32.mrf.mxu1  ;;  %v2053_v62 = vpop.f32.mrf.mxu0 }
 0x2dd   : > { %v2054_v34 = vadd.f32 %v2053_v62, %v8486_v38  ;;  %v2123_v26 = vadd.f32 %v2122_v20, %v8492_v14  ;;  %v2322_v39 = vmax.f32 %v2050_v49, 0.0  ;;  %v2306_v49 = vmax.f32 %v8530_v7, 0.0 }
 0x2de   : > { %v2126_v1 = vpop.f32.mrf.mxu1  ;;  %v2055_v24 = vpop.f32.mrf.mxu0  ;;  %v2323_v52 = vmax.f32 %v2121_v16, 0.0  ;;  %v2298_v7 = vmax.f32 %v8520_v36, 0.0  ;;  %v2290_v36 = vmax.f32 %v8514_v63, 0.0 }
 0x2df   : > { %v2056_v53 = vadd.f32 %v2055_v24, %v8486_v38  ;;  %v2127_v29 = vadd.f32 %v2126_v1, %v8486_v38  ;;  %v2329_v41 = vmax.f32 %v2054_v34, 0.0  ;;  %v2324_v20 = vmax.f32 %v2123_v26, 0.0 }
 0x2e0   : > { %v2128_v57 = vpop.f32.mrf.mxu1  ;;  %v2057_v25 = vpop.f32.mrf.mxu0  ;;  %v2362_v34 = vpack.c.bf16 %v2322_v39, %v2314_v23  ;;  %v2354_v39 = vpack.c.bf16 %v2306_v49, %v2298_v7  ;;  %v2289_v23 = vmax.f32 %v8511_v3, 0.0 }
 0x2e1   : > { %v2058_v31 = vadd.f32 %v2057_v25, %v8484_v13  ;;  %v2129_v42 = vadd.f32 %v2128_v57, %v8486_v38  ;;  %v2330_v21 = vmax.f32 %v2056_v53, 0.0  ;;  %v2321_v57 = vmax.f32 %v2048_v51, 0.0 }
 0x2e2   : > { %v2130_v2 = vpop.f32.mrf.mxu1  ;;  %v2059_v28 = vpop.f32.mrf.mxu0  ;;  %v2331_v25 = vmax.f32 %v2127_v29, 0.0  ;;  %v2316_v53 = vmax.f32 %v2119_v37, 0.0  ;;  %v2308_v51 = vmax.f32 %v8535_v56, 0.0  ;;  %v2300_v56 = vmax.f32 %v8523_v47, 0.0 }
 0x2e3   : > { %v2131_v59 = vadd.f32 %v2130_v2, %v8484_v13  ;;  %v2060_v60 = vadd.f32 %v2059_v28, %v8484_v13  ;;  %v2337_v54 = vmax.f32 %v2058_v31, 0.0  ;;  %v2332_v62 = vmax.f32 %v2129_v42, 0.0 }
 0x2e4   : > { %v2132_v32 = vpop.f32.mrf.mxu1  ;;  %v8544_v5 = vpop.f32.mrf.mxu0  ;;  %v2356_v63 = vpack.c.bf16 %v2308_v51, %v2300_v56 }
 0x2e5   : > { %v2338_v10 = vmax.f32 %v2060_v60, 0.0  ;;  %v2133_v0 = vadd.f32 %v2132_v32, %v8484_v13  ;;  %v2339_v44 = vmax.f32 %v2131_v59, 0.0  ;;  %v2369_v31 = vpack.c.bf16 %v2337_v54, %v2329_v41 }
 0x2e6   : > { %v8552_v48 = vpop.f32.mrf.mxu0  ;;  %v2111_v59 = vadd.f32 %v8490_v61, %v8496_v17  ;;  %v2313_v60 = vmax.f32 %v2044_v43, 0.0  ;;  %v2364_v32 = vpack.c.bf16 %v2324_v20, %v2316_v53  ;;  %v2107_v61 = vadd.f32 %v8488_v27, %v8498_v45 }
 0x2e7   : > { %v8550_v50 = vpop.f32.mrf.mxu1  ;;  %v2340_v22 = vmax.f32 %v2133_v0, 0.0  ;;  %v2370_v33 = vpack.c.bf16 %v2338_v10, %v2330_v21  ;;  %v2371_v26 = vpack.c.bf16 %v2339_v44, %v2331_v25  ;;  %v2305_v54 = vmax.f32 %v8527_v6, 0.0 }
 0x2e8   : > { %v8557_v24 = vpop.f32.mrf.mxu0  ;;  %v2315_v10 = vmax.f32 %v2117_v15, 0.0  ;;  %v2361_v0 = vpack.c.bf16 %v2321_v57, %v2313_v60  ;;  %v2101_v27 = vadd.f32 %v8480_v19, %v8500_v30  ;;  %v2297_v6 = vmax.f32 %v8517_v46, 0.0 }
 0x2e9   : > { %v8555_v1 = vpop.f32.mrf.mxu1  ;;  %2561 = vmatprep.subr.bf16.mxu0 %v2370_v33  ;;  %v2372_v2 = vpack.c.bf16 %v2340_v22, %v2332_v62  ;;  %v2307_v21 = vmax.f32 %v2111_v59, 0.0  ;;  %v2282_v41 = vmax.f32 %v8508_v12, 0.0  ;;  %v2097_v22 = vadd.f32 %v8476_v55, %v8502_v35  ;;  %v8601_v59 = vld [vmem:[%s10616_s4] sm:$0xff]  }
 0x2ea   : > { %v8563_v28 = vpop.f32.mrf.mxu0  ;;  %2562 = vmatpush1.bf16.msra.mxu0 %v2369_v31  ;;  %v2363_v16 = vpack.c.bf16 %v2323_v52, %v2315_v10  ;;  %v2299_v20 = vmax.f32 %v2107_v61, 0.0  ;;  %v2353_v19 = vpack.c.bf16 %v2305_v54, %v2297_v6  ;;  %v2284_v46 = vmax.f32 %v2099_v40, 0.0  ;;  %v8612_v54 = vld [vmem:[%s10616_s4 + $0x8] sm:$0xff]  }
 0x2eb   : > { %v8561_v18 = vpop.f32.mrf.mxu1  ;;  %2674 = vmatprep.subr.bf16.mxu1 %v2372_v2  ;;  %2563 = vmatprep.subr.bf16.mxu0 %v2362_v34  ;;  %v2346_v12 = vpack.c.bf16 %v2290_v36, %v2282_v41  ;;  %v2281_v15 = vmax.f32 %v8505_v4, 0.0  ;;  %v2291_v57 = vmax.f32 %v2101_v27, 0.0  ;;  %v2283_v3 = vmax.f32 %v2097_v22, 0.0 }
 0x2ec   : > { %v8573_v29 = vpop.f32.mrf.mxu0  ;;  %2675 = vmatpush1.bf16.msra.mxu1 %v2371_v26  ;;  %v2355_v25 = vpack.c.bf16 %v2307_v21, %v2299_v20  ;;  %v2348_v55 = vpack.c.bf16 %v2292_v9, %v2284_v46  ;;  %v8616_v10 = vadd.f32 %v8544_v5, %v8502_v35  ;;  %v8624_v40 = vadd.f32 %v8557_v24, %v8500_v30 }
 0x2ed   : > { %v8571_v42 = vpop.f32.mrf.mxu1  ;;  %2676 = vmatprep.subr.bf16.mxu1 %v2364_v32  ;;  %v2345_v53 = vpack.c.bf16 %v2289_v23, %v2281_v15  ;;  %v2347_v4 = vpack.c.bf16 %v2291_v57, %v2283_v3  ;;  %v8628_v36 = vadd.f32 %v8563_v28, %v8500_v30  ;;  %v8632_v27 = vadd.f32 %v8573_v29, %v8498_v45 }
 0x2ee   : > { %v2181_v37 = vpop.f32.mrf.mxu0  ;;  %2564 = vmatpush1.bf16.msra.mxu0 %v2361_v0  ;;  %v8620_v0 = vadd.f32 %v8552_v48, %v8502_v35 }
 0x2ef   : > { %v8582_v43 = vpop.f32.mrf.mxu1  ;;  %2565 = vmatprep.subr.bf16.mxu0 %v2354_v39  ;;  %v8635_v5 = vadd.f32 %v2181_v37, %v8498_v45 }
 0x2f0   : > { %v2183_v47 = vpop.f32.mrf.mxu0  ;;  %2677 = vmatpush1.bf16.msra.mxu1 %v2363_v16 }
 0x2f1   : > { %v8588_v44 = vpop.f32.mrf.mxu1  ;;  %2678 = vmatprep.subr.bf16.mxu1 %v2356_v63  ;;  %v8640_v24 = vadd.f32 %v2183_v47, %v8496_v17 }
 0x2f2   : > { %v2185_v33 = vpop.f32.mrf.mxu0  ;;  %2566 = vmatpush1.bf16.msra.mxu0 %v2353_v19 }
 0x2f3   : > { %v8593_v62 = vpop.f32.mrf.mxu1  ;;  %2567 = vmatprep.subr.bf16.mxu0 %v2346_v12  ;;  %v8643_v21 = vadd.f32 %v2185_v33, %v8496_v17 }
 0x2f4   : > { %v2189_v49 = vpop.f32.mrf.mxu0  ;;  %2679 = vmatpush1.bf16.msra.mxu1 %v2355_v25 }
 0x2f5   : > { %v8596_v31 = vpop.f32.mrf.mxu1  ;;  %2680 = vmatprep.subr.bf16.mxu1 %v2348_v55  ;;  %v2190_v37 = vadd.f32 %v2189_v49, %v8494_v8 }
 0x2f6   : > { %v2191_v34 = vpop.f32.mrf.mxu0  ;;  %2568 = vmatpush1.bf16.msra.mxu0 %v2345_v53 }
 0x2f7   : > { %v2262_v2 = vpop.f32.mrf.mxu1  ;;  %v2192_v22 = vadd.f32 %v2191_v34, %v8494_v8 }
 0x2f8   : > { %v2193_v52 = vpop.f32.mrf.mxu0  ;;  %2681 = vmatpush1.bf16.msra.mxu1 %v2347_v4 }
 0x2f9   : > { %v2264_v60 = vpop.f32.mrf.mxu1  ;;  %6364 = vmatmul.mubr.msk.bf16.vlgmr.msra.gmra.mxu0 %vm1500_vm0, %v8601_v59  ;;  %v2194_v23 = vadd.f32 %v2193_v52, %v8492_v14 }
 0x2fa   : > { %v2195_v58 = vpop.f32.mrf.mxu0  ;;  %2595 = vmatprep.mubr.bf16.mxu0 %v10864_v11  ;;  %v2265_v25 = vadd.f32 %v2264_v60, %v8494_v8 }
 0x2fb   : > { %v2266_v26 = vpop.f32.mrf.mxu1  ;;  %6372 = vmatmul.mubr.msk.bf16.vlgmr.msra.gmra.mxu1 %vm1500_vm0, %v8601_v59  ;;  %v2196_v28 = vadd.f32 %v2195_v58, %v8492_v14  ;;  %v2263_v58 = vadd.f32 %v2262_v2, %v8494_v8  ;;  %v2257_v8 = vadd.f32 %v8593_v62, %v8496_v17 }
 0x2fc   : > { %v2199_v51 = vpop.f32.mrf.mxu0  ;;  %2708 = vmatprep.mubr.bf16.mxu1 %v10864_v11  ;;  %v2267_v55 = vadd.f32 %v2266_v26, %v8492_v14 }
 0x2fd   : > { %v2268_v7 = vpop.f32.mrf.mxu1  ;;  %v2200_v16 = vadd.f32 %v2199_v51, %v8486_v38  ;;  %v2326_v49 = vmax.f32 %v2196_v28, 0.0  ;;  %v2325_v51 = vmax.f32 %v2194_v23, 0.0  ;;  %v2249_v28 = vadd.f32 %v8571_v42, %v8500_v30 }
 0x2fe   : > { %v2201_v61 = vpop.f32.mrf.mxu0  ;;  %v2269_v20 = vadd.f32 %v2268_v7, %v8492_v14  ;;  %v2318_v7 = vmax.f32 %v2192_v22, 0.0  ;;  %v2327_v2 = vmax.f32 %v2267_v55, 0.0  ;;  %v2319_v62 = vmax.f32 %v2263_v58, 0.0 }
 0x2ff   : > { %v2272_v32 = vpop.f32.mrf.mxu1  ;;  %v2202_v48 = vadd.f32 %v2201_v61, %v8486_v38  ;;  %v2333_v3 = vmax.f32 %v2200_v16, 0.0  ;;  %v2255_v61 = vadd.f32 %v8588_v44, %v8498_v45  ;;  %v2302_v44 = vmax.f32 %v8635_v5, 0.0 }
 0x300   : > { %v2203_v39 = vpop.f32.mrf.mxu0  ;;  %v2273_v19 = vadd.f32 %v2272_v32, %v8486_v38  ;;  %v2328_v60 = vmax.f32 %v2269_v20, 0.0  ;;  %v2245_v42 = vadd.f32 %v8555_v1, %v8502_v35  ;;  %v2294_v5 = vmax.f32 %v8628_v36, 0.0 }
 0x301   : > { %v2274_v56 = vpop.f32.mrf.mxu1  ;;  %v2204_v6 = vadd.f32 %v2203_v39, %v8484_v13  ;;  %6365 = vmatmul.mubr.msk.bf16.gmra.mxu0 %vm1500_vm0, %v8612_v54  ;;  %v2334_v33 = vmax.f32 %v2202_v48, 0.0  ;;  %v2320_v39 = vmax.f32 %v2265_v25, 0.0  ;;  %v2366_v48 = vpack.c.bf16 %v2326_v49, %v2318_v7  ;;  %v6747_v25 = vld [vmem:[%s10616_s4 + $0x38] sm:$0xff]  }
 0x302   : > { %v2205_v29 = vpop.f32.mrf.mxu0  ;;  %v2275_v9 = vadd.f32 %v2274_v56, %v8486_v38  ;;  %2605 = vmatprep.mubr.bf16.mxu0 %v10864_v11  ;;  %v8667_v38 = vld [vmem:[%s10616_s4 + $0x10] sm:$0xff]   ;;  %v2335_v14 = vmax.f32 %v2273_v19, 0.0  ;;  %v2310_v56 = vmax.f32 %v8643_v21, 0.0  ;;  %v2286_v1 = vmax.f32 %v8620_v0, 0.0 }
 0x303   : > { %v2276_v41 = vpop.f32.mrf.mxu1  ;;  %v2206_v47 = vadd.f32 %v2205_v29, %v8484_v13  ;;  %6373 = vmatmul.mubr.msk.bf16.gmra.mxu1 %vm1500_vm0, %v8612_v54  ;;  %v2341_v12 = vmax.f32 %v2204_v6, 0.0  ;;  %v2368_v21 = vpack.c.bf16 %v2328_v60, %v2320_v39  ;;  %v2296_v36 = vmax.f32 %v2249_v28, 0.0 }
 0x304   : > { %v2277_v63 = vadd.f32 %v2276_v41, %v8484_v13  ;;  %2718 = vmatprep.mubr.bf16.mxu1 %v10864_v11  ;;  %v2336_v53 = vmax.f32 %v2275_v9, 0.0  ;;  %v2253_v41 = vadd.f32 %v8582_v43, %v8498_v45  ;;  %v2358_v9 = vpack.c.bf16 %v2310_v56, %v2302_v44  ;;  %v8695_v45 = vld [vmem:[%s10616_s4 + $0x18] sm:$0xff]  }
 0x305   : > { %v2278_v46 = vpop.f32.mrf.mxu1  ;;  %v2342_v15 = vmax.f32 %v2206_v47, 0.0  ;;  %v2373_v26 = vpack.c.bf16 %v2341_v12, %v2333_v3  ;;  %v2247_v43 = vadd.f32 %v8561_v18, %v8500_v30  ;;  %v2367_v47 = vpack.c.bf16 %v2327_v2, %v2319_v62 }
 0x306   : > { %v2279_v57 = vadd.f32 %v2278_v46, %v8484_v13  ;;  %v2343_v34 = vmax.f32 %v2277_v63, 0.0  ;;  %v2259_v13 = vadd.f32 %v8596_v31, %v8496_v17  ;;  %v2317_v31 = vmax.f32 %v2190_v37, 0.0 }
 0x307   : > { %v2374_v52 = vpack.c.bf16 %v2342_v15, %v2334_v33  ;;  %v2309_v17 = vmax.f32 %v8640_v24, 0.0  ;;  %v2304_v37 = vmax.f32 %v2255_v61, 0.0  ;;  %v2301_v24 = vmax.f32 %v8632_v27, 0.0  ;;  %v6745_v15 = vld [vmem:[%s10616_s4 + $0x28] sm:$0xff]  }
 0x308   : > { %v2344_v4 = vmax.f32 %v2279_v57, 0.0  ;;  %v2375_v6 = vpack.c.bf16 %v2343_v34, %v2335_v14  ;;  %v2312_v16 = vmax.f32 %v2259_v13, 0.0  ;;  %v2365_v29 = vpack.c.bf16 %v2325_v51, %v2317_v31  ;;  %v6746_v57 = vld [vmem:[%s10616_s4 + $0x30] sm:$0xff]  }
 0x309   : > { %2787 = vmatprep.subr.bf16.mxu0 %v2374_v52  ;;  %6366 = vmatmul.mubr.msk.bf16.gmra.mxu0 %vm1500_vm0, %v8667_v38  ;;  %v2311_v63 = vmax.f32 %v2257_v8, 0.0  ;;  %v2243_v23 = vadd.f32 %v8550_v50, %v8502_v35  ;;  %v2293_v20 = vmax.f32 %v8624_v40, 0.0  ;;  %v2303_v19 = vmax.f32 %v2253_v41, 0.0 }
 0x30a   : > { %v2376_v32 = vpack.c.bf16 %v2344_v4, %v2336_v53  ;;  %2788 = vmatpush1.bf16.msra.mxu0 %v2373_v26  ;;  %2615 = vmatprep.mubr.bf16.mxu0 %v10864_v11  ;;  %v2360_v22 = vpack.c.bf16 %v2312_v16, %v2304_v37  ;;  %v2357_v46 = vpack.c.bf16 %v2309_v17, %v2301_v24  ;;  %v2288_v33 = vmax.f32 %v2245_v42, 0.0 }
 0x30b   : > { %6374 = vmatmul.mubr.msk.bf16.gmra.mxu1 %vm1500_vm0, %v8667_v38  ;;  %2789 = vmatprep.subr.bf16.mxu0 %v2366_v48  ;;  %v2350_v30 = vpack.c.bf16 %v2294_v5, %v2286_v1  ;;  %v2285_v18 = vmax.f32 %v8616_v10, 0.0  ;;  %v2295_v0 = vmax.f32 %v2247_v43, 0.0  ;;  %v2359_v27 = vpack.c.bf16 %v2311_v63, %v2303_v19  ;;  %v6744_v10 = vld [vmem:[%s10616_s4 + $0x20] sm:$0xff]  }
 0x30c   : > { %2900 = vmatprep.subr.bf16.mxu1 %v2376_v32  ;;  %2728 = vmatprep.mubr.bf16.mxu1 %v10864_v11  ;;  %v2352_v35 = vpack.c.bf16 %v2296_v36, %v2288_v33  ;;  %v2287_v50 = vmax.f32 %v2243_v23, 0.0 }
 0x30d   : > { %2901 = vmatpush1.bf16.msra.mxu1 %v2375_v6  ;;  %v2349_v40 = vpack.c.bf16 %v2293_v20, %v2285_v18 }
 0x30e   : > { %2902 = vmatprep.subr.bf16.mxu1 %v2368_v21  ;;  %2790 = vmatpush1.bf16.msra.mxu0 %v2365_v29  ;;  %v2351_v12 = vpack.c.bf16 %v2295_v0, %v2287_v50 }
 0x30f   : > { %2791 = vmatprep.subr.bf16.mxu0 %v2358_v9 }
 0x311   : > { %2903 = vmatpush1.bf16.msra.mxu1 %v2367_v47  ;;  %6367 = vmatmul.mubr.msk.bf16.gmra.mxu0 %vm1500_vm0, %v8695_v45 }
 0x312   : > { %2904 = vmatprep.subr.bf16.mxu1 %v2360_v22  ;;  %2792 = vmatpush1.bf16.msra.mxu0 %v2357_v46 }
 0x313   : > { %2625 = vmatprep.mubr.bf16.mxu0 %v10864_v11  ;;  %6375 = vmatmul.mubr.msk.bf16.gmra.mxu1 %vm1500_vm0, %v8695_v45 }
 0x314   : > { %2793 = vmatprep.subr.bf16.mxu0 %v2350_v30  ;;  %2738 = vmatprep.mubr.bf16.mxu1 %v10864_v11 }
 0x315   : > { %2905 = vmatpush1.bf16.msra.mxu1 %v2359_v27 }
 0x316   : > { %2906 = vmatprep.subr.bf16.mxu1 %v2352_v35  ;;  %2794 = vmatpush1.bf16.msra.mxu0 %v2349_v40 }
 0x319   : > { %2907 = vmatpush1.bf16.msra.mxu1 %v2351_v12  ;;  %6368 = vmatmul.mubr.msk.bf16.gmra.mxu0 %vm1500_vm0, %v6744_v10 }
 0x31a   : > { %2635 = vmatprep.mubr.bf16.mxu0 %v10864_v11 }
 0x31b   : > { %6376 = vmatmul.mubr.msk.bf16.gmra.mxu1 %vm1500_vm0, %v6744_v10 }
 0x31c   : > { %2748 = vmatprep.mubr.bf16.mxu1 %v10864_v11 }
 0x321   : > { %6369 = vmatmul.mubr.msk.bf16.gmra.mxu0 %vm1500_vm0, %v6745_v15 }
 0x322   : > { %2645 = vmatprep.mubr.bf16.mxu0 %v10864_v11 }
 0x323   : > { %6377 = vmatmul.mubr.msk.bf16.gmra.mxu1 %vm1500_vm0, %v6745_v15 }
 0x324   : > { %2758 = vmatprep.mubr.bf16.mxu1 %v10864_v11 }
 0x329   : > { %6370 = vmatmul.mubr.msk.bf16.gmra.mxu0 %vm1500_vm0, %v6746_v57 }
 0x32a   : > { %2655 = vmatprep.mubr.bf16.mxu0 %v10864_v11 }
 0x32b   : > { %6378 = vmatmul.mubr.msk.bf16.gmra.mxu1 %vm1500_vm0, %v6746_v57 }
 0x32c   : > { %2768 = vmatprep.mubr.bf16.mxu1 %v10864_v11 }
 0x331   : > { %6371 = vmatmul.mubr.msk.bf16.gmra.mxu0 %vm1500_vm0, %v6747_v25 }
 0x332   : > { %2811 = vmatprep.mubr.bf16.mxu0 %v10864_v11 }
 0x333   : > { %6379 = vmatmul.mubr.msk.bf16.gmra.mxu1 %vm1500_vm0, %v6747_v25 }
 0x334   : > { %2924 = vmatprep.mubr.bf16.mxu1 %v10864_v11 }
 0x339   : > { %6380 = vmatmul.mubr.msk.bf16.vlgmr.msra.gmra.mxu0 %vm1500_vm0, %v8601_v59 }
 0x33a   : > { %2821 = vmatprep.mubr.bf16.mxu0 %v10864_v11 }
 0x33b   : > { %6388 = vmatmul.mubr.msk.bf16.vlgmr.msra.gmra.mxu1 %vm1500_vm0, %v8601_v59  ;;  %v8779_v59 = vpop.permute.xlu1 %2481 }
 0x33c   : > { %2934 = vmatprep.mubr.bf16.mxu1 %v10864_v11  ;;  %10878 = vst [vmem:[#allocation24_spill] sm:$0xff] %v8779_v59 }
 0x33f   : > { %v8783_v55 = vpop.permute.xlu1 %2471 }
 0x340   : > { %10880 = vst [vmem:[#allocation30_spill] sm:$0xff] %v8783_v55 }
 0x341   : > { %6381 = vmatmul.mubr.msk.bf16.gmra.mxu0 %vm1500_vm0, %v8612_v54 }
 0x342   : > { %2831 = vmatprep.mubr.bf16.mxu0 %v10864_v11 }
 0x343   : > { %6389 = vmatmul.mubr.msk.bf16.gmra.mxu1 %vm1500_vm0, %v8612_v54  ;;  %v8781_v54 = vpop.permute.xlu0 %2486  ;;  %v8787_v3 = vpop.permute.xlu1 %2461 }
 0x344   : > { %2944 = vmatprep.mubr.bf16.mxu1 %v10864_v11  ;;  %10879 = vst [vmem:[#allocation18_spill] sm:$0xff] %v8781_v54  ;;  %10881 = vst [vmem:[#allocation31_spill] sm:$0xff] %v8787_v3 }
 0x347   : > { %v8785_v49 = vpop.permute.xlu0 %2476  ;;  %v8791_v53 = vpop.permute.xlu1 %2451 }
 0x348   : > { %10883 = vst [vmem:[#allocation36_spill] sm:$0xff] %v8791_v53 }
 0x349   : > { %6382 = vmatmul.mubr.msk.bf16.gmra.mxu0 %vm1500_vm0, %v8667_v38 }
 0x34a   : > { %2841 = vmatprep.mubr.bf16.mxu0 %v10864_v11 }
 0x34b   : > { %6390 = vmatmul.mubr.msk.bf16.gmra.mxu1 %vm1500_vm0, %v8667_v38  ;;  %v8789_v38 = vpop.permute.xlu0 %2466  ;;  %v8795_v4 = vpop.permute.xlu1 %2441 }
 0x34c   : > { %2954 = vmatprep.mubr.bf16.mxu1 %v10864_v11  ;;  %10882 = vst [vmem:[#allocation32_spill] sm:$0xff] %v8789_v38  ;;  %10885 = vst [vmem:[#allocation19_spill] sm:$0xff] %v8795_v4 }
 0x34f   : > { %v8793_v34 = vpop.permute.xlu0 %2456  ;;  %v8799_v13 = vpop.permute.xlu1 %2431 }
 0x350   : > { %10884 = vst [vmem:[#allocation34_spill] sm:$0xff] %v8793_v34 }
 0x351   : > { %6383 = vmatmul.mubr.msk.bf16.gmra.mxu0 %vm1500_vm0, %v8695_v45 }
 0x352   : > { %2851 = vmatprep.mubr.bf16.mxu0 %v10864_v11 }
 0x353   : > { %6391 = vmatmul.mubr.msk.bf16.gmra.mxu1 %vm1500_vm0, %v8695_v45  ;;  %v8797_v52 = vpop.permute.xlu0 %2446  ;;  %v8803_v7 = vpop.permute.xlu1 %2421 }
 0x354   : > { %2964 = vmatprep.mubr.bf16.mxu1 %v10864_v11  ;;  %10886 = vst [vmem:[#allocation25_spill] sm:$0xff] %v8797_v52  ;;  %10888 = vst [vmem:[#allocation21_spill] sm:$0xff] %v8803_v7 }
 0x357   : > { %v8801_v58 = vpop.permute.xlu0 %2436  ;;  %v8807_v14 = vpop.permute.xlu1 %2411 }
 0x358   : > { %10887 = vst [vmem:[#allocation20_spill] sm:$0xff] %v8801_v58  ;;  %10890 = vst [vmem:[#allocation26_spill] sm:$0xff] %v8807_v14 }
 0x359   : > { %6384 = vmatmul.mubr.msk.bf16.gmra.mxu0 %vm1500_vm0, %v6744_v10 }
 0x35a   : > { %2861 = vmatprep.mubr.bf16.mxu0 %v10864_v11 }
 0x35b   : > { %6392 = vmatmul.mubr.msk.bf16.gmra.mxu1 %vm1500_vm0, %v6744_v10  ;;  %v8805_v60 = vpop.permute.xlu0 %2426 }
 0x35c   : > { %2974 = vmatprep.mubr.bf16.mxu1 %v10864_v11  ;;  %10889 = vst [vmem:[#allocation37_spill] sm:$0xff] %v8805_v60 }
 0x35f   : > { %v8811_v61 = vpop.permute.xlu0 %2416 }
 0x360   : > { %10891 = vst [vmem:[#allocation22_spill] sm:$0xff] %v8811_v61 }
 0x361   : > { %6385 = vmatmul.mubr.msk.bf16.gmra.mxu0 %vm1500_vm0, %v6745_v15 }
 0x362   : > { %2871 = vmatprep.mubr.bf16.mxu0 %v10864_v11 }
 0x363   : > { %6393 = vmatmul.mubr.msk.bf16.gmra.mxu1 %vm1500_vm0, %v6745_v15 }
 0x364   : > { %2984 = vmatprep.mubr.bf16.mxu1 %v10864_v11 }
 0x369   : > { %6386 = vmatmul.mubr.msk.bf16.gmra.mxu0 %vm1500_vm0, %v6746_v57 }
 0x36a   : > { %2881 = vmatprep.mubr.bf16.mxu0 %v10864_v11 }
 0x36b   : > { %6394 = vmatmul.mubr.msk.bf16.gmra.mxu1 %vm1500_vm0, %v6746_v57 }
 0x36c   : > { %2994 = vmatprep.mubr.bf16.mxu1 %v10864_v11 }
 0x371   : > { %6387 = vmatmul.mubr.msk.bf16.gmra.mxu0 %vm1500_vm0, %v6747_v25 }
 0x372   : > { %3549 = vmatprep.mubr.bf16.mxu0 %v10864_v11 }
 0x373   : > { %6395 = vmatmul.mubr.msk.bf16.gmra.mxu1 %vm1500_vm0, %v6747_v25 }
 0x374   : > { %3742 = vmatprep.mubr.bf16.mxu1 %v10864_v11 }
 0x3b9   : > { %v2587_v51 = vpop.f32.mrf.mxu0 }
 0x3ba   : > { %v2588_v56 = vadd.f32 %v2587_v51, %v8807_v14 }
 0x3bb   : > { %v2700_v26 = vpop.f32.mrf.mxu1  ;;  %v8809_v32 = vpop.f32.mrf.mxu0 }
 0x3bc   : > { %v2701_v8 = vadd.f32 %v2700_v26, %v8807_v14  ;;  %v3005_v28 = vmax.f32 %v2588_v56, 0.0 }
 0x3bd   : > { %v8814_v39 = vpop.f32.mrf.mxu1  ;;  %v2591_v48 = vpop.f32.mrf.mxu0 }
 0x3be   : > { %10892 = vst [vmem:[#allocation38_spill] sm:$0xff] %v8814_v39  ;;  %v2592_v31 = vadd.f32 %v2591_v48, %v8811_v61  ;;  %v3007_v17 = vmax.f32 %v2701_v8, 0.0 }
 0x3bf   : > { %v2704_v2 = vpop.f32.mrf.mxu1  ;;  %v8818_v6 = vpop.f32.mrf.mxu0 }
 0x3c0   : > { %v3013_v44 = vmax.f32 %v2592_v31, 0.0  ;;  %v2705_v16 = vadd.f32 %v2704_v2, %v8811_v61 }
 0x3c1   : > { %v8821_v21 = vpop.f32.mrf.mxu1  ;;  %v2597_v41 = vpop.f32.mrf.mxu0 }
 0x3c2   : > { %10893 = vst [vmem:[#allocation50_spill] sm:$0xff] %v8821_v21  ;;  %v8823_v62 = vpack.c.bf16 %v3013_v44, %v3005_v28  ;;  %v3015_v29 = vmax.f32 %v2705_v16, 0.0  ;;  %v2598_v9 = vadd.f32 %v2597_v41, %v8803_v7 }
 0x3c3   : > { %v2710_v42 = vpop.f32.mrf.mxu1  ;;  %v8825_v5 = vpop.f32.mrf.mxu0 }
 0x3c4   : > { %10894 = vst [vmem:[#allocation51_spill] sm:$0xff] %v8823_v62  ;;  %v8827_v37 = vpack.c.bf16 %v3015_v29, %v3007_v17  ;;  %v2711_v24 = vadd.f32 %v2710_v42, %v8803_v7  ;;  %v3021_v36 = vmax.f32 %v2598_v9, 0.0  ;;  %v8859_v62 = vadd.f32 %v8809_v32, %v8807_v14 }
 0x3c5   : > { %v8830_v45 = vpop.f32.mrf.mxu1  ;;  %v2601_v43 = vpop.f32.mrf.mxu0 }
 0x3c6   : > { %10895 = vst [vmem:[#allocation52_spill] sm:$0xff] %v8827_v37  ;;  %10896 = vst [vmem:[#allocation54_spill] sm:$0xff] %v8830_v45  ;;  %v2602_v63 = vadd.f32 %v2601_v43, %v8805_v60  ;;  %v3023_v46 = vmax.f32 %v2711_v24, 0.0 }
 0x3c7   : > { %v2714_v47 = vpop.f32.mrf.mxu1  ;;  %v2603_v1 = vpop.f32.mrf.mxu0  ;;  %10902 = vst [vmem:[#allocation68_spill] sm:$0xff] %v8859_v62 }
 0x3c8   : > { %v3029_v22 = vmax.f32 %v2602_v63, 0.0  ;;  %v2715_v23 = vadd.f32 %v2714_v47, %v8805_v60 }
 0x3c9   : > { %v8835_v20 = vpop.f32.mrf.mxu1  ;;  %v2607_v19 = vpop.f32.mrf.mxu0 }
 0x3ca   : > { %10897 = vst [vmem:[#allocation43_spill] sm:$0xff] %v8835_v20  ;;  %v8837_v33 = vpack.c.bf16 %v3029_v22, %v3021_v36  ;;  %v3031_v30 = vmax.f32 %v2715_v23, 0.0  ;;  %v2608_v35 = vadd.f32 %v2607_v19, %v8799_v13 }
 0x3cb   : > { %v2720_v18 = vpop.f32.mrf.mxu1  ;;  %v2609_v0 = vpop.f32.mrf.mxu0 }
 0x3cc   : > { %10898 = vst [vmem:[#allocation58_spill] sm:$0xff] %v8837_v33  ;;  %v8839_v27 = vpack.c.bf16 %v3031_v30, %v3023_v46  ;;  %v2721_v10 = vadd.f32 %v2720_v18, %v8799_v13  ;;  %v3037_v25 = vmax.f32 %v2608_v35, 0.0  ;;  %v8867_v33 = vadd.f32 %v8825_v5, %v8803_v7 }
 0x3cd   : > { %v2722_v50 = vpop.f32.mrf.mxu1  ;;  %v2611_v40 = vpop.f32.mrf.mxu0 }
 0x3ce   : > { %10899 = vst [vmem:[#allocation6_spill] sm:$0xff] %v8839_v27  ;;  %v2612_v12 = vadd.f32 %v2611_v40, %v8801_v58  ;;  %v3039_v8 = vmax.f32 %v2721_v10, 0.0  ;;  %v8863_v27 = vadd.f32 %v8818_v6, %v8811_v61  ;;  %10904 = vst [vmem:[#allocation27_spill] sm:$0xff] %v8867_v33 }
 0x3cf   : > { %v2724_v15 = vpop.f32.mrf.mxu1  ;;  %v2613_v57 = vpop.f32.mrf.mxu0 }
 0x3d0   : > { %v3045_v51 = vmax.f32 %v2612_v12, 0.0  ;;  %v2725_v26 = vadd.f32 %v2724_v15, %v8801_v58  ;;  %10903 = vst [vmem:[#allocation69_spill] sm:$0xff] %v8863_v27  ;;  %v8879_v32 = vadd.f32 %v2613_v57, %v8801_v58 }
 0x3d1   : > { %v2726_v56 = vpop.f32.mrf.mxu1  ;;  %v2617_v48 = vpop.f32.mrf.mxu0 }
 0x3d2   : > { %v8845_v31 = vpack.c.bf16 %v3045_v51, %v3037_v25  ;;  %v3047_v2 = vmax.f32 %v2725_v26, 0.0  ;;  %v8882_v62 = vadd.f32 %v2726_v56, %v8801_v58  ;;  %v8885_v5 = vadd.f32 %v2617_v48, %v8795_v4 }
 0x3d3   : > { %v2730_v28 = vpop.f32.mrf.mxu1  ;;  %v2619_v44 = vpop.f32.mrf.mxu0 }
 0x3d4   : > { %10900 = vst [vmem:[#allocation66_spill] sm:$0xff] %v8845_v31  ;;  %v8847_v16 = vpack.c.bf16 %v3047_v2, %v3039_v8  ;;  %v8850_v8 = vadd.f32 %v2619_v44, %v8795_v4  ;;  %v8870_v44 = vadd.f32 %v2603_v1, %v8805_v60  ;;  %10908 = vst [vmem:[#allocation59_spill] sm:$0xff] %v8882_v62 }
 0x3d5   : > { %v2732_v41 = vpop.f32.mrf.mxu1  ;;  %v2621_v17 = vpop.f32.mrf.mxu0  ;;  %v8888_v1 = vadd.f32 %v2730_v28, %v8795_v4 }
 0x3d6   : > { %10901 = vst [vmem:[#allocation67_spill] sm:$0xff] %v8847_v16  ;;  %10905 = vst [vmem:[#allocation11_spill] sm:$0xff] %v8870_v44  ;;  %v8876_v16 = vadd.f32 %v2722_v50, %v8799_v13  ;;  %v8892_v27 = vadd.f32 %v2732_v41, %v8795_v4  ;;  %v8895_v50 = vadd.f32 %v2621_v17, %v8797_v52 }
 0x3d7   : > { %v2734_v29 = vpop.f32.mrf.mxu1  ;;  %v2623_v42 = vpop.f32.mrf.mxu0  ;;  %10909 = vst [vmem:[#allocation8_spill] sm:$0xff] %v8888_v1 }
 0x3d8   : > { %v8853_v2 = vadd.f32 %v2623_v42, %v8797_v52  ;;  %v8873_v42 = vadd.f32 %v2609_v0, %v8799_v13  ;;  %10907 = vst [vmem:[#allocation44_spill] sm:$0xff] %v8876_v16  ;;  %v8898_v57 = vadd.f32 %v2734_v29, %v8797_v52 }
 0x3d9   : > { %v2736_v9 = vpop.f32.mrf.mxu1  ;;  %v2627_v43 = vpop.f32.mrf.mxu0 }
 0x3da   : > { %10906 = vst [vmem:[#allocation7_spill] sm:$0xff] %v8873_v42  ;;  %v8905_v28 = vadd.f32 %v2736_v9, %v8797_v52  ;;  %v8908_v0 = vadd.f32 %v2627_v43, %v8791_v53 }
 0x3db   : > { %v2740_v24 = vpop.f32.mrf.mxu1  ;;  %v2629_v63 = vpop.f32.mrf.mxu0 }
 0x3dc   : > { %v8911_v41 = vadd.f32 %v2740_v24, %v8791_v53  ;;  %v8917_v29 = vadd.f32 %v2629_v63, %v8791_v53 }
 0x3dd   : > { %v2742_v47 = vpop.f32.mrf.mxu1  ;;  %v2631_v36 = vpop.f32.mrf.mxu0 }
 0x3de   : > { %v8923_v56 = vadd.f32 %v2631_v36, %v8793_v34 }
 0x3df   : > { %v2744_v22 = vpop.f32.mrf.mxu1  ;;  %v2633_v23 = vpop.f32.mrf.mxu0 }
 0x3e0   : > { %v8926_v9 = vadd.f32 %v2744_v22, %v8793_v34  ;;  %v8929_v24 = vadd.f32 %v2633_v23, %v8793_v34 }
 0x3e1   : > { %v2746_v19 = vpop.f32.mrf.mxu1  ;;  %v2637_v46 = vpop.f32.mrf.mxu0 }
 0x3e2   : > { %v8935_v63 = vadd.f32 %v2637_v46, %v8787_v3 }
 0x3e3   : > { %v2750_v30 = vpop.f32.mrf.mxu1  ;;  %v2639_v18 = vpop.f32.mrf.mxu0 }
 0x3e4   : > { %v8902_v39 = vadd.f32 %v2639_v18, %v8787_v3  ;;  %v8920_v18 = vadd.f32 %v2742_v47, %v8791_v53  ;;  %v8941_v36 = vadd.f32 %v2750_v30, %v8787_v3 }
 0x3e5   : > { %v2752_v35 = vpop.f32.mrf.mxu1  ;;  %v2641_v40 = vpop.f32.mrf.mxu0 }
 0x3e6   : > { %v8945_v53 = vadd.f32 %v2752_v35, %v8787_v3 }
 0x3e7   : > { %v2754_v10 = vpop.f32.mrf.mxu1  ;;  %v2643_v12 = vpop.f32.mrf.mxu0 }
 0x3e8   : > { %v8914_v17 = vadd.f32 %v2643_v12, %v8789_v38  ;;  %v8932_v12 = vadd.f32 %v2746_v19, %v8793_v34  ;;  %v8949_v19 = vadd.f32 %v2641_v40, %v8789_v38  ;;  %v8952_v46 = vadd.f32 %v2754_v10, %v8789_v38 }
 0x3e9   : > { %v2756_v15 = vpop.f32.mrf.mxu1  ;;  %v2647_v25 = vpop.f32.mrf.mxu0 }
 0x3ea   : > { %v8938_v47 = vadd.f32 %v2647_v25, %v8783_v55  ;;  %v8957_v34 = vadd.f32 %v2756_v15, %v8789_v38 }
 0x3eb   : > { %v2760_v51 = vpop.f32.mrf.mxu1  ;;  %v2649_v26 = vpop.f32.mrf.mxu0 }
 0x3ec   : > { %v2650_v23 = vadd.f32 %v2649_v26, %v8783_v55  ;;  %v8960_v35 = vadd.f32 %v2760_v51, %v8783_v55  ;;  %v3101_v16 = vmax.f32 %v8938_v47, 0.0 }
 0x3ed   : > { %v8855_v11 = vpop.f32.mrf.mxu1  ;;  %v2651_v37 = vpop.f32.mrf.mxu0 }
 0x3ee   : > { %v3102_v44 = vmax.f32 %v2650_v23, 0.0  ;;  %v2652_v15 = vadd.f32 %v2651_v37, %v8785_v49 }
 0x3ef   : > { %v2764_v6 = vpop.f32.mrf.mxu1  ;;  %v2653_v31 = vpop.f32.mrf.mxu0 }
 0x3f0   : > { %v2654_v26 = vadd.f32 %v2653_v31, %v8785_v49 }
 0x3f1   : > { %v2766_v48 = vpop.f32.mrf.mxu1  ;;  %v2657_v33 = vpop.f32.mrf.mxu0 }
 0x3f2   : > { %v2658_v10 = vadd.f32 %v2657_v33, %v8779_v59  ;;  %v2767_v51 = vadd.f32 %v2766_v48, %v8785_v49  ;;  %v2765_v33 = vadd.f32 %v2764_v6, %v8785_v49  ;;  %v3110_v23 = vmax.f32 %v2654_v26, 0.0 }
 0x3f3   : > { %v2770_v43 = vpop.f32.mrf.mxu1  ;;  %v2659_v52 = vpop.f32.mrf.mxu0 }
 0x3f4   : > { %v2660_v22 = vadd.f32 %v2659_v52, %v8779_v59  ;;  %v2771_v52 = vadd.f32 %v2770_v43, %v8779_v59  ;;  %v3117_v48 = vmax.f32 %v2658_v10, 0.0  ;;  %v3109_v43 = vmax.f32 %v2652_v15, 0.0 }
 0x3f5   : > { %v2772_v4 = vpop.f32.mrf.mxu1  ;;  %v2661_v21 = vpop.f32.mrf.mxu0 }
 0x3f6   : > { %v2662_v30 = vadd.f32 %v2661_v21, %v8781_v54  ;;  %v2773_v38 = vadd.f32 %v2772_v4, %v8779_v59 }
 0x3f7   : > { %v2774_v3 = vpop.f32.mrf.mxu1  ;;  %v2663_v40 = vpop.f32.mrf.mxu0 }
 0x3f8   : > { %v2775_v25 = vadd.f32 %v2774_v3, %v8781_v54  ;;  %v2664_v21 = vadd.f32 %v2663_v40, %v8781_v54  ;;  %v3125_v58 = vmax.f32 %v2662_v30, 0.0  ;;  %v2763_v3 = vadd.f32 %v8855_v11, %v8783_v55 }
 0x3f9   : > { %v2776_v31 = vpop.f32.mrf.mxu1  ;;  %v2813_v45 = vpop.f32.mrf.mxu0  ;;  %v3118_v40 = vmax.f32 %v2660_v22, 0.0  ;;  %v3112_v30 = vmax.f32 %v2767_v51, 0.0  ;;  %v3119_v11 = vmax.f32 %v2771_v52, 0.0  ;;  %v3103_v52 = vmax.f32 %v8960_v35, 0.0 }
 0x3fa   : > { %v3126_v1 = vmax.f32 %v2664_v21, 0.0  ;;  %v2777_v47 = vadd.f32 %v2776_v31, %v8781_v54  ;;  %v3127_v4 = vmax.f32 %v2775_v25, 0.0  ;;  %v2814_v20 = vadd.f32 %v2813_v45, %v8807_v14 }
 0x3fb   : > { %v2926_v37 = vpop.f32.mrf.mxu1  ;;  %v8976_v62 = vpop.f32.mrf.mxu0  ;;  %v3120_v21 = vmax.f32 %v2773_v38, 0.0  ;;  %v3189_v55 = vpack.c.bf16 %v3125_v58, %v3117_v48  ;;  %v3104_v26 = vmax.f32 %v2763_v3, 0.0  ;;  %v3182_v45 = vpack.c.bf16 %v3110_v23, %v3102_v44 }
 0x3fc   : > { %10910 = vst [vmem:[#allocation12_spill] sm:$0xff] %v8976_v62  ;;  %v3128_v42 = vmax.f32 %v2777_v47, 0.0  ;;  %v3190_v54 = vpack.c.bf16 %v3126_v1, %v3118_v40  ;;  %v2927_v6 = vadd.f32 %v2926_v37, %v8807_v14  ;;  %v3111_v62 = vmax.f32 %v2765_v33, 0.0 }
 0x3fd   : > { %v8979_v59 = vpop.f32.mrf.mxu1  ;;  %v2817_v31 = vpop.f32.mrf.mxu0  ;;  %v3191_v15 = vpack.c.bf16 %v3127_v4, %v3119_v11  ;;  %v3009_v38 = vmax.f32 %v2814_v20, 0.0  ;;  %v3093_v58 = vmax.f32 %v8949_v19, 0.0  ;;  %v3096_v1 = vmax.f32 %v8957_v34, 0.0 }
 0x3fe   : > { %10911 = vst [vmem:[#allocation28_spill] sm:$0xff] %v8979_v59  ;;  %v2818_v22 = vadd.f32 %v2817_v31, %v8811_v61  ;;  %3517 = vmatprep.subr.bf16.mxu0 %v3190_v54  ;;  %v3192_v25 = vpack.c.bf16 %v3128_v42, %v3120_v21  ;;  %v3184_v54 = vpack.c.bf16 %v3112_v30, %v3104_v26  ;;  %v3011_v44 = vmax.f32 %v2927_v6, 0.0 }
 0x3ff   : > { %v2930_v10 = vpop.f32.mrf.mxu1  ;;  %v8983_v47 = vpop.f32.mrf.mxu0  ;;  %3518 = vmatpush1.bf16.msra.mxu0 %v3189_v55  ;;  %v3181_v33 = vpack.c.bf16 %v3109_v43, %v3101_v16  ;;  %v3078_v55 = vmax.f32 %v8929_v24, 0.0  ;;  %v3085_v19 = vmax.f32 %v8935_v63, 0.0  ;;  %v3088_v34 = vmax.f32 %v8945_v53, 0.0 }
 0x400   : > { %10912 = vst [vmem:[#allocation45_spill] sm:$0xff] %v8983_v47  ;;  %v3017_v51 = vmax.f32 %v2818_v22, 0.0  ;;  %v2931_v59 = vadd.f32 %v2930_v10, %v8811_v61  ;;  %3710 = vmatprep.subr.bf16.mxu1 %v3192_v25  ;;  %3519 = vmatprep.subr.bf16.mxu0 %v3182_v45  ;;  %v10916_v37 = vmax.f32 %v8902_v39, 0.0  ;;  %v10917_v48 = vmax.f32 %v8914_v17, 0.0  ;;  %v10962_v47 = vld [vmem:[#allocation18_spill] sm:$0xff] }
 0x401   : > { %v8989_v3 = vpop.f32.mrf.mxu1  ;;  %v2823_v42 = vpop.f32.mrf.mxu0  ;;  %3711 = vmatpush1.bf16.msra.mxu1 %v3191_v15  ;;  %v3095_v4 = vmax.f32 %v8952_v46, 0.0  ;;  %v3183_v43 = vpack.c.bf16 %v3111_v62, %v3103_v52  ;;  %v3070_v63 = vmax.f32 %v8917_v29, 0.0  ;;  %v3077_v53 = vmax.f32 %v8923_v56, 0.0 }
 0x402   : > { %10913 = vst [vmem:[#allocation60_spill] sm:$0xff] %v8989_v3  ;;  %v8991_v23 = vpack.c.bf16 %v3017_v51, %v3009_v38  ;;  %v3019_v20 = vmax.f32 %v2931_v59, 0.0  ;;  %3712 = vmatprep.subr.bf16.mxu1 %v3184_v54  ;;  %v3174_v16 = vpack.c.bf16 %v10917_v48, %v10916_v37  ;;  %v2824_v24 = vadd.f32 %v2823_v42, %v8803_v7  ;;  %v10926_v37 = vld [vmem:[#allocation7_spill] sm:$0xff] }
 0x403   : > { %v2936_v35 = vpop.f32.mrf.mxu1  ;;  %v8996_v40 = vpop.f32.mrf.mxu0  ;;  %3520 = vmatpush1.bf16.msra.mxu0 %v3181_v33  ;;  %v3080_v30 = vmax.f32 %v8932_v12, 0.0  ;;  %v3176_v39 = vpack.c.bf16 %v3096_v1, %v3088_v34  ;;  %v3087_v31 = vmax.f32 %v8941_v36, 0.0  ;;  %v3173_v46 = vpack.c.bf16 %v3093_v58, %v3085_v19 }
 0x404   : > { %10914 = vst [vmem:[#allocation13_spill] sm:$0xff] %v8991_v23  ;;  %10915 = vst [vmem:[#allocation29_spill] sm:$0xff] %v8996_v40  ;;  %v9003_v59 = vpack.c.bf16 %v3019_v20, %v3011_v44  ;;  %3521 = vmatprep.subr.bf16.mxu0 %v3174_v16  ;;  %v2937_v62 = vadd.f32 %v2936_v35, %v8803_v7  ;;  %v3069_v6 = vmax.f32 %v8908_v0, 0.0  ;;  %v3072_v29 = vmax.f32 %v8920_v18, 0.0  ;;  %v10927_v16 = vld [vmem:[#allocation59_spill] sm:$0xff] }
 0x405   : > { %v9009_v21 = vpop.f32.mrf.mxu1  ;;  %v2827_v17 = vpop.f32.mrf.mxu0  ;;  %3713 = vmatpush1.bf16.msra.mxu1 %v3183_v43  ;;  %v3079_v56 = vmax.f32 %v8926_v9, 0.0  ;;  %v3166_v26 = vpack.c.bf16 %v3078_v55, %v3070_v63  ;;  %v3175_v10 = vpack.c.bf16 %v3095_v4, %v3087_v31  ;;  %v3025_v25 = vmax.f32 %v2824_v24, 0.0  ;;  %v10929_v24 = vld [vmem:[#allocation8_spill] sm:$0xff] }
 0x406   : > { %10918 = vst [vmem:[#allocation10_spill] sm:$0xff] %v9003_v59  ;;  %10919 = vst [vmem:[#allocation46_spill] sm:$0xff] %v9009_v21  ;;  %v2828_v11 = vadd.f32 %v2827_v17, %v8805_v60  ;;  %3714 = vmatprep.subr.bf16.mxu1 %v3176_v39  ;;  %v3061_v15 = vmax.f32 %v8895_v50, 0.0  ;;  %v3064_v38 = vmax.f32 %v8905_v28, 0.0  ;;  %v3071_v0 = vmax.f32 %v8911_v41, 0.0  ;;  %v10931_v17 = vld [vmem:[#allocation54_spill] sm:$0xff] }
 0x407   : > { %v2940_v12 = vpop.f32.mrf.mxu1  ;;  %v9017_v22 = vpop.f32.mrf.mxu0  ;;  %3522 = vmatpush1.bf16.msra.mxu0 %v3173_v46  ;;  %v3168_v9 = vpack.c.bf16 %v3080_v30, %v3072_v29  ;;  %v3165_v58 = vpack.c.bf16 %v3077_v53, %v3069_v6  ;;  %v3027_v1 = vmax.f32 %v2937_v62, 0.0  ;;  %v3046_v42 = vmax.f32 %v8879_v32, 0.0  ;;  %v10930_v30 = vld [vmem:[#allocation20_spill] sm:$0xff]  ;;  %v10932_v46 = vld [vmem:[#allocation11_spill] sm:$0xff] }
 0x408   : > { %v3033_v36 = vmax.f32 %v2828_v11, 0.0  ;;  %v2941_v45 = vadd.f32 %v2940_v12, %v8805_v60  ;;  %3523 = vmatprep.subr.bf16.mxu0 %v3166_v26  ;;  %v3053_v33 = vmax.f32 %v8885_v5, 0.0  ;;  %v3056_v50 = vmax.f32 %v8892_v27, 0.0  ;;  %v10925_v5 = vld [vmem:[#allocation43_spill] sm:$0xff]  ;;  %v10933_v11 = vld [vmem:[#allocation44_spill] sm:$0xff] }
 0x409   : > { %v9023_v18 = vpop.f32.mrf.mxu1  ;;  %v2833_v51 = vpop.f32.mrf.mxu0  ;;  %3715 = vmatpush1.bf16.msra.mxu1 %v3175_v10  ;;  %v10922_v44 = vmax.f32 %v8850_v8, 0.0  ;;  %v10923_v20 = vmax.f32 %v8853_v2, 0.0  ;;  %v3063_v19 = vmax.f32 %v8898_v57, 0.0  ;;  %v3167_v34 = vpack.c.bf16 %v3079_v56, %v3071_v0  ;;  %v10961_v21 = vld [vmem:[#allocation24_spill] sm:$0xff] }
 0x40a   : > { %10920 = vst [vmem:[#allocation62_spill] sm:$0xff] %v9023_v18  ;;  %v9025_v52 = vpack.c.bf16 %v3033_v36, %v3025_v25  ;;  %v3035_v54 = vmax.f32 %v2941_v45, 0.0  ;;  %3716 = vmatprep.subr.bf16.mxu1 %v3168_v9  ;;  %v2834_v32 = vadd.f32 %v2833_v51, %v8799_v13  ;;  %v2717_v27 = vadd.f32 %v10925_v5, %v8805_v60  ;;  %v10934_v45 = vld [vmem:[#allocation50_spill] sm:$0xff] }
 0x40b   : > { %v2946_v28 = vpop.f32.mrf.mxu1  ;;  %v9030_v41 = vpop.f32.mrf.mxu0  ;;  %v3158_v55 = vpack.c.bf16 %v10923_v20, %v10922_v44  ;;  %3524 = vmatpush1.bf16.msra.mxu0 %v3165_v58  ;;  %v3038_v48 = vmax.f32 %v10926_v37, 0.0  ;;  %v3048_v4 = vmax.f32 %v10927_v16, 0.0  ;;  %v3160_v8 = vpack.c.bf16 %v3064_v38, %v3056_v50  ;;  %v10935_v38 = vld [vmem:[#allocation27_spill] sm:$0xff]  ;;  %v10937_v50 = vld [vmem:[#allocation38_spill] sm:$0xff]  ;;  %v10938_v44 = vld [vmem:[#allocation69_spill] sm:$0xff] }
 0x40c   : > { %10921 = vst [vmem:[#allocation14_spill] sm:$0xff] %v9025_v52  ;;  %v9037_v35 = vpack.c.bf16 %v3035_v54, %v3027_v1  ;;  %v3055_v57 = vmax.f32 %v10929_v24, 0.0  ;;  %v3157_v63 = vpack.c.bf16 %v3061_v15, %v3053_v33  ;;  %v2947_v53 = vadd.f32 %v2946_v28, %v8799_v13  ;;  %v10941_v37 = vld [vmem:[#allocation68_spill] sm:$0xff]  ;;  %v10942_v24 = vld [vmem:[#allocation67_spill] sm:$0xff] }
 0x40d   : > { %v9044_v43 = vpop.f32.mrf.mxu1  ;;  %3525 = vmatprep.subr.bf16.mxu0 %v3158_v55  ;;  %v2837_v2 = vpop.f32.mrf.mxu0  ;;  %3717 = vmatpush1.bf16.msra.mxu1 %v3167_v34  ;;  %v2713_v31 = vadd.f32 %v10931_v17, %v8803_v7  ;;  %v3030_v62 = vmax.f32 %v10932_v46, 0.0  ;;  %v3040_v6 = vmax.f32 %v10933_v11, 0.0  ;;  %v3150_v12 = vpack.c.bf16 %v3046_v42, %v3038_v48  ;;  %v10943_v17 = vld [vmem:[#allocation58_spill] sm:$0xff] }
 0x40e   : > { %10924 = vst [vmem:[#allocation33_spill] sm:$0xff] %v9037_v35  ;;  %10928 = vst [vmem:[#allocation63_spill] sm:$0xff] %v9044_v43  ;;  %v2838_v39 = vadd.f32 %v2837_v2, %v10930_v30  ;;  %3718 = vmatprep.subr.bf16.mxu1 %v3160_v8  ;;  %v3159_v26 = vpack.c.bf16 %v3063_v19, %v3055_v57  ;;  %v3041_v10 = vmax.f32 %v2834_v32, 0.0  ;;  %v3022_v0 = vmax.f32 %v10935_v38, 0.0  ;;  %v10944_v11 = vld [vmem:[#allocation6_spill] sm:$0xff]  ;;  %v10958_v35 = vld [vmem:[#allocation36_spill] sm:$0xff] }
 0x40f   : > { %v2950_v29 = vpop.f32.mrf.mxu1  ;;  %v9053_v56 = vpop.f32.mrf.mxu0  ;;  %3526 = vmatpush1.bf16.msra.mxu0 %v3157_v63  ;;  %v2707_v15 = vadd.f32 %v10934_v45, %v8811_v61  ;;  %v3032_v9 = vmax.f32 %v2717_v27, 0.0  ;;  %v3152_v58 = vpack.c.bf16 %v3048_v4, %v3040_v6  ;;  %v3043_v54 = vmax.f32 %v2947_v53, 0.0  ;;  %v10940_v27 = vld [vmem:[#allocation66_spill] sm:$0xff] }
 0x410   : > { %v3049_v25 = vmax.f32 %v2838_v39, 0.0  ;;  %v2951_v36 = vadd.f32 %v2950_v29, %v10930_v30  ;;  %3527 = vmatprep.subr.bf16.mxu0 %v3150_v12  ;;  %v2703_v28 = vadd.f32 %v10937_v50, %v8807_v14  ;;  %v3014_v20 = vmax.f32 %v10938_v44, 0.0  ;;  %v9092_v12 = vld [vmem:[%s10617_s5] sm:$0xff]  }
 0x411   : > { %v9059_v51 = vpop.f32.mrf.mxu1  ;;  %v9061_v1 = vpop.f32.mrf.mxu0  ;;  %3719 = vmatpush1.bf16.msra.mxu1 %v3159_v26  ;;  %v3024_v55 = vmax.f32 %v2713_v31, 0.0  ;;  %v3142_v32 = vpack.c.bf16 %v3030_v62, %v3022_v0  ;;  %v3006_v48 = vmax.f32 %v10941_v37, 0.0  ;;  %v3016_v16 = vmax.f32 %v2707_v15, 0.0  ;;  %10945 = vst [vmem:[#allocation15_spill] sm:$0xff] %v9092_v12  ;;  %v10946_v26 = vld [vmem:[#allocation51_spill] sm:$0xff] }
 0x412   : > { %v9063_v42 = vpack.c.bf16 %v3049_v25, %v3041_v10  ;;  %v3051_v33 = vmax.f32 %v2951_v36, 0.0  ;;  %3720 = vmatprep.subr.bf16.mxu1 %v3152_v58  ;;  %v3008_v57 = vmax.f32 %v2703_v28, 0.0  ;;  %v10947_v36 = vld [vmem:[#allocation52_spill] sm:$0xff]  ;;  %v10948_v38 = vmov 0  }
 0x413   : > { %v9068_v19 = vpop.f32.mrf.mxu1  ;;  %v9070_v34 = vpop.f32.mrf.mxu0  ;;  %3528 = vmatpush1.bf16.msra.mxu0 %v10940_v27  ;;  %v3144_v8 = vpack.c.bf16 %v3032_v9, %v3024_v55  ;;  %v3134_v39 = vpack.c.bf16 %v3014_v20, %v3006_v48  ;;  %v9128_v48 = vld [vmem:[%s10617_s5 + $0x10] sm:$0xff]  }
 0x414   : > { %10936 = vst [vmem:[#allocation65_spill] sm:$0xff] %v9063_v42  ;;  %v9072_v5 = vpack.c.bf16 %v3051_v33, %v3043_v54  ;;  %3529 = vmatprep.subr.bf16.mxu0 %v3142_v32  ;;  %v3136_v46 = vpack.c.bf16 %v3016_v16, %v3008_v57  ;;  %v9111_v33 = vld [vmem:[%s10617_s5 + $0x8] sm:$0xff]   ;;  %10950 = vst [vmem:[#allocation48_spill] sm:$0xff] %v9128_v48  ;;  %v10959_v42 = vld [vmem:[#allocation34_spill] sm:$0xff] }
 0x415   : > { %v9076_v4 = vpop.f32.mrf.mxu1  ;;  %v9078_v2 = vpop.f32.mrf.mxu0  ;;  %3721 = vmatpush1.bf16.msra.mxu1 %v10942_v24  ;;  %10949 = vst [vmem:[#allocation47_spill] sm:$0xff] %v9111_v33 }
 0x416   : > { %10939 = vst [vmem:[#allocation23_spill] sm:$0xff] %v9072_v5  ;;  %3722 = vmatprep.subr.bf16.mxu1 %v3144_v8 }
 0x417   : > { %v9081_v63 = vpop.f32.mrf.mxu1  ;;  %v2849_v53 = vpop.f32.mrf.mxu0  ;;  %3530 = vmatpush1.bf16.msra.mxu0 %v10943_v17 }
 0x418   : > { %3531 = vmatprep.subr.bf16.mxu0 %v3134_v39 }
 0x419   : > { %v9084_v31 = vpop.f32.mrf.mxu1  ;;  %v2853_v62 = vpop.f32.mrf.mxu0  ;;  %3723 = vmatpush1.bf16.msra.mxu1 %v10944_v11  ;;  %v9140_v11 = vadd.f32 %v9030_v41, %v8799_v13  ;;  %v10957_v41 = vld [vmem:[#allocation25_spill] sm:$0xff] }
 0x41a   : > { %3724 = vmatprep.subr.bf16.mxu1 %v3136_v46  ;;  %v9136_v46 = vadd.f32 %v9017_v22, %v8805_v60  ;;  %v9161_v23 = vadd.f32 %v9078_v2, %v10957_v41  ;;  %v9167_v52 = vadd.f32 %v2853_v62, %v10958_v35 }
 0x41b   : > { %v9087_v6 = vpop.f32.mrf.mxu1  ;;  %v2855_v29 = vpop.f32.mrf.mxu0  ;;  %3532 = vmatpush1.bf16.msra.mxu0 %v10946_v26  ;;  %10952 = vst [vmem:[#allocation40_spill] sm:$0xff] %v9140_v11  ;;  %v9144_v26 = vadd.f32 %v9053_v56, %v10930_v30  ;;  %v9164_v56 = vadd.f32 %v2849_v53, %v10957_v41 }
 0x41c   : > { %10951 = vst [vmem:[#allocation39_spill] sm:$0xff] %v9136_v46  ;;  %v9170_v5 = vadd.f32 %v2855_v29, %v10958_v35  ;;  %v10960_v46 = vld [vmem:[#allocation31_spill] sm:$0xff]  ;;  %v10963_v29 = vld [vmem:[#allocation32_spill] sm:$0xff] }
 0x41d   : > { %v9095_v10 = vpop.f32.mrf.mxu1  ;;  %v2857_v25 = vpop.f32.mrf.mxu0  ;;  %3725 = vmatpush1.bf16.msra.mxu1 %v10947_v36  ;;  %10953 = vst [vmem:[#allocation9_spill] sm:$0xff] %v9144_v26 }
 0x41e   : > { %3550 = vmatmul.mubr.bf16.vlgmr.msra.gmra.mxu0 %v9092_v12 }
 0x41f   : > { %v9098_v45 = vpop.f32.mrf.mxu1  ;;  %v2859_v15 = vpop.f32.mrf.mxu0  ;;  %3559 = vmatprep.mubr.bf16.mxu0 %v10948_v38 }
 0x420   : > { %3743 = vmatmul.mubr.bf16.vlgmr.msra.gmra.mxu1 %v9092_v12  ;;  %v10955_v12 = vld [vmem:[#allocation19_spill] sm:$0xff]  ;;  %v9176_v3 = vadd.f32 %v2859_v15, %v10959_v42 }
 0x421   : > { %v9103_v0 = vpop.f32.mrf.mxu1  ;;  %v2863_v9 = vpop.f32.mrf.mxu0  ;;  %3752 = vmatprep.mubr.bf16.mxu1 %v10948_v38  ;;  %v9153_v59 = vadd.f32 %v9061_v1, %v10955_v12  ;;  %v9157_v22 = vadd.f32 %v9070_v34, %v10955_v12  ;;  %v9173_v1 = vadd.f32 %v2857_v25, %v10959_v42 }
 0x422   : > { %v9179_v2 = vadd.f32 %v2863_v9, %v10960_v46 }
 0x423   : > { %v9106_v58 = vpop.f32.mrf.mxu1  ;;  %v2865_v54 = vpop.f32.mrf.mxu0  ;;  %10956 = vst [vmem:[#allocation53_spill] sm:$0xff] %v9153_v59 }
 0x424   : > { %v9182_v53 = vadd.f32 %v2865_v54, %v10960_v46  ;;  %v10964_v54 = vld [vmem:[#allocation30_spill] sm:$0xff] }
 0x425   : > { %v9113_v50 = vpop.f32.mrf.mxu1  ;;  %v2867_v28 = vpop.f32.mrf.mxu0 }
 0x426   : > { %3560 = vmatmul.mubr.bf16.gmra.mxu0 %v9111_v33  ;;  %v9187_v11 = vadd.f32 %v2867_v28, %v10963_v29 }
 0x427   : > { %v9115_v44 = vpop.f32.mrf.mxu1  ;;  %v2869_v20 = vpop.f32.mrf.mxu0  ;;  %3569 = vmatprep.mubr.bf16.mxu0 %v10948_v38 }
 0x428   : > { %3753 = vmatmul.mubr.bf16.gmra.mxu1 %v9111_v33  ;;  %v9190_v25 = vadd.f32 %v2869_v20, %v10963_v29 }
 0x429   : > { %v9120_v55 = vpop.f32.mrf.mxu1  ;;  %v2873_v32 = vpop.f32.mrf.mxu0  ;;  %3762 = vmatprep.mubr.bf16.mxu1 %v10948_v38 }
 0x42a   : > { %v2874_v59 = vadd.f32 %v2873_v32, %v10964_v54 }
 0x42b   : > { %v9123_v27 = vpop.f32.mrf.mxu1  ;;  %v2875_v37 = vpop.f32.mrf.mxu0 }
 0x42c   : > { %v2876_v20 = vadd.f32 %v2875_v37, %v10964_v54 }
 0x42d   : > { %v2988_v16 = vpop.f32.mrf.mxu1  ;;  %v2877_v8 = vpop.f32.mrf.mxu0 }
 0x42e   : > { %3570 = vmatmul.mubr.bf16.gmra.mxu0 %v9128_v48 }
 0x42f   : > { %v2990_v24 = vpop.f32.mrf.mxu1  ;;  %v2879_v57 = vpop.f32.mrf.mxu0  ;;  %3579 = vmatprep.mubr.bf16.mxu0 %v10948_v38 }
 0x430   : > { %3763 = vmatmul.mubr.bf16.gmra.mxu1 %v9128_v48  ;;  %v9149_v48 = vld [vmem:[%s10617_s5 + $0x18] sm:$0xff]   ;;  %v2880_v15 = vadd.f32 %v2879_v57, %v8785_v49  ;;  %v2878_v57 = vadd.f32 %v2877_v8, %v8785_v49  ;;  %v2991_v37 = vadd.f32 %v2990_v24, %v8785_v49 }
 0x431   : > { %v2992_v39 = vpop.f32.mrf.mxu1  ;;  %v2883_v17 = vpop.f32.mrf.mxu0  ;;  %3772 = vmatprep.mubr.bf16.mxu1 %v10948_v38  ;;  %10954 = vst [vmem:[#allocation49_spill] sm:$0xff] %v9149_v48 }
 0x432   : > { %v2884_v18 = vadd.f32 %v2883_v17, %v10961_v21  ;;  %v2993_v17 = vadd.f32 %v2992_v39, %v8785_v49  ;;  %v3114_v43 = vmax.f32 %v2880_v15, 0.0  ;;  %v3113_v49 = vmax.f32 %v2878_v57, 0.0 }
 0x433   : > { %v2996_v36 = vpop.f32.mrf.mxu1  ;;  %v2885_v33 = vpop.f32.mrf.mxu0 }
 0x434   : > { %v2886_v62 = vadd.f32 %v2885_v33, %v10961_v21  ;;  %v2997_v40 = vadd.f32 %v2996_v36, %v10961_v21  ;;  %v3121_v8 = vmax.f32 %v2884_v18, 0.0 }
 0x435   : > { %v2998_v34 = vpop.f32.mrf.mxu1  ;;  %v2887_v14 = vpop.f32.mrf.mxu0 }
 0x436   : > { %v2888_v61 = vadd.f32 %v2887_v14, %v10962_v47  ;;  %3580 = vmatmul.mubr.bf16.gmra.mxu0 %v9149_v48  ;;  %v2999_v33 = vadd.f32 %v2998_v34, %v10961_v21  ;;  %v3122_v32 = vmax.f32 %v2886_v62, 0.0  ;;  %v9212_v21 = vld [vmem:[%s10617_s5 + $0x20] sm:$0xff]   ;;  %v3123_v24 = vmax.f32 %v2997_v40, 0.0 }
 0x437   : > { %v3000_v60 = vpop.f32.mrf.mxu1  ;;  %v2889_v9 = vpop.f32.mrf.mxu0  ;;  %3589 = vmatprep.mubr.bf16.mxu0 %v10948_v38  ;;  %v2973_v40 = vadd.f32 %v9103_v0, %v10959_v42  ;;  %v2969_v0 = vadd.f32 %v9095_v10, %v10958_v35  ;;  %v3074_v10 = vmax.f32 %v9170_v5, 0.0 }
 0x438   : > { %v3001_v14 = vadd.f32 %v3000_v60, %v10962_v47  ;;  %v2890_v28 = vadd.f32 %v2889_v9, %v10962_v47  ;;  %3773 = vmatmul.mubr.bf16.gmra.mxu1 %v9149_v48  ;;  %v3129_v26 = vmax.f32 %v2888_v61, 0.0  ;;  %v2989_v9 = vadd.f32 %v2988_v16, %v10964_v54 }
 0x439   : > { %v3002_v7 = vpop.f32.mrf.mxu1  ;;  %3782 = vmatprep.mubr.bf16.mxu1 %v10948_v38  ;;  %v3124_v39 = vmax.f32 %v2999_v33, 0.0  ;;  %v3106_v16 = vmax.f32 %v2876_v20, 0.0  ;;  %v2979_v48 = vadd.f32 %v9113_v50, %v10960_v46  ;;  %v3098_v33 = vmax.f32 %v9190_v25, 0.0 }
 0x43a   : > { %v3130_v34 = vmax.f32 %v2890_v28, 0.0  ;;  %v3003_v60 = vadd.f32 %v3002_v7, %v10962_v47  ;;  %v3131_v36 = vmax.f32 %v3001_v14, 0.0  ;;  %v2983_v7 = vadd.f32 %v9120_v55, %v10963_v29 }
 0x43b   : > { %v2987_v47 = vadd.f32 %v9123_v27, %v10964_v54  ;;  %v3116_v28 = vmax.f32 %v2993_v17, 0.0  ;;  %v3193_v18 = vpack.c.bf16 %v3129_v26, %v3121_v8  ;;  %v3108_v14 = vmax.f32 %v2989_v9, 0.0 }
 0x43c   : > { %v3132_v62 = vmax.f32 %v3003_v60, 0.0  ;;  %v3194_v61 = vpack.c.bf16 %v3130_v34, %v3122_v32  ;;  %v3186_v32 = vpack.c.bf16 %v3114_v43, %v3106_v16  ;;  %v2981_v55 = vadd.f32 %v9115_v44, %v10963_v29 }
 0x43d   : > { %v3105_v27 = vmax.f32 %v2874_v59, 0.0  ;;  %v3115_v54 = vmax.f32 %v2991_v37, 0.0  ;;  %v3195_v20 = vpack.c.bf16 %v3131_v36, %v3123_v24  ;;  %v3090_v26 = vmax.f32 %v9182_v53, 0.0  ;;  %v10969_v24 = vld [vmem:[#allocation53_spill] sm:$0xff] }
 0x43e   : > { %3903 = vmatprep.subr.bf16.mxu0 %v3194_v61  ;;  %v3196_v15 = vpack.c.bf16 %v3132_v62, %v3124_v39  ;;  %3590 = vmatmul.mubr.bf16.gmra.mxu0 %v9212_v21  ;;  %v3100_v50 = vmax.f32 %v2983_v7, 0.0  ;;  %v3188_v25 = vpack.c.bf16 %v3116_v28, %v3108_v14  ;;  %v2977_v43 = vadd.f32 %v9106_v58, %v10960_v46  ;;  %v9239_v58 = vld [vmem:[%s10617_s5 + $0x28] sm:$0xff]   ;;  %v10970_v14 = vld [vmem:[#allocation37_spill] sm:$0xff] }
 0x43f   : > { %3904 = vmatpush1.bf16.msra.mxu0 %v3193_v18  ;;  %v3097_v44 = vmax.f32 %v9187_v11, 0.0  ;;  %v3107_v59 = vmax.f32 %v2987_v47, 0.0  ;;  %v3185_v29 = vpack.c.bf16 %v3113_v49, %v3105_v27  ;;  %3599 = vmatprep.mubr.bf16.mxu0 %v10948_v38  ;;  %v3082_v53 = vmax.f32 %v9176_v3, 0.0  ;;  %v10965_v47 = vld [vmem:[#allocation63_spill] sm:$0xff]  ;;  %v9272_v49 = vld [vmem:[%s10617_s5 + $0x30] sm:$0xff]  }
 0x440   : > { %4096 = vmatprep.subr.bf16.mxu1 %v3196_v15  ;;  %3783 = vmatmul.mubr.bf16.gmra.mxu1 %v9212_v21  ;;  %v3092_v57 = vmax.f32 %v2979_v48, 0.0  ;;  %v3178_v17 = vpack.c.bf16 %v3098_v33, %v3090_v26  ;;  %v2971_v46 = vadd.f32 %v9098_v45, %v10959_v42  ;;  %v3089_v11 = vmax.f32 %v9179_v2, 0.0  ;;  %v10974_v26 = vld [vmem:[#allocation45_spill] sm:$0xff] }
 0x441   : > { %3905 = vmatprep.subr.bf16.mxu0 %v3186_v32  ;;  %4097 = vmatpush1.bf16.msra.mxu1 %v3195_v20  ;;  %v3099_v34 = vmax.f32 %v2981_v55, 0.0  ;;  %v3187_v60 = vpack.c.bf16 %v3115_v54, %v3107_v59  ;;  %v2963_v3 = vadd.f32 %v9084_v31, %v10957_v41  ;;  %v3084_v48 = vmax.f32 %v2973_v40, 0.0  ;;  %v10972_v55 = vld [vmem:[#allocation40_spill] sm:$0xff]  ;;  %v10973_v40 = vld [vmem:[#allocation22_spill] sm:$0xff] }
 0x442   : > { %4098 = vmatprep.subr.bf16.mxu1 %v3188_v25  ;;  %3792 = vmatprep.mubr.bf16.mxu1 %v10948_v38  ;;  %v3180_v9 = vpack.c.bf16 %v3100_v50, %v3092_v57  ;;  %v2967_v37 = vadd.f32 %v9087_v6, %v10958_v35  ;;  %v3081_v8 = vmax.f32 %v9173_v1, 0.0  ;;  %v3091_v39 = vmax.f32 %v2977_v43, 0.0 }
 0x443   : > { %3906 = vmatpush1.bf16.msra.mxu0 %v3185_v29  ;;  %v3177_v42 = vpack.c.bf16 %v3097_v44, %v3089_v11  ;;  %v2959_v45 = vadd.f32 %v9076_v4, %v10955_v12  ;;  %v3066_v2 = vmax.f32 %v9164_v56, 0.0  ;;  %v3076_v36 = vmax.f32 %v2969_v0, 0.0  ;;  %v10975_v44 = vld [vmem:[#allocation46_spill] sm:$0xff]  ;;  %v10976_v29 = vld [vmem:[#allocation39_spill] sm:$0xff] }
 0x444   : > { %3907 = vmatprep.subr.bf16.mxu0 %v3178_v17  ;;  %v3170_v5 = vpack.c.bf16 %v3082_v53, %v3074_v10  ;;  %v2961_v31 = vadd.f32 %v9081_v63, %v10957_v41  ;;  %v3073_v35 = vmax.f32 %v9167_v52, 0.0  ;;  %v3083_v6 = vmax.f32 %v2971_v46, 0.0  ;;  %v10977_v17 = vld [vmem:[#allocation26_spill] sm:$0xff]  ;;  %v10978_v46 = vld [vmem:[#allocation12_spill] sm:$0xff] }
 0x445   : > { %4099 = vmatpush1.bf16.msra.mxu1 %v3187_v60  ;;  %v3179_v1 = vpack.c.bf16 %v3099_v34, %v3091_v39  ;;  %v2953_v4 = vadd.f32 %v9059_v51, %v10930_v30  ;;  %v3058_v56 = vmax.f32 %v9157_v22, 0.0  ;;  %v3068_v62 = vmax.f32 %v2963_v3, 0.0  ;;  %v10966_v51 = vld [vmem:[#allocation9_spill] sm:$0xff]  ;;  %v10979_v60 = vld [vmem:[#allocation60_spill] sm:$0xff] }
 0x446   : > { %4100 = vmatprep.subr.bf16.mxu1 %v3180_v9  ;;  %3600 = vmatmul.mubr.bf16.gmra.mxu0 %v9239_v58  ;;  %v3172_v61 = vpack.c.bf16 %v3084_v48, %v3076_v36  ;;  %v2957_v63 = vadd.f32 %v9068_v19, %v10955_v12  ;;  %v3065_v52 = vmax.f32 %v9161_v23, 0.0  ;;  %v3075_v41 = vmax.f32 %v2967_v37, 0.0  ;;  %v10967_v19 = vld [vmem:[#allocation21_spill] sm:$0xff]  ;;  %v10980_v37 = vld [vmem:[#allocation28_spill] sm:$0xff] }
 0x447   : > { %3908 = vmatpush1.bf16.msra.mxu0 %v3177_v42  ;;  %3609 = vmatprep.mubr.bf16.mxu0 %v10948_v38  ;;  %v3169_v7 = vpack.c.bf16 %v3081_v8, %v3073_v35  ;;  %v2949_v30 = vadd.f32 %v10965_v47, %v8799_v13  ;;  %v3050_v22 = vmax.f32 %v10966_v51, 0.0  ;;  %v3060_v16 = vmax.f32 %v2959_v45, 0.0  ;;  %v10968_v23 = vld [vmem:[#allocation29_spill] sm:$0xff]  ;;  %v10971_v13 = vld [vmem:[#allocation62_spill] sm:$0xff]  ;;  %v9331_v47 = vld [vmem:[%s10617_s5 + $0x50] sm:$0xff]  }
 0x448   : > { %3793 = vmatmul.mubr.bf16.gmra.mxu1 %v9239_v58  ;;  %3909 = vmatprep.subr.bf16.mxu0 %v3170_v5  ;;  %v3162_v28 = vpack.c.bf16 %v3066_v2, %v3058_v56  ;;  %v2826_v12 = vadd.f32 %v10968_v23, %v10967_v19  ;;  %v3057_v18 = vmax.f32 %v10969_v24, 0.0  ;;  %v3067_v15 = vmax.f32 %v2961_v31, 0.0  ;;  %v9298_v2 = vld [vmem:[%s10617_s5 + $0x38] sm:$0xff]   ;;  %v10983_v56 = vld [vmem:[#allocation14_spill] sm:$0xff]  ;;  %v10988_v23 = vld [vmem:[#allocation47_spill] sm:$0xff] }
 0x449   : > { %4101 = vmatpush1.bf16.msra.mxu1 %v3179_v1  ;;  %3802 = vmatprep.mubr.bf16.mxu1 %v10948_v38  ;;  %v3171_v33 = vpack.c.bf16 %v3083_v6, %v3075_v41  ;;  %v2943_v32 = vadd.f32 %v10971_v13, %v10970_v14  ;;  %v3042_v27 = vmax.f32 %v10972_v55, 0.0  ;;  %v3052_v54 = vmax.f32 %v2953_v4, 0.0  ;;  %v10981_v36 = vld [vmem:[#allocation65_spill] sm:$0xff]  ;;  %v10982_v6 = vld [vmem:[#allocation23_spill] sm:$0xff]  ;;  %v10986_v41 = vld [vmem:[#allocation10_spill] sm:$0xff] }
 0x44a   : > { %4102 = vmatprep.subr.bf16.mxu1 %v3172_v61  ;;  %v3164_v20 = vpack.c.bf16 %v3068_v62, %v3060_v16  ;;  %v2820_v50 = vadd.f32 %v10974_v26, %v10973_v40  ;;  %v3059_v25 = vmax.f32 %v2957_v63, 0.0  ;;  %v3161_v43 = vpack.c.bf16 %v3065_v52, %v3057_v18  ;;  %v10984_v61 = vld [vmem:[#allocation33_spill] sm:$0xff]  ;;  %v9311_v63 = vld [vmem:[%s10617_s5 + $0x40] sm:$0xff]   ;;  %v9367_v16 = vld [vmem:[%s10617_s5 + $0x70] sm:$0xff]  }
 0x44b   : > { %3910 = vmatpush1.bf16.msra.mxu0 %v3169_v7  ;;  %v2939_v59 = vadd.f32 %v10975_v44, %v10967_v19  ;;  %v3034_v0 = vmax.f32 %v10976_v29, 0.0  ;;  %v3044_v53 = vmax.f32 %v2949_v30, 0.0  ;;  %v3154_v57 = vpack.c.bf16 %v3050_v22, %v3042_v27  ;;  %v10985_v52 = vld [vmem:[#allocation13_spill] sm:$0xff]  ;;  %v9322_v7 = vld [vmem:[%s10617_s5 + $0x48] sm:$0xff]   ;;  %v9349_v51 = vld [vmem:[%s10617_s5 + $0x60] sm:$0xff]  }
 0x44c   : > { %3911 = vmatprep.subr.bf16.mxu0 %v3162_v28  ;;  %v2816_v11 = vadd.f32 %v10978_v46, %v10977_v17  ;;  %v3163_v34 = vpack.c.bf16 %v3067_v15, %v3059_v25  ;;  %v2933_v3 = vadd.f32 %v10979_v60, %v10973_v40  ;;  %v3026_v10 = vmax.f32 %v2826_v12, 0.0  ;;  %v9340_v30 = vld [vmem:[%s10617_s5 + $0x58] sm:$0xff]   ;;  %v9358_v22 = vld [vmem:[%s10617_s5 + $0x68] sm:$0xff]   ;;  %v10989_v12 = vld [vmem:[#allocation48_spill] sm:$0xff] }
 0x44d   : > { %4103 = vmatpush1.bf16.msra.mxu1 %v3171_v33  ;;  %v3036_v48 = vmax.f32 %v2943_v32, 0.0  ;;  %v3156_v9 = vpack.c.bf16 %v3052_v54, %v3044_v53  ;;  %v2929_v8 = vadd.f32 %v10980_v37, %v10977_v17  ;;  %v3018_v39 = vmax.f32 %v2820_v50, 0.0  ;;  %v9376_v28 = vld [vmem:[%s10617_s5 + $0x78] sm:$0xff]   ;;  %v10987_v19 = vld [vmem:[#allocation15_spill] sm:$0xff]  ;;  %v9423_v54 = vpop.permute.xlu0 %3268  ;;  %v4546_v29 = vld [vmem:[#allocation2] sm:$0xff] }
 0x44e   : > { %4104 = vmatprep.subr.bf16.mxu1 %v3164_v20  ;;  %3610 = vmatmul.mubr.bf16.gmra.mxu0 %v9272_v49  ;;  %v3028_v42 = vmax.f32 %v2939_v59, 0.0  ;;  %v3146_v45 = vpack.c.bf16 %v3034_v0, %v3026_v10  ;;  %v3010_v5 = vmax.f32 %v2816_v11, 0.0  ;;  %v3020_v31 = vmax.f32 %v2933_v3, 0.0  ;;  %v10990_v24 = vld [vmem:[#allocation49_spill] sm:$0xff] }
 0x44f   : > { %3912 = vmatpush1.bf16.msra.mxu0 %v3161_v43  ;;  %3619 = vmatprep.mubr.bf16.mxu0 %v10948_v38  ;;  %v3012_v1 = vmax.f32 %v2929_v8, 0.0 }
 0x450   : > { %3803 = vmatmul.mubr.bf16.gmra.mxu1 %v9272_v49  ;;  %3913 = vmatprep.subr.bf16.mxu0 %v3154_v57  ;;  %v3148_v35 = vpack.c.bf16 %v3036_v48, %v3028_v42  ;;  %v3138_v4 = vpack.c.bf16 %v3018_v39, %v3010_v5 }
 0x451   : > { %4105 = vmatpush1.bf16.msra.mxu1 %v3163_v34  ;;  %3812 = vmatprep.mubr.bf16.mxu1 %v10948_v38  ;;  %v3140_v62 = vpack.c.bf16 %v3020_v31, %v3012_v1  ;;  %v9436_v39 = vpop.permute.xlu0 %3278 }
 0x452   : > { %4106 = vmatprep.subr.bf16.mxu1 %v3156_v9 }
 0x453   : > { %3914 = vmatpush1.bf16.msra.mxu0 %v10981_v36 }
 0x454   : > { %3915 = vmatprep.subr.bf16.mxu0 %v3146_v45  ;;  %v4547_v45 = vld [vmem:[#allocation2 + $0xd8] sm:$0xff] }
 0x455   : > { %4107 = vmatpush1.bf16.msra.mxu1 %v10982_v6 }
 0x456   : > { %4108 = vmatprep.subr.bf16.mxu1 %v3148_v35  ;;  %3620 = vmatmul.mubr.bf16.gmra.mxu0 %v9298_v2 }
 0x457   : > { %3916 = vmatpush1.bf16.msra.mxu0 %v10983_v56  ;;  %3629 = vmatprep.mubr.bf16.mxu0 %v10948_v38 }
 0x458   : > { %3813 = vmatmul.mubr.bf16.gmra.mxu1 %v9298_v2  ;;  %3917 = vmatprep.subr.bf16.mxu0 %v3138_v4 }
 0x459   : > { %4109 = vmatpush1.bf16.msra.mxu1 %v10984_v61  ;;  %3822 = vmatprep.mubr.bf16.mxu1 %v10948_v38 }
 0x45a   : > { %4110 = vmatprep.subr.bf16.mxu1 %v3140_v62 }
 0x45b   : > { %3918 = vmatpush1.bf16.msra.mxu0 %v10985_v52 }
 0x45d   : > { %4111 = vmatpush1.bf16.msra.mxu1 %v10986_v41  ;;  %v4548_v41 = vld [vmem:[#allocation2 + $0x18] sm:$0xff] }
 0x45e   : > { %3630 = vmatmul.mubr.bf16.gmra.mxu0 %v9311_v63 }
 0x45f   : > { %3639 = vmatprep.mubr.bf16.mxu0 %v10948_v38 }
 0x460   : > { %3823 = vmatmul.mubr.bf16.gmra.mxu1 %v9311_v63 }
 0x461   : > { %3832 = vmatprep.mubr.bf16.mxu1 %v10948_v38 }
 0x466   : > { %3640 = vmatmul.mubr.bf16.gmra.mxu0 %v9322_v7 }
 0x467   : > { %3649 = vmatprep.mubr.bf16.mxu0 %v10948_v38 }
 0x468   : > { %3833 = vmatmul.mubr.bf16.gmra.mxu1 %v9322_v7 }
 0x469   : > { %3842 = vmatprep.mubr.bf16.mxu1 %v10948_v38 }
 0x46e   : > { %3650 = vmatmul.mubr.bf16.gmra.mxu0 %v9331_v47 }
 0x46f   : > { %3659 = vmatprep.mubr.bf16.mxu0 %v10948_v38 }
 0x470   : > { %3843 = vmatmul.mubr.bf16.gmra.mxu1 %v9331_v47 }
 0x471   : > { %3852 = vmatprep.mubr.bf16.mxu1 %v10948_v38 }
 0x476   : > { %3660 = vmatmul.mubr.bf16.gmra.mxu0 %v9340_v30 }
 0x477   : > { %3669 = vmatprep.mubr.bf16.mxu0 %v10948_v38 }
 0x478   : > { %3853 = vmatmul.mubr.bf16.gmra.mxu1 %v9340_v30 }
 0x479   : > { %3862 = vmatprep.mubr.bf16.mxu1 %v10948_v38 }
 0x47e   : > { %3670 = vmatmul.mubr.bf16.gmra.mxu0 %v9349_v51 }
 0x47f   : > { %3679 = vmatprep.mubr.bf16.mxu0 %v10948_v38 }
 0x480   : > { %3863 = vmatmul.mubr.bf16.gmra.mxu1 %v9349_v51 }
 0x481   : > { %3872 = vmatprep.mubr.bf16.mxu1 %v10948_v38 }
 0x486   : > { %3680 = vmatmul.mubr.bf16.gmra.mxu0 %v9358_v22 }
 0x487   : > { %3689 = vmatprep.mubr.bf16.mxu0 %v10948_v38 }
 0x488   : > { %3873 = vmatmul.mubr.bf16.gmra.mxu1 %v9358_v22 }
 0x489   : > { %3882 = vmatprep.mubr.bf16.mxu1 %v10948_v38 }
 0x48e   : > { %3690 = vmatmul.mubr.bf16.gmra.mxu0 %v9367_v16 }
 0x48f   : > { %3699 = vmatprep.mubr.bf16.mxu0 %v10948_v38 }
 0x490   : > { %3883 = vmatmul.mubr.bf16.gmra.mxu1 %v9367_v16 }
 0x491   : > { %3892 = vmatprep.mubr.bf16.mxu1 %v10948_v38 }
 0x496   : > { %3700 = vmatmul.mubr.bf16.gmra.mxu0 %v9376_v28 }
 0x497   : > { %3935 = vmatprep.mubr.bf16.mxu0 %v10948_v38 }
 0x498   : > { %3893 = vmatmul.mubr.bf16.gmra.mxu1 %v9376_v28 }
 0x499   : > { %4128 = vmatprep.mubr.bf16.mxu1 %v10948_v38 }
 0x49e   : > { %3936 = vmatmul.mubr.bf16.vlgmr.msra.gmra.mxu0 %v10987_v19 }
 0x49f   : > { %3945 = vmatprep.mubr.bf16.mxu0 %v10948_v38 }
 0x4a0   : > { %4129 = vmatmul.mubr.bf16.vlgmr.msra.gmra.mxu1 %v10987_v19 }
 0x4a1   : > { %4138 = vmatprep.mubr.bf16.mxu1 %v10948_v38 }
 0x4a6   : > { %3946 = vmatmul.mubr.bf16.gmra.mxu0 %v10988_v23 }
 0x4a7   : > { %3955 = vmatprep.mubr.bf16.mxu0 %v10948_v38 }
 0x4a8   : > { %4139 = vmatmul.mubr.bf16.gmra.mxu1 %v10988_v23 }
 0x4a9   : > { %4148 = vmatprep.mubr.bf16.mxu1 %v10948_v38 }
 0x4ae   : > { %3956 = vmatmul.mubr.bf16.gmra.mxu0 %v10989_v12 }
 0x4af   : > { %3965 = vmatprep.mubr.bf16.mxu0 %v10948_v38 }
 0x4b0   : > { %4149 = vmatmul.mubr.bf16.gmra.mxu1 %v10989_v12 }
 0x4b1   : > { %4158 = vmatprep.mubr.bf16.mxu1 %v10948_v38 }
 0x4b6   : > { %3966 = vmatmul.mubr.bf16.gmra.mxu0 %v10990_v24 }
 0x4b7   : > { %3975 = vmatprep.mubr.bf16.mxu0 %v10948_v38 }
 0x4b8   : > { %4159 = vmatmul.mubr.bf16.gmra.mxu1 %v10990_v24 }
 0x4b9   : > { %4168 = vmatprep.mubr.bf16.mxu1 %v10948_v38 }
 0x4be   : > { %3976 = vmatmul.mubr.bf16.gmra.mxu0 %v9212_v21 }
 0x4bf   : > { %3985 = vmatprep.mubr.bf16.mxu0 %v10948_v38 }
 0x4c0   : > { %4169 = vmatmul.mubr.bf16.gmra.mxu1 %v9212_v21  ;;  %v9414_v21 = vpop.permute.xlu1 %3263 }
 0x4c1   : > { %4178 = vmatprep.mubr.bf16.mxu1 %v10948_v38 }
 0x4c4   : > { %v9430_v11 = vpop.permute.xlu1 %3273 }
 0x4c6   : > { %3986 = vmatmul.mubr.bf16.gmra.mxu0 %v9239_v58 }
 0x4c7   : > { %3995 = vmatprep.mubr.bf16.mxu0 %v10948_v38 }
 0x4c8   : > { %4179 = vmatmul.mubr.bf16.gmra.mxu1 %v9239_v58 }
 0x4c9   : > { %4188 = vmatprep.mubr.bf16.mxu1 %v10948_v38 }
 0x4ce   : > { %3996 = vmatmul.mubr.bf16.gmra.mxu0 %v9272_v49 }
 0x4cf   : > { %4005 = vmatprep.mubr.bf16.mxu0 %v10948_v38 }
 0x4d0   : > { %4189 = vmatmul.mubr.bf16.gmra.mxu1 %v9272_v49  ;;  %v4545_v49 = vld [vmem:[#allocation2 + $0xb0] sm:$0xff] }
 0x4d1   : > { %4198 = vmatprep.mubr.bf16.mxu1 %v10948_v38 }
 0x4d6   : > { %4006 = vmatmul.mubr.bf16.gmra.mxu0 %v9298_v2 }
 0x4d7   : > { %4015 = vmatprep.mubr.bf16.mxu0 %v10948_v38 }
 0x4d8   : > { %4199 = vmatmul.mubr.bf16.gmra.mxu1 %v9298_v2 }
 0x4d9   : > { %4208 = vmatprep.mubr.bf16.mxu1 %v10948_v38 }
 0x4de   : > { %v3551_v58 = vpop.f32.mrf.mxu0  ;;  %4016 = vmatmul.mubr.bf16.gmra.mxu0 %v9311_v63 }
 0x4df   : > { %v3552_v18 = vadd.f32 %v3551_v58, %v9414_v21  ;;  %4025 = vmatprep.mubr.bf16.mxu0 %v10948_v38 }
 0x4e0   : > { %v3744_v15 = vpop.f32.mrf.mxu1  ;;  %4209 = vmatmul.mubr.bf16.gmra.mxu1 %v9311_v63  ;;  %v3553_v33 = vpop.f32.mrf.mxu0 }
 0x4e1   : > { %v4289_v14 = vmax.f32 %v3552_v18, 0.0  ;;  %v3745_v13 = vadd.f32 %v3744_v15, %v9414_v21  ;;  %v3554_v32 = vadd.f32 %v3553_v33, %v9414_v21  ;;  %4218 = vmatprep.mubr.bf16.mxu1 %v10948_v38 }
 0x4e2   : > { %v3746_v55 = vpop.f32.mrf.mxu1  ;;  %v3555_v27 = vpop.f32.mrf.mxu0 }
 0x4e3   : > { %v4577_v20 = vmax.f32 %v4545_v49, %v4289_v14  ;;  %v4290_v40 = vmax.f32 %v3554_v32, 0.0  ;;  %v3747_v26 = vadd.f32 %v3746_v55, %v9414_v21  ;;  %v3556_v50 = vadd.f32 %v3555_v27, %v9423_v54  ;;  %v9450_v14 = vpop.permute.xlu1 %3283 }
 0x4e4   : > { %v3748_v25 = vpop.f32.mrf.mxu1  ;;  %v3557_v43 = vpop.f32.mrf.mxu0  ;;  %v4291_v44 = vmax.f32 %v3745_v13, 0.0 }
 0x4e5   : > { %v4609_v59 = vmax.f32 %v4577_v20, %v4290_v40  ;;  %v3558_v0 = vadd.f32 %v3557_v43, %v9423_v54  ;;  %v4297_v53 = vmax.f32 %v3556_v50, 0.0  ;;  %v3749_v57 = vadd.f32 %v3748_v25, %v9423_v54 }
 0x4e6   : > { %v3750_v17 = vpop.f32.mrf.mxu1  ;;  %v3561_v46 = vpop.f32.mrf.mxu0  ;;  %4026 = vmatmul.mubr.bf16.gmra.mxu0 %v9322_v7  ;;  %v4292_v34 = vmax.f32 %v3747_v26, 0.0 }
 0x4e7   : > { %v4641_v60 = vmax.f32 %v4609_v59, %v4291_v44  ;;  %v4298_v3 = vmax.f32 %v3558_v0, 0.0  ;;  %4035 = vmatprep.mubr.bf16.mxu0 %v10948_v38  ;;  %v4578_v10 = vmax.f32 %v4546_v29, %v4297_v53  ;;  %v3751_v48 = vadd.f32 %v3750_v17, %v9423_v54  ;;  %v4549_v44 = vld [vmem:[#allocation2 + $0x50] sm:$0xff] }
 0x4e8   : > { %v3562_v9 = vadd.f32 %v3561_v46, %v9430_v11  ;;  %v3754_v37 = vpop.f32.mrf.mxu1  ;;  %4219 = vmatmul.mubr.bf16.gmra.mxu1 %v9322_v7  ;;  %v3563_v8 = vpop.f32.mrf.mxu0  ;;  %v4299_v36 = vmax.f32 %v3749_v57, 0.0 }
 0x4e9   : > { %v9438_v42 = vmax.f32 %v4641_v60, %v4292_v34  ;;  %v3564_v2 = vadd.f32 %v3563_v8, %v9430_v11  ;;  %4228 = vmatprep.mubr.bf16.mxu1 %v10948_v38  ;;  %v4610_v5 = vmax.f32 %v4578_v10, %v4298_v3  ;;  %v3755_v35 = vadd.f32 %v3754_v37, %v9430_v11  ;;  %v9461_v46 = vpop.permute.xlu0 %3288  ;;  %v9465_v8 = vpop.permute.xlu1 %3293 }
 0x4ea   : > { %v4305_v31 = vmax.f32 %v3562_v9, 0.0  ;;  %v3756_v6 = vpop.f32.mrf.mxu1  ;;  %v3565_v1 = vpop.f32.mrf.mxu0  ;;  %v4300_v62 = vmax.f32 %v3751_v48, 0.0 }
 0x4eb   : > { %v4306_v4 = vmax.f32 %v3564_v2, 0.0  ;;  %v3566_v56 = vadd.f32 %v3565_v1, %v9436_v39  ;;  %v4642_v61 = vmax.f32 %v4610_v5, %v4299_v36  ;;  %v3757_v52 = vadd.f32 %v3756_v6, %v9430_v11  ;;  %v4550_v2 = vld [vmem:[#allocation2 + $0x68] sm:$0xff] }
 0x4ec   : > { %v4579_v63 = vmax.f32 %v4547_v45, %v4305_v31  ;;  %v3758_v7 = vpop.f32.mrf.mxu1  ;;  %v3567_v19 = vpop.f32.mrf.mxu0  ;;  %v4307_v18 = vmax.f32 %v3755_v35, 0.0 }
 0x4ed   : > { %v4313_v23 = vmax.f32 %v3566_v56, 0.0  ;;  %v3759_v12 = vadd.f32 %v3758_v7, %v9436_v39  ;;  %v3568_v24 = vadd.f32 %v3567_v19, %v9436_v39  ;;  %v9447_v58 = vmax.f32 %v4642_v61, %v4300_v62  ;;  %v4551_v7 = vld [vmem:[#allocation2 + $0x30] sm:$0xff] }
 0x4ee   : > { %v4611_v49 = vmax.f32 %v4579_v63, %v4306_v4  ;;  %v3760_v15 = vpop.f32.mrf.mxu1  ;;  %v3571_v33 = vpop.f32.mrf.mxu0  ;;  %4036 = vmatmul.mubr.bf16.gmra.mxu0 %v9331_v47  ;;  %v4308_v27 = vmax.f32 %v3757_v52, 0.0 }
 0x4ef   : > { %v4580_v13 = vmax.f32 %v4548_v41, %v4313_v23  ;;  %v4314_v32 = vmax.f32 %v3568_v24, 0.0  ;;  %v3761_v55 = vadd.f32 %v3760_v15, %v9436_v39  ;;  %4045 = vmatprep.mubr.bf16.mxu0 %v10948_v38  ;;  %v3572_v40 = vadd.f32 %v3571_v33, %v9450_v14 }
 0x4f0   : > { %v4643_v20 = vmax.f32 %v4611_v49, %v4307_v18  ;;  %v3764_v26 = vpop.f32.mrf.mxu1  ;;  %4229 = vmatmul.mubr.bf16.gmra.mxu1 %v9331_v47  ;;  %v3573_v50 = vpop.f32.mrf.mxu0  ;;  %v4315_v25 = vmax.f32 %v3759_v12, 0.0 }
 0x4f1   : > { %v4612_v43 = vmax.f32 %v4580_v13, %v4314_v32  ;;  %v3574_v59 = vadd.f32 %v3573_v50, %v9450_v14  ;;  %4238 = vmatprep.mubr.bf16.mxu1 %v10948_v38  ;;  %v4321_v0 = vmax.f32 %v3572_v40, 0.0  ;;  %v3765_v53 = vadd.f32 %v3764_v26, %v9450_v14 }
 0x4f2   : > { %v9458_v29 = vmax.f32 %v4643_v20, %v4308_v27  ;;  %v3766_v57 = vpop.f32.mrf.mxu1  ;;  %v3575_v17 = vpop.f32.mrf.mxu0  ;;  %v4316_v34 = vmax.f32 %v3761_v55, 0.0 }
 0x4f3   : > { %v4644_v60 = vmax.f32 %v4612_v43, %v4315_v25  ;;  %v4322_v47 = vmax.f32 %v3574_v59, 0.0  ;;  %v4581_v3 = vmax.f32 %v4549_v44, %v4321_v0  ;;  %v3767_v10 = vadd.f32 %v3766_v57, %v9450_v14  ;;  %v9481_v55 = vpop.permute.xlu0 %3298  ;;  %v4552_v0 = vld [vmem:[#allocation2 + $0x48] sm:$0xff] }
 0x4f4   : > { %v3576_v48 = vadd.f32 %v3575_v17, %v9461_v46  ;;  %v3768_v9 = vpop.f32.mrf.mxu1  ;;  %v3577_v37 = vpop.f32.mrf.mxu0  ;;  %v4323_v5 = vmax.f32 %v3765_v53, 0.0 }
 0x4f5   : > { %v9467_v45 = vmax.f32 %v4644_v60, %v4316_v34  ;;  %v3578_v36 = vadd.f32 %v3577_v37, %v9461_v46  ;;  %v4613_v31 = vmax.f32 %v4581_v3, %v4322_v47  ;;  %v3769_v6 = vadd.f32 %v3768_v9, %v9461_v46  ;;  %v9490_v3 = vpop.permute.xlu1 %3303 }
 0x4f6   : > { %v4329_v35 = vmax.f32 %v3576_v48, 0.0  ;;  %v3770_v1 = vpop.f32.mrf.mxu1  ;;  %v3581_v4 = vpop.f32.mrf.mxu0  ;;  %4046 = vmatmul.mubr.bf16.gmra.mxu0 %v9340_v30  ;;  %v4324_v61 = vmax.f32 %v3767_v10, 0.0 }
 0x4f7   : > { %v4330_v56 = vmax.f32 %v3578_v36, 0.0  ;;  %v3582_v62 = vadd.f32 %v3581_v4, %v9465_v8  ;;  %4055 = vmatprep.mubr.bf16.mxu0 %v10948_v38  ;;  %v4645_v63 = vmax.f32 %v4613_v31, %v4323_v5  ;;  %v3771_v41 = vadd.f32 %v3770_v1, %v9461_v46  ;;  %v4553_v1 = vld [vmem:[#allocation2 + $0x80] sm:$0xff] }
 0x4f8   : > { %v4582_v52 = vmax.f32 %v4550_v2, %v4329_v35  ;;  %v3774_v19 = vpop.f32.mrf.mxu1  ;;  %4239 = vmatmul.mubr.bf16.gmra.mxu1 %v9340_v30  ;;  %v3583_v23 = vpop.f32.mrf.mxu0  ;;  %v4331_v15 = vmax.f32 %v3769_v6, 0.0 }
 0x4f9   : > { %v4337_v12 = vmax.f32 %v3582_v62, 0.0  ;;  %v3775_v24 = vadd.f32 %v3774_v19, %v9465_v8  ;;  %v3584_v18 = vadd.f32 %v3583_v23, %v9465_v8  ;;  %4248 = vmatprep.mubr.bf16.mxu1 %v10948_v38  ;;  %v9479_v49 = vmax.f32 %v4645_v63, %v4324_v61  ;;  %v9496_v35 = vpop.permute.xlu0 %3308 }
 0x4fa   : > { %v4614_v33 = vmax.f32 %v4582_v52, %v4330_v56  ;;  %v3776_v13 = vpop.f32.mrf.mxu1  ;;  %v3585_v32 = vpop.f32.mrf.mxu0  ;;  %v4332_v40 = vmax.f32 %v3771_v41, 0.0 }
 0x4fb   : > { %v4583_v27 = vmax.f32 %v4551_v7, %v4337_v12  ;;  %v4338_v20 = vmax.f32 %v3584_v18, 0.0  ;;  %v3777_v30 = vadd.f32 %v3776_v13, %v9465_v8  ;;  %v3586_v50 = vadd.f32 %v3585_v32, %v9481_v55  ;;  %v4554_v18 = vld [vmem:[#allocation2 + $0x88] sm:$0xff] }
 0x4fc   : > { %v4646_v26 = vmax.f32 %v4614_v33, %v4331_v15  ;;  %v3778_v25 = vpop.f32.mrf.mxu1  ;;  %v3587_v43 = vpop.f32.mrf.mxu0  ;;  %v4339_v44 = vmax.f32 %v3775_v24, 0.0 }
 0x4fd   : > { %v4615_v59 = vmax.f32 %v4583_v27, %v4338_v20  ;;  %v3588_v53 = vadd.f32 %v3587_v43, %v9481_v55  ;;  %v4345_v17 = vmax.f32 %v3586_v50, 0.0  ;;  %v3779_v34 = vadd.f32 %v3778_v25, %v9481_v55  ;;  %v9510_v25 = vpop.permute.xlu1 %3313 }
 0x4fe   : > { %v9486_v57 = vmax.f32 %v4646_v26, %v4332_v40  ;;  %v3780_v60 = vpop.f32.mrf.mxu1  ;;  %v3591_v47 = vpop.f32.mrf.mxu0  ;;  %4056 = vmatmul.mubr.bf16.gmra.mxu0 %v9349_v51  ;;  %v4340_v10 = vmax.f32 %v3777_v30, 0.0 }
 0x4ff   : > { %v4647_v48 = vmax.f32 %v4615_v59, %v4339_v44  ;;  %v4346_v9 = vmax.f32 %v3588_v53, 0.0  ;;  %4065 = vmatprep.mubr.bf16.mxu0 %v10948_v38  ;;  %v4584_v37 = vmax.f32 %v4552_v0, %v4345_v17  ;;  %v3781_v2 = vadd.f32 %v3780_v60, %v9481_v55 }
 0x500   : > { %v3592_v36 = vadd.f32 %v3591_v47, %v9490_v3  ;;  %v3784_v5 = vpop.f32.mrf.mxu1  ;;  %4249 = vmatmul.mubr.bf16.gmra.mxu1 %v9349_v51  ;;  %v3593_v31 = vpop.f32.mrf.mxu0  ;;  %v4347_v56 = vmax.f32 %v3779_v34, 0.0 }
 0x501   : > { %v9498_v6 = vmax.f32 %v4647_v48, %v4340_v10  ;;  %v3594_v4 = vadd.f32 %v3593_v31, %v9490_v3  ;;  %4258 = vmatprep.mubr.bf16.mxu1 %v10948_v38  ;;  %v4616_v62 = vmax.f32 %v4584_v37, %v4346_v9  ;;  %v3785_v63 = vadd.f32 %v3784_v5, %v9490_v3  ;;  %v4555_v48 = vld [vmem:[#allocation2 + $0xe8] sm:$0xff] }
 0x502   : > { %v4353_v61 = vmax.f32 %v3592_v36, 0.0  ;;  %v3786_v52 = vpop.f32.mrf.mxu1  ;;  %v3595_v41 = vpop.f32.mrf.mxu0  ;;  %v4348_v19 = vmax.f32 %v3781_v2, 0.0 }
 0x503   : > { %v4354_v7 = vmax.f32 %v3594_v4, 0.0  ;;  %v3596_v51 = vadd.f32 %v3595_v41, %v9496_v35  ;;  %v4648_v23 = vmax.f32 %v4616_v62, %v4347_v56  ;;  %v3787_v24 = vadd.f32 %v3786_v52, %v9490_v3 }
 0x504   : > { %v4585_v12 = vmax.f32 %v4553_v1, %v4353_v61  ;;  %v3788_v15 = vpop.f32.mrf.mxu1  ;;  %v3597_v33 = vpop.f32.mrf.mxu0  ;;  %v4355_v30 = vmax.f32 %v3785_v63, 0.0 }
 0x505   : > { %v4361_v13 = vmax.f32 %v3596_v51, 0.0  ;;  %v3789_v32 = vadd.f32 %v3788_v15, %v9496_v35  ;;  %v3598_v27 = vadd.f32 %v3597_v33, %v9496_v35  ;;  %v9507_v20 = vmax.f32 %v4648_v23, %v4348_v19  ;;  %v9521_v1 = vpop.permute.xlu0 %3318  ;;  %v4556_v19 = vld [vmem:[#allocation2 + $0xb8] sm:$0xff] }
 0x506   : > { %v4617_v40 = vmax.f32 %v4585_v12, %v4354_v7  ;;  %v3790_v26 = vpop.f32.mrf.mxu1  ;;  %v3601_v50 = vpop.f32.mrf.mxu0  ;;  %4066 = vmatmul.mubr.bf16.gmra.mxu0 %v9358_v22  ;;  %v4356_v0 = vmax.f32 %v3787_v24, 0.0 }
 0x507   : > { %v4586_v43 = vmax.f32 %v4554_v18, %v4361_v13  ;;  %v4362_v44 = vmax.f32 %v3598_v27, 0.0  ;;  %v3791_v59 = vadd.f32 %v3790_v26, %v9496_v35  ;;  %4075 = vmatprep.mubr.bf16.mxu0 %v10948_v38  ;;  %v3602_v17 = vadd.f32 %v3601_v50, %v9510_v25  ;;  %v9525_v7 = vpop.permute.xlu1 %3323 }
 0x508   : > { %v4649_v53 = vmax.f32 %v4617_v40, %v4355_v30  ;;  %v3794_v34 = vpop.f32.mrf.mxu1  ;;  %4259 = vmatmul.mubr.bf16.gmra.mxu1 %v9358_v22  ;;  %v3603_v60 = vpop.f32.mrf.mxu0  ;;  %v4363_v47 = vmax.f32 %v3789_v32, 0.0 }
 0x509   : > { %v4618_v10 = vmax.f32 %v4586_v43, %v4362_v44  ;;  %v3604_v9 = vadd.f32 %v3603_v60, %v9510_v25  ;;  %4268 = vmatprep.mubr.bf16.mxu1 %v10948_v38  ;;  %v4369_v2 = vmax.f32 %v3602_v17, 0.0  ;;  %v3795_v36 = vadd.f32 %v3794_v34, %v9510_v25  ;;  %v4557_v43 = vld [vmem:[#allocation2 + $0x60] sm:$0xff] }
 0x50a   : > { %v9518_v37 = vmax.f32 %v4649_v53, %v4356_v0  ;;  %v3796_v5 = vpop.f32.mrf.mxu1  ;;  %v3605_v31 = vpop.f32.mrf.mxu0  ;;  %v4364_v4 = vmax.f32 %v3791_v59, 0.0 }
 0x50b   : > { %v4650_v56 = vmax.f32 %v4618_v10, %v4363_v47  ;;  %v4370_v22 = vmax.f32 %v3604_v9, 0.0  ;;  %v4587_v62 = vmax.f32 %v4555_v48, %v4369_v2  ;;  %v3797_v61 = vadd.f32 %v3796_v5, %v9510_v25  ;;  %v9541_v9 = vpop.permute.xlu0 %3328 }
 0x50c   : > { %v3606_v63 = vadd.f32 %v3605_v31, %v9521_v1  ;;  %v3798_v52 = vpop.f32.mrf.mxu1  ;;  %v3607_v41 = vpop.f32.mrf.mxu0  ;;  %v4371_v12 = vmax.f32 %v3795_v36, 0.0 }
 0x50d   : > { %v9527_v51 = vmax.f32 %v4650_v56, %v4364_v4  ;;  %v3608_v23 = vadd.f32 %v3607_v41, %v9521_v1  ;;  %v4619_v24 = vmax.f32 %v4587_v62, %v4370_v22  ;;  %v3799_v15 = vadd.f32 %v3798_v52, %v9521_v1 }
 0x50e   : > { %v4377_v18 = vmax.f32 %v3606_v63, 0.0  ;;  %v3800_v33 = vpop.f32.mrf.mxu1  ;;  %v3611_v13 = vpop.f32.mrf.mxu0  ;;  %4076 = vmatmul.mubr.bf16.gmra.mxu0 %v9367_v16  ;;  %v4372_v30 = vmax.f32 %v3797_v61, 0.0  ;;  %v4558_v61 = vld [vmem:[#allocation2 + $0xf0] sm:$0xff] }
 0x50f   : > { %v4378_v32 = vmax.f32 %v3608_v23, 0.0  ;;  %v3612_v27 = vadd.f32 %v3611_v13, %v9525_v7  ;;  %4085 = vmatprep.mubr.bf16.mxu0 %v10948_v38  ;;  %v4651_v40 = vmax.f32 %v4619_v24, %v4371_v12  ;;  %v3801_v50 = vadd.f32 %v3800_v33, %v9521_v1  ;;  %v9550_v24 = vpop.permute.xlu1 %3333 }
 0x510   : > { %v4588_v26 = vmax.f32 %v4556_v19, %v4377_v18  ;;  %v3804_v44 = vpop.f32.mrf.mxu1  ;;  %4269 = vmatmul.mubr.bf16.gmra.mxu1 %v9367_v16  ;;  %v3613_v59 = vpop.f32.mrf.mxu0  ;;  %v4379_v60 = vmax.f32 %v3799_v15, 0.0 }
 0x511   : > { %v4385_v0 = vmax.f32 %v3612_v27, 0.0  ;;  %v3805_v53 = vadd.f32 %v3804_v44, %v9525_v7  ;;  %v3614_v17 = vadd.f32 %v3613_v59, %v9525_v7  ;;  %4278 = vmatprep.mubr.bf16.mxu1 %v10948_v38  ;;  %v9539_v34 = vmax.f32 %v4651_v40, %v4372_v30 }
 0x512   : > { %v4620_v47 = vmax.f32 %v4588_v26, %v4378_v32  ;;  %v3806_v10 = vpop.f32.mrf.mxu1  ;;  %v3615_v48 = vpop.f32.mrf.mxu0  ;;  %v4380_v5 = vmax.f32 %v3801_v50, 0.0 }
 0x513   : > { %v4589_v2 = vmax.f32 %v4557_v43, %v4385_v0  ;;  %v4386_v36 = vmax.f32 %v3614_v17, 0.0  ;;  %v3807_v16 = vadd.f32 %v3806_v10, %v9525_v7  ;;  %v3616_v4 = vadd.f32 %v3615_v48, %v9541_v9  ;;  %v9555_v26 = vpop.permute.xlu0 %3338  ;;  %v4559_v43 = vld [vmem:[#allocation2 + $0x8] sm:$0xff] }
 0x514   : > { %v4652_v31 = vmax.f32 %v4620_v47, %v4379_v60  ;;  %v3808_v56 = vpop.f32.mrf.mxu1  ;;  %v3617_v22 = vpop.f32.mrf.mxu0  ;;  %v4387_v62 = vmax.f32 %v3805_v53, 0.0 }
 0x515   : > { %v4621_v38 = vmax.f32 %v4589_v2, %v4386_v36  ;;  %v3618_v63 = vadd.f32 %v3617_v22, %v9541_v9  ;;  %v4393_v41 = vmax.f32 %v3616_v4, 0.0  ;;  %v3809_v19 = vadd.f32 %v3808_v56, %v9541_v9 }
 0x516   : > { %v9546_v52 = vmax.f32 %v4652_v31, %v4380_v5  ;;  %v3810_v23 = vpop.f32.mrf.mxu1  ;;  %v3621_v12 = vpop.f32.mrf.mxu0  ;;  %4086 = vmatmul.mubr.bf16.gmra.mxu0 %v9376_v28  ;;  %v4388_v18 = vmax.f32 %v3807_v16, 0.0  ;;  %v4560_v5 = vld [vmem:[#allocation2 + $0x78] sm:$0xff] }
 0x517   : > { %v4653_v15 = vmax.f32 %v4621_v38, %v4387_v62  ;;  %v4394_v33 = vmax.f32 %v3618_v63, 0.0  ;;  %v4590_v13 = vmax.f32 %v4558_v61, %v4393_v41  ;;  %v3811_v32 = vadd.f32 %v3810_v23, %v9541_v9  ;;  %v9567_v23 = vpop.permute.xlu1 %3343 }
 0x518   : > { %v3622_v27 = vadd.f32 %v3621_v12, %v9550_v24  ;;  %v3814_v30 = vpop.f32.mrf.mxu1  ;;  %4279 = vmatmul.mubr.bf16.gmra.mxu1 %v9376_v28  ;;  %v3623_v40 = vpop.f32.mrf.mxu0  ;;  %v4395_v59 = vmax.f32 %v3809_v19, 0.0 }
 0x519   : > { %v9557_v50 = vmax.f32 %v4653_v15, %v4388_v18  ;;  %v3624_v44 = vadd.f32 %v3623_v40, %v9550_v24  ;;  %v4622_v0 = vmax.f32 %v4590_v13, %v4394_v33  ;;  %v3815_v17 = vadd.f32 %v3814_v30, %v9550_v24 }
 0x51a   : > { %v4401_v53 = vmax.f32 %v3622_v27, 0.0  ;;  %v3816_v60 = vpop.f32.mrf.mxu1  ;;  %v3625_v47 = vpop.f32.mrf.mxu0  ;;  %v4396_v2 = vmax.f32 %v3811_v32, 0.0 }
 0x51b   : > { %v4402_v10 = vmax.f32 %v3624_v44, 0.0  ;;  %v3626_v48 = vadd.f32 %v3625_v47, %v9555_v26  ;;  %v4654_v28 = vmax.f32 %v4622_v0, %v4395_v59  ;;  %v3817_v16 = vadd.f32 %v3816_v60, %v9550_v24  ;;  %v4561_v44 = vld [vmem:[#allocation2 + $0x38] sm:$0xff] }
 0x51c   : > { %v4591_v36 = vmax.f32 %v4559_v43, %v4401_v53  ;;  %v3818_v31 = vpop.f32.mrf.mxu1  ;;  %v3627_v4 = vpop.f32.mrf.mxu0  ;;  %v4403_v61 = vmax.f32 %v3815_v17, 0.0 }
 0x51d   : > { %v4409_v56 = vmax.f32 %v3626_v48, 0.0  ;;  %v3819_v22 = vadd.f32 %v3818_v31, %v9555_v26  ;;  %v3628_v62 = vadd.f32 %v3627_v4, %v9555_v26  ;;  %v9565_v38 = vmax.f32 %v4654_v28, %v4396_v2 }
 0x51e   : > { %v4623_v63 = vmax.f32 %v4591_v36, %v4402_v10  ;;  %v3820_v41 = vpop.f32.mrf.mxu1  ;;  %v3631_v19 = vpop.f32.mrf.mxu0  ;;  %v4404_v33 = vmax.f32 %v3817_v16, 0.0 }
 0x51f   : > { %v4592_v12 = vmax.f32 %v4560_v5, %v4409_v56  ;;  %v4410_v18 = vmax.f32 %v3628_v62, 0.0  ;;  %v3821_v15 = vadd.f32 %v3820_v41, %v9555_v26  ;;  %v3632_v32 = vadd.f32 %v3631_v19, %v9567_v23  ;;  %v9575_v10 = vpop.permute.xlu0 %3348  ;;  %v9579_v56 = vpop.permute.xlu1 %3353  ;;  %v4562_v62 = vld [vmem:[#allocation2 + $0x58] sm:$0xff] }
 0x520   : > { %v4655_v13 = vmax.f32 %v4623_v63, %v4403_v61  ;;  %v3824_v27 = vpop.f32.mrf.mxu1  ;;  %v3633_v30 = vpop.f32.mrf.mxu0  ;;  %v4411_v40 = vmax.f32 %v3819_v22, 0.0 }
 0x521   : > { %v4624_v43 = vmax.f32 %v4592_v12, %v4410_v18  ;;  %v3634_v59 = vadd.f32 %v3633_v30, %v9567_v23  ;;  %v4417_v53 = vmax.f32 %v3632_v32, 0.0  ;;  %v3825_v17 = vadd.f32 %v3824_v27, %v9567_v23 }
 0x522   : > { %v9572_v0 = vmax.f32 %v4655_v13, %v4404_v33  ;;  %v3826_v60 = vpop.f32.mrf.mxu1  ;;  %v3635_v47 = vpop.f32.mrf.mxu0  ;;  %v4412_v48 = vmax.f32 %v3821_v15, 0.0 }
 0x523   : > { %v4656_v2 = vmax.f32 %v4624_v43, %v4411_v40  ;;  %v4418_v28 = vmax.f32 %v3634_v59, 0.0  ;;  %v4593_v36 = vmax.f32 %v4561_v44, %v4417_v53  ;;  %v3827_v16 = vadd.f32 %v3826_v60, %v9567_v23  ;;  %v4563_v43 = vld [vmem:[#allocation2 + $0x40] sm:$0xff] }
 0x524   : > { %v3636_v5 = vadd.f32 %v3635_v47, %v9575_v10  ;;  %v3828_v31 = vpop.f32.mrf.mxu1  ;;  %v3637_v4 = vpop.f32.mrf.mxu0  ;;  %v4419_v63 = vmax.f32 %v3825_v17, 0.0 }
 0x525   : > { %v9581_v22 = vmax.f32 %v4656_v2, %v4412_v48  ;;  %v3638_v61 = vadd.f32 %v3637_v4, %v9575_v10  ;;  %v4625_v41 = vmax.f32 %v4593_v36, %v4418_v28  ;;  %v3829_v12 = vadd.f32 %v3828_v31, %v9575_v10 }
 0x526   : > { %v4425_v19 = vmax.f32 %v3636_v5, 0.0  ;;  %v3830_v18 = vpop.f32.mrf.mxu1  ;;  %v3641_v15 = vpop.f32.mrf.mxu0  ;;  %v4420_v32 = vmax.f32 %v3827_v16, 0.0 }
 0x527   : > { %v4426_v33 = vmax.f32 %v3638_v61, 0.0  ;;  %v3642_v13 = vadd.f32 %v3641_v15, %v9579_v56  ;;  %v4657_v27 = vmax.f32 %v4625_v41, %v4419_v63  ;;  %v3831_v40 = vadd.f32 %v3830_v18, %v9575_v10  ;;  %v9591_v5 = vpop.permute.xlu0 %3358 }
 0x528   : > { %v4594_v30 = vmax.f32 %v4562_v62, %v4425_v19  ;;  %v3834_v44 = vpop.f32.mrf.mxu1  ;;  %v3643_v59 = vpop.f32.mrf.mxu0  ;;  %v4427_v48 = vmax.f32 %v3829_v12, 0.0  ;;  %10991 = vst [vmem:[#allocation41_spill] sm:$0xff] %v9591_v5 }
 0x529   : > { %v4433_v53 = vmax.f32 %v3642_v13, 0.0  ;;  %v3835_v17 = vadd.f32 %v3834_v44, %v9579_v56  ;;  %v3644_v60 = vadd.f32 %v3643_v59, %v9579_v56  ;;  %v9589_v47 = vmax.f32 %v4657_v27, %v4420_v32  ;;  %v4564_v13 = vld [vmem:[#allocation2 + $0xc8] sm:$0xff]  ;;  %v9599_v44 = vpop.permute.xlu1 %3363 }
 0x52a   : > { %v4626_v2 = vmax.f32 %v4594_v30, %v4426_v33  ;;  %v3836_v28 = vpop.f32.mrf.mxu1  ;;  %v3645_v36 = vpop.f32.mrf.mxu0  ;;  %v4428_v62 = vmax.f32 %v3831_v40, 0.0  ;;  %10992 = vst [vmem:[#allocation64_spill] sm:$0xff] %v9599_v44 }
 0x52b   : > { %v4595_v16 = vmax.f32 %v4563_v43, %v4433_v53  ;;  %v4434_v31 = vmax.f32 %v3644_v60, 0.0  ;;  %v3837_v4 = vadd.f32 %v3836_v28, %v9579_v56  ;;  %v3646_v63 = vadd.f32 %v3645_v36, %v9591_v5  ;;  %v9603_v36 = vpop.permute.xlu0 %3368 }
 0x52c   : > { %v4658_v61 = vmax.f32 %v4626_v2, %v4427_v48  ;;  %v3838_v41 = vpop.f32.mrf.mxu1  ;;  %v3647_v19 = vpop.f32.mrf.mxu0  ;;  %v4435_v18 = vmax.f32 %v3835_v17, 0.0  ;;  %10993 = vst [vmem:[#allocation16_spill] sm:$0xff] %v9603_v36 }
 0x52d   : > { %v4627_v15 = vmax.f32 %v4595_v16, %v4434_v31  ;;  %v3648_v12 = vadd.f32 %v3647_v19, %v9591_v5  ;;  %v4441_v32 = vmax.f32 %v3646_v63, 0.0  ;;  %v3839_v27 = vadd.f32 %v3838_v41, %v9591_v5  ;;  %v4565_v31 = vld [vmem:[#allocation2 + $0xe0] sm:$0xff] }
 0x52e   : > { %v9596_v33 = vmax.f32 %v4658_v61, %v4428_v62  ;;  %v3840_v30 = vpop.f32.mrf.mxu1  ;;  %v3651_v43 = vpop.f32.mrf.mxu0  ;;  %v4436_v40 = vmax.f32 %v3837_v4, 0.0 }
 0x52f   : > { %v4659_v59 = vmax.f32 %v4627_v15, %v4435_v18  ;;  %v4442_v53 = vmax.f32 %v3648_v12, 0.0  ;;  %v4596_v60 = vmax.f32 %v4564_v13, %v4441_v32  ;;  %v3841_v48 = vadd.f32 %v3840_v30, %v9591_v5 }
 0x530   : > { %v3652_v17 = vadd.f32 %v3651_v43, %v9599_v44  ;;  %v3844_v2 = vpop.f32.mrf.mxu1  ;;  %v3653_v28 = vpop.f32.mrf.mxu0  ;;  %v4443_v61 = vmax.f32 %v3839_v27, 0.0 }
 0x531   : > { %v9605_v16 = vmax.f32 %v4659_v59, %v4436_v40  ;;  %v3654_v62 = vadd.f32 %v3653_v28, %v9599_v44  ;;  %v4628_v63 = vmax.f32 %v4596_v60, %v4442_v53  ;;  %v3845_v4 = vadd.f32 %v3844_v2, %v9599_v44  ;;  %v4566_v40 = vld [vmem:[#allocation2 + $0x90] sm:$0xff] }
 0x532   : > { %v4449_v41 = vmax.f32 %v3652_v17, 0.0  ;;  %v3846_v19 = vpop.f32.mrf.mxu1  ;;  %v3655_v18 = vpop.f32.mrf.mxu0  ;;  %v4444_v12 = vmax.f32 %v3841_v48, 0.0 }
 0x533   : > { %10994 = vst [vmem:[#allocation42_spill] sm:$0xff] %v9605_v16  ;;  %v4450_v15 = vmax.f32 %v3654_v62, 0.0  ;;  %v3656_v13 = vadd.f32 %v3655_v18, %v9603_v36  ;;  %v4660_v32 = vmax.f32 %v4628_v63, %v4443_v61  ;;  %v3847_v43 = vadd.f32 %v3846_v19, %v9599_v44  ;;  %v9615_v18 = vpop.permute.xlu1 %3373 }
 0x534   : > { %v4597_v30 = vmax.f32 %v4565_v31, %v4449_v41  ;;  %v3848_v59 = vpop.f32.mrf.mxu1  ;;  %v3657_v16 = vpop.f32.mrf.mxu0  ;;  %v4451_v17 = vmax.f32 %v3845_v4, 0.0  ;;  %10996 = vst [vmem:[#allocation55_spill] sm:$0xff] %v9615_v18 }
 0x535   : > { %v4457_v5 = vmax.f32 %v3656_v13, 0.0  ;;  %v3849_v27 = vadd.f32 %v3848_v59, %v9603_v36  ;;  %v3658_v53 = vadd.f32 %v3657_v16, %v9603_v36  ;;  %v9613_v60 = vmax.f32 %v4660_v32, %v4444_v12  ;;  %v4567_v12 = vld [vmem:[#allocation2 + $0x70] sm:$0xff] }
 0x536   : > { %v4629_v2 = vmax.f32 %v4597_v30, %v4450_v15  ;;  %v3850_v28 = vpop.f32.mrf.mxu1  ;;  %v3661_v62 = vpop.f32.mrf.mxu0  ;;  %v4452_v63 = vmax.f32 %v3847_v43, 0.0 }
 0x537   : > { %10995 = vst [vmem:[#allocation35_spill] sm:$0xff] %v9613_v60  ;;  %v4598_v48 = vmax.f32 %v4566_v40, %v4457_v5  ;;  %v4458_v31 = vmax.f32 %v3658_v53, 0.0  ;;  %v3851_v61 = vadd.f32 %v3850_v28, %v9603_v36  ;;  %v3662_v19 = vadd.f32 %v3661_v62, %v9615_v18  ;;  %v9623_v53 = vpop.permute.xlu0 %3378 }
 0x538   : > { %v4661_v41 = vmax.f32 %v4629_v2, %v4451_v17  ;;  %v3854_v13 = vpop.f32.mrf.mxu1  ;;  %v3663_v59 = vpop.f32.mrf.mxu0  ;;  %v4459_v44 = vmax.f32 %v3849_v27, 0.0  ;;  %10998 = vst [vmem:[#allocation56_spill] sm:$0xff] %v9623_v53 }
 0x539   : > { %v4630_v16 = vmax.f32 %v4598_v48, %v4458_v31  ;;  %v3664_v4 = vadd.f32 %v3663_v59, %v9615_v18  ;;  %v4465_v32 = vmax.f32 %v3662_v19, 0.0  ;;  %v3855_v30 = vadd.f32 %v3854_v13, %v9615_v18  ;;  %v9627_v59 = vpop.permute.xlu1 %3383 }
 0x53a   : > { %v9620_v15 = vmax.f32 %v4661_v41, %v4452_v63  ;;  %v3856_v5 = vpop.f32.mrf.mxu1  ;;  %v3665_v40 = vpop.f32.mrf.mxu0  ;;  %v4460_v43 = vmax.f32 %v3851_v61, 0.0  ;;  %10999 = vst [vmem:[#allocation57_spill] sm:$0xff] %v9627_v59  ;;  %v4568_v41 = vld [vmem:[#allocation2 + $0xc0] sm:$0xff] }
 0x53b   : > { %v4662_v17 = vmax.f32 %v4630_v16, %v4459_v44  ;;  %v4466_v2 = vmax.f32 %v3664_v4, 0.0  ;;  %v4599_v28 = vmax.f32 %v4567_v12, %v4465_v32  ;;  %v3857_v62 = vadd.f32 %v3856_v5, %v9615_v18 }
 0x53c   : > { %10997 = vst [vmem:[#allocation17_spill] sm:$0xff] %v9620_v15  ;;  %v3666_v27 = vadd.f32 %v3665_v40, %v9623_v53  ;;  %v3858_v48 = vpop.f32.mrf.mxu1  ;;  %v3667_v31 = vpop.f32.mrf.mxu0  ;;  %v4467_v13 = vmax.f32 %v3855_v30, 0.0 }
 0x53d   : > { %v9629_v63 = vmax.f32 %v4662_v17, %v4460_v43  ;;  %v3668_v19 = vadd.f32 %v3667_v31, %v9623_v53  ;;  %v4631_v36 = vmax.f32 %v4599_v28, %v4466_v2  ;;  %v3859_v44 = vadd.f32 %v3858_v48, %v9623_v53  ;;  %v4569_v43 = vld [vmem:[#allocation2 + $0xa8] sm:$0xff] }
 0x53e   : > { %v4473_v15 = vmax.f32 %v3666_v27, 0.0  ;;  %v3860_v61 = vpop.f32.mrf.mxu1  ;;  %v3671_v16 = vpop.f32.mrf.mxu0  ;;  %v4468_v32 = vmax.f32 %v3857_v62, 0.0 }
 0x53f   : > { %11000 = vst [vmem:[#allocation61_spill] sm:$0xff] %v9629_v63  ;;  %v4474_v12 = vmax.f32 %v3668_v19, 0.0  ;;  %v3672_v4 = vadd.f32 %v3671_v16, %v9627_v59  ;;  %v4663_v5 = vmax.f32 %v4631_v36, %v4467_v13  ;;  %v3861_v18 = vadd.f32 %v3860_v61, %v9623_v53  ;;  %v9639_v16 = vpop.permute.xlu0 %3388 }
 0x540   : > { %v4600_v40 = vmax.f32 %v4568_v41, %v4473_v15  ;;  %v3864_v17 = vpop.f32.mrf.mxu1  ;;  %v3673_v63 = vpop.f32.mrf.mxu0  ;;  %v4475_v27 = vmax.f32 %v3859_v44, 0.0  ;;  %11002 = vst [vmem:[#allocation7_spill] sm:$0xff] %v9639_v16 }
 0x541   : > { %v4481_v60 = vmax.f32 %v3672_v4, 0.0  ;;  %v3865_v30 = vadd.f32 %v3864_v17, %v9627_v59  ;;  %v3674_v2 = vadd.f32 %v3673_v63, %v9627_v59  ;;  %v9637_v28 = vmax.f32 %v4663_v5, %v4468_v32  ;;  %v4570_v32 = vld [vmem:[#allocation2 + $0xd0] sm:$0xff] }
 0x542   : > { %v4632_v48 = vmax.f32 %v4600_v40, %v4474_v12  ;;  %v3866_v31 = vpop.f32.mrf.mxu1  ;;  %v3675_v19 = vpop.f32.mrf.mxu0  ;;  %v4476_v41 = vmax.f32 %v3861_v18, 0.0 }
 0x543   : > { %11001 = vst [vmem:[#allocation43_spill] sm:$0xff] %v9637_v28  ;;  %v4601_v36 = vmax.f32 %v4569_v43, %v4481_v60  ;;  %v4482_v15 = vmax.f32 %v3674_v2, 0.0  ;;  %v3867_v62 = vadd.f32 %v3866_v31, %v9627_v59  ;;  %v3676_v61 = vadd.f32 %v3675_v19, %v9639_v16  ;;  %v9647_v2 = vpop.permute.xlu1 %3393 }
 0x544   : > { %v4664_v13 = vmax.f32 %v4632_v48, %v4475_v27  ;;  %v3868_v4 = vpop.f32.mrf.mxu1  ;;  %v3677_v17 = vpop.f32.mrf.mxu0  ;;  %v4483_v53 = vmax.f32 %v3865_v30, 0.0  ;;  %11004 = vst [vmem:[#allocation8_spill] sm:$0xff] %v9647_v2 }
 0x545   : > { %v4633_v63 = vmax.f32 %v4601_v36, %v4482_v15  ;;  %v3678_v44 = vadd.f32 %v3677_v17, %v9639_v16  ;;  %v4489_v5 = vmax.f32 %v3676_v61, 0.0  ;;  %v3869_v40 = vadd.f32 %v3868_v4, %v9639_v16  ;;  %v9651_v17 = vpop.permute.xlu0 %3398 }
 0x546   : > { %v9644_v12 = vmax.f32 %v4664_v13, %v4476_v41  ;;  %v3870_v60 = vpop.f32.mrf.mxu1  ;;  %v3681_v43 = vpop.f32.mrf.mxu0  ;;  %v4484_v18 = vmax.f32 %v3867_v62, 0.0  ;;  %11005 = vst [vmem:[#allocation20_spill] sm:$0xff] %v9651_v17  ;;  %v4571_v13 = vld [vmem:[#allocation2 + $0x10] sm:$0xff] }
 0x547   : > { %v4665_v27 = vmax.f32 %v4633_v63, %v4483_v53  ;;  %v4490_v48 = vmax.f32 %v3678_v44, 0.0  ;;  %v4602_v31 = vmax.f32 %v4570_v32, %v4489_v5  ;;  %v3871_v19 = vadd.f32 %v3870_v60, %v9639_v16 }
 0x548   : > { %11003 = vst [vmem:[#allocation59_spill] sm:$0xff] %v9644_v12  ;;  %v3682_v30 = vadd.f32 %v3681_v43, %v9647_v2  ;;  %v3874_v36 = vpop.f32.mrf.mxu1  ;;  %v3683_v15 = vpop.f32.mrf.mxu0  ;;  %v4491_v4 = vmax.f32 %v3869_v40, 0.0 }
 0x549   : > { %v9653_v41 = vmax.f32 %v4665_v27, %v4484_v18  ;;  %v3684_v61 = vadd.f32 %v3683_v15, %v9647_v2  ;;  %v4634_v59 = vmax.f32 %v4602_v31, %v4490_v48  ;;  %v3875_v53 = vadd.f32 %v3874_v36, %v9647_v2  ;;  %v4572_v18 = vld [vmem:[#allocation2 + $0x28] sm:$0xff] }
 0x54a   : > { %v4497_v12 = vmax.f32 %v3682_v30, 0.0  ;;  %v3876_v62 = vpop.f32.mrf.mxu1  ;;  %v3685_v63 = vpop.f32.mrf.mxu0  ;;  %v4492_v5 = vmax.f32 %v3871_v19, 0.0 }
 0x54b   : > { %11006 = vst [vmem:[#allocation54_spill] sm:$0xff] %v9653_v41  ;;  %v4498_v32 = vmax.f32 %v3684_v61, 0.0  ;;  %v3686_v44 = vadd.f32 %v3685_v63, %v9651_v17  ;;  %v4666_v60 = vmax.f32 %v4634_v59, %v4491_v4  ;;  %v3877_v16 = vadd.f32 %v3876_v62, %v9647_v2  ;;  %v9663_v63 = vpop.permute.xlu1 %3403 }
 0x54c   : > { %v4603_v43 = vmax.f32 %v4571_v13, %v4497_v12  ;;  %v3878_v27 = vpop.f32.mrf.mxu1  ;;  %v3687_v41 = vpop.f32.mrf.mxu0  ;;  %v4499_v30 = vmax.f32 %v3875_v53, 0.0  ;;  %11008 = vst [vmem:[#allocation44_spill] sm:$0xff] %v9663_v63 }
 0x54d   : > { %v4505_v28 = vmax.f32 %v3686_v44, 0.0  ;;  %v3879_v40 = vadd.f32 %v3878_v27, %v9651_v17  ;;  %v3688_v48 = vadd.f32 %v3687_v41, %v9651_v17  ;;  %v9661_v31 = vmax.f32 %v4666_v60, %v4492_v5  ;;  %v4573_v5 = vld [vmem:[#allocation2 + $0xa0] sm:$0xff] }
 0x54e   : > { %v4635_v36 = vmax.f32 %v4603_v43, %v4498_v32  ;;  %v3880_v15 = vpop.f32.mrf.mxu1  ;;  %v3691_v61 = vpop.f32.mrf.mxu0  ;;  %v4500_v13 = vmax.f32 %v3877_v16, 0.0 }
 0x54f   : > { %11007 = vst [vmem:[#allocation11_spill] sm:$0xff] %v9661_v31  ;;  %v4604_v59 = vmax.f32 %v4572_v18, %v4505_v28  ;;  %v4506_v12 = vmax.f32 %v3688_v48, 0.0  ;;  %v3881_v19 = vadd.f32 %v3880_v15, %v9651_v17  ;;  %v3692_v62 = vadd.f32 %v3691_v61, %v9663_v63  ;;  %v9671_v48 = vpop.permute.xlu0 %3408 }
 0x550   : > { %v4667_v4 = vmax.f32 %v4635_v36, %v4499_v30  ;;  %v3884_v44 = vpop.f32.mrf.mxu1  ;;  %v3693_v27 = vpop.f32.mrf.mxu0  ;;  %v4507_v2 = vmax.f32 %v3879_v40, 0.0  ;;  %11010 = vst [vmem:[#allocation27_spill] sm:$0xff] %v9671_v48 }
 0x551   : > { %v4636_v41 = vmax.f32 %v4604_v59, %v4506_v12  ;;  %v3694_v53 = vadd.f32 %v3693_v27, %v9663_v63  ;;  %v4513_v60 = vmax.f32 %v3692_v62, 0.0  ;;  %v3885_v43 = vadd.f32 %v3884_v44, %v9663_v63  ;;  %v9675_v27 = vpop.permute.xlu1 %3413 }
 0x552   : > { %v9668_v32 = vmax.f32 %v4667_v4, %v4500_v13  ;;  %v3886_v28 = vpop.f32.mrf.mxu1  ;;  %v3695_v18 = vpop.f32.mrf.mxu0  ;;  %v4508_v16 = vmax.f32 %v3881_v19, 0.0  ;;  %11011 = vst [vmem:[#allocation38_spill] sm:$0xff] %v9675_v27  ;;  %v4574_v4 = vld [vmem:[#allocation2 + $0xf8] sm:$0xff] }
 0x553   : > { %v4668_v30 = vmax.f32 %v4636_v41, %v4507_v2  ;;  %v4514_v36 = vmax.f32 %v3694_v53, 0.0  ;;  %v4605_v15 = vmax.f32 %v4573_v5, %v4513_v60  ;;  %v3887_v61 = vadd.f32 %v3886_v28, %v9663_v63 }
 0x554   : > { %11009 = vst [vmem:[#allocation50_spill] sm:$0xff] %v9668_v32  ;;  %v3696_v40 = vadd.f32 %v3695_v18, %v9671_v48  ;;  %v3888_v59 = vpop.f32.mrf.mxu1  ;;  %v3697_v12 = vpop.f32.mrf.mxu0  ;;  %v4515_v44 = vmax.f32 %v3885_v43, 0.0 }
 0x555   : > { %v9677_v13 = vmax.f32 %v4668_v30, %v4508_v16  ;;  %v3698_v62 = vadd.f32 %v3697_v12, %v9671_v48  ;;  %v4637_v17 = vmax.f32 %v4605_v15, %v4514_v36  ;;  %v3889_v2 = vadd.f32 %v3888_v59, %v9671_v48  ;;  %v4575_v16 = vld [vmem:[#allocation2 + $0x20] sm:$0xff] }
 0x556   : > { %v4521_v32 = vmax.f32 %v3696_v40, 0.0  ;;  %v3890_v19 = vpop.f32.mrf.mxu1  ;;  %v3701_v41 = vpop.f32.mrf.mxu0  ;;  %v4516_v60 = vmax.f32 %v3887_v61, 0.0 }
 0x557   : > { %11012 = vst [vmem:[#allocation69_spill] sm:$0xff] %v9677_v13  ;;  %v4522_v5 = vmax.f32 %v3698_v62, 0.0  ;;  %v3702_v53 = vadd.f32 %v3701_v41, %v9675_v27  ;;  %v4669_v28 = vmax.f32 %v4637_v17, %v4515_v44  ;;  %v3891_v63 = vadd.f32 %v3890_v19, %v9671_v48  ;;  %v9687_v41 = vpop.permute.xlu0 %3418 }
 0x558   : > { %v4606_v18 = vmax.f32 %v4574_v4, %v4521_v32  ;;  %v3894_v30 = vpop.f32.mrf.mxu1  ;;  %v3703_v13 = vpop.f32.mrf.mxu0  ;;  %v4523_v40 = vmax.f32 %v3889_v2, 0.0 }
 0x559   : > { %v4529_v31 = vmax.f32 %v3702_v53, 0.0  ;;  %v3895_v43 = vadd.f32 %v3894_v30, %v9675_v27  ;;  %v3704_v36 = vadd.f32 %v3703_v13, %v9675_v27  ;;  %v9685_v15 = vmax.f32 %v4669_v28, %v4516_v60  ;;  %v4576_v60 = vld [vmem:[#allocation2 + $0x98] sm:$0xff] }
 0x55a   : > { %v4638_v59 = vmax.f32 %v4606_v18, %v4522_v5  ;;  %v3896_v12 = vpop.f32.mrf.mxu1  ;;  %v3705_v62 = vpop.f32.mrf.mxu0  ;;  %v4524_v4 = vmax.f32 %v3891_v63, 0.0 }
 0x55b   : > { %v4607_v17 = vmax.f32 %v4575_v16, %v4529_v31  ;;  %v4530_v32 = vmax.f32 %v3704_v36, 0.0  ;;  %v3897_v61 = vadd.f32 %v3896_v12, %v9675_v27  ;;  %v3706_v19 = vadd.f32 %v3705_v62, %v9687_v41 }
 0x55c   : > { %v4670_v44 = vmax.f32 %v4638_v59, %v4523_v40  ;;  %v3898_v53 = vpop.f32.mrf.mxu1  ;;  %v3707_v30 = vpop.f32.mrf.mxu0  ;;  %v4531_v48 = vmax.f32 %v3895_v43, 0.0 }
 0x55d   : > { %v4639_v13 = vmax.f32 %v4607_v17, %v4530_v32  ;;  %v3708_v2 = vadd.f32 %v3707_v30, %v9687_v41  ;;  %v4537_v28 = vmax.f32 %v3706_v19, 0.0  ;;  %v3899_v18 = vadd.f32 %v3898_v53, %v9687_v41 }
 0x55e   : > { %v9692_v5 = vmax.f32 %v4670_v44, %v4524_v4  ;;  %v3900_v31 = vpop.f32.mrf.mxu1  ;;  %v3937_v16 = vpop.f32.mrf.mxu0  ;;  %v4532_v36 = vmax.f32 %v3897_v61, 0.0 }
 0x55f   : > { %v4671_v12 = vmax.f32 %v4639_v13, %v4531_v48  ;;  %v4538_v63 = vmax.f32 %v3708_v2, 0.0  ;;  %v4608_v40 = vmax.f32 %v4576_v60, %v4537_v28  ;;  %v3901_v59 = vadd.f32 %v3900_v31, %v9687_v41 }
 0x560   : > { %v3938_v62 = vadd.f32 %v3937_v16, %v9414_v21  ;;  %v4130_v43 = vpop.f32.mrf.mxu1  ;;  %v3939_v17 = vpop.f32.mrf.mxu0  ;;  %v4539_v44 = vmax.f32 %v3899_v18, 0.0 }
 0x561   : > { %v9697_v32 = vmax.f32 %v4671_v12, %v4532_v36  ;;  %v3940_v4 = vadd.f32 %v3939_v17, %v9414_v21  ;;  %v4640_v19 = vmax.f32 %v4608_v40, %v4538_v63  ;;  %v4131_v53 = vadd.f32 %v4130_v43, %v9414_v21 }
 0x562   : > { %v4293_v30 = vmax.f32 %v3938_v62, 0.0  ;;  %v4132_v27 = vpop.f32.mrf.mxu1  ;;  %v3941_v61 = vpop.f32.mrf.mxu0  ;;  %v4540_v60 = vmax.f32 %v3901_v59, 0.0 }
 0x563   : > { %v4294_v48 = vmax.f32 %v3940_v4, 0.0  ;;  %v3942_v13 = vadd.f32 %v3941_v61, %v9423_v54  ;;  %v4672_v2 = vmax.f32 %v4640_v19, %v4539_v44  ;;  %v4133_v31 = vadd.f32 %v4132_v27, %v9414_v21 }
 0x564   : > { %v4705_v28 = vmax.f32 %v9438_v42, %v4293_v30  ;;  %v4134_v16 = vpop.f32.mrf.mxu1  ;;  %v3943_v36 = vpop.f32.mrf.mxu0  ;;  %v4295_v62 = vmax.f32 %v4131_v53, 0.0 }
 0x565   : > { %v4301_v12 = vmax.f32 %v3942_v13, 0.0  ;;  %v4135_v18 = vadd.f32 %v4134_v16, %v9423_v54  ;;  %v3944_v63 = vadd.f32 %v3943_v36, %v9423_v54  ;;  %v9706_v40 = vmax.f32 %v4672_v2, %v4540_v60 }
 0x566   : > { %v4737_v43 = vmax.f32 %v4705_v28, %v4294_v48  ;;  %v4136_v17 = vpop.f32.mrf.mxu1  ;;  %v3947_v4 = vpop.f32.mrf.mxu0  ;;  %v4296_v19 = vmax.f32 %v4133_v31, 0.0 }
 0x567   : > { %v4706_v59 = vmax.f32 %v9447_v58, %v4301_v12  ;;  %v4302_v44 = vmax.f32 %v3944_v63, 0.0  ;;  %v4137_v42 = vadd.f32 %v4136_v17, %v9423_v54  ;;  %v3948_v27 = vadd.f32 %v3947_v4, %v9430_v11 }
 0x568   : > { %v4769_v21 = vmax.f32 %v4737_v43, %v4295_v62  ;;  %v4140_v30 = vpop.f32.mrf.mxu1  ;;  %v3949_v61 = vpop.f32.mrf.mxu0  ;;  %v4303_v13 = vmax.f32 %v4135_v18, 0.0 }
 0x569   : > { %v4738_v16 = vmax.f32 %v4706_v59, %v4302_v44  ;;  %v3950_v60 = vadd.f32 %v3949_v61, %v9430_v11  ;;  %v4309_v53 = vmax.f32 %v3948_v27, 0.0  ;;  %v4141_v48 = vadd.f32 %v4140_v30, %v9430_v11 }
 0x56a   : > { %v4801_v2 = vmax.f32 %v4769_v21, %v4296_v19  ;;  %v4142_v28 = vpop.f32.mrf.mxu1  ;;  %v3951_v36 = vpop.f32.mrf.mxu0  ;;  %v4304_v58 = vmax.f32 %v4137_v42, 0.0 }
 0x56b   : > { %v4770_v12 = vmax.f32 %v4738_v16, %v4303_v13  ;;  %v4310_v63 = vmax.f32 %v3950_v60, 0.0  ;;  %v4707_v54 = vmax.f32 %v9458_v29, %v4309_v53  ;;  %v4143_v31 = vadd.f32 %v4142_v28, %v9430_v11 }
 0x56c   : > { %4833 = vst [vmem:[#allocation2 + $0xb0] sm:$0xff] %v4801_v2  ;;  %v3952_v62 = vadd.f32 %v3951_v36, %v9436_v39  ;;  %v4144_v18 = vpop.f32.mrf.mxu1  ;;  %v3953_v43 = vpop.f32.mrf.mxu0  ;;  %v4311_v59 = vmax.f32 %v4141_v48, 0.0 }
 0x56d   : > { %v4802_v17 = vmax.f32 %v4770_v12, %v4304_v58  ;;  %v3954_v4 = vadd.f32 %v3953_v43, %v9436_v39  ;;  %v4739_v44 = vmax.f32 %v4707_v54, %v4310_v63  ;;  %v4145_v21 = vadd.f32 %v4144_v18, %v9436_v39 }
 0x56e   : > { %v4317_v19 = vmax.f32 %v3952_v62, 0.0  ;;  %v4146_v42 = vpop.f32.mrf.mxu1  ;;  %v3957_v27 = vpop.f32.mrf.mxu0  ;;  %v4312_v61 = vmax.f32 %v4143_v31, 0.0 }
 0x56f   : > { %4834 = vst [vmem:[#allocation2] sm:$0xff] %v4802_v17  ;;  %v4318_v30 = vmax.f32 %v3954_v4, 0.0  ;;  %v3958_v29 = vadd.f32 %v3957_v27, %v9450_v14  ;;  %v4771_v11 = vmax.f32 %v4739_v44, %v4311_v59  ;;  %v4147_v16 = vadd.f32 %v4146_v42, %v9436_v39 }
 0x570   : > { %v4708_v13 = vmax.f32 %v9467_v45, %v4317_v19  ;;  %v4150_v60 = vpop.f32.mrf.mxu1  ;;  %v3959_v2 = vpop.f32.mrf.mxu0  ;;  %v4319_v58 = vmax.f32 %v4145_v21, 0.0 }
 0x571   : > { %v4325_v53 = vmax.f32 %v3958_v29, 0.0  ;;  %v4151_v48 = vadd.f32 %v4150_v60, %v9450_v14  ;;  %v3960_v28 = vadd.f32 %v3959_v2, %v9450_v14  ;;  %v4803_v36 = vmax.f32 %v4771_v11, %v4312_v61 }
 0x572   : > { %v4740_v12 = vmax.f32 %v4708_v13, %v4318_v30  ;;  %v4152_v63 = vpop.f32.mrf.mxu1  ;;  %v3961_v54 = vpop.f32.mrf.mxu0  ;;  %v4320_v45 = vmax.f32 %v4147_v16, 0.0 }
 0x573   : > { %v4709_v62 = vmax.f32 %v9479_v49, %v4325_v53  ;;  %v4326_v31 = vmax.f32 %v3960_v28, 0.0  ;;  %v4153_v18 = vadd.f32 %v4152_v63, %v9450_v14  ;;  %4835 = vst [vmem:[#allocation2 + $0xd8] sm:$0xff] %v4803_v36  ;;  %v3962_v43 = vadd.f32 %v3961_v54, %v9461_v46 }
 0x574   : > { %v4772_v39 = vmax.f32 %v4740_v12, %v4319_v58  ;;  %v4154_v17 = vpop.f32.mrf.mxu1  ;;  %v3963_v4 = vpop.f32.mrf.mxu0  ;;  %v4327_v59 = vmax.f32 %v4151_v48, 0.0 }
 0x575   : > { %v4741_v44 = vmax.f32 %v4709_v62, %v4326_v31  ;;  %v3964_v19 = vadd.f32 %v3963_v4, %v9461_v46  ;;  %v4333_v42 = vmax.f32 %v3962_v43, 0.0  ;;  %v4155_v27 = vadd.f32 %v4154_v17, %v9461_v46 }
 0x576   : > { %v4804_v21 = vmax.f32 %v4772_v39, %v4320_v45  ;;  %v4156_v30 = vpop.f32.mrf.mxu1  ;;  %v3967_v49 = vpop.f32.mrf.mxu0  ;;  %v4328_v29 = vmax.f32 %v4153_v18, 0.0 }
 0x577   : > { %v4773_v61 = vmax.f32 %v4741_v44, %v4327_v59  ;;  %v4334_v14 = vmax.f32 %v3964_v19, 0.0  ;;  %v4710_v11 = vmax.f32 %v9486_v57, %v4333_v42  ;;  %v4157_v13 = vadd.f32 %v4156_v30, %v9461_v46 }
 0x578   : > { %4836 = vst [vmem:[#allocation2 + $0x18] sm:$0xff] %v4804_v21  ;;  %v3968_v16 = vadd.f32 %v3967_v49, %v9465_v8  ;;  %v4160_v60 = vpop.f32.mrf.mxu1  ;;  %v3969_v2 = vpop.f32.mrf.mxu0  ;;  %v4335_v28 = vmax.f32 %v4155_v27, 0.0 }
 0x579   : > { %v4805_v53 = vmax.f32 %v4773_v61, %v4328_v29  ;;  %v3970_v48 = vadd.f32 %v3969_v2, %v9465_v8  ;;  %v4742_v36 = vmax.f32 %v4710_v11, %v4334_v14  ;;  %v4161_v12 = vadd.f32 %v4160_v60, %v9465_v8 }
 0x57a   : > { %v4341_v58 = vmax.f32 %v3968_v16, 0.0  ;;  %v4162_v63 = vpop.f32.mrf.mxu1  ;;  %v3971_v54 = vpop.f32.mrf.mxu0  ;;  %v4336_v31 = vmax.f32 %v4157_v13, 0.0 }
 0x57b   : > { %4837 = vst [vmem:[#allocation2 + $0x50] sm:$0xff] %v4805_v53  ;;  %v4342_v62 = vmax.f32 %v3970_v48, 0.0  ;;  %v3972_v57 = vadd.f32 %v3971_v54, %v9481_v55  ;;  %v4774_v46 = vmax.f32 %v4742_v36, %v4335_v28  ;;  %v4163_v45 = vadd.f32 %v4162_v63, %v9465_v8 }
 0x57c   : > { %v4711_v18 = vmax.f32 %v9498_v6, %v4341_v58  ;;  %v4164_v39 = vpop.f32.mrf.mxu1  ;;  %v3973_v43 = vpop.f32.mrf.mxu0  ;;  %v4343_v19 = vmax.f32 %v4161_v12, 0.0 }
 0x57d   : > { %v4349_v17 = vmax.f32 %v3972_v57, 0.0  ;;  %v4165_v4 = vadd.f32 %v4164_v39, %v9481_v55  ;;  %v3974_v59 = vadd.f32 %v3973_v43, %v9481_v55  ;;  %v4806_v44 = vmax.f32 %v4774_v46, %v4336_v31 }
 0x57e   : > { %v4743_v21 = vmax.f32 %v4711_v18, %v4342_v62  ;;  %v4166_v42 = vpop.f32.mrf.mxu1  ;;  %v3977_v27 = vpop.f32.mrf.mxu0  ;;  %v4344_v6 = vmax.f32 %v4163_v45, 0.0 }
 0x57f   : > { %v4712_v30 = vmax.f32 %v9507_v20, %v4349_v17  ;;  %v4350_v49 = vmax.f32 %v3974_v59, 0.0  ;;  %v4167_v29 = vadd.f32 %v4166_v42, %v9481_v55  ;;  %4838 = vst [vmem:[#allocation2 + $0x68] sm:$0xff] %v4806_v44  ;;  %v3978_v61 = vadd.f32 %v3977_v27, %v9490_v3 }
 0x580   : > { %v4775_v8 = vmax.f32 %v4743_v21, %v4343_v19  ;;  %v4170_v14 = vpop.f32.mrf.mxu1  ;;  %v3979_v11 = vpop.f32.mrf.mxu0  ;;  %v4351_v13 = vmax.f32 %v4165_v4, 0.0 }
 0x581   : > { %v4744_v16 = vmax.f32 %v4712_v30, %v4350_v49  ;;  %v3980_v60 = vadd.f32 %v3979_v11, %v9490_v3  ;;  %v4357_v53 = vmax.f32 %v3978_v61, 0.0  ;;  %v4171_v48 = vadd.f32 %v4170_v14, %v9490_v3 }
 0x582   : > { %v4807_v2 = vmax.f32 %v4775_v8, %v4344_v6  ;;  %v4172_v28 = vpop.f32.mrf.mxu1  ;;  %v3981_v20 = vpop.f32.mrf.mxu0  ;;  %v4352_v36 = vmax.f32 %v4167_v29, 0.0 }
 0x583   : > { %v4776_v58 = vmax.f32 %v4744_v16, %v4351_v13  ;;  %v4358_v55 = vmax.f32 %v3980_v60, 0.0  ;;  %v4713_v12 = vmax.f32 %v9518_v37, %v4357_v53  ;;  %v4173_v63 = vadd.f32 %v4172_v28, %v9490_v3 }
 0x584   : > { %4839 = vst [vmem:[#allocation2 + $0x30] sm:$0xff] %v4807_v2  ;;  %v3982_v54 = vadd.f32 %v3981_v20, %v9496_v35  ;;  %v4174_v62 = vpop.f32.mrf.mxu1  ;;  %v3983_v57 = vpop.f32.mrf.mxu0  ;;  %v4359_v18 = vmax.f32 %v4171_v48, 0.0 }
 0x585   : > { %v4808_v31 = vmax.f32 %v4776_v58, %v4352_v36  ;;  %v3984_v46 = vadd.f32 %v3983_v57, %v9496_v35  ;;  %v4745_v45 = vmax.f32 %v4713_v12, %v4358_v55  ;;  %v4175_v43 = vadd.f32 %v4174_v62, %v9496_v35 }
 0x586   : > { %v4365_v39 = vmax.f32 %v3982_v54, 0.0  ;;  %v4176_v17 = vpop.f32.mrf.mxu1  ;;  %v3987_v4 = vpop.f32.mrf.mxu0  ;;  %v4360_v44 = vmax.f32 %v4173_v63, 0.0 }
 0x587   : > { %4840 = vst [vmem:[#allocation2 + $0x48] sm:$0xff] %v4808_v31  ;;  %v4366_v59 = vmax.f32 %v3984_v46, 0.0  ;;  %v3988_v37 = vadd.f32 %v3987_v4, %v9510_v25  ;;  %v4777_v3 = vmax.f32 %v4745_v45, %v4359_v18  ;;  %v4177_v21 = vadd.f32 %v4176_v17, %v9496_v35 }
 0x588   : > { %v4714_v19 = vmax.f32 %v9527_v51, %v4365_v39  ;;  %v4180_v42 = vpop.f32.mrf.mxu1  ;;  %v3989_v27 = vpop.f32.mrf.mxu0  ;;  %v4367_v8 = vmax.f32 %v4175_v43, 0.0 }
 0x589   : > { %v4373_v30 = vmax.f32 %v3988_v37, 0.0  ;;  %v4181_v49 = vadd.f32 %v4180_v42, %v9510_v25  ;;  %v3990_v29 = vadd.f32 %v3989_v27, %v9510_v25  ;;  %v4809_v6 = vmax.f32 %v4777_v3, %v4360_v44 }
 0x58a   : > { %v4746_v61 = vmax.f32 %v4714_v19, %v4366_v59  ;;  %v4182_v14 = vpop.f32.mrf.mxu1  ;;  %v3991_v11 = vpop.f32.mrf.mxu0  ;;  %v4368_v51 = vmax.f32 %v4177_v21, 0.0 }
 0x58b   : > { %v4715_v13 = vmax.f32 %v9539_v34, %v4373_v30  ;;  %v4374_v16 = vmax.f32 %v3990_v29, 0.0  ;;  %v4183_v60 = vadd.f32 %v4182_v14, %v9510_v25  ;;  %4841 = vst [vmem:[#allocation2 + $0x80] sm:$0xff] %v4809_v6  ;;  %v3992_v2 = vadd.f32 %v3991_v11, %v9521_v1 }
 0x58c   : > { %v4778_v35 = vmax.f32 %v4746_v61, %v4367_v8  ;;  %v4184_v53 = vpop.f32.mrf.mxu1  ;;  %v3993_v48 = vpop.f32.mrf.mxu0  ;;  %v4375_v28 = vmax.f32 %v4181_v49, 0.0 }
 0x58d   : > { %v4747_v20 = vmax.f32 %v4715_v13, %v4374_v16  ;;  %v3994_v36 = vadd.f32 %v3993_v48, %v9521_v1  ;;  %v4381_v55 = vmax.f32 %v3992_v2, 0.0  ;;  %v4185_v12 = vadd.f32 %v4184_v53, %v9521_v1 }
 0x58e   : > { %v4810_v58 = vmax.f32 %v4778_v35, %v4368_v51  ;;  %v4186_v63 = vpop.f32.mrf.mxu1  ;;  %v3997_v34 = vpop.f32.mrf.mxu0  ;;  %v4376_v54 = vmax.f32 %v4183_v60, 0.0 }
 0x58f   : > { %v4779_v62 = vmax.f32 %v4747_v20, %v4375_v28  ;;  %v4382_v25 = vmax.f32 %v3994_v36, 0.0  ;;  %v4716_v57 = vmax.f32 %v9546_v52, %v4381_v55  ;;  %v4187_v31 = vadd.f32 %v4186_v63, %v9521_v1 }
 0x590   : > { %4842 = vst [vmem:[#allocation2 + $0x88] sm:$0xff] %v4810_v58  ;;  %v3998_v46 = vadd.f32 %v3997_v34, %v9525_v7  ;;  %v4190_v18 = vpop.f32.mrf.mxu1  ;;  %v3999_v45 = vpop.f32.mrf.mxu0  ;;  %v4383_v17 = vmax.f32 %v4185_v12, 0.0 }
 0x591   : > { %v4811_v39 = vmax.f32 %v4779_v62, %v4376_v54  ;;  %v4000_v43 = vadd.f32 %v3999_v45, %v9525_v7  ;;  %v4748_v4 = vmax.f32 %v4716_v57, %v4382_v25  ;;  %v4191_v37 = vadd.f32 %v4190_v18, %v9525_v7 }
 0x592   : > { %v4389_v59 = vmax.f32 %v3998_v46, 0.0  ;;  %v4192_v44 = vpop.f32.mrf.mxu1  ;;  %v4001_v3 = vpop.f32.mrf.mxu0  ;;  %v4384_v21 = vmax.f32 %v4187_v31, 0.0 }
 0x593   : > { %4843 = vst [vmem:[#allocation2 + $0xe8] sm:$0xff] %v4811_v39  ;;  %v4390_v19 = vmax.f32 %v4000_v43, 0.0  ;;  %v4002_v52 = vadd.f32 %v4001_v3, %v9541_v9  ;;  %v4780_v1 = vmax.f32 %v4748_v4, %v4383_v17  ;;  %v4193_v27 = vadd.f32 %v4192_v44, %v9525_v7 }
 0x594   : > { %v4717_v42 = vmax.f32 %v9557_v50, %v4389_v59  ;;  %v4194_v30 = vpop.f32.mrf.mxu1  ;;  %v4003_v49 = vpop.f32.mrf.mxu0  ;;  %v4391_v14 = vmax.f32 %v4191_v37, 0.0 }
 0x595   : > { %v4397_v29 = vmax.f32 %v4002_v52, 0.0  ;;  %v4195_v6 = vadd.f32 %v4194_v30, %v9541_v9  ;;  %v4004_v8 = vadd.f32 %v4003_v49, %v9541_v9  ;;  %v4812_v61 = vmax.f32 %v4780_v1, %v4384_v21 }
 0x596   : > { %v4749_v11 = vmax.f32 %v4717_v42, %v4390_v19  ;;  %v4196_v13 = vpop.f32.mrf.mxu1  ;;  %v4007_v16 = vpop.f32.mrf.mxu0  ;;  %v4392_v50 = vmax.f32 %v4193_v27, 0.0 }
 0x597   : > { %v4718_v60 = vmax.f32 %v9565_v38, %v4397_v29  ;;  %v4398_v51 = vmax.f32 %v4004_v8, 0.0  ;;  %v4197_v35 = vadd.f32 %v4196_v13, %v9541_v9  ;;  %4844 = vst [vmem:[#allocation2 + $0xb8] sm:$0xff] %v4812_v61  ;;  %v4008_v2 = vadd.f32 %v4007_v16, %v9550_v24 }
 0x598   : > { %v4781_v7 = vmax.f32 %v4749_v11, %v4391_v14  ;;  %v4200_v53 = vpop.f32.mrf.mxu1  ;;  %v4009_v48 = vpop.f32.mrf.mxu0  ;;  %v4399_v28 = vmax.f32 %v4195_v6, 0.0 }
 0x599   : > { %v4750_v20 = vmax.f32 %v4718_v60, %v4398_v51  ;;  %v4010_v36 = vadd.f32 %v4009_v48, %v9550_v24  ;;  %v4405_v55 = vmax.f32 %v4008_v2, 0.0  ;;  %v4201_v12 = vadd.f32 %v4200_v53, %v9550_v24 }
 0x59a   : > { %v4813_v58 = vmax.f32 %v4781_v7, %v4392_v50  ;;  %v4202_v63 = vpop.f32.mrf.mxu1  ;;  %v4011_v38 = vpop.f32.mrf.mxu0  ;;  %v4400_v34 = vmax.f32 %v4197_v35, 0.0 }
 0x59b   : > { %v4782_v54 = vmax.f32 %v4750_v20, %v4399_v28  ;;  %v4406_v9 = vmax.f32 %v4010_v36, 0.0  ;;  %v4719_v62 = vmax.f32 %v9572_v0, %v4405_v55  ;;  %v4203_v25 = vadd.f32 %v4202_v63, %v9550_v24 }
 0x59c   : > { %4845 = vst [vmem:[#allocation2 + $0x60] sm:$0xff] %v4813_v58  ;;  %v4012_v57 = vadd.f32 %v4011_v38, %v9555_v26  ;;  %v4204_v31 = vpop.f32.mrf.mxu1  ;;  %v4013_v46 = vpop.f32.mrf.mxu0  ;;  %v4407_v39 = vmax.f32 %v4201_v12, 0.0 }
 0x59d   : > { %v4814_v18 = vmax.f32 %v4782_v54, %v4400_v34  ;;  %v4014_v45 = vadd.f32 %v4013_v46, %v9555_v26  ;;  %v4751_v43 = vmax.f32 %v4719_v62, %v4406_v9  ;;  %v4205_v4 = vadd.f32 %v4204_v31, %v9555_v26 }
 0x59e   : > { %v4413_v17 = vmax.f32 %v4012_v57, 0.0  ;;  %v4206_v59 = vpop.f32.mrf.mxu1  ;;  %v4017_v37 = vpop.f32.mrf.mxu0  ;;  %v4408_v3 = vmax.f32 %v4203_v25, 0.0 }
 0x59f   : > { %4846 = vst [vmem:[#allocation2 + $0xf0] sm:$0xff] %v4814_v18  ;;  %v4414_v44 = vmax.f32 %v4014_v45, 0.0  ;;  %v4018_v0 = vadd.f32 %v4017_v37, %v9567_v23  ;;  %v4783_v24 = vmax.f32 %v4751_v43, %v4407_v39  ;;  %v4207_v52 = vadd.f32 %v4206_v59, %v9555_v26  ;;  %v11013_v45 = vld [vmem:[#allocation41_spill] sm:$0xff]  ;;  %v11014_v43 = vld [vmem:[#allocation42_spill] sm:$0xff] }
 0x5a0   : > { %v4720_v19 = vmax.f32 %v9581_v22, %v4413_v17  ;;  %v4210_v21 = vpop.f32.mrf.mxu1  ;;  %v4019_v1 = vpop.f32.mrf.mxu0  ;;  %v4415_v29 = vmax.f32 %v4205_v4, 0.0 }
 0x5a1   : > { %v4421_v42 = vmax.f32 %v4018_v0, 0.0  ;;  %v4211_v27 = vadd.f32 %v4210_v21, %v9567_v23  ;;  %v4020_v30 = vadd.f32 %v4019_v1, %v9567_v23  ;;  %v4815_v49 = vmax.f32 %v4783_v24, %v4408_v3 }
 0x5a2   : > { %v4752_v6 = vmax.f32 %v4720_v19, %v4414_v44  ;;  %v4212_v8 = vpop.f32.mrf.mxu1  ;;  %v4021_v61 = vpop.f32.mrf.mxu0  ;;  %v4416_v22 = vmax.f32 %v4207_v52, 0.0 }
 0x5a3   : > { %v4721_v14 = vmax.f32 %v9589_v47, %v4421_v42  ;;  %v4422_v11 = vmax.f32 %v4020_v30, 0.0  ;;  %v4213_v13 = vadd.f32 %v4212_v8, %v9567_v23  ;;  %4847 = vst [vmem:[#allocation2 + $0x8] sm:$0xff] %v4815_v49  ;;  %v4022_v16 = vadd.f32 %v4021_v61, %v9575_v10  ;;  %v11015_v42 = vld [vmem:[#allocation35_spill] sm:$0xff] }
 0x5a4   : > { %v4784_v26 = vmax.f32 %v4752_v6, %v4415_v29  ;;  %v4214_v60 = vpop.f32.mrf.mxu1  ;;  %v4023_v51 = vpop.f32.mrf.mxu0  ;;  %v4423_v35 = vmax.f32 %v4211_v27, 0.0  ;;  %v11016_v6 = vld [vmem:[#allocation64_spill] sm:$0xff] }
 0x5a5   : > { %v4753_v50 = vmax.f32 %v4721_v14, %v4422_v11  ;;  %v4024_v7 = vadd.f32 %v4023_v51, %v9575_v10  ;;  %v4429_v53 = vmax.f32 %v4022_v16, 0.0  ;;  %v4215_v48 = vadd.f32 %v4214_v60, %v9575_v10 }
 0x5a6   : > { %v4816_v2 = vmax.f32 %v4784_v26, %v4416_v22  ;;  %v4216_v28 = vpop.f32.mrf.mxu1  ;;  %v4027_v47 = vpop.f32.mrf.mxu0  ;;  %v4424_v20 = vmax.f32 %v4213_v13, 0.0 }
 0x5a7   : > { %v4785_v36 = vmax.f32 %v4753_v50, %v4423_v35  ;;  %v4430_v23 = vmax.f32 %v4024_v7, 0.0  ;;  %v4722_v58 = vmax.f32 %v9596_v33, %v4429_v53  ;;  %v4217_v55 = vadd.f32 %v4216_v28, %v9575_v10  ;;  %v11017_v53 = vld [vmem:[#allocation17_spill] sm:$0xff] }
 0x5a8   : > { %4848 = vst [vmem:[#allocation2 + $0x78] sm:$0xff] %v4816_v2  ;;  %v4028_v12 = vadd.f32 %v4027_v47, %v9579_v56  ;;  %v4220_v63 = vpop.f32.mrf.mxu1  ;;  %v4029_v38 = vpop.f32.mrf.mxu0  ;;  %v4431_v9 = vmax.f32 %v4215_v48, 0.0  ;;  %v11018_v47 = vld [vmem:[#allocation16_spill] sm:$0xff] }
 0x5a9   : > { %v4817_v34 = vmax.f32 %v4785_v36, %v4424_v20  ;;  %v4030_v54 = vadd.f32 %v4029_v38, %v9579_v56  ;;  %v4754_v62 = vmax.f32 %v4722_v58, %v4430_v23  ;;  %v4221_v57 = vadd.f32 %v4220_v63, %v9579_v56 }
 0x5aa   : > { %v4437_v25 = vmax.f32 %v4028_v12, 0.0  ;;  %v4222_v31 = vpop.f32.mrf.mxu1  ;;  %v4031_v46 = vpop.f32.mrf.mxu0  ;;  %v4432_v39 = vmax.f32 %v4217_v55, 0.0 }
 0x5ab   : > { %4849 = vst [vmem:[#allocation2 + $0x38] sm:$0xff] %v4817_v34  ;;  %v4438_v18 = vmax.f32 %v4030_v54, 0.0  ;;  %v4032_v33 = vadd.f32 %v4031_v46, %v11013_v45  ;;  %v4786_v10 = vmax.f32 %v4754_v62, %v4431_v9  ;;  %v4223_v4 = vadd.f32 %v4222_v31, %v9579_v56 }
 0x5ac   : > { %v4723_v17 = vmax.f32 %v11014_v43, %v4437_v25  ;;  %v4224_v59 = vpop.f32.mrf.mxu1  ;;  %v4033_v37 = vpop.f32.mrf.mxu0  ;;  %v4439_v19 = vmax.f32 %v4221_v57, 0.0  ;;  %v11019_v25 = vld [vmem:[#allocation55_spill] sm:$0xff] }
 0x5ad   : > { %v4445_v44 = vmax.f32 %v4032_v33, 0.0  ;;  %v4225_v0 = vadd.f32 %v4224_v59, %v11013_v45  ;;  %v4034_v3 = vadd.f32 %v4033_v37, %v11013_v45  ;;  %v4818_v24 = vmax.f32 %v4786_v10, %v4432_v39 }
 0x5ae   : > { %v4755_v52 = vmax.f32 %v4723_v17, %v4438_v18  ;;  %v4226_v21 = vpop.f32.mrf.mxu1  ;;  %v4037_v1 = vpop.f32.mrf.mxu0  ;;  %v4440_v29 = vmax.f32 %v4223_v4, 0.0  ;;  %v11020_v18 = vld [vmem:[#allocation61_spill] sm:$0xff] }
 0x5af   : > { %v4724_v27 = vmax.f32 %v11015_v42, %v4445_v44  ;;  %v4446_v30 = vmax.f32 %v4034_v3, 0.0  ;;  %v4227_v49 = vadd.f32 %v4226_v21, %v11013_v45  ;;  %4850 = vst [vmem:[#allocation2 + $0x58] sm:$0xff] %v4818_v24  ;;  %v4038_v8 = vadd.f32 %v4037_v1, %v11016_v6  ;;  %v11021_v24 = vld [vmem:[#allocation43_spill] sm:$0xff] }
 0x5b0   : > { %v4787_v56 = vmax.f32 %v4755_v52, %v4439_v19  ;;  %v4230_v61 = vpop.f32.mrf.mxu1  ;;  %v4039_v14 = vpop.f32.mrf.mxu0  ;;  %v4447_v11 = vmax.f32 %v4225_v0, 0.0 }
 0x5b1   : > { %v4756_v13 = vmax.f32 %v4724_v27, %v4446_v30  ;;  %v4040_v22 = vadd.f32 %v4039_v14, %v11016_v6  ;;  %v4453_v16 = vmax.f32 %v4038_v8, 0.0  ;;  %v4231_v60 = vadd.f32 %v4230_v61, %v11016_v6  ;;  %v11022_v27 = vld [vmem:[#allocation56_spill] sm:$0xff] }
 0x5b2   : > { %v4819_v26 = vmax.f32 %v4787_v56, %v4440_v29  ;;  %v4232_v51 = vpop.f32.mrf.mxu1  ;;  %v4041_v35 = vpop.f32.mrf.mxu0  ;;  %v4448_v50 = vmax.f32 %v4227_v49, 0.0 }
 0x5b3   : > { %v4788_v7 = vmax.f32 %v4756_v13, %v4447_v11  ;;  %v4454_v2 = vmax.f32 %v4040_v22, 0.0  ;;  %v4725_v48 = vmax.f32 %v11017_v53, %v4453_v16  ;;  %v4233_v28 = vadd.f32 %v4232_v51, %v11016_v6  ;;  %v11023_v51 = vld [vmem:[#allocation59_spill] sm:$0xff] }
 0x5b4   : > { %4851 = vst [vmem:[#allocation2 + $0x40] sm:$0xff] %v4819_v26  ;;  %v4042_v20 = vadd.f32 %v4041_v35, %v11018_v47  ;;  %v4234_v36 = vpop.f32.mrf.mxu1  ;;  %v4043_v23 = vpop.f32.mrf.mxu0  ;;  %v4455_v12 = vmax.f32 %v4231_v60, 0.0 }
 0x5b5   : > { %v4820_v58 = vmax.f32 %v4788_v7, %v4448_v50  ;;  %v4044_v55 = vadd.f32 %v4043_v23, %v11018_v47  ;;  %v4757_v63 = vmax.f32 %v4725_v48, %v4454_v2  ;;  %v4235_v34 = vadd.f32 %v4234_v36, %v11018_v47  ;;  %v11024_v7 = vld [vmem:[#allocation57_spill] sm:$0xff] }
 0x5b6   : > { %v4461_v38 = vmax.f32 %v4042_v20, 0.0  ;;  %v4236_v54 = vpop.f32.mrf.mxu1  ;;  %v4047_v9 = vpop.f32.mrf.mxu0  ;;  %v4456_v31 = vmax.f32 %v4233_v28, 0.0 }
 0x5b7   : > { %4852 = vst [vmem:[#allocation2 + $0xc8] sm:$0xff] %v4820_v58  ;;  %v4462_v62 = vmax.f32 %v4044_v55, 0.0  ;;  %v4048_v57 = vadd.f32 %v4047_v9, %v11019_v25  ;;  %v4789_v46 = vmax.f32 %v4757_v63, %v4455_v12  ;;  %v4237_v33 = vadd.f32 %v4236_v54, %v11018_v47 }
 0x5b8   : > { %v4726_v45 = vmax.f32 %v11020_v18, %v4461_v38  ;;  %v4240_v39 = vpop.f32.mrf.mxu1  ;;  %v4049_v10 = vpop.f32.mrf.mxu0  ;;  %v4463_v37 = vmax.f32 %v4235_v34, 0.0  ;;  %v11025_v38 = vld [vmem:[#allocation7_spill] sm:$0xff] }
 0x5b9   : > { %v4469_v43 = vmax.f32 %v4048_v57, 0.0  ;;  %v4241_v17 = vadd.f32 %v4240_v39, %v11019_v25  ;;  %v4050_v4 = vadd.f32 %v4049_v10, %v11019_v25  ;;  %v4821_v59 = vmax.f32 %v4789_v46, %v4456_v31 }
 0x5ba   : > { %v4758_v44 = vmax.f32 %v4726_v45, %v4462_v62  ;;  %v4242_v0 = vpop.f32.mrf.mxu1  ;;  %v4051_v3 = vpop.f32.mrf.mxu0  ;;  %v4464_v1 = vmax.f32 %v4237_v33, 0.0  ;;  %v11026_v62 = vld [vmem:[#allocation54_spill] sm:$0xff] }
 0x5bb   : > { %v4727_v19 = vmax.f32 %v11021_v24, %v4469_v43  ;;  %v4470_v52 = vmax.f32 %v4050_v4, 0.0  ;;  %v4243_v21 = vadd.f32 %v4242_v0, %v11019_v25  ;;  %4853 = vst [vmem:[#allocation2 + $0xe0] sm:$0xff] %v4821_v59  ;;  %v4052_v30 = vadd.f32 %v4051_v3, %v11022_v27  ;;  %v11027_v59 = vld [vmem:[#allocation11_spill] sm:$0xff] }
 0x5bc   : > { %v4790_v42 = vmax.f32 %v4758_v44, %v4463_v37  ;;  %v4244_v49 = vpop.f32.mrf.mxu1  ;;  %v4053_v29 = vpop.f32.mrf.mxu0  ;;  %v4471_v56 = vmax.f32 %v4241_v17, 0.0 }
 0x5bd   : > { %v4759_v6 = vmax.f32 %v4727_v19, %v4470_v52  ;;  %v4054_v8 = vadd.f32 %v4053_v29, %v11022_v27  ;;  %v4477_v14 = vmax.f32 %v4052_v30, 0.0  ;;  %v4245_v11 = vadd.f32 %v4244_v49, %v11022_v27  ;;  %v11028_v19 = vld [vmem:[#allocation8_spill] sm:$0xff] }
 0x5be   : > { %v4822_v61 = vmax.f32 %v4790_v42, %v4464_v1  ;;  %v4246_v13 = vpop.f32.mrf.mxu1  ;;  %v4057_v22 = vpop.f32.mrf.mxu0  ;;  %v4472_v26 = vmax.f32 %v4243_v21, 0.0 }
 0x5bf   : > { %v4791_v16 = vmax.f32 %v4759_v6, %v4471_v56  ;;  %v4478_v60 = vmax.f32 %v4054_v8, 0.0  ;;  %v4728_v35 = vmax.f32 %v11023_v51, %v4477_v14  ;;  %v4247_v50 = vadd.f32 %v4246_v13, %v11022_v27  ;;  %v11029_v13 = vld [vmem:[#allocation50_spill] sm:$0xff] }
 0x5c0   : > { %4854 = vst [vmem:[#allocation2 + $0x90] sm:$0xff] %v4822_v61  ;;  %v4058_v2 = vadd.f32 %v4057_v22, %v11024_v7  ;;  %v4250_v53 = vpop.f32.mrf.mxu1  ;;  %v4059_v48 = vpop.f32.mrf.mxu0  ;;  %v4479_v20 = vmax.f32 %v4245_v11, 0.0 }
 0x5c1   : > { %v4823_v28 = vmax.f32 %v4791_v16, %v4472_v26  ;;  %v4060_v47 = vadd.f32 %v4059_v48, %v11024_v7  ;;  %v4760_v36 = vmax.f32 %v4728_v35, %v4478_v60  ;;  %v4251_v58 = vadd.f32 %v4250_v53, %v11024_v7  ;;  %v11030_v16 = vld [vmem:[#allocation20_spill] sm:$0xff] }
 0x5c2   : > { %v4485_v23 = vmax.f32 %v4058_v2, 0.0  ;;  %v4252_v55 = vpop.f32.mrf.mxu1  ;;  %v4061_v12 = vpop.f32.mrf.mxu0  ;;  %v4480_v54 = vmax.f32 %v4247_v50, 0.0 }
 0x5c3   : > { %4855 = vst [vmem:[#allocation2 + $0x70] sm:$0xff] %v4823_v28  ;;  %v4486_v63 = vmax.f32 %v4060_v47, 0.0  ;;  %v4062_v34 = vadd.f32 %v4061_v12, %v11025_v38  ;;  %v4792_v9 = vmax.f32 %v4760_v36, %v4479_v20  ;;  %v4253_v57 = vadd.f32 %v4252_v55, %v11024_v7 }
 0x5c4   : > { %v4729_v25 = vmax.f32 %v11026_v62, %v4485_v23  ;;  %v4254_v31 = vpop.f32.mrf.mxu1  ;;  %v4063_v46 = vpop.f32.mrf.mxu0  ;;  %v4487_v10 = vmax.f32 %v4251_v58, 0.0  ;;  %v11031_v23 = vld [vmem:[#allocation44_spill] sm:$0xff] }
 0x5c5   : > { %v4493_v18 = vmax.f32 %v4062_v34, 0.0  ;;  %v4255_v45 = vadd.f32 %v4254_v31, %v11025_v38  ;;  %v4064_v33 = vadd.f32 %v4063_v46, %v11025_v38  ;;  %v4824_v39 = vmax.f32 %v4792_v9, %v4480_v54 }
 0x5c6   : > { %v4761_v43 = vmax.f32 %v4729_v25, %v4486_v63  ;;  %v4256_v17 = vpop.f32.mrf.mxu1  ;;  %v4067_v4 = vpop.f32.mrf.mxu0  ;;  %v4488_v3 = vmax.f32 %v4253_v57, 0.0  ;;  %v11032_v63 = vld [vmem:[#allocation69_spill] sm:$0xff] }
 0x5c7   : > { %v4730_v37 = vmax.f32 %v11027_v59, %v4493_v18  ;;  %v4494_v44 = vmax.f32 %v4064_v33, 0.0  ;;  %v4257_v0 = vadd.f32 %v4256_v17, %v11025_v38  ;;  %4856 = vst [vmem:[#allocation2 + $0xc0] sm:$0xff] %v4824_v39  ;;  %v4068_v52 = vadd.f32 %v4067_v4, %v11028_v19  ;;  %v11033_v59 = vld [vmem:[#allocation27_spill] sm:$0xff] }
 0x5c8   : > { %v4793_v24 = vmax.f32 %v4761_v43, %v4487_v10  ;;  %v4260_v21 = vpop.f32.mrf.mxu1  ;;  %v4069_v1 = vpop.f32.mrf.mxu0  ;;  %v4495_v42 = vmax.f32 %v4255_v45, 0.0 }
 0x5c9   : > { %v4762_v27 = vmax.f32 %v4730_v37, %v4494_v44  ;;  %v4070_v30 = vadd.f32 %v4069_v1, %v11028_v19  ;;  %v4501_v29 = vmax.f32 %v4068_v52, 0.0  ;;  %v4261_v56 = vadd.f32 %v4260_v21, %v11028_v19 }
 0x5ca   : > { %v4825_v49 = vmax.f32 %v4793_v24, %v4488_v3  ;;  %v4262_v6 = vpop.f32.mrf.mxu1  ;;  %v4071_v8 = vpop.f32.mrf.mxu0  ;;  %v4496_v61 = vmax.f32 %v4257_v0, 0.0 }
 0x5cb   : > { %v4794_v14 = vmax.f32 %v4762_v27, %v4495_v42  ;;  %v4502_v11 = vmax.f32 %v4070_v30, 0.0  ;;  %v4731_v22 = vmax.f32 %v11029_v13, %v4501_v29  ;;  %v4263_v26 = vadd.f32 %v4262_v6, %v11028_v19  ;;  %v11034_v6 = vld [vmem:[#allocation38_spill] sm:$0xff] }
 0x5cc   : > { %4857 = vst [vmem:[#allocation2 + $0xa8] sm:$0xff] %v4825_v49  ;;  %v4072_v60 = vadd.f32 %v4071_v8, %v11030_v16  ;;  %v4264_v51 = vpop.f32.mrf.mxu1  ;;  %v4073_v35 = vpop.f32.mrf.mxu0  ;;  %v4503_v2 = vmax.f32 %v4261_v56, 0.0 }
 0x5cd   : > { %v4826_v50 = vmax.f32 %v4794_v14, %v4496_v61  ;;  %v4074_v7 = vadd.f32 %v4073_v35, %v11030_v16  ;;  %v4763_v53 = vmax.f32 %v4731_v22, %v4502_v11  ;;  %v4265_v28 = vadd.f32 %v4264_v51, %v11030_v16 }
 0x5ce   : > { %v4509_v48 = vmax.f32 %v4072_v60, 0.0  ;;  %v4266_v47 = vpop.f32.mrf.mxu1  ;;  %v4077_v20 = vpop.f32.mrf.mxu0  ;;  %v4504_v55 = vmax.f32 %v4263_v26, 0.0 }
 0x5cf   : > { %4858 = vst [vmem:[#allocation2 + $0xd0] sm:$0xff] %v4826_v50  ;;  %v4510_v36 = vmax.f32 %v4074_v7, 0.0  ;;  %v4078_v58 = vadd.f32 %v4077_v20, %v11031_v23  ;;  %v4795_v12 = vmax.f32 %v4763_v53, %v4503_v2  ;;  %v4267_v34 = vadd.f32 %v4266_v47, %v11030_v16 }
 0x5d0   : > { %v4732_v38 = vmax.f32 %v11032_v63, %v4509_v48  ;;  %v4270_v54 = vpop.f32.mrf.mxu1  ;;  %v4079_v9 = vpop.f32.mrf.mxu0  ;;  %v4511_v46 = vmax.f32 %v4265_v28, 0.0 }
 0x5d1   : > { %v4517_v62 = vmax.f32 %v4078_v58, 0.0  ;;  %v4271_v25 = vadd.f32 %v4270_v54, %v11031_v23  ;;  %v4080_v57 = vadd.f32 %v4079_v9, %v11031_v23  ;;  %v4827_v31 = vmax.f32 %v4795_v12, %v4504_v55 }
 0x5d2   : > { %v4764_v18 = vmax.f32 %v4732_v38, %v4510_v36  ;;  %v4272_v45 = vpop.f32.mrf.mxu1  ;;  %v4081_v33 = vpop.f32.mrf.mxu0  ;;  %v4512_v17 = vmax.f32 %v4267_v34, 0.0 }
 0x5d3   : > { %v4733_v39 = vmax.f32 %v9685_v15, %v4517_v62  ;;  %v4518_v10 = vmax.f32 %v4080_v57, 0.0  ;;  %v4273_v43 = vadd.f32 %v4272_v45, %v11031_v23  ;;  %4859 = vst [vmem:[#allocation2 + $0x10] sm:$0xff] %v4827_v31  ;;  %v4082_v37 = vadd.f32 %v4081_v33, %v11033_v59 }
 0x5d4   : > { %v4796_v4 = vmax.f32 %v4764_v18, %v4511_v46  ;;  %v4274_v44 = vpop.f32.mrf.mxu1  ;;  %v4083_v0 = vpop.f32.mrf.mxu0  ;;  %v4519_v3 = vmax.f32 %v4271_v25, 0.0 }
 0x5d5   : > { %v4765_v24 = vmax.f32 %v4733_v39, %v4518_v10  ;;  %v4084_v19 = vadd.f32 %v4083_v0, %v11033_v59  ;;  %v4525_v21 = vmax.f32 %v4082_v37, 0.0  ;;  %v4275_v1 = vadd.f32 %v4274_v44, %v11033_v59 }
 0x5d6   : > { %v4828_v52 = vmax.f32 %v4796_v4, %v4512_v17  ;;  %v4276_v42 = vpop.f32.mrf.mxu1  ;;  %v4087_v15 = vpop.f32.mrf.mxu0  ;;  %v4520_v27 = vmax.f32 %v4273_v43, 0.0 }
 0x5d7   : > { %v4797_v30 = vmax.f32 %v4765_v24, %v4519_v3  ;;  %v4526_v49 = vmax.f32 %v4084_v19, 0.0  ;;  %v4734_v29 = vmax.f32 %v9692_v5, %v4525_v21  ;;  %v4277_v56 = vadd.f32 %v4276_v42, %v11033_v59 }
 0x5d8   : > { %4860 = vst [vmem:[#allocation2 + $0x28] sm:$0xff] %v4828_v52  ;;  %v4088_v8 = vadd.f32 %v4087_v15, %v11034_v6  ;;  %v4280_v61 = vpop.f32.mrf.mxu1  ;;  %v4089_v14 = vpop.f32.mrf.mxu0  ;;  %v4527_v22 = vmax.f32 %v4275_v1, 0.0 }
 0x5d9   : > { %v4829_v11 = vmax.f32 %v4797_v30, %v4520_v27  ;;  %v4090_v13 = vadd.f32 %v4089_v14, %v11034_v6  ;;  %v4766_v26 = vmax.f32 %v4734_v29, %v4526_v49  ;;  %v4281_v60 = vadd.f32 %v4280_v61, %v11034_v6 }
 0x5da   : > { %v4533_v16 = vmax.f32 %v4088_v8, 0.0  ;;  %v4282_v51 = vpop.f32.mrf.mxu1  ;;  %v4091_v35 = vpop.f32.mrf.mxu0  ;;  %v4528_v7 = vmax.f32 %v4277_v56, 0.0 }
 0x5db   : > { %4861 = vst [vmem:[#allocation2 + $0xa0] sm:$0xff] %v4829_v11  ;;  %v4534_v50 = vmax.f32 %v4090_v13, 0.0  ;;  %v4092_v5 = vadd.f32 %v4091_v35, %v9687_v41  ;;  %v4798_v2 = vmax.f32 %v4766_v26, %v4527_v22  ;;  %v4283_v48 = vadd.f32 %v4282_v51, %v11034_v6 }
 0x5dc   : > { %v4735_v53 = vmax.f32 %v9697_v32, %v4533_v16  ;;  %v4284_v28 = vpop.f32.mrf.mxu1  ;;  %v4093_v47 = vpop.f32.mrf.mxu0  ;;  %v4535_v55 = vmax.f32 %v4281_v60, 0.0 }
 0x5dd   : > { %v4541_v20 = vmax.f32 %v4092_v5, 0.0  ;;  %v4285_v36 = vadd.f32 %v4284_v28, %v9687_v41  ;;  %v4094_v23 = vadd.f32 %v4093_v47, %v9687_v41  ;;  %v4830_v58 = vmax.f32 %v4798_v2, %v4528_v7 }
 0x5de   : > { %v4767_v12 = vmax.f32 %v4735_v53, %v4534_v50  ;;  %v4286_v63 = vpop.f32.mrf.mxu1  ;;  %v4536_v32 = vmax.f32 %v4283_v48, 0.0 }
 0x5df   : > { %v4736_v38 = vmax.f32 %v9706_v40, %v4541_v20  ;;  %v4542_v34 = vmax.f32 %v4094_v23, 0.0  ;;  %v4287_v54 = vadd.f32 %v4286_v63, %v9687_v41  ;;  %4862 = vst [vmem:[#allocation2 + $0xf8] sm:$0xff] %v4830_v58  ;;  %v4543_v62 = vmax.f32 %v4285_v36, 0.0 }
 0x5e0   : > { %v4799_v9 = vmax.f32 %v4767_v12, %v4535_v55 }
 0x5e1   : > { %v4768_v25 = vmax.f32 %v4736_v38, %v4542_v34  ;;  %v4544_v31 = vmax.f32 %v4287_v54, 0.0 }
 0x5e2   : > { %v4831_v57 = vmax.f32 %v4799_v9, %v4536_v32 }
 0x5e3   : > { %v4800_v46 = vmax.f32 %v4768_v25, %v4543_v62  ;;  %4868 = sbr.rel (%p6412_p8) target bundleno = 2399 (0x95f), region = 88 }
 0x5e4   : > { %4863 = vst [vmem:[#allocation2 + $0x20] sm:$0xff] %v4831_v57 }
 0x5e5   : > { %v4832_v18 = vmax.f32 %v4800_v46, %v4544_v31 }
 0x5e7   : > { %4864 = vst [vmem:[#allocation2 + $0x98] sm:$0xff] %v4832_v18 }
 0x5e8   : > { %v4883_v45 = vld [vmem:[#allocation2 + $0x8] sm:$0xff]  ;;  %v4881_v33 = vld [vmem:[#allocation2 + $0x60] sm:$0xff]  ;;  %v4884_v40 = vld [vmem:[#allocation2 + $0x78] sm:$0xff]  ;;  %v6952_v0 = vmov 0   ;;  %vm6216_vm1 = vcmask 7168  }
 0x5e9   : > { %4929 = vmax.xlane.f32.xlu0 %v4883_v45  ;;  %4925 = vmax.xlane.f32.xlu1 %v4881_v33  ;;  %v4882_v41 = vld [vmem:[#allocation2 + $0xf0] sm:$0xff]  ;;  %v4880_v39 = vld [vmem:[#allocation2 + $0xb8] sm:$0xff]  ;;  %v4879_v10 = vld [vmem:[#allocation2 + $0xe8] sm:$0xff] }
 0x5ea   : > { %v4878_v43 = vld [vmem:[#allocation2 + $0x88] sm:$0xff]  ;;  %v4877_v17 = vld [vmem:[#allocation2 + $0x80] sm:$0xff]  ;;  %v4875_v59 = vld [vmem:[#allocation2 + $0x30] sm:$0xff]  ;;  %5429 = vmatprep.subr.bf16.mxu0 %v6952_v0  ;;  %6640 = vmatprep.subr.bf16.mxu1 %v6952_v0 }
 0x5eb   : > { %v4876_v4 = vld [vmem:[#allocation2 + $0x48] sm:$0xff]  ;;  %v4873_v44 = vld [vmem:[#allocation2 + $0x50] sm:$0xff]  ;;  %v4872_v3 = vld [vmem:[#allocation2 + $0x18] sm:$0xff] }
 0x5ec   : > { %v4874_v37 = vld [vmem:[#allocation2 + $0x68] sm:$0xff]  ;;  %v4871_v24 = vld [vmem:[#allocation2 + $0xd8] sm:$0xff]  ;;  %v4870_v19 = vld [vmem:[#allocation2] sm:$0xff] }
 0x5ed   : > { %4931 = vmax.xlane.f32.xlu0 %v4884_v40  ;;  %4927 = vmax.xlane.f32.xlu1 %v4882_v41  ;;  %v4869_v52 = vld [vmem:[#allocation2 + $0xb0] sm:$0xff]  ;;  %v4899_v1 = vld [vmem:[#allocation2 + $0x20] sm:$0xff]  ;;  %v4898_v42 = vld [vmem:[#allocation2 + $0xf8] sm:$0xff] }
 0x5ee   : > { %v4900_v21 = vld [vmem:[#allocation2 + $0x98] sm:$0xff]  ;;  %v4897_v15 = vld [vmem:[#allocation2 + $0xa0] sm:$0xff]  ;;  %v4896_v27 = vld [vmem:[#allocation2 + $0x28] sm:$0xff] }
 0x5ef   : > { %v4895_v30 = vld [vmem:[#allocation2 + $0x10] sm:$0xff]  ;;  %v4893_v29 = vld [vmem:[#allocation2 + $0xa8] sm:$0xff]  ;;  %v4892_v56 = vld [vmem:[#allocation2 + $0xc0] sm:$0xff] }
 0x5f0   : > { %v4894_v49 = vld [vmem:[#allocation2 + $0xd0] sm:$0xff]  ;;  %v4889_v61 = vld [vmem:[#allocation2 + $0xe0] sm:$0xff]  ;;  %v4888_v14 = vld [vmem:[#allocation2 + $0xc8] sm:$0xff] }
 0x5f1   : > { %4923 = vmax.xlane.f32.xlu1 %v4880_v39  ;;  %4921 = vmax.xlane.f32.xlu0 %v4879_v10  ;;  %v4891_v6 = vld [vmem:[#allocation2 + $0x70] sm:$0xff]  ;;  %v4887_v11 = vld [vmem:[#allocation2 + $0x40] sm:$0xff]  ;;  %v4886_v13 = vld [vmem:[#allocation2 + $0x58] sm:$0xff] }
 0x5f2   : > { %v4890_v8 = vld [vmem:[#allocation2 + $0x90] sm:$0xff]  ;;  %v4885_v22 = vld [vmem:[#allocation2 + $0x38] sm:$0xff]  ;;  %v6766_v26 = vld [vmem:[%s10623_s11 + $0x4] ss:$8 sps:$4 sm:$0xff]  }
 0x5f3   : > { %5461 = vmatprep.mubr.bf16.mxu0 %v6766_v26  ;;  %v6776_v26 = vld [vmem:[%s10623_s11 + $0x44] ss:$8 sps:$4 sm:$0xff]  }
 0x5f5   : > { %4919 = vmax.xlane.f32.xlu1 %v4878_v43  ;;  %4917 = vmax.xlane.f32.xlu0 %v4877_v17 }
 0x5f9   : > { %4915 = vmax.xlane.f32.xlu1 %v4876_v4  ;;  %4913 = vmax.xlane.f32.xlu0 %v4875_v59 }
 0x5fd   : > { %4911 = vmax.xlane.f32.xlu1 %v4874_v37  ;;  %4909 = vmax.xlane.f32.xlu0 %v4873_v44 }
 0x601   : > { %4907 = vmax.xlane.f32.xlu1 %v4872_v3  ;;  %4905 = vmax.xlane.f32.xlu0 %v4871_v24 }
 0x605   : > { %4903 = vmax.xlane.f32.xlu1 %v4870_v19  ;;  %4901 = vmax.xlane.f32.xlu0 %v4869_v52 }
 0x609   : > { %4963 = vmax.xlane.f32.xlu1 %v4900_v21  ;;  %4961 = vmax.xlane.f32.xlu0 %v4899_v1  ;;  %v6814_v1 = vld [vmem:[%s10623_s11 + $0x184] ss:$8 sps:$4 sm:$0xff]  }
 0x60a   : > { %5653 = vmatprep.mubr.bf16.mxu1 %v6814_v1  ;;  %v5093_v1 = vld [vmem:[%s10624_s12 + $0x180] sm:$0xff] }
 0x60d   : > { %4959 = vmax.xlane.f32.xlu1 %v4898_v42  ;;  %4957 = vmax.xlane.f32.xlu0 %v4897_v15  ;;  %v6764_v15 = vld [vmem:[%s10623_s11] ss:$8 sps:$4 sm:$0xff]  }
 0x611   : > { %4955 = vmax.xlane.f32.xlu1 %v4896_v27  ;;  %4953 = vmax.xlane.f32.xlu0 %v4895_v30  ;;  %v6812_v27 = vld [vmem:[%s10623_s11 + $0x180] ss:$8 sps:$4 sm:$0xff]   ;;  %v6767_v30 = vld [vmem:[%s10623_s11 + $0x14] ss:$8 sps:$4 sm:$0xff]  }
 0x615   : > { %4951 = vmax.xlane.f32.xlu1 %v4894_v49  ;;  %4949 = vmax.xlane.f32.xlu0 %v4893_v29  ;;  %v6818_v49 = vld [vmem:[%s10623_s11 + $0x194] ss:$8 sps:$4 sm:$0xff]   ;;  %v6820_v29 = vld [vmem:[%s10623_s11 + $0x190] ss:$8 sps:$4 sm:$0xff]  }
 0x619   : > { %4947 = vmax.xlane.f32.xlu1 %v4892_v56  ;;  %4945 = vmax.xlane.f32.xlu0 %v4891_v6  ;;  %v6770_v56 = vld [vmem:[%s10623_s11 + $0x24] ss:$8 sps:$4 sm:$0xff]  }
 0x61a   : > { %v6824_v6 = vld [vmem:[%s10623_s11 + $0x1a4] ss:$8 sps:$4 sm:$0xff]  }
 0x61d   : > { %4943 = vmax.xlane.f32.xlu1 %v4890_v8  ;;  %4941 = vmax.xlane.f32.xlu0 %v4889_v61  ;;  %v6772_v8 = vld [vmem:[%s10623_s11 + $0x20] ss:$8 sps:$4 sm:$0xff]  }
 0x61e   : > { %v6826_v61 = vld [vmem:[%s10623_s11 + $0x1a0] ss:$8 sps:$4 sm:$0xff]  }
 0x621   : > { %4939 = vmax.xlane.f32.xlu1 %v4888_v14  ;;  %4937 = vmax.xlane.f32.xlu0 %v4887_v11  ;;  %v6773_v14 = vld [vmem:[%s10623_s11 + $0x34] ss:$8 sps:$4 sm:$0xff]  }
 0x622   : > { %v6830_v11 = vld [vmem:[%s10623_s11 + $0x1b4] ss:$8 sps:$4 sm:$0xff]  }
 0x625   : > { %4935 = vmax.xlane.f32.xlu1 %v4886_v13  ;;  %4933 = vmax.xlane.f32.xlu0 %v4885_v22  ;;  %v6775_v13 = vld [vmem:[%s10623_s11 + $0x30] ss:$8 sps:$4 sm:$0xff]  }
 0x626   : > { %v6832_v22 = vld [vmem:[%s10623_s11 + $0x1b0] ss:$8 sps:$4 sm:$0xff]  }
 0x672   : > { %v4930_v16 = vpop.xlane.xlu0 %4929  ;;  %v4926_v60 = vpop.xlane.xlu1 %4925 }
 0x676   : > { %v4932_v51 = vpop.xlane.xlu0 %4931  ;;  %v4928_v35 = vpop.xlane.xlu1 %4927 }
 0x677   : > { %v5036_v50 = vpack.c.bf16 %v4932_v51, %v4930_v16  ;;  %v5035_v2 = vpack.c.bf16 %v4928_v35, %v4926_v60  ;;  %v6836_v16 = vld [vmem:[%s10623_s11 + $0x1c4] ss:$8 sps:$4 sm:$0xff]   ;;  %v6778_v60 = vld [vmem:[%s10623_s11 + $0x40] ss:$8 sps:$4 sm:$0xff]   ;;  %v6779_v35 = vld [vmem:[%s10623_s11 + $0x54] ss:$8 sps:$4 sm:$0xff]  }
 0x678   : > { %v6838_v51 = vld [vmem:[%s10623_s11 + $0x1c0] ss:$8 sps:$4 sm:$0xff]  }
 0x679   : > { %5430 = vmatpush1.bf16.msra.mxu0 %v5036_v50  ;;  %6656 = vmatpush1.bf16.msra.mxu1 %v5036_v50  ;;  %v6842_v50 = vld [vmem:[%s10623_s11 + $0x1d4] ss:$8 sps:$4 sm:$0xff]  }
 0x67a   : > { %5431 = vmatprep.subr.bf16.mxu0 %v6952_v0  ;;  %6641 = vmatprep.subr.bf16.mxu1 %v6952_v0  ;;  %v4924_v5 = vpop.xlane.xlu1 %4923  ;;  %v4922_v7 = vpop.xlane.xlu0 %4921 }
 0x67b   : > { %v5034_v53 = vpack.c.bf16 %v4924_v5, %v4922_v7  ;;  %v6781_v5 = vld [vmem:[%s10623_s11 + $0x50] ss:$8 sps:$4 sm:$0xff]  }
 0x67c   : > { %v6844_v7 = vld [vmem:[%s10623_s11 + $0x1d0] ss:$8 sps:$4 sm:$0xff]  }
 0x67d   : > { %5432 = vmatpush1.bf16.msra.mxu0 %v5035_v2  ;;  %6657 = vmatpush1.bf16.msra.mxu1 %v5035_v2  ;;  %v6782_v2 = vld [vmem:[%s10623_s11 + $0x64] ss:$8 sps:$4 sm:$0xff]  }
 0x67e   : > { %5433 = vmatprep.subr.bf16.mxu0 %v6952_v0  ;;  %6642 = vmatprep.subr.bf16.mxu1 %v6952_v0  ;;  %v4920_v48 = vpop.xlane.xlu1 %4919  ;;  %v4918_v28 = vpop.xlane.xlu0 %4917 }
 0x67f   : > { %v5033_v47 = vpack.c.bf16 %v4920_v48, %v4918_v28  ;;  %v6784_v48 = vld [vmem:[%s10623_s11 + $0x60] ss:$8 sps:$4 sm:$0xff]  }
 0x680   : > { %v6850_v28 = vld [vmem:[%s10623_s11 + $0x1e0] ss:$8 sps:$4 sm:$0xff]  }
 0x681   : > { %5434 = vmatpush1.bf16.msra.mxu0 %v5034_v53  ;;  %6658 = vmatpush1.bf16.msra.mxu1 %v5034_v53  ;;  %v6848_v53 = vld [vmem:[%s10623_s11 + $0x1e4] ss:$8 sps:$4 sm:$0xff]  }
 0x682   : > { %5435 = vmatprep.subr.bf16.mxu0 %v6952_v0  ;;  %6643 = vmatprep.subr.bf16.mxu1 %v6952_v0  ;;  %v4916_v20 = vpop.xlane.xlu1 %4915  ;;  %v4914_v36 = vpop.xlane.xlu0 %4913 }
 0x683   : > { %v5032_v23 = vpack.c.bf16 %v4916_v20, %v4914_v36  ;;  %v6854_v20 = vld [vmem:[%s10623_s11 + $0x1f4] ss:$8 sps:$4 sm:$0xff]   ;;  %v6787_v36 = vld [vmem:[%s10623_s11 + $0x70] ss:$8 sps:$4 sm:$0xff]  }
 0x685   : > { %5436 = vmatpush1.bf16.msra.mxu0 %v5033_v47  ;;  %6659 = vmatpush1.bf16.msra.mxu1 %v5033_v47  ;;  %v6785_v47 = vld [vmem:[%s10623_s11 + $0x74] ss:$8 sps:$4 sm:$0xff]  }
 0x686   : > { %5437 = vmatprep.subr.bf16.mxu0 %v6952_v0  ;;  %6644 = vmatprep.subr.bf16.mxu1 %v6952_v0  ;;  %v4912_v58 = vpop.xlane.xlu1 %4911  ;;  %v4910_v55 = vpop.xlane.xlu0 %4909 }
 0x687   : > { %v5031_v12 = vpack.c.bf16 %v4912_v58, %v4910_v55  ;;  %v6788_v58 = vld [vmem:[%s10623_s11 + $0x84] ss:$8 sps:$4 sm:$0xff]   ;;  %v6790_v55 = vld [vmem:[%s10623_s11 + $0x80] ss:$8 sps:$4 sm:$0xff]  }
 0x689   : > { %5438 = vmatpush1.bf16.msra.mxu0 %v5032_v23  ;;  %6660 = vmatpush1.bf16.msra.mxu1 %v5032_v23  ;;  %v6856_v23 = vld [vmem:[%s10623_s11 + $0x1f0] ss:$8 sps:$4 sm:$0xff]  }
 0x68a   : > { %5439 = vmatprep.subr.bf16.mxu0 %v6952_v0  ;;  %6645 = vmatprep.subr.bf16.mxu1 %v6952_v0  ;;  %v4908_v63 = vpop.xlane.xlu1 %4907  ;;  %v4906_v38 = vpop.xlane.xlu0 %4905 }
 0x68b   : > { %v5030_v34 = vpack.c.bf16 %v4908_v63, %v4906_v38  ;;  %v6793_v63 = vld [vmem:[%s10623_s11 + $0x90] ss:$8 sps:$4 sm:$0xff]   ;;  %v6794_v38 = vld [vmem:[%s10623_s11 + $0xa4] ss:$8 sps:$4 sm:$0xff]  }
 0x68d   : > { %5440 = vmatpush1.bf16.msra.mxu0 %v5031_v12  ;;  %6661 = vmatpush1.bf16.msra.mxu1 %v5031_v12  ;;  %v6791_v12 = vld [vmem:[%s10623_s11 + $0x94] ss:$8 sps:$4 sm:$0xff]  }
 0x68e   : > { %5441 = vmatprep.subr.bf16.mxu0 %v6952_v0  ;;  %6646 = vmatprep.subr.bf16.mxu1 %v6952_v0  ;;  %v4904_v54 = vpop.xlane.xlu1 %4903  ;;  %v4902_v32 = vpop.xlane.xlu0 %4901 }
 0x68f   : > { %v5029_v9 = vpack.c.bf16 %v4904_v54, %v4902_v32  ;;  %v6797_v54 = vld [vmem:[%s10623_s11 + $0xb4] ss:$8 sps:$4 sm:$0xff]   ;;  %v6799_v32 = vld [vmem:[%s10623_s11 + $0xb0] ss:$8 sps:$4 sm:$0xff]  }
 0x691   : > { %5442 = vmatpush1.bf16.msra.mxu0 %v5030_v34  ;;  %6662 = vmatpush1.bf16.msra.mxu1 %v5030_v34  ;;  %v6796_v34 = vld [vmem:[%s10623_s11 + $0xa0] ss:$8 sps:$4 sm:$0xff]  }
 0x692   : > { %5443 = vmatprep.subr.bf16.mxu0 %v6952_v0  ;;  %6647 = vmatprep.subr.bf16.mxu1 %v6952_v0  ;;  %v4964_v62 = vpop.xlane.xlu1 %4963  ;;  %v4962_v25 = vpop.xlane.xlu0 %4961 }
 0x693   : > { %v5044_v57 = vpack.c.bf16 %v4964_v62, %v4962_v25  ;;  %v6802_v62 = vld [vmem:[%s10623_s11 + $0xc0] ss:$8 sps:$4 sm:$0xff]   ;;  %v6803_v25 = vld [vmem:[%s10623_s11 + $0xd4] ss:$8 sps:$4 sm:$0xff]  }
 0x695   : > { %5444 = vmatpush1.bf16.msra.mxu0 %v5029_v9  ;;  %6663 = vmatpush1.bf16.msra.mxu1 %v5029_v9  ;;  %v6800_v9 = vld [vmem:[%s10623_s11 + $0xc4] ss:$8 sps:$4 sm:$0xff]  }
 0x696   : > { %5445 = vmatprep.subr.bf16.mxu0 %v6952_v0  ;;  %6648 = vmatprep.subr.bf16.mxu1 %v6952_v0  ;;  %v4960_v31 = vpop.xlane.xlu1 %4959  ;;  %v4958_v46 = vpop.xlane.xlu0 %4957 }
 0x697   : > { %v5043_v18 = vpack.c.bf16 %v4960_v31, %v4958_v46  ;;  %v6806_v31 = vld [vmem:[%s10623_s11 + $0xe4] ss:$8 sps:$4 sm:$0xff]   ;;  %v6808_v46 = vld [vmem:[%s10623_s11 + $0xe0] ss:$8 sps:$4 sm:$0xff]  }
 0x699   : > { %5446 = vmatpush2.bf16.msra.mxu0 %v5044_v57  ;;  %6664 = vmatpush2.bf16.msra.mxu1 %v5044_v57  ;;  %v6805_v57 = vld [vmem:[%s10623_s11 + $0xd0] ss:$8 sps:$4 sm:$0xff]  }
 0x69a   : > { %5447 = vmatprep.subr.bf16.mxu0 %v6952_v0  ;;  %6649 = vmatprep.subr.bf16.mxu1 %v6952_v0  ;;  %v4956_v45 = vpop.xlane.xlu1 %4955  ;;  %v4954_v33 = vpop.xlane.xlu0 %4953 }
 0x69b   : > { %v5042_v40 = vpack.c.bf16 %v4956_v45, %v4954_v33  ;;  %v6811_v45 = vld [vmem:[%s10623_s11 + $0xf0] ss:$8 sps:$4 sm:$0xff]   ;;  %v6815_v33 = vld [vmem:[%s10623_s11 + $0x104] ss:$8 sps:$4 sm:$0xff]  }
 0x69d   : > { %5448 = vmatpush2.bf16.msra.mxu0 %v5043_v18  ;;  %6665 = vmatpush2.bf16.msra.mxu1 %v5043_v18  ;;  %v6809_v18 = vld [vmem:[%s10623_s11 + $0xf4] ss:$8 sps:$4 sm:$0xff]  }
 0x69e   : > { %5449 = vmatprep.subr.bf16.mxu0 %v6952_v0  ;;  %6650 = vmatprep.subr.bf16.mxu1 %v6952_v0  ;;  %v4952_v41 = vpop.xlane.xlu1 %4951  ;;  %v4950_v39 = vpop.xlane.xlu0 %4949 }
 0x69f   : > { %v5041_v10 = vpack.c.bf16 %v4952_v41, %v4950_v39  ;;  %v6821_v41 = vld [vmem:[%s10623_s11 + $0x114] ss:$8 sps:$4 sm:$0xff]   ;;  %v6823_v39 = vld [vmem:[%s10623_s11 + $0x110] ss:$8 sps:$4 sm:$0xff]  }
 0x6a1   : > { %5450 = vmatpush2.bf16.msra.mxu0 %v5042_v40  ;;  %6666 = vmatpush2.bf16.msra.mxu1 %v5042_v40  ;;  %v6817_v40 = vld [vmem:[%s10623_s11 + $0x100] ss:$8 sps:$4 sm:$0xff]  }
 0x6a2   : > { %5451 = vmatprep.subr.bf16.mxu0 %v6952_v0  ;;  %6651 = vmatprep.subr.bf16.mxu1 %v6952_v0  ;;  %v4948_v43 = vpop.xlane.xlu1 %4947  ;;  %v4946_v17 = vpop.xlane.xlu0 %4945 }
 0x6a3   : > { %v5040_v4 = vpack.c.bf16 %v4948_v43, %v4946_v17  ;;  %v6829_v43 = vld [vmem:[%s10623_s11 + $0x120] ss:$8 sps:$4 sm:$0xff]   ;;  %v6833_v17 = vld [vmem:[%s10623_s11 + $0x134] ss:$8 sps:$4 sm:$0xff]  }
 0x6a5   : > { %5452 = vmatpush2.bf16.msra.mxu0 %v5041_v10  ;;  %6667 = vmatpush2.bf16.msra.mxu1 %v5041_v10  ;;  %v6827_v10 = vld [vmem:[%s10623_s11 + $0x124] ss:$8 sps:$4 sm:$0xff]  }
 0x6a6   : > { %5453 = vmatprep.subr.bf16.mxu0 %v6952_v0  ;;  %6652 = vmatprep.subr.bf16.mxu1 %v6952_v0  ;;  %v4944_v59 = vpop.xlane.xlu1 %4943  ;;  %v4942_v37 = vpop.xlane.xlu0 %4941 }
 0x6a7   : > { %v5039_v44 = vpack.c.bf16 %v4944_v59, %v4942_v37  ;;  %v6839_v59 = vld [vmem:[%s10623_s11 + $0x144] ss:$8 sps:$4 sm:$0xff]   ;;  %v6841_v37 = vld [vmem:[%s10623_s11 + $0x140] ss:$8 sps:$4 sm:$0xff]  }
 0x6a9   : > { %5454 = vmatpush2.bf16.msra.mxu0 %v5040_v4  ;;  %6668 = vmatpush2.bf16.msra.mxu1 %v5040_v4  ;;  %v6835_v4 = vld [vmem:[%s10623_s11 + $0x130] ss:$8 sps:$4 sm:$0xff]  }
 0x6aa   : > { %5455 = vmatprep.subr.bf16.mxu0 %v6952_v0  ;;  %6653 = vmatprep.subr.bf16.mxu1 %v6952_v0  ;;  %v4940_v3 = vpop.xlane.xlu1 %4939  ;;  %v4938_v24 = vpop.xlane.xlu0 %4937 }
 0x6ab   : > { %v5038_v19 = vpack.c.bf16 %v4940_v3, %v4938_v24  ;;  %v6847_v3 = vld [vmem:[%s10623_s11 + $0x150] ss:$8 sps:$4 sm:$0xff]   ;;  %v6851_v24 = vld [vmem:[%s10623_s11 + $0x164] ss:$8 sps:$4 sm:$0xff]  }
 0x6ad   : > { %5456 = vmatpush2.bf16.msra.mxu0 %v5039_v44  ;;  %6669 = vmatpush2.bf16.msra.mxu1 %v5039_v44  ;;  %v6845_v44 = vld [vmem:[%s10623_s11 + $0x154] ss:$8 sps:$4 sm:$0xff]  }
 0x6ae   : > { %5457 = vmatprep.subr.bf16.mxu0 %v6952_v0  ;;  %6654 = vmatprep.subr.bf16.mxu1 %v6952_v0  ;;  %v4936_v52 = vpop.xlane.xlu1 %4935  ;;  %v4934_v21 = vpop.xlane.xlu0 %4933 }
 0x6af   : > { %v5037_v42 = vpack.c.bf16 %v4936_v52, %v4934_v21  ;;  %v6857_v52 = vld [vmem:[%s10623_s11 + $0x174] ss:$8 sps:$4 sm:$0xff]   ;;  %v6859_v21 = vld [vmem:[%s10623_s11 + $0x170] ss:$8 sps:$4 sm:$0xff]  }
 0x6b1   : > { %5458 = vmatpush2.bf16.msra.mxu0 %v5038_v19  ;;  %6670 = vmatpush2.bf16.msra.mxu1 %v5038_v19  ;;  %v6853_v19 = vld [vmem:[%s10623_s11 + $0x160] ss:$8 sps:$4 sm:$0xff]  }
 0x6b2   : > { %5459 = vmatprep.subr.bf16.mxu0 %v6952_v0  ;;  %6655 = vmatprep.subr.bf16.mxu1 %v6952_v0  ;;  %v6769_v0 = vld [vmem:[%s10623_s11 + $0x10] ss:$8 sps:$4 sm:$0xff]  }
 0x6b5   : > { %5460 = vmatpush2.bf16.msra.mxu0 %v5037_v42  ;;  %6671 = vmatpush2.bf16.msra.mxu1 %v5037_v42  ;;  %v5045_v42 = vld [vmem:[%s10624_s12] sm:$0xff] }
 0x6b8   : > { %5462 = vmatmul.mubr.bf16.vlgmr.msra.gmra.mxu0 %v6764_v15  ;;  %5654 = vmatmul.mubr.bf16.vlgmr.msra.gmra.mxu1 %v6812_v27 }
 0x6b9   : > { %5469 = vmatprep.mubr.bf16.mxu0 %v6767_v30  ;;  %5661 = vmatprep.mubr.bf16.mxu1 %v6818_v49 }
 0x6c0   : > { %5470 = vmatmul.mubr.bf16.gmra.mxu0 %v6769_v0  ;;  %5662 = vmatmul.mubr.bf16.gmra.mxu1 %v6820_v29  ;;  %v5046_v0 = vld [vmem:[%s10624_s12 + $0x8] sm:$0xff] }
 0x6c1   : > { %5477 = vmatprep.mubr.bf16.mxu0 %v6770_v56  ;;  %5669 = vmatprep.mubr.bf16.mxu1 %v6824_v6  ;;  %v5094_v56 = vld [vmem:[%s10624_s12 + $0x188] sm:$0xff] }
 0x6c8   : > { %5478 = vmatmul.mubr.bf16.gmra.mxu0 %v6772_v8  ;;  %5670 = vmatmul.mubr.bf16.gmra.mxu1 %v6826_v61 }
 0x6c9   : > { %5485 = vmatprep.mubr.bf16.mxu0 %v6773_v14  ;;  %5677 = vmatprep.mubr.bf16.mxu1 %v6830_v11 }
 0x6d0   : > { %5486 = vmatmul.mubr.bf16.gmra.mxu0 %v6775_v13  ;;  %5678 = vmatmul.mubr.bf16.gmra.mxu1 %v6832_v22 }
 0x6d1   : > { %5493 = vmatprep.mubr.bf16.mxu0 %v6776_v26  ;;  %5685 = vmatprep.mubr.bf16.mxu1 %v6836_v16  ;;  %v5095_v16 = vld [vmem:[%s10624_s12 + $0x190] sm:$0xff] }
 0x6d8   : > { %5494 = vmatmul.mubr.bf16.gmra.mxu0 %v6778_v60  ;;  %5686 = vmatmul.mubr.bf16.gmra.mxu1 %v6838_v51 }
 0x6d9   : > { %5501 = vmatprep.mubr.bf16.mxu0 %v6779_v35  ;;  %5693 = vmatprep.mubr.bf16.mxu1 %v6842_v50  ;;  %v5047_v50 = vld [vmem:[%s10624_s12 + $0x10] sm:$0xff] }
 0x6e0   : > { %5502 = vmatmul.mubr.bf16.gmra.mxu0 %v6781_v5  ;;  %5694 = vmatmul.mubr.bf16.gmra.mxu1 %v6844_v7 }
 0x6e1   : > { %5509 = vmatprep.mubr.bf16.mxu0 %v6782_v2  ;;  %5701 = vmatprep.mubr.bf16.mxu1 %v6848_v53 }
 0x6e8   : > { %5510 = vmatmul.mubr.bf16.gmra.mxu0 %v6784_v48  ;;  %5702 = vmatmul.mubr.bf16.gmra.mxu1 %v6850_v28 }
 0x6e9   : > { %5517 = vmatprep.mubr.bf16.mxu0 %v6785_v47  ;;  %5709 = vmatprep.mubr.bf16.mxu1 %v6854_v20  ;;  %v5048_v47 = vld [vmem:[%s10624_s12 + $0x18] sm:$0xff] }
 0x6f0   : > { %5518 = vmatmul.mubr.bf16.gmra.mxu0 %v6787_v36  ;;  %5710 = vmatmul.mubr.bf16.gmra.mxu1 %v6856_v23  ;;  %v5096_v36 = vld [vmem:[%s10624_s12 + $0x198] sm:$0xff] }
 0x6f1   : > { %5525 = vmatprep.mubr.bf16.mxu0 %v6788_v58 }
 0x6f8   : > { %5526 = vmatmul.mubr.bf16.gmra.mxu0 %v6790_v55 }
 0x6f9   : > { %5533 = vmatprep.mubr.bf16.mxu0 %v6791_v12 }
 0x700   : > { %5534 = vmatmul.mubr.bf16.gmra.mxu0 %v6793_v63 }
 0x701   : > { %5541 = vmatprep.mubr.bf16.mxu0 %v6794_v38 }
 0x708   : > { %5542 = vmatmul.mubr.bf16.gmra.mxu0 %v6796_v34 }
 0x709   : > { %5549 = vmatprep.mubr.bf16.mxu0 %v6797_v54 }
 0x710   : > { %5550 = vmatmul.mubr.bf16.gmra.mxu0 %v6799_v32  ;;  %v5097_v32 = vld [vmem:[%s10624_s12 + $0x1a0] sm:$0xff] }
 0x711   : > { %5557 = vmatprep.mubr.bf16.mxu0 %v6800_v9 }
 0x718   : > { %5558 = vmatmul.mubr.bf16.gmra.mxu0 %v6802_v62 }
 0x719   : > { %5565 = vmatprep.mubr.bf16.mxu0 %v6803_v25 }
 0x720   : > { %5566 = vmatmul.mubr.bf16.gmra.mxu0 %v6805_v57  ;;  %v5049_v57 = vld [vmem:[%s10624_s12 + $0x20] sm:$0xff] }
 0x721   : > { %5573 = vmatprep.mubr.bf16.mxu0 %v6806_v31 }
 0x728   : > { %5574 = vmatmul.mubr.bf16.gmra.mxu0 %v6808_v46 }
 0x729   : > { %5581 = vmatprep.mubr.bf16.mxu0 %v6809_v18 }
 0x730   : > { %5582 = vmatmul.mubr.bf16.gmra.mxu0 %v6811_v45 }
 0x731   : > { %5589 = vmatprep.mubr.bf16.mxu0 %v6815_v33 }
 0x738   : > { %5590 = vmatmul.mubr.bf16.gmra.mxu0 %v6817_v40 }
 0x739   : > { %5597 = vmatprep.mubr.bf16.mxu0 %v6821_v41  ;;  %v5050_v41 = vld [vmem:[%s10624_s12 + $0x28] sm:$0xff] }
 0x740   : > { %5598 = vmatmul.mubr.bf16.gmra.mxu0 %v6823_v39 }
 0x741   : > { %5605 = vmatprep.mubr.bf16.mxu0 %v6827_v10  ;;  %v5098_v10 = vld [vmem:[%s10624_s12 + $0x1a8] sm:$0xff] }
 0x748   : > { %5606 = vmatmul.mubr.bf16.gmra.mxu0 %v6829_v43 }
 0x749   : > { %5613 = vmatprep.mubr.bf16.mxu0 %v6833_v17 }
 0x750   : > { %5614 = vmatmul.mubr.bf16.gmra.mxu0 %v6835_v4 }
 0x751   : > { %5621 = vmatprep.mubr.bf16.mxu0 %v6839_v59 }
 0x758   : > { %5622 = vmatmul.mubr.bf16.gmra.mxu0 %v6841_v37 }
 0x759   : > { %5629 = vmatprep.mubr.bf16.mxu0 %v6845_v44 }
 0x760   : > { %5630 = vmatmul.mubr.bf16.gmra.mxu0 %v6847_v3 }
 0x761   : > { %5637 = vmatprep.mubr.bf16.mxu0 %v6851_v24 }
 0x768   : > { %5638 = vmatmul.mubr.bf16.gmra.mxu0 %v6853_v19  ;;  %v5099_v19 = vld [vmem:[%s10624_s12 + $0x1b0] sm:$0xff] }
 0x769   : > { %5645 = vmatprep.mubr.bf16.mxu0 %v6857_v52 }
 0x770   : > { %5646 = vmatmul.mubr.bf16.gmra.mxu0 %v6859_v21 }
 0x778   : > { %v5463_v15 = vpop.f32.mrf.mxu0  ;;  %v5655_v27 = vpop.f32.mrf.mxu1 }
 0x779   : > { %v5656_v30 = vadd.f32 %v5655_v27, %v5093_v1  ;;  %v5464_v6 = vadd.f32 %v5463_v15, %v5045_v42  ;;  %v5051_v42 = vld [vmem:[%s10624_s12 + $0x30] sm:$0xff] }
 0x77a   : > { %v5465_v49 = vpop.f32.mrf.mxu0  ;;  %v5657_v29 = vpop.f32.mrf.mxu1 }
 0x77b   : > { %v5766_v11 = vmax.f32 %v5656_v30, 0.0  ;;  %v5718_v60 = vmax.f32 %v5464_v6, 0.0 }
 0x77c   : > { %v5466_v8 = vpop.f32.mrf.mxu0  ;;  %v5658_v61 = vpop.f32.mrf.mxu1 }
 0x77d   : > { %v5467_v14 = vadd.f32 %v5466_v8, %v5046_v0  ;;  %v5659_v13 = vadd.f32 %v5658_v61, %v5094_v56  ;;  %v5052_v56 = vld [vmem:[%s10624_s12 + $0x38] sm:$0xff] }
 0x77e   : > { %v5468_v22 = vpop.f32.mrf.mxu0  ;;  %v5660_v26 = vpop.f32.mrf.mxu1  ;;  %v5100_v8 = vld [vmem:[%s10624_s12 + $0x1b8] sm:$0xff] }
 0x77f   : > { %v5719_v51 = vmax.f32 %v5467_v14, 0.0  ;;  %v5767_v35 = vmax.f32 %v5659_v13, 0.0 }
 0x780   : > { %v5471_v5 = vpop.f32.mrf.mxu0  ;;  %v5663_v7 = vpop.f32.mrf.mxu1 }
 0x781   : > { %v10103_v2 = vpack.c.bf16 %v5719_v51, %v5718_v60  ;;  %v10105_v53 = vpack.c.bf16 %v5767_v35, %v5766_v11  ;;  %v5664_v48 = vadd.f32 %v5663_v7, %v5095_v16  ;;  %v5472_v23 = vadd.f32 %v5471_v5, %v5047_v50  ;;  %v5101_v51 = vld [vmem:[%s10624_s12 + $0x1c0] sm:$0xff] }
 0x782   : > { %v5473_v28 = vpop.f32.mrf.mxu0  ;;  %v5665_v20 = vpop.f32.mrf.mxu1  ;;  %v5053_v7 = vld [vmem:[%s10624_s12 + $0x40] sm:$0xff] }
 0x783   : > { %v5768_v63 = vmax.f32 %v5664_v48, 0.0  ;;  %v5720_v9 = vmax.f32 %v5472_v23, 0.0 }
 0x784   : > { %v5474_v58 = vpop.f32.mrf.mxu0  ;;  %v5666_v55 = vpop.f32.mrf.mxu1 }
 0x785   : > { %v5475_v12 = vadd.f32 %v5474_v58, %v5048_v47  ;;  %v5667_v38 = vadd.f32 %v5666_v55, %v5096_v36  ;;  %v6862_v47 = vld [vmem:[%s10625_s13 + $0x4] ss:$16 sps:$4 sm:$0xff]   ;;  %v5054_v55 = vld [vmem:[%s10624_s12 + $0x48] sm:$0xff] }
 0x786   : > { %v5476_v34 = vpop.f32.mrf.mxu0  ;;  %v5668_v54 = vpop.f32.mrf.mxu1  ;;  %6054 = vmatprep.mubr.bf16.mxu1 %v6862_v47 }
 0x787   : > { %v5721_v62 = vmax.f32 %v5475_v12, 0.0  ;;  %v5769_v25 = vmax.f32 %v5667_v38, 0.0 }
 0x788   : > { %v5479_v31 = vpop.f32.mrf.mxu0  ;;  %v5671_v46 = vpop.f32.mrf.mxu1 }
 0x789   : > { %v10119_v18 = vpack.c.bf16 %v5721_v62, %v5720_v9  ;;  %v10121_v45 = vpack.c.bf16 %v5769_v25, %v5768_v63  ;;  %v5672_v33 = vadd.f32 %v5671_v46, %v5097_v32  ;;  %v5480_v43 = vadd.f32 %v5479_v31, %v5049_v57  ;;  %v5102_v63 = vld [vmem:[%s10624_s12 + $0x1c8] sm:$0xff]  ;;  %v5103_v31 = vld [vmem:[%s10624_s12 + $0x1d0] sm:$0xff] }
 0x78a   : > { %v5481_v40 = vpop.f32.mrf.mxu0  ;;  %v5673_v39 = vpop.f32.mrf.mxu1 }
 0x78b   : > { %v5770_v37 = vmax.f32 %v5672_v33, 0.0  ;;  %v5722_v52 = vmax.f32 %v5480_v43, 0.0 }
 0x78c   : > { %v5482_v17 = vpop.f32.mrf.mxu0  ;;  %v5674_v4 = vpop.f32.mrf.mxu1 }
 0x78d   : > { %v5483_v59 = vadd.f32 %v5482_v17, %v5050_v41  ;;  %v5675_v44 = vadd.f32 %v5674_v4, %v5098_v10  ;;  %v5055_v41 = vld [vmem:[%s10624_s12 + $0x50] sm:$0xff] }
 0x78e   : > { %v5484_v3 = vpop.f32.mrf.mxu0  ;;  %v5676_v24 = vpop.f32.mrf.mxu1 }
 0x78f   : > { %v5723_v21 = vmax.f32 %v5483_v59, 0.0  ;;  %v5771_v1 = vmax.f32 %v5675_v44, 0.0  ;;  %v5104_v3 = vld [vmem:[%s10624_s12 + $0x1d8] sm:$0xff] }
 0x790   : > { %v5487_v15 = vpop.f32.mrf.mxu0  ;;  %v5679_v27 = vpop.f32.mrf.mxu1 }
 0x791   : > { %v10135_v30 = vpack.c.bf16 %v5723_v21, %v5722_v52  ;;  %v10137_v49 = vpack.c.bf16 %v5771_v1, %v5770_v37  ;;  %v5680_v0 = vadd.f32 %v5679_v27, %v5099_v19  ;;  %v5488_v61 = vadd.f32 %v5487_v15, %v5051_v42  ;;  %v5056_v37 = vld [vmem:[%s10624_s12 + $0x58] sm:$0xff] }
 0x792   : > { %v5489_v29 = vpop.f32.mrf.mxu0  ;;  %v5681_v6 = vpop.f32.mrf.mxu1 }
 0x793   : > { %v5772_v22 = vmax.f32 %v5680_v0, 0.0  ;;  %v5724_v35 = vmax.f32 %v5488_v61, 0.0  ;;  %v5105_v0 = vld [vmem:[%s10624_s12 + $0x1e0] sm:$0xff] }
 0x794   : > { %v5490_v14 = vpop.f32.mrf.mxu0  ;;  %v5682_v11 = vpop.f32.mrf.mxu1 }
 0x795   : > { %v5491_v13 = vadd.f32 %v5490_v14, %v5052_v56  ;;  %v5683_v26 = vadd.f32 %v5682_v11, %v5100_v8  ;;  %v5057_v8 = vld [vmem:[%s10624_s12 + $0x60] sm:$0xff] }
 0x796   : > { %v5492_v16 = vpop.f32.mrf.mxu0  ;;  %v5684_v60 = vpop.f32.mrf.mxu1 }
 0x797   : > { %v5725_v50 = vmax.f32 %v5491_v13, 0.0  ;;  %v5773_v5 = vmax.f32 %v5683_v26, 0.0  ;;  %v5058_v16 = vld [vmem:[%s10624_s12 + $0x68] sm:$0xff] }
 0x798   : > { %v5495_v48 = vpop.f32.mrf.mxu0  ;;  %v5687_v28 = vpop.f32.mrf.mxu1 }
 0x799   : > { %v10154_v20 = vpack.c.bf16 %v5725_v50, %v5724_v35  ;;  %v10156_v36 = vpack.c.bf16 %v5773_v5, %v5772_v22  ;;  %v5688_v23 = vadd.f32 %v5687_v28, %v5101_v51  ;;  %v5496_v38 = vadd.f32 %v5495_v48, %v5053_v7  ;;  %v5106_v51 = vld [vmem:[%s10624_s12 + $0x1e8] sm:$0xff] }
 0x79a   : > { %v5497_v58 = vpop.f32.mrf.mxu0  ;;  %v5689_v12 = vpop.f32.mrf.mxu1 }
 0x79b   : > { %v5774_v9 = vmax.f32 %v5688_v23, 0.0  ;;  %v5726_v46 = vmax.f32 %v5496_v38, 0.0  ;;  %v5107_v58 = vld [vmem:[%s10624_s12 + $0x1f0] sm:$0xff] }
 0x79c   : > { %v5498_v34 = vpop.f32.mrf.mxu0  ;;  %v5690_v54 = vpop.f32.mrf.mxu1  ;;  %v5059_v38 = vld [vmem:[%s10624_s12 + $0x70] sm:$0xff] }
 0x79d   : > { %v5499_v32 = vadd.f32 %v5498_v34, %v5054_v55  ;;  %v5691_v62 = vadd.f32 %v5690_v54, %v5102_v63 }
 0x79e   : > { %v5500_v25 = vpop.f32.mrf.mxu0  ;;  %v5692_v57 = vpop.f32.mrf.mxu1 }
 0x79f   : > { %v5727_v33 = vmax.f32 %v5499_v32, 0.0  ;;  %v5775_v40 = vmax.f32 %v5691_v62, 0.0  ;;  %v5060_v57 = vld [vmem:[%s10624_s12 + $0x78] sm:$0xff] }
 0x7a0   : > { %v5503_v39 = vpop.f32.mrf.mxu0  ;;  %v5695_v10 = vpop.f32.mrf.mxu1 }
 0x7a1   : > { %v10170_v43 = vpack.c.bf16 %v5727_v33, %v5726_v46  ;;  %v10172_v17 = vpack.c.bf16 %v5775_v40, %v5774_v9  ;;  %v5696_v4 = vadd.f32 %v5695_v10, %v5103_v31  ;;  %v5504_v24 = vadd.f32 %v5503_v39, %v5055_v41  ;;  %v5108_v46 = vld [vmem:[%s10624_s12 + $0x1f8] sm:$0xff] }
 0x7a2   : > { %v5505_v59 = vpop.f32.mrf.mxu0  ;;  %v5697_v44 = vpop.f32.mrf.mxu1 }
 0x7a3   : > { %v5776_v1 = vmax.f32 %v5696_v4, 0.0  ;;  %v5728_v29 = vmax.f32 %v5504_v24, 0.0 }
 0x7a4   : > { %v5506_v19 = vpop.f32.mrf.mxu0  ;;  %v5698_v52 = vpop.f32.mrf.mxu1 }
 0x7a5   : > { %v5507_v21 = vadd.f32 %v5506_v19, %v5056_v37  ;;  %v5699_v42 = vadd.f32 %v5698_v52, %v5104_v3  ;;  %v5061_v19 = vld [vmem:[%s10624_s12 + $0x80] sm:$0xff] }
 0x7a6   : > { %v5508_v15 = vpop.f32.mrf.mxu0  ;;  %v5700_v27 = vpop.f32.mrf.mxu1 }
 0x7a7   : > { %v5729_v56 = vmax.f32 %v5507_v21, 0.0  ;;  %v5777_v6 = vmax.f32 %v5699_v42, 0.0  ;;  %v5062_v15 = vld [vmem:[%s10624_s12 + $0x88] sm:$0xff] }
 0x7a8   : > { %v5511_v61 = vpop.f32.mrf.mxu0  ;;  %v5703_v14 = vpop.f32.mrf.mxu1 }
 0x7a9   : > { %v10186_v11 = vpack.c.bf16 %v5729_v56, %v5728_v29  ;;  %v10188_v13 = vpack.c.bf16 %v5777_v6, %v5776_v1  ;;  %v5704_v22 = vadd.f32 %v5703_v14, %v5105_v0  ;;  %v5512_v35 = vadd.f32 %v5511_v61, %v5057_v8  ;;  %v5063_v61 = vld [vmem:[%s10624_s12 + $0x90] sm:$0xff] }
 0x7aa   : > { %v5513_v26 = vpop.f32.mrf.mxu0  ;;  %v5705_v60 = vpop.f32.mrf.mxu1 }
 0x7ab   : > { %v5778_v48 = vmax.f32 %v5704_v22, 0.0  ;;  %v5730_v55 = vmax.f32 %v5512_v35, 0.0 }
 0x7ac   : > { %v5514_v50 = vpop.f32.mrf.mxu0  ;;  %v5706_v5 = vpop.f32.mrf.mxu1 }
 0x7ad   : > { %v5515_v7 = vadd.f32 %v5514_v50, %v5058_v16  ;;  %v5707_v28 = vadd.f32 %v5706_v5, %v5106_v51  ;;  %v5064_v16 = vld [vmem:[%s10624_s12 + $0x98] sm:$0xff] }
 0x7ae   : > { %v5516_v47 = vpop.f32.mrf.mxu0  ;;  %v5708_v23 = vpop.f32.mrf.mxu1 }
 0x7af   : > { %v5731_v12 = vmax.f32 %v5515_v7, 0.0  ;;  %v5779_v63 = vmax.f32 %v5707_v28, 0.0 }
 0x7b0   : > { %v5519_v34 = vpop.f32.mrf.mxu0  ;;  %v5711_v54 = vpop.f32.mrf.mxu1 }
 0x7b1   : > { %v10202_v32 = vpack.c.bf16 %v5731_v12, %v5730_v55  ;;  %v10204_v9 = vpack.c.bf16 %v5779_v63, %v5778_v48  ;;  %v5712_v62 = vadd.f32 %v5711_v54, %v5107_v58  ;;  %v5520_v33 = vadd.f32 %v5519_v34, %v5059_v38 }
 0x7b2   : > { %v5521_v25 = vpop.f32.mrf.mxu0  ;;  %v5713_v31 = vpop.f32.mrf.mxu1 }
 0x7b3   : > { %v5780_v10 = vmax.f32 %v5712_v62, 0.0  ;;  %v5732_v44 = vmax.f32 %v5520_v33, 0.0 }
 0x7b4   : > { %v5522_v40 = vpop.f32.mrf.mxu0  ;;  %v5714_v41 = vpop.f32.mrf.mxu1 }
 0x7b5   : > { %v5523_v39 = vadd.f32 %v5522_v40, %v5060_v57  ;;  %v5715_v4 = vadd.f32 %v5714_v41, %v5108_v46 }
 0x7b6   : > { %v5524_v59 = vpop.f32.mrf.mxu0  ;;  %v5716_v37 = vpop.f32.mrf.mxu1 }
 0x7b7   : > { %v5733_v3 = vmax.f32 %v5523_v39, 0.0  ;;  %v5781_v24 = vmax.f32 %v5715_v4, 0.0  ;;  %v5074_v4 = vld [vmem:[%s10624_s12 + $0xe8] sm:$0xff]  ;;  %v5075_v59 = vld [vmem:[%s10624_s12 + $0xf0] sm:$0xff] }
 0x7b8   : > { %v5527_v52 = vpop.f32.mrf.mxu0 }
 0x7b9   : > { %v10215_v21 = vpack.c.bf16 %v5733_v3, %v5732_v44  ;;  %v10217_v1 = vpack.c.bf16 %v5781_v24, %v5780_v10  ;;  %v5528_v27 = vadd.f32 %v5527_v52, %v5061_v19  ;;  %v5073_v44 = vld [vmem:[%s10624_s12 + $0xe0] sm:$0xff]  ;;  %v5076_v24 = vld [vmem:[%s10624_s12 + $0xf8] sm:$0xff] }
 0x7ba   : > { %v5529_v42 = vpop.f32.mrf.mxu0 }
 0x7bb   : > { %v5734_v6 = vmax.f32 %v5528_v27, 0.0  ;;  %v5072_v42 = vld [vmem:[%s10624_s12 + $0xd8] sm:$0xff] }
 0x7bc   : > { %v5530_v0 = vpop.f32.mrf.mxu0 }
 0x7bd   : > { %v5531_v29 = vadd.f32 %v5530_v0, %v5062_v15 }
 0x7be   : > { %v5532_v56 = vpop.f32.mrf.mxu0 }
 0x7bf   : > { %v5735_v8 = vmax.f32 %v5531_v29, 0.0  ;;  %v5071_v29 = vld [vmem:[%s10624_s12 + $0xd0] sm:$0xff] }
 0x7c0   : > { %v5535_v14 = vpop.f32.mrf.mxu0 }
 0x7c1   : > { %v10225_v22 = vpack.c.bf16 %v5735_v8, %v5734_v6  ;;  %v5536_v60 = vadd.f32 %v5535_v14, %v5063_v61 }
 0x7c2   : > { %v5537_v26 = vpop.f32.mrf.mxu0 }
 0x7c3   : > { %v5736_v5 = vmax.f32 %v5536_v60, 0.0  ;;  %v5070_v26 = vld [vmem:[%s10624_s12 + $0xc8] sm:$0xff] }
 0x7c4   : > { %v5538_v51 = vpop.f32.mrf.mxu0 }
 0x7c5   : > { %v5539_v35 = vadd.f32 %v5538_v51, %v5064_v16  ;;  %v5077_v16 = vld [vmem:[%s10624_s12 + $0x100] sm:$0xff] }
 0x7c6   : > { %v5540_v50 = vpop.f32.mrf.mxu0 }
 0x7c7   : > { %v5737_v7 = vmax.f32 %v5539_v35, 0.0 }
 0x7c8   : > { %v10230_v48 = vpop.f32.mrf.mxu0 }
 0x7c9   : > { %v10232_v28 = vpack.c.bf16 %v5737_v7, %v5736_v5  ;;  %v5069_v5 = vld [vmem:[%s10624_s12 + $0xc0] sm:$0xff] }
 0x7ca   : > { %v5545_v47 = vpop.f32.mrf.mxu0 }
 0x7cb   : > { %v5078_v47 = vld [vmem:[%s10624_s12 + $0x108] sm:$0xff] }
 0x7cc   : > { %v10234_v23 = vpop.f32.mrf.mxu0 }
 0x7ce   : > { %v5548_v58 = vpop.f32.mrf.mxu0 }
 0x7cf   : > { %v5068_v58 = vld [vmem:[%s10624_s12 + $0xb8] sm:$0xff] }
 0x7d0   : > { %v10236_v55 = vpop.f32.mrf.mxu0 }
 0x7d2   : > { %v5553_v12 = vpop.f32.mrf.mxu0 }
 0x7d4   : > { %v5554_v63 = vpop.f32.mrf.mxu0 }
 0x7d6   : > { %v5556_v38 = vpop.f32.mrf.mxu0 }
 0x7d8   : > { %v5559_v34 = vpop.f32.mrf.mxu0 }
 0x7da   : > { %v5561_v54 = vpop.f32.mrf.mxu0 }
 0x7dc   : > { %v5562_v62 = vpop.f32.mrf.mxu0 }
 0x7dd   : > { %v5563_v12 = vadd.f32 %v5562_v62, %v5070_v26 }
 0x7de   : > { %v5564_v25 = vpop.f32.mrf.mxu0 }
 0x7e0   : > { %v5567_v57 = vpop.f32.mrf.mxu0 }
 0x7e1   : > { %v5568_v51 = vadd.f32 %v5567_v57, %v5071_v29 }
 0x7e2   : > { %v5569_v31 = vpop.f32.mrf.mxu0 }
 0x7e3   : > { %v5560_v31 = vadd.f32 %v5559_v34, %v5069_v5 }
 0x7e4   : > { %v5570_v46 = vpop.f32.mrf.mxu0 }
 0x7e5   : > { %v5571_v6 = vadd.f32 %v5570_v46, %v5072_v42  ;;  %v5744_v46 = vmax.f32 %v5568_v51, 0.0 }
 0x7e6   : > { %v5572_v33 = vpop.f32.mrf.mxu0 }
 0x7e7   : > { %v5745_v38 = vmax.f32 %v5571_v6, 0.0 }
 0x7e8   : > { %v5575_v40 = vpop.f32.mrf.mxu0 }
 0x7e9   : > { %v5576_v27 = vadd.f32 %v5575_v40, %v5073_v44  ;;  %v5067_v40 = vld [vmem:[%s10624_s12 + $0xb0] sm:$0xff] }
 0x7ea   : > { %v5577_v41 = vpop.f32.mrf.mxu0  ;;  %v5552_v44 = vadd.f32 %v10236_v55, %v5067_v40 }
 0x7eb   : > { %v5746_v35 = vmax.f32 %v5576_v27, 0.0  ;;  %v5555_v41 = vadd.f32 %v5554_v63, %v5068_v58  ;;  %v6865_v58 = vld [vmem:[%s10625_s13 + $0x20] ss:$16 sps:$4 sm:$0xff]  }
 0x7ec   : > { %v5578_v39 = vpop.f32.mrf.mxu0  ;;  %v5740_v29 = vmax.f32 %v5552_v44, 0.0  ;;  %v5089_v44 = vld [vmem:[%s10624_s12 + $0x160] sm:$0xff] }
 0x7ed   : > { %v5579_v19 = vadd.f32 %v5578_v39, %v5074_v4  ;;  %v5795_v4 = vpack.c.bf16 %v5745_v38, %v5744_v46 }
 0x7ee   : > { %v5580_v10 = vpop.f32.mrf.mxu0 }
 0x7ef   : > { %v5747_v8 = vmax.f32 %v5579_v19, 0.0  ;;  %v5743_v10 = vmax.f32 %v5563_v12, 0.0 }
 0x7f0   : > { %v5583_v37 = vpop.f32.mrf.mxu0 }
 0x7f1   : > { %v5584_v52 = vadd.f32 %v5583_v37, %v5075_v59  ;;  %v5796_v54 = vpack.c.bf16 %v5747_v8, %v5746_v35  ;;  %v5066_v37 = vld [vmem:[%s10624_s12 + $0xa8] sm:$0xff] }
 0x7f2   : > { %v5585_v3 = vpop.f32.mrf.mxu0  ;;  %v5547_v42 = vadd.f32 %v10234_v23, %v5066_v37  ;;  %v5090_v37 = vld [vmem:[%s10624_s12 + $0x168] sm:$0xff] }
 0x7f3   : > { %v5748_v61 = vmax.f32 %v5584_v52, 0.0  ;;  %v5742_v3 = vmax.f32 %v5560_v31, 0.0  ;;  %v5080_v52 = vld [vmem:[%s10624_s12 + $0x118] sm:$0xff]  ;;  %v6869_v31 = vld [vmem:[%s10625_s13 + $0x64] ss:$16 sps:$4 sm:$0xff]  }
 0x7f4   : > { %v5586_v15 = vpop.f32.mrf.mxu0  ;;  %v5739_v8 = vmax.f32 %v5547_v42, 0.0 }
 0x7f5   : > { %v5587_v0 = vadd.f32 %v5586_v15, %v5076_v24  ;;  %v5065_v24 = vld [vmem:[%s10624_s12 + $0xa0] sm:$0xff]  ;;  %v5741_v15 = vmax.f32 %v5555_v41, 0.0  ;;  %v5794_v27 = vpack.c.bf16 %v5743_v10, %v5742_v3 }
 0x7f6   : > { %v5588_v56 = vpop.f32.mrf.mxu0  ;;  %v5544_v55 = vadd.f32 %v10230_v48, %v5065_v24  ;;  %v6871_v41 = vld [vmem:[%s10625_s13 + $0x60] ss:$16 sps:$4 sm:$0xff]  }
 0x7f7   : > { %v5749_v14 = vmax.f32 %v5587_v0, 0.0 }
 0x7f8   : > { %v5591_v60 = vpop.f32.mrf.mxu0  ;;  %v5738_v23 = vmax.f32 %v5544_v55, 0.0  ;;  %v5087_v55 = vld [vmem:[%s10624_s12 + $0x150] sm:$0xff] }
 0x7f9   : > { %v5797_v50 = vpack.c.bf16 %v5749_v14, %v5748_v61  ;;  %v5592_v25 = vadd.f32 %v5591_v60, %v5077_v16  ;;  %v5793_v61 = vpack.c.bf16 %v5741_v15, %v5740_v29 }
 0x7fa   : > { %v5593_v7 = vpop.f32.mrf.mxu0 }
 0x7fb   : > { %6512 = vmatprep.subr.bf16.mxu1 %v5797_v50  ;;  %v5750_v62 = vmax.f32 %v5592_v25, 0.0 }
 0x7fc   : > { %v5594_v57 = vpop.f32.mrf.mxu0  ;;  %6513 = vmatpush3.bf16.msra.mxu1 %v10215_v21  ;;  %v5079_v21 = vld [vmem:[%s10624_s12 + $0x110] sm:$0xff] }
 0x7fd   : > { %v5595_v33 = vadd.f32 %v5594_v57, %v5078_v47  ;;  %6514 = vmatprep.subr.bf16.mxu1 %v5796_v54 }
 0x7fe   : > { %v5596_v39 = vpop.f32.mrf.mxu0 }
 0x7ff   : > { %v5751_v59 = vmax.f32 %v5595_v33, 0.0  ;;  %v5091_v39 = vld [vmem:[%s10624_s12 + $0x170] sm:$0xff] }
 0x800   : > { %v5599_v34 = vpop.f32.mrf.mxu0  ;;  %6515 = vmatpush3.bf16.msra.mxu1 %v10202_v32 }
 0x801   : > { %v10283_v63 = vpack.c.bf16 %v5751_v59, %v5750_v62  ;;  %6516 = vmatprep.subr.bf16.mxu1 %v5795_v4  ;;  %v5600_v32 = vadd.f32 %v5599_v34, %v5079_v21  ;;  %v6872_v4 = vld [vmem:[%s10625_s13 + $0x84] ss:$16 sps:$4 sm:$0xff]   ;;  %v5092_v59 = vld [vmem:[%s10624_s12 + $0x178] sm:$0xff] }
 0x802   : > { %v5601_v19 = vpop.f32.mrf.mxu0 }
 0x803   : > { %v5752_v14 = vmax.f32 %v5600_v32, 0.0 }
 0x804   : > { %v5602_v0 = vpop.f32.mrf.mxu0  ;;  %6517 = vmatpush3.bf16.msra.mxu1 %v10186_v11  ;;  %v5792_v11 = vpack.c.bf16 %v5739_v8, %v5738_v23  ;;  %v5086_v8 = vld [vmem:[%s10624_s12 + $0x148] sm:$0xff] }
 0x805   : > { %v5603_v56 = vadd.f32 %v5602_v0, %v5080_v52  ;;  %6518 = vmatprep.subr.bf16.mxu1 %v5794_v27  ;;  %v5088_v52 = vld [vmem:[%s10624_s12 + $0x158] sm:$0xff]  ;;  %v6874_v27 = vld [vmem:[%s10625_s13 + $0x80] ss:$16 sps:$4 sm:$0xff]   ;;  %v6875_v0 = vld [vmem:[%s10625_s13 + $0xa4] ss:$16 sps:$4 sm:$0xff]  }
 0x806   : > { %v5604_v6 = vpop.f32.mrf.mxu0 }
 0x807   : > { %v5753_v26 = vmax.f32 %v5603_v56, 0.0 }
 0x808   : > { %v10294_v16 = vpop.f32.mrf.mxu0  ;;  %6519 = vmatpush3.bf16.msra.mxu1 %v10170_v43 }
 0x809   : > { %v10297_v60 = vpack.c.bf16 %v5753_v26, %v5752_v14  ;;  %6520 = vmatprep.subr.bf16.mxu1 %v5793_v61  ;;  %v5085_v26 = vld [vmem:[%s10624_s12 + $0x140] sm:$0xff] }
 0x80a   : > { %v5609_v51 = vpop.f32.mrf.mxu0 }
 0x80c   : > { %v10299_v35 = vpop.f32.mrf.mxu0  ;;  %6521 = vmatpush3.bf16.msra.mxu1 %v10154_v20  ;;  %v6860_v20 = vld [vmem:[%s10625_s13] ss:$16 sps:$4 sm:$0xff]  }
 0x80d   : > { %6522 = vmatprep.subr.bf16.mxu1 %v5792_v11 }
 0x80e   : > { %v5612_v48 = vpop.f32.mrf.mxu0 }
 0x80f   : > { %v5084_v48 = vld [vmem:[%s10624_s12 + $0x138] sm:$0xff] }
 0x810   : > { %v10302_v50 = vpop.f32.mrf.mxu0  ;;  %6523 = vmatpush3.bf16.msra.mxu1 %v10135_v30  ;;  %v6863_v30 = vld [vmem:[%s10625_s13 + $0x24] ss:$16 sps:$4 sm:$0xff]  }
 0x811   : > { %6524 = vmatprep.subr.bf16.mxu1 %v10232_v28 }
 0x812   : > { %v5617_v5 = vpop.f32.mrf.mxu0 }
 0x813   : > { %v6877_v5 = vld [vmem:[%s10625_s13 + $0xa0] ss:$16 sps:$4 sm:$0xff]  }
 0x814   : > { %v10306_v43 = vpop.f32.mrf.mxu0  ;;  %6525 = vmatpush3.bf16.msra.mxu1 %v10119_v18 }
 0x815   : > { %6526 = vmatprep.subr.bf16.mxu1 %v10225_v22 }
 0x816   : > { %v5620_v7 = vpop.f32.mrf.mxu0 }
 0x818   : > { %v10313_v47 = vpop.f32.mrf.mxu0  ;;  %6527 = vmatpush3.bf16.msra.mxu1 %v10103_v2  ;;  %v6866_v2 = vld [vmem:[%s10625_s13 + $0x44] ss:$16 sps:$4 sm:$0xff]  }
 0x819   : > { %6576 = vmatprep.subr.bf16.mxu1 %v10217_v1  ;;  %v6868_v1 = vld [vmem:[%s10625_s13 + $0x40] ss:$16 sps:$4 sm:$0xff]   ;;  %v5624_v7 = vadd.f32 %v10313_v47, %v5085_v26  ;;  %v5082_v47 = vld [vmem:[%s10624_s12 + $0x128] sm:$0xff] }
 0x81a   : > { %v5625_v28 = vpop.f32.mrf.mxu0 }
 0x81b   : > { %6055 = vmatmul.mubr.bf16.vlgmr.msra.gmra.mxu1 %v6860_v20  ;;  %v5619_v28 = vadd.f32 %v10306_v43, %v5084_v48 }
 0x81c   : > { %v5626_v18 = vpop.f32.mrf.mxu0  ;;  %6062 = vmatprep.mubr.bf16.mxu1 %v6863_v30  ;;  %v6878_v30 = vld [vmem:[%s10625_s13 + $0xc4] ss:$16 sps:$4 sm:$0xff]  }
 0x81d   : > { %v5627_v23 = vadd.f32 %v5626_v18, %v5086_v8  ;;  %v5757_v43 = vmax.f32 %v5619_v28, 0.0 }
 0x81e   : > { %v5628_v22 = vpop.f32.mrf.mxu0 }
 0x81f   : > { %v5759_v18 = vmax.f32 %v5627_v23, 0.0 }
 0x820   : > { %v5631_v12 = vpop.f32.mrf.mxu0 }
 0x821   : > { %v5632_v61 = vadd.f32 %v5631_v12, %v5087_v55  ;;  %v5758_v12 = vmax.f32 %v5624_v7, 0.0 }
 0x822   : > { %v5633_v38 = vpop.f32.mrf.mxu0 }
 0x823   : > { %6063 = vmatmul.mubr.bf16.gmra.mxu1 %v6865_v58  ;;  %v5760_v20 = vmax.f32 %v5632_v61, 0.0  ;;  %v5802_v38 = vpack.c.bf16 %v5759_v18, %v5758_v12 }
 0x824   : > { %v5634_v54 = vpop.f32.mrf.mxu0  ;;  %6070 = vmatprep.mubr.bf16.mxu1 %v6866_v2  ;;  %v5081_v2 = vld [vmem:[%s10624_s12 + $0x120] sm:$0xff] }
 0x825   : > { %v5635_v56 = vadd.f32 %v5634_v54, %v5088_v52  ;;  %v6880_v54 = vld [vmem:[%s10625_s13 + $0xc0] ss:$16 sps:$4 sm:$0xff]  }
 0x826   : > { %v5636_v25 = vpop.f32.mrf.mxu0 }
 0x827   : > { %v5761_v51 = vmax.f32 %v5635_v56, 0.0  ;;  %v5608_v25 = vadd.f32 %v10294_v16, %v5081_v2  ;;  %v6883_v16 = vld [vmem:[%s10625_s13 + $0xe0] ss:$16 sps:$4 sm:$0xff]  }
 0x828   : > { %v5639_v57 = vpop.f32.mrf.mxu0 }
 0x829   : > { %v5640_v32 = vadd.f32 %v5639_v57, %v5089_v44  ;;  %v5803_v22 = vpack.c.bf16 %v5761_v51, %v5760_v20 }
 0x82a   : > { %v5641_v46 = vpop.f32.mrf.mxu0 }
 0x82b   : > { %6071 = vmatmul.mubr.bf16.gmra.mxu1 %v6868_v1  ;;  %v5762_v14 = vmax.f32 %v5640_v32, 0.0  ;;  %v6881_v1 = vld [vmem:[%s10625_s13 + $0xe4] ss:$16 sps:$4 sm:$0xff]   ;;  %v6886_v46 = vld [vmem:[%s10625_s13 + $0xc] ss:$16 sps:$4 sm:$0xff]  }
 0x82c   : > { %v5642_v33 = vpop.f32.mrf.mxu0  ;;  %6078 = vmatprep.mubr.bf16.mxu1 %v6869_v31 }
 0x82d   : > { %v5643_v24 = vadd.f32 %v5642_v33, %v5090_v37  ;;  %v6895_v33 = vld [vmem:[%s10625_s13 + $0x68] ss:$16 sps:$4 sm:$0xff]  }
 0x82e   : > { %v5644_v40 = vpop.f32.mrf.mxu0  ;;  %v6907_v37 = vld [vmem:[%s10625_s13 + $0xe8] ss:$16 sps:$4 sm:$0xff]  }
 0x82f   : > { %v5763_v6 = vmax.f32 %v5643_v24, 0.0  ;;  %v6896_v40 = vld [vmem:[%s10625_s13 + $0x8c] ss:$16 sps:$4 sm:$0xff]  }
 0x830   : > { %v5647_v10 = vpop.f32.mrf.mxu0 }
 0x831   : > { %v5648_v21 = vadd.f32 %v5647_v10, %v5091_v39  ;;  %v5804_v11 = vpack.c.bf16 %v5763_v6, %v5762_v14  ;;  %v6899_v39 = vld [vmem:[%s10625_s13 + $0xac] ss:$16 sps:$4 sm:$0xff]   ;;  %v6901_v10 = vld [vmem:[%s10625_s13 + $0xa8] ss:$16 sps:$4 sm:$0xff]  }
 0x832   : > { %v5649_v62 = vpop.f32.mrf.mxu0 }
 0x833   : > { %6079 = vmatmul.mubr.bf16.gmra.mxu1 %v6871_v41  ;;  %v5764_v42 = vmax.f32 %v5648_v21, 0.0  ;;  %v6898_v41 = vld [vmem:[%s10625_s13 + $0x88] ss:$16 sps:$4 sm:$0xff]  }
 0x834   : > { %v5650_v34 = vpop.f32.mrf.mxu0  ;;  %6086 = vmatprep.mubr.bf16.mxu1 %v6872_v4  ;;  %v6902_v4 = vld [vmem:[%s10625_s13 + $0xcc] ss:$16 sps:$4 sm:$0xff]   ;;  %v6904_v62 = vld [vmem:[%s10625_s13 + $0xc8] ss:$16 sps:$4 sm:$0xff]  }
 0x835   : > { %v5651_v3 = vadd.f32 %v5650_v34, %v5092_v59  ;;  %v6905_v59 = vld [vmem:[%s10625_s13 + $0xec] ss:$16 sps:$4 sm:$0xff]  }
 0x836   : > { %v5652_v19 = vpop.f32.mrf.mxu0 }
 0x837   : > { %v5765_v15 = vmax.f32 %v5651_v3, 0.0 }
 0x839   : > { %v5805_v29 = vpack.c.bf16 %v5765_v15, %v5764_v42 }
 0x83b   : > { %6087 = vmatmul.mubr.bf16.gmra.mxu1 %v6874_v27 }
 0x83c   : > { %6577 = vmatpush3.bf16.msra.mxu1 %v5805_v29  ;;  %6094 = vmatprep.mubr.bf16.mxu1 %v6875_v0 }
 0x83d   : > { %6578 = vmatprep.subr.bf16.mxu1 %v10204_v9  ;;  %v5083_v9 = vld [vmem:[%s10624_s12 + $0x130] sm:$0xff] }
 0x83e   : > { %v5616_v58 = vadd.f32 %v10302_v50, %v5083_v9 }
 0x840   : > { %6579 = vmatpush3.bf16.msra.mxu1 %v5804_v11  ;;  %v5756_v50 = vmax.f32 %v5616_v58, 0.0  ;;  %v5846_v58 = vld [vmem:[%s10626_s14] sm:$0xff] }
 0x841   : > { %6580 = vmatprep.subr.bf16.mxu1 %v10188_v13  ;;  %v5611_v13 = vadd.f32 %v10299_v35, %v5082_v47  ;;  %v5754_v35 = vmax.f32 %v5608_v25, 0.0 }
 0x843   : > { %6095 = vmatmul.mubr.bf16.gmra.mxu1 %v6877_v5  ;;  %v5755_v57 = vmax.f32 %v5611_v13, 0.0 }
 0x844   : > { %6581 = vmatpush3.bf16.msra.mxu1 %v5803_v22  ;;  %6102 = vmatprep.mubr.bf16.mxu1 %v6878_v30 }
 0x845   : > { %6582 = vmatprep.subr.bf16.mxu1 %v10172_v17  ;;  %v5801_v17 = vpack.c.bf16 %v5757_v43, %v5756_v50  ;;  %v5800_v31 = vpack.c.bf16 %v5755_v57, %v5754_v35 }
 0x848   : > { %6583 = vmatpush3.bf16.msra.mxu1 %v5802_v38 }
 0x849   : > { %6584 = vmatprep.subr.bf16.mxu1 %v10156_v36  ;;  %v6887_v36 = vld [vmem:[%s10625_s13 + $0x2c] ss:$16 sps:$4 sm:$0xff]  }
 0x84b   : > { %6103 = vmatmul.mubr.bf16.gmra.mxu1 %v6880_v54  ;;  %v5847_v54 = vld [vmem:[%s10626_s14 + $0x8] sm:$0xff] }
 0x84c   : > { %6585 = vmatpush3.bf16.msra.mxu1 %v5801_v17  ;;  %6110 = vmatprep.mubr.bf16.mxu1 %v6881_v1 }
 0x84d   : > { %6586 = vmatprep.subr.bf16.mxu1 %v10137_v49  ;;  %v6884_v49 = vld [vmem:[%s10625_s13 + $0x8] ss:$16 sps:$4 sm:$0xff]  }
 0x850   : > { %6587 = vmatpush3.bf16.msra.mxu1 %v5800_v31  ;;  %v5848_v31 = vld [vmem:[%s10626_s14 + $0x10] sm:$0xff] }
 0x851   : > { %6588 = vmatprep.subr.bf16.mxu1 %v10121_v45  ;;  %v6889_v45 = vld [vmem:[%s10625_s13 + $0x28] ss:$16 sps:$4 sm:$0xff]  }
 0x853   : > { %6111 = vmatmul.mubr.bf16.gmra.mxu1 %v6883_v16 }
 0x854   : > { %6589 = vmatpush3.bf16.msra.mxu1 %v10297_v60  ;;  %6151 = vmatprep.mubr.bf16.mxu1 %v6886_v46  ;;  %v6893_v60 = vld [vmem:[%s10625_s13 + $0x6c] ss:$16 sps:$4 sm:$0xff]  }
 0x855   : > { %6590 = vmatprep.subr.bf16.mxu1 %v10105_v53  ;;  %v6890_v53 = vld [vmem:[%s10625_s13 + $0x4c] ss:$16 sps:$4 sm:$0xff]  }
 0x858   : > { %6591 = vmatpush3.bf16.msra.mxu1 %v10283_v63  ;;  %v6892_v63 = vld [vmem:[%s10625_s13 + $0x48] ss:$16 sps:$4 sm:$0xff]  }
 0x85b   : > { %6152 = vmatmul.mubr.bf16.vlgmr.msra.gmra.mxu1 %v6884_v49 }
 0x85c   : > { %6159 = vmatprep.mubr.bf16.mxu1 %v6887_v36 }
 0x863   : > { %6160 = vmatmul.mubr.bf16.gmra.mxu1 %v6889_v45 }
 0x864   : > { %6167 = vmatprep.mubr.bf16.mxu1 %v6890_v53 }
 0x86b   : > { %6168 = vmatmul.mubr.bf16.gmra.mxu1 %v6892_v63  ;;  %v5849_v63 = vld [vmem:[%s10626_s14 + $0x18] sm:$0xff] }
 0x86c   : > { %6175 = vmatprep.mubr.bf16.mxu1 %v6893_v60 }
 0x873   : > { %6176 = vmatmul.mubr.bf16.gmra.mxu1 %v6895_v33 }
 0x874   : > { %6183 = vmatprep.mubr.bf16.mxu1 %v6896_v40 }
 0x87b   : > { %6184 = vmatmul.mubr.bf16.gmra.mxu1 %v6898_v41 }
 0x87c   : > { %6191 = vmatprep.mubr.bf16.mxu1 %v6899_v39 }
 0x883   : > { %6192 = vmatmul.mubr.bf16.gmra.mxu1 %v6901_v10 }
 0x884   : > { %6199 = vmatprep.mubr.bf16.mxu1 %v6902_v4  ;;  %v5850_v4 = vld [vmem:[%s10626_s14 + $0x20] sm:$0xff] }
 0x88b   : > { %6200 = vmatmul.mubr.bf16.gmra.mxu1 %v6904_v62 }
 0x88c   : > { %6207 = vmatprep.mubr.bf16.mxu1 %v6905_v59 }
 0x893   : > { %6208 = vmatmul.mubr.bf16.gmra.mxu1 %v6907_v37 }
 0x8db   : > { %v6528_v21 = vpop.f32.mrf.mxu1 }
 0x8dd   : > { %v6529_v34 = vpop.f32.mrf.mxu1 }
 0x8de   : > { %v6530_v47 = vadd.f32 %v6529_v34, %v6528_v21 }
 0x8df   : > { %v6531_v44 = vpop.f32.mrf.mxu1 }
 0x8e0   : > { %v6057_v13 = vadd.f32 %v6530_v47, %v5846_v58 }
 0x8e1   : > { %v6532_v3 = vpop.f32.mrf.mxu1 }
 0x8e2   : > { %v6533_v43 = vadd.f32 %v6532_v3, %v6531_v44  ;;  %v5851_v3 = vld [vmem:[%s10626_s14 + $0x28] sm:$0xff] }
 0x8e3   : > { %v6534_v24 = vpop.f32.mrf.mxu1 }
 0x8e4   : > { %v6060_v57 = vadd.f32 %v6533_v43, %v5847_v54 }
 0x8e5   : > { %v6535_v19 = vpop.f32.mrf.mxu1 }
 0x8e6   : > { %v6536_v17 = vadd.f32 %v6535_v19, %v6534_v24 }
 0x8e7   : > { %v6537_v52 = vpop.f32.mrf.mxu1 }
 0x8e8   : > { %v6065_v36 = vadd.f32 %v6536_v17, %v5848_v31 }
 0x8e9   : > { %v6538_v42 = vpop.f32.mrf.mxu1 }
 0x8ea   : > { %v6539_v45 = vadd.f32 %v6538_v42, %v6537_v52 }
 0x8eb   : > { %v6540_v15 = vpop.f32.mrf.mxu1 }
 0x8ec   : > { %v6068_v41 = vadd.f32 %v6539_v45, %v5849_v63 }
 0x8ed   : > { %v6541_v27 = vpop.f32.mrf.mxu1 }
 0x8ee   : > { %v6542_v39 = vadd.f32 %v6541_v27, %v6540_v15 }
 0x8ef   : > { %v6543_v32 = vpop.f32.mrf.mxu1 }
 0x8f0   : > { %v6073_v21 = vadd.f32 %v6542_v39, %v5850_v4 }
 0x8f1   : > { %v6544_v0 = vpop.f32.mrf.mxu1 }
 0x8f2   : > { %v6545_v34 = vadd.f32 %v6544_v0, %v6543_v32  ;;  %v5852_v32 = vld [vmem:[%s10626_s14 + $0x30] sm:$0xff] }
 0x8f3   : > { %v10457_v55 = vpop.f32.mrf.mxu1 }
 0x8f4   : > { %v6076_v42 = vadd.f32 %v6545_v34, %v5851_v3 }
 0x8f5   : > { %v10459_v29 = vpop.f32.mrf.mxu1 }
 0x8f6   : > { %v6548_v15 = vadd.f32 %v10459_v29, %v10457_v55  ;;  %v5853_v55 = vld [vmem:[%s10626_s14 + $0x38] sm:$0xff] }
 0x8f7   : > { %v10461_v56 = vpop.f32.mrf.mxu1 }
 0x8f9   : > { %v10463_v6 = vpop.f32.mrf.mxu1 }
 0x8fb   : > { %v10465_v8 = vpop.f32.mrf.mxu1 }
 0x8fd   : > { %v10467_v61 = vpop.f32.mrf.mxu1 }
 0x8ff   : > { %v10469_v14 = vpop.f32.mrf.mxu1 }
 0x901   : > { %v10471_v26 = vpop.f32.mrf.mxu1 }
 0x903   : > { %v10473_v23 = vpop.f32.mrf.mxu1 }
 0x905   : > { %v10475_v51 = vpop.f32.mrf.mxu1 }
 0x907   : > { %v10477_v11 = vpop.f32.mrf.mxu1 }
 0x909   : > { %v10479_v48 = vpop.f32.mrf.mxu1 }
 0x90b   : > { %v10481_v5 = vpop.f32.mrf.mxu1 }
 0x90d   : > { %v10483_v7 = vpop.f32.mrf.mxu1 }
 0x90e   : > { %v6566_v4 = vadd.f32 %v10483_v7, %v10481_v5  ;;  %v5859_v5 = vld [vmem:[%s10626_s14 + $0x68] sm:$0xff] }
 0x90f   : > { %v10485_v20 = vpop.f32.mrf.mxu1 }
 0x911   : > { %v10487_v30 = vpop.f32.mrf.mxu1 }
 0x912   : > { %v6569_v34 = vadd.f32 %v10487_v30, %v10485_v20  ;;  %v5860_v20 = vld [vmem:[%s10626_s14 + $0x70] sm:$0xff] }
 0x913   : > { %v10489_v9 = vpop.f32.mrf.mxu1 }
 0x915   : > { %v10491_v28 = vpop.f32.mrf.mxu1 }
 0x917   : > { %v10493_v18 = vpop.f32.mrf.mxu1 }
 0x919   : > { %v10495_v22 = vpop.f32.mrf.mxu1 }
 0x91b   : > { %v6592_v12 = vpop.f32.mrf.mxu1 }
 0x91d   : > { %v6593_v2 = vpop.f32.mrf.mxu1 }
 0x91e   : > { %v6594_v38 = vadd.f32 %v6593_v2, %v6592_v12  ;;  %v6081_v12 = vadd.f32 %v6548_v15, %v5852_v32  ;;  %v6551_v2 = vadd.f32 %v10463_v6, %v10461_v56  ;;  %v5854_v56 = vld [vmem:[%s10626_s14 + $0x40] sm:$0xff] }
 0x91f   : > { %v6595_v25 = vpop.f32.mrf.mxu1 }
 0x920   : > { %v6154_v50 = vadd.f32 %v6594_v38, %v6057_v13  ;;  %v6084_v54 = vadd.f32 %v6551_v2, %v5853_v55 }
 0x921   : > { %v6596_v1 = vpop.f32.mrf.mxu1 }
 0x922   : > { %6217 = vst.msk [vmem:[%s7069_s16] sm:$0xff] %vm6216_vm1, %v6154_v50  ;;  %v6597_v35 = vadd.f32 %v6596_v1, %v6595_v25  ;;  %v6554_v25 = vadd.f32 %v10467_v61, %v10465_v8  ;;  %v5855_v8 = vld [vmem:[%s10626_s14 + $0x48] sm:$0xff] }
 0x923   : > { %v6598_v16 = vpop.f32.mrf.mxu1 }
 0x924   : > { %v6157_v46 = vadd.f32 %v6597_v35, %v6060_v57  ;;  %v6089_v17 = vadd.f32 %v6554_v25, %v5854_v56  ;;  %v6557_v35 = vadd.f32 %v10471_v26, %v10469_v14  ;;  %v5856_v14 = vld [vmem:[%s10626_s14 + $0x50] sm:$0xff] }
 0x925   : > { %v6599_v49 = vpop.f32.mrf.mxu1 }
 0x926   : > { %6218 = vst.msk [vmem:[%s7069_s16 + $0x8] sm:$0xff] %vm6216_vm1, %v6157_v46  ;;  %v6600_v53 = vadd.f32 %v6599_v49, %v6598_v16  ;;  %v6092_v49 = vadd.f32 %v6557_v35, %v5855_v8 }
 0x927   : > { %v6601_v60 = vpop.f32.mrf.mxu1 }
 0x928   : > { %v6162_v33 = vadd.f32 %v6600_v53, %v6065_v36  ;;  %v6560_v36 = vadd.f32 %v10475_v51, %v10473_v23  ;;  %v5857_v23 = vld [vmem:[%s10626_s14 + $0x58] sm:$0xff] }
 0x929   : > { %v6602_v40 = vpop.f32.mrf.mxu1 }
 0x92a   : > { %6219 = vst.msk [vmem:[%s7069_s16 + $0x10] sm:$0xff] %vm6216_vm1, %v6162_v33  ;;  %v6603_v10 = vadd.f32 %v6602_v40, %v6601_v60  ;;  %v6097_v60 = vadd.f32 %v6560_v36, %v5856_v14  ;;  %v6563_v33 = vadd.f32 %v10479_v48, %v10477_v11  ;;  %v5858_v11 = vld [vmem:[%s10626_s14 + $0x60] sm:$0xff] }
 0x92b   : > { %v6604_v62 = vpop.f32.mrf.mxu1 }
 0x92c   : > { %v6165_v59 = vadd.f32 %v6603_v10, %v6068_v41  ;;  %v6100_v10 = vadd.f32 %v6563_v33, %v5857_v23 }
 0x92d   : > { %v6605_v37 = vpop.f32.mrf.mxu1 }
 0x92e   : > { %6220 = vst.msk [vmem:[%s7069_s16 + $0x18] sm:$0xff] %vm6216_vm1, %v6165_v59  ;;  %v6606_v44 = vadd.f32 %v6605_v37, %v6604_v62 }
 0x92f   : > { %v6607_v24 = vpop.f32.mrf.mxu1 }
 0x930   : > { %v6170_v19 = vadd.f32 %v6606_v44, %v6073_v21  ;;  %v6105_v21 = vadd.f32 %v6566_v4, %v5858_v11 }
 0x931   : > { %v6608_v52 = vpop.f32.mrf.mxu1 }
 0x932   : > { %6221 = vst.msk [vmem:[%s7069_s16 + $0x20] sm:$0xff] %vm6216_vm1, %v6170_v19  ;;  %v6609_v27 = vadd.f32 %v6608_v52, %v6607_v24  ;;  %v6108_v19 = vadd.f32 %v6569_v34, %v5859_v5  ;;  %v6572_v52 = vadd.f32 %v10491_v28, %v10489_v9  ;;  %v5861_v9 = vld [vmem:[%s10626_s14 + $0x78] sm:$0xff] }
 0x933   : > { %v6610_v0 = vpop.f32.mrf.mxu1 }
 0x934   : > { %v6173_v47 = vadd.f32 %v6609_v27, %v6076_v42  ;;  %v6113_v32 = vadd.f32 %v6572_v52, %v5860_v20 }
 0x935   : > { %v6611_v58 = vpop.f32.mrf.mxu1 }
 0x936   : > { %6222 = vst.msk [vmem:[%s7069_s16 + $0x28] sm:$0xff] %vm6216_vm1, %v6173_v47  ;;  %v6612_v13 = vadd.f32 %v6611_v58, %v6610_v0  ;;  %v6575_v0 = vadd.f32 %v10495_v22, %v10493_v18 }
 0x937   : > { %v6613_v29 = vpop.f32.mrf.mxu1 }
 0x938   : > { %v6178_v43 = vadd.f32 %v6612_v13, %v6081_v12  ;;  %v6116_v2 = vadd.f32 %v6575_v0, %v5861_v9 }
 0x939   : > { %v6614_v38 = vpop.f32.mrf.mxu1 }
 0x93a   : > { %6223 = vst.msk [vmem:[%s7069_s16 + $0x30] sm:$0xff] %vm6216_vm1, %v6178_v43  ;;  %v6615_v50 = vadd.f32 %v6614_v38, %v6613_v29 }
 0x93b   : > { %v6616_v6 = vpop.f32.mrf.mxu1 }
 0x93c   : > { %v6181_v1 = vadd.f32 %v6615_v50, %v6084_v54 }
 0x93d   : > { %v6617_v57 = vpop.f32.mrf.mxu1 }
 0x93e   : > { %6224 = vst.msk [vmem:[%s7069_s16 + $0x38] sm:$0xff] %vm6216_vm1, %v6181_v1  ;;  %v6618_v31 = vadd.f32 %v6617_v57, %v6616_v6 }
 0x93f   : > { %v6619_v61 = vpop.f32.mrf.mxu1 }
 0x940   : > { %v6186_v16 = vadd.f32 %v6618_v31, %v6089_v17 }
 0x941   : > { %v6620_v46 = vpop.f32.mrf.mxu1 }
 0x942   : > { %6225 = vst.msk [vmem:[%s7069_s16 + $0x40] sm:$0xff] %vm6216_vm1, %v6186_v16  ;;  %v6621_v45 = vadd.f32 %v6620_v46, %v6619_v61 }
 0x943   : > { %v6622_v26 = vpop.f32.mrf.mxu1 }
 0x944   : > { %v6189_v53 = vadd.f32 %v6621_v45, %v6092_v49 }
 0x945   : > { %v6623_v63 = vpop.f32.mrf.mxu1 }
 0x946   : > { %6226 = vst.msk [vmem:[%s7069_s16 + $0x48] sm:$0xff] %vm6216_vm1, %v6189_v53  ;;  %v6624_v40 = vadd.f32 %v6623_v63, %v6622_v26 }
 0x947   : > { %v6625_v51 = vpop.f32.mrf.mxu1 }
 0x948   : > { %v6194_v41 = vadd.f32 %v6624_v40, %v6097_v60 }
 0x949   : > { %v6626_v39 = vpop.f32.mrf.mxu1 }
 0x94a   : > { %6227 = vst.msk [vmem:[%s7069_s16 + $0x50] sm:$0xff] %vm6216_vm1, %v6194_v41  ;;  %v6627_v62 = vadd.f32 %v6626_v39, %v6625_v51 }
 0x94b   : > { %v6628_v48 = vpop.f32.mrf.mxu1 }
 0x94c   : > { %v6197_v59 = vadd.f32 %v6627_v62, %v6100_v10 }
 0x94d   : > { %v6629_v37 = vpop.f32.mrf.mxu1 }
 0x94e   : > { %6228 = vst.msk [vmem:[%s7069_s16 + $0x58] sm:$0xff] %vm6216_vm1, %v6197_v59  ;;  %v6630_v44 = vadd.f32 %v6629_v37, %v6628_v48 }
 0x94f   : > { %v6631_v7 = vpop.f32.mrf.mxu1 }
 0x950   : > { %v6202_v3 = vadd.f32 %v6630_v44, %v6105_v21 }
 0x951   : > { %v6632_v24 = vpop.f32.mrf.mxu1 }
 0x952   : > { %6229 = vst.msk [vmem:[%s7069_s16 + $0x60] sm:$0xff] %vm6216_vm1, %v6202_v3  ;;  %v6633_v42 = vadd.f32 %v6632_v24, %v6631_v7 }
 0x953   : > { %v6634_v30 = vpop.f32.mrf.mxu1 }
 0x954   : > { %v6205_v15 = vadd.f32 %v6633_v42, %v6108_v19 }
 0x955   : > { %v6635_v27 = vpop.f32.mrf.mxu1 }
 0x956   : > { %6230 = vst.msk [vmem:[%s7069_s16 + $0x68] sm:$0xff] %vm6216_vm1, %v6205_v15  ;;  %v6636_v47 = vadd.f32 %v6635_v27, %v6634_v30 }
 0x957   : > { %v6637_v28 = vpop.f32.mrf.mxu1 }
 0x958   : > { %v6210_v58 = vadd.f32 %v6636_v47, %v6113_v32 }
 0x959   : > { %v6638_v12 = vpop.f32.mrf.mxu1 }
 0x95a   : > { %6231 = vst.msk [vmem:[%s7069_s16 + $0x70] sm:$0xff] %vm6216_vm1, %v6210_v58  ;;  %v6639_v13 = vadd.f32 %v6638_v12, %v6637_v28 }
 0x95c   : > { %v6213_v55 = vadd.f32 %v6639_v13, %v6116_v2 }
 0x95e   : > { %6232 = vst.msk [vmem:[%s7069_s16 + $0x78] sm:$0xff] %vm6216_vm1, %v6213_v55 }
 0x95f PF: > { %s25_s22 = sadd.s32 1, %s6946_s22   ;;  %s11035_s19 = sld [smem:[#allocation3_spill]] }
 0x960   : > { %p22_p9 = scmp.ge.s32.totalorder %s25_s22, 6   ;;  %s11036_s26 = sld [smem:[#allocation4_spill]] }
 0x961   : > { %s11037_s21 = sld [smem:[#allocation5_spill]]  ;;  %s11038_s18 = smov %s6938_s20 }
 0x962   :  { %24 = sbr.rel (!%p22_p9) target bundleno = 3 (0x3), region = 118 }
 0x966   : > { %s11039_s20 = smov %s11036_s26 }

</bundles_post_ra>
